<compile_context>
chip_gen: v5e
topology: v5e:2x2
jax: 0.10.0
libtpu: 0.0.40
codegen_flags: <defaults>
</compile_context>

<pallas_src>
import jax
import jax.numpy as jnp
from jax.experimental import pallas as pl
from jax.experimental.pallas import tpu as pltpu


def _round_up(x, m):
    return (x + m - 1) // m * m


def _lane_tiling(m, cap=4096):
    """Pick a lane-dim tile for an axis of length m.

    Prefer the largest multiple of 128 (<= cap) that divides m exactly (no padding,
    unmasked stores).  If none exists and m is small, use the full extent as a single
    block (allowed by the (8,128) rule).  Otherwise fall back to padding."""
    t = min(cap, m) // 128 * 128
    while t >= 128:
        if m % t == 0:
            return t, m
        t -= 128
    if m <= 2 * cap:
        return m, m
    mp = _round_up(m, cap)
    return cap, mp


# ------------------------------ Pallas kernels ------------------------------

def _conv_matmul_kernel(w_ref, p_ref, b_ref, o_ref):
    """out(Cout, tile) = W'(Cout, K) @ patchesT(K, tile) + bias(Cout, 1)."""
    acc = jnp.dot(w_ref[...], p_ref[...], preferred_element_type=jnp.float32)
    o_ref[...] = (acc + b_ref[...]).astype(o_ref.dtype)


def _mlp_kernel(x_ref, w1_ref, b1_ref, w2_ref, b2_ref, w3_ref, b3_ref, o_ref):
    """Fused fc1 -> relu -> fc2 -> relu -> fc3; all operands VMEM resident."""
    h = jnp.dot(x_ref[...], w1_ref[...], preferred_element_type=jnp.float32)
    h = jnp.maximum(h + b1_ref[...], 0.0)
    h = jnp.dot(h, w2_ref[...], preferred_element_type=jnp.float32)
    h = jnp.maximum(h + b2_ref[...], 0.0)
    h = jnp.dot(h, w3_ref[...], preferred_element_type=jnp.float32)
    o_ref[...] = (h + b3_ref[...]).astype(o_ref.dtype)


# ------------------------- fused conv + avg-pool op --------------------------

def _pool_fused_weight(w, p):
    """Conv2d(stride=1) + AvgPool2d(p, p)  ==  strided conv with this kernel.

    W'[o,i,ey,ex] = (1/p^2) * sum_{dy,dx in [0,p), valid} W[o,i,ey-dy,ex-dx],
    i.e. the conv kernel "full"-correlated with a p x p box of 1/p^2."""
    cout, cin, kh, kw = w.shape
    wf = jnp.zeros((cout, cin, kh + p - 1, kw + p - 1), w.dtype)
    for dy in range(p):
        for dx in range(p):
            wf = wf.at[:, :, dy:dy + kh, dx:dx + kw].add(w)
    return wf * (1.0 / (p * p))


def _strided_patches(x, eh, ew, s, poh, pow_, k_pad=0):
    """x:(C,B,H,W) -> patchesT (C*eh*ew + k_pad, B*poh*pow_).

    Rows ordered (c, ey, ex) to match W'.reshape(Cout, Cin*eh*ew); columns ordered
    (b, ph, pw).  k_pad extra zero rows are appended inside the same concat (free)
    to keep the contraction dim sublane-aligned."""
    c, b, _, _ = x.shape
    cols = []
    for ci in range(c):
        for ey in range(eh):
            for ex in range(ew):
                cols.append(jax.lax.slice(
                    x,
                    (ci, 0, ey, ex),
                    (ci + 1, b, ey + s * (poh - 1) + 1, ex + s * (pow_ - 1) + 1),
                    (1, 1, s, s)))
    if k_pad:
        cols.append(jnp.zeros((k_pad, b, poh, pow_), x.dtype))
    patches = jnp.concatenate(cols, axis=0)              # (K+pad, B, poh, pow_)
    return patches.reshape(c * eh * ew + k_pad, b * poh * pow_)


def conv2d_avgpool(x_cbhw, w, b, pool):
    """nn.Conv2d(stride=1, padding=0) followed by nn.AvgPool2d(pool, pool),
    fused into one strided conv executed as a transposed MXU matmul.

    x_cbhw: (Cin, B, H, W) channel-major activations.
    w:      (Cout, Cin, KH, KW) torch conv weight.   b: (Cout,)
    returns (Cout, B, POH, POW) channel-major pooled activations."""
    cout, cin, kh, kw = w.shape
    c, bsz, h, wd = x_cbhw.shape
    assert c == cin
    eh, ew = kh + pool - 1, kw + pool - 1
    poh = (h - kh + 1) // pool
    pow_ = (wd - kw + 1) // pool

    kdim = cin * eh * ew
    kblk = _round_up(kdim, 8)        # sublane-align the contraction dim (cheap)

    wf = _pool_fused_weight(w, pool).reshape(cout, kdim)
    if kblk != kdim:
        wf = jnp.pad(wf, ((0, 0), (0, kblk - kdim)))
    patches = _strided_patches(x_cbhw, eh, ew, pool, poh, pow_, k_pad=kblk - kdim)

    m = bsz * poh * pow_
    tn, mp = _lane_tiling(m)
    if mp != m:
        patches = jnp.pad(patches, ((0, 0), (0, mp - m)))

    out = pl.pallas_call(
        _conv_matmul_kernel,
        out_shape=jax.ShapeDtypeStruct((cout, mp), jnp.float32),
        grid_spec=pltpu.PrefetchScalarGridSpec(
            num_scalar_prefetch=0,
            grid=(mp // tn,),
            in_specs=[
                pl.BlockSpec((cout, kblk), lambda j: (0, 0)),
                pl.BlockSpec((kblk, tn), lambda j: (0, j)),
                pl.BlockSpec((cout, 1), lambda j: (0, 0)),
            ],
            out_specs=pl.BlockSpec((cout, tn), lambda j: (0, j)),
        ),
        compiler_params=pltpu.CompilerParams(
            dimension_semantics=("parallel",)),
    )(wf, patches, b.reshape(cout, 1))
    return out[:, :m].reshape(cout, bsz, poh, pow_)


# ------------------------------- fused MLP head ------------------------------

def mlp3(x, w1, b1, w2, b2, w3, b3):
    """relu(x@w1+b1) -> relu(@w2+b2) -> @w3+b3 fused into a single pallas_call.
    Weights are (in, out).  With B=2 the whole fc1 weight (~10 MB f32) is a single
    VMEM block; the op is HBM-bandwidth bound on that one weight read."""
    bsz, k1 = x.shape
    n1, n2, n3 = w1.shape[1], w2.shape[1], w3.shape[1]
    return pl.pallas_call(
        _mlp_kernel,
        out_shape=jax.ShapeDtypeStruct((bsz, n3), jnp.float32),
        grid_spec=pltpu.PrefetchScalarGridSpec(
            num_scalar_prefetch=0,
            grid=(1,),
            in_specs=[
                pl.BlockSpec((bsz, k1), lambda i: (0, 0)),
                pl.BlockSpec((k1, n1), lambda i: (0, 0)),
                pl.BlockSpec((1, n1), lambda i: (0, 0)),
                pl.BlockSpec((n1, n2), lambda i: (0, 0)),
                pl.BlockSpec((1, n2), lambda i: (0, 0)),
                pl.BlockSpec((n2, n3), lambda i: (0, 0)),
                pl.BlockSpec((1, n3), lambda i: (0, 0)),
            ],
            out_specs=pl.BlockSpec((bsz, n3), lambda i: (0, 0)),
        ),
        compiler_params=pltpu.CompilerParams(
            dimension_semantics=("arbitrary",),
            # fc1's ~10 MB weight block is (double-)buffered: raise the scoped VMEM
            # limit above v5e's 16 MiB default while staying well under v7x's 64 MiB.
            vmem_limit_bytes=40 * 1024 * 1024),
    )(x, w1, b1.reshape(1, n1), w2, b2.reshape(1, n2), w3, b3.reshape(1, n3))


# -------------------------------- model glue ---------------------------------

def init_params(key, output=10):
    """PyTorch-style uniform(+-1/sqrt(fan_in)) init.  Conv weights keep the torch
    (Cout, Cin, KH, KW) layout; Linear weights are stored (in_features, out_features)
    -- i.e. the transpose of torch's nn.Linear.weight -- so no transpose is needed
    in the jit-hot path."""
    ks = jax.random.split(key, 10)

    def u(k, shape, fan_in):
        bound = 1.0 / float(fan_in) ** 0.5
        return jax.random.uniform(k, shape, jnp.float32, -bound, bound)

    return {
        "conv1_w": u(ks[0], (8, 1, 5, 5), 1 * 5 * 5),
        "conv1_b": u(ks[1], (8,), 1 * 5 * 5),
        "conv2_w": u(ks[2], (16, 8, 3, 3), 8 * 3 * 3),
        "conv2_b": u(ks[3], (16,), 8 * 3 * 3),
        "fc1_w":   u(ks[4], (35 * 35 * 16, 128), 35 * 35 * 16),
        "fc1_b":   u(ks[5], (128,), 35 * 35 * 16),
        "fc2_w":   u(ks[6], (128, 64), 128),
        "fc2_b":   u(ks[7], (64,), 128),
        "fc3_w":   u(ks[8], (64, output), 64),
        "fc3_b":   u(ks[9], (output,), 64),
    }


def forward(params, x):
    """x: (B, 1, H, W) NCHW.  Same semantics as SimpleCNN1.forward."""
    bsz = x.shape[0]
    h = jnp.transpose(x, (1, 0, 2, 3))                    # channel-major (C,B,H,W)
    h = conv2d_avgpool(h, params["conv1_w"], params["conv1_b"], pool=3)
    h = conv2d_avgpool(h, params["conv2_w"], params["conv2_b"], pool=2)
    # torch.nn.Flatten on NCHW: flatten (C, H, W) per sample (tiny 157 KB transpose).
    h = jnp.transpose(h, (1, 0, 2, 3)).reshape(bsz, -1)
    return mlp3(h, params["fc1_w"], params["fc1_b"],
                params["fc2_w"], params["fc2_b"],
                params["fc3_w"], params["fc3_b"])


# -------------------------- pure-XLA reference check --------------------------

def _reference_forward(params, x):
    hi = jax.lax.Precision.HIGHEST

    def conv(z, w, b):
        y = jax.lax.conv_general_dilated(
            z, w, window_strides=(1, 1), padding="VALID",
            dimension_numbers=("NCHW", "OIHW", "NCHW"), precision=hi)
        return y + b[None, :, None, None]

    def avg_pool(z, k):
        s = jax.lax.reduce_window(z, jnp.float32(0.0), jax.lax.add,
                                  (1, 1, k, k), (1, 1, k, k), "VALID")
        return s / float(k * k)

    h = avg_pool(conv(x, params["conv1_w"], params["conv1_b"]), 3)
    h = avg_pool(conv(h, params["conv2_w"], params["conv2_b"]), 2)
    h = h.reshape(h.shape[0], -1)
    h = jnp.maximum(jnp.dot(h, params["fc1_w"], precision=hi) + params["fc1_b"], 0.0)
    h = jnp.maximum(jnp.dot(h, params["fc2_w"], precision=hi) + params["fc2_b"], 0.0)
    return jnp.dot(h, params["fc3_w"], precision=hi) + params["fc3_b"]


if __name__ == "__main__":
    key = jax.random.PRNGKey(0)
    pkey, xkey = jax.random.split(key)
    output_classes = 10
    params = init_params(pkey, output=output_classes)

    # Input geometry is pinned by fc1's hard-coded 35*35*16 flatten size:
    # 220 -conv5-> 216 -pool3-> 72 -conv3-> 70 -pool2-> 35.  NCHW, batch=2.
    x = jax.random.normal(xkey, (2, 1, 220, 220), jnp.float32)

    out = jax.jit(forward)(params, x)
    jax.block_until_ready(out)
    assert out.shape == (2, output_classes)
    assert out.dtype == jnp.float32

    ref = jax.jit(_reference_forward)(params, x)
    jax.block_until_ready(ref)
    assert bool(jnp.allclose(out, ref, rtol=1e-3, atol=1e-3)), \
        "Pallas forward does not match XLA reference"

    print("KERNEL_OK")
</pallas_src>

<mosaic_0001>
module attributes {stable_mosaic.version = 11 : i64} {
  func.func @_conv_matmul_kernel(%arg0: i32, %arg1: memref<8x56xf32, #tpu.memory_space<vmem>>, %arg2: memref<56x3456xf32, #tpu.memory_space<vmem>>, %arg3: memref<8x1xf32, #tpu.memory_space<vmem>>, %arg4: memref<8x3456xf32, #tpu.memory_space<vmem>>) attributes {dimension_semantics = [#tpu.dimension_semantics<parallel>], iteration_bounds = array<i64: 3>, scalar_prefetch = 0 : i64, scratch_operands = 0 : i64, tpu.core_type = #tpu.core_type<tc>, window_params = [{pipeline_mode = #tpu.pipeline_mode<synchronous>, transform_indices = @transform_0, window_bounds = array<i64: 8, 56>}, {transform_indices = @transform_1, window_bounds = array<i64: 56, 3456>}, {pipeline_mode = #tpu.pipeline_mode<synchronous>, transform_indices = @transform_2, window_bounds = array<i64: 8, 1>}, {transform_indices = @transform_3, window_bounds = array<i64: 8, 3456>}]} {
    %c0 = arith.constant 0 : index
    %c0_0 = arith.constant 0 : index
    %0 = vector.load %arg1[%c0, %c0_0] : memref<8x56xf32, #tpu.memory_space<vmem>>, vector<8x56xf32>
    %c0_1 = arith.constant 0 : index
    %c0_2 = arith.constant 0 : index
    %1 = vector.load %arg2[%c0_1, %c0_2] : memref<56x3456xf32, #tpu.memory_space<vmem>>, vector<56x3456xf32>
    %cst = arith.constant dense<0.000000e+00> : vector<8x3456xf32>
    %2 = tpu.matmul %0, %1, %cst {dimension_numbers = #tpu.dot_dimension_numbers<[1], [0], [0], [1], [0, 0, 1, 1], [], []>} : vector<8x56xf32>, vector<56x3456xf32>, vector<8x3456xf32> -> vector<8x3456xf32>
    %c0_3 = arith.constant 0 : index
    %c0_4 = arith.constant 0 : index
    %3 = vector.load %arg3[%c0_3, %c0_4] : memref<8x1xf32, #tpu.memory_space<vmem>>, vector<8x1xf32>
    %4 = vector.broadcast %3 : vector<8x1xf32> to vector<8x3456xf32>
    %5 = arith.addf %2, %4 : vector<8x3456xf32>
    %c0_5 = arith.constant 0 : index
    %c0_6 = arith.constant 0 : index
    %6 = vector.load %arg4[%c0_5, %c0_6] : memref<8x3456xf32, #tpu.memory_space<vmem>>, vector<8x3456xf32>
    tpu.vector_store %arg4[%c0_5, %c0_6], %5 {strides = array<i32>} : memref<8x3456xf32, #tpu.memory_space<vmem>>, vector<8x3456xf32>,
    return
  }
  func.func @transform_0(%arg0: i32) -> (i32, i32) {
    %c0_i32 = arith.constant 0 : i32
    %c0_i32_0 = arith.constant 0 : i32
    %c0_i32_1 = arith.constant 0 : i32
    return %c0_i32, %c0_i32_0 : i32, i32
  }
  func.func @transform_1(%arg0: i32) -> (i32, i32) {
    %c0_i32 = arith.constant 0 : i32
    %c0_i32_0 = arith.constant 0 : i32
    return %c0_i32, %arg0 : i32, i32
  }
  func.func @transform_2(%arg0: i32) -> (i32, i32) {
    %c0_i32 = arith.constant 0 : i32
    %c0_i32_0 = arith.constant 0 : i32
    %c0_i32_1 = arith.constant 0 : i32
    return %c0_i32, %c0_i32_0 : i32, i32
  }
  func.func @transform_3(%arg0: i32) -> (i32, i32) {
    %c0_i32 = arith.constant 0 : i32
    %c0_i32_0 = arith.constant 0 : i32
    return %c0_i32, %arg0 : i32, i32
  }
}

module attributes {stable_mosaic.version = 11 : i64} {
  func.func @_conv_matmul_kernel(%arg0: i32, %arg1: memref<16x128xf32, #tpu.memory_space<vmem>>, %arg2: memref<128x2450xf32, #tpu.memory_space<vmem>>, %arg3: memref<16x1xf32, #tpu.memory_space<vmem>>, %arg4: memref<16x2450xf32, #tpu.memory_space<vmem>>) attributes {dimension_semantics = [#tpu.dimension_semantics<parallel>], iteration_bounds = array<i64: 1>, scalar_prefetch = 0 : i64, scratch_operands = 0 : i64, tpu.core_type = #tpu.core_type<tc>, window_params = [{pipeline_mode = #tpu.pipeline_mode<synchronous>, transform_indices = @transform_0, window_bounds = array<i64: 16, 128>}, {transform_indices = @transform_1, window_bounds = array<i64: 128, 2450>}, {pipeline_mode = #tpu.pipeline_mode<synchronous>, transform_indices = @transform_2, window_bounds = array<i64: 16, 1>}, {transform_indices = @transform_3, window_bounds = array<i64: 16, 2450>}]} {
    %c0 = arith.constant 0 : index
    %c0_0 = arith.constant 0 : index
    %0 = vector.load %arg1[%c0, %c0_0] : memref<16x128xf32, #tpu.memory_space<vmem>>, vector<16x128xf32>
    %c0_1 = arith.constant 0 : index
    %c0_2 = arith.constant 0 : index
    %1 = vector.load %arg2[%c0_1, %c0_2] : memref<128x2450xf32, #tpu.memory_space<vmem>>, vector<128x2450xf32>
    %cst = arith.constant dense<0.000000e+00> : vector<16x2450xf32>
    %2 = tpu.matmul %0, %1, %cst {dimension_numbers = #tpu.dot_dimension_numbers<[1], [0], [0], [1], [0, 0, 1, 1], [], []>} : vector<16x128xf32>, vector<128x2450xf32>, vector<16x2450xf32> -> vector<16x2450xf32>
    %c0_3 = arith.constant 0 : index
    %c0_4 = arith.constant 0 : index
    %3 = vector.load %arg3[%c0_3, %c0_4] : memref<16x1xf32, #tpu.memory_space<vmem>>, vector<16x1xf32>
    %4 = vector.broadcast %3 : vector<16x1xf32> to vector<16x2450xf32>
    %5 = arith.addf %2, %4 : vector<16x2450xf32>
    %c0_5 = arith.constant 0 : index
    %c0_6 = arith.constant 0 : index
    %6 = vector.load %arg4[%c0_5, %c0_6] : memref<16x2450xf32, #tpu.memory_space<vmem>>, vector<16x2450xf32>
    tpu.vector_store %arg4[%c0_5, %c0_6], %5 {strides = array<i32>} : memref<16x2450xf32, #tpu.memory_space<vmem>>, vector<16x2450xf32>,
    return
  }
  func.func @transform_0(%arg0: i32) -> (i32, i32) {
    %c0_i32 = arith.constant 0 : i32
    %c0_i32_0 = arith.constant 0 : i32
    %c0_i32_1 = arith.constant 0 : i32
    return %c0_i32, %c0_i32_0 : i32, i32
  }
  func.func @transform_1(%arg0: i32) -> (i32, i32) {
    %c0_i32 = arith.constant 0 : i32
    %c0_i32_0 = arith.constant 0 : i32
    return %c0_i32, %arg0 : i32, i32
  }
  func.func @transform_2(%arg0: i32) -> (i32, i32) {
    %c0_i32 = arith.constant 0 : i32
    %c0_i32_0 = arith.constant 0 : i32
    %c0_i32_1 = arith.constant 0 : i32
    return %c0_i32, %c0_i32_0 : i32, i32
  }
  func.func @transform_3(%arg0: i32) -> (i32, i32) {
    %c0_i32 = arith.constant 0 : i32
    %c0_i32_0 = arith.constant 0 : i32
    return %c0_i32, %arg0 : i32, i32
  }
}

module attributes {stable_mosaic.version = 11 : i64} {
  func.func @_mlp_kernel(%arg0: i32, %arg1: memref<2x19600xf32, #tpu.memory_space<vmem>>, %arg2: memref<19600x128xf32, #tpu.memory_space<vmem>>, %arg3: memref<1x128xf32, #tpu.memory_space<vmem>>, %arg4: memref<128x64xf32, #tpu.memory_space<vmem>>, %arg5: memref<1x64xf32, #tpu.memory_space<vmem>>, %arg6: memref<64x10xf32, #tpu.memory_space<vmem>>, %arg7: memref<1x10xf32, #tpu.memory_space<vmem>>, %arg8: memref<2x10xf32, #tpu.memory_space<vmem>>) attributes {dimension_semantics = [#tpu.dimension_semantics<arbitrary>], iteration_bounds = array<i64: 1>, scalar_prefetch = 0 : i64, scratch_operands = 0 : i64, tpu.core_type = #tpu.core_type<tc>, window_params = [{pipeline_mode = #tpu.pipeline_mode<synchronous>, transform_indices = @transform_0, window_bounds = array<i64: 2, 19600>}, {pipeline_mode = #tpu.pipeline_mode<synchronous>, transform_indices = @transform_1, window_bounds = array<i64: 19600, 128>}, {pipeline_mode = #tpu.pipeline_mode<synchronous>, transform_indices = @transform_2, window_bounds = array<i64: 1, 128>}, {pipeline_mode = #tpu.pipeline_mode<synchronous>, transform_indices = @transform_3, window_bounds = array<i64: 128, 64>}, {pipeline_mode = #tpu.pipeline_mode<synchronous>, transform_indices = @transform_4, window_bounds = array<i64: 1, 64>}, {pipeline_mode = #tpu.pipeline_mode<synchronous>, transform_indices = @transform_5, window_bounds = array<i64: 64, 10>}, {pipeline_mode = #tpu.pipeline_mode<synchronous>, transform_indices = @transform_6, window_bounds = array<i64: 1, 10>}, {pipeline_mode = #tpu.pipeline_mode<synchronous>, transform_indices = @transform_7, window_bounds = array<i64: 2, 10>}]} {
    %c0 = arith.constant 0 : index
    %c0_0 = arith.constant 0 : index
    %0 = vector.load %arg1[%c0, %c0_0] : memref<2x19600xf32, #tpu.memory_space<vmem>>, vector<2x19600xf32>
    %c0_1 = arith.constant 0 : index
    %c0_2 = arith.constant 0 : index
    %1 = vector.load %arg2[%c0_1, %c0_2] : memref<19600x128xf32, #tpu.memory_space<vmem>>, vector<19600x128xf32>
    %cst = arith.constant dense<0.000000e+00> : vector<2x128xf32>
    %2 = tpu.matmul %0, %1, %cst {dimension_numbers = #tpu.dot_dimension_numbers<[1], [0], [0], [1], [0, 0, 1, 1], [], []>} : vector<2x19600xf32>, vector<19600x128xf32>, vector<2x128xf32> -> vector<2x128xf32>
    %c0_3 = arith.constant 0 : index
    %c0_4 = arith.constant 0 : index
    %3 = vector.load %arg3[%c0_3, %c0_4] : memref<1x128xf32, #tpu.memory_space<vmem>>, vector<1x128xf32>
    %4 = vector.broadcast %3 : vector<1x128xf32> to vector<2x128xf32>
    %5 = arith.addf %2, %4 : vector<2x128xf32>
    %cst_5 = arith.constant 0.000000e+00 : f32
    %6 = vector.broadcast %cst_5 : f32 to vector<2x128xf32>
    %7 = arith.maximumf %5, %6 : vector<2x128xf32>
    %c0_6 = arith.constant 0 : index
    %c0_7 = arith.constant 0 : index
    %8 = vector.load %arg4[%c0_6, %c0_7] : memref<128x64xf32, #tpu.memory_space<vmem>>, vector<128x64xf32>
    %cst_8 = arith.constant dense<0.000000e+00> : vector<2x64xf32>
    %9 = tpu.matmul %7, %8, %cst_8 {dimension_numbers = #tpu.dot_dimension_numbers<[1], [0], [0], [1], [0, 0, 1, 1], [], []>} : vector<2x128xf32>, vector<128x64xf32>, vector<2x64xf32> -> vector<2x64xf32>
    %c0_9 = arith.constant 0 : index
    %c0_10 = arith.constant 0 : index
    %10 = vector.load %arg5[%c0_9, %c0_10] : memref<1x64xf32, #tpu.memory_space<vmem>>, vector<1x64xf32>
    %11 = vector.broadcast %10 : vector<1x64xf32> to vector<2x64xf32>
    %12 = arith.addf %9, %11 : vector<2x64xf32>
    %cst_11 = arith.constant 0.000000e+00 : f32
    %13 = vector.broadcast %cst_11 : f32 to vector<2x64xf32>
    %14 = arith.maximumf %12, %13 : vector<2x64xf32>
    %c0_12 = arith.constant 0 : index
    %c0_13 = arith.constant 0 : index
    %15 = vector.load %arg6[%c0_12, %c0_13] : memref<64x10xf32, #tpu.memory_space<vmem>>, vector<64x10xf32>
    %cst_14 = arith.constant dense<0.000000e+00> : vector<2x10xf32>
    %16 = tpu.matmul %14, %15, %cst_14 {dimension_numbers = #tpu.dot_dimension_numbers<[1], [0], [0], [1], [0, 0, 1, 1], [], []>} : vector<2x64xf32>, vector<64x10xf32>, vector<2x10xf32> -> vector<2x10xf32>
    %c0_15 = arith.constant 0 : index
    %c0_16 = arith.constant 0 : index
    %17 = vector.load %arg7[%c0_15, %c0_16] : memref<1x10xf32, #tpu.memory_space<vmem>>, vector<1x10xf32>
    %18 = vector.broadcast %17 : vector<1x10xf32> to vector<2x10xf32>
    %19 = arith.addf %16, %18 : vector<2x10xf32>
    %c0_17 = arith.constant 0 : index
    %c0_18 = arith.constant 0 : index
    %20 = vector.load %arg8[%c0_17, %c0_18] : memref<2x10xf32, #tpu.memory_space<vmem>>, vector<2x10xf32>
    tpu.vector_store %arg8[%c0_17, %c0_18], %19 {strides = array<i32>} : memref<2x10xf32, #tpu.memory_space<vmem>>, vector<2x10xf32>,
    return
  }
  func.func @transform_0(%arg0: i32) -> (i32, i32) {
    %c0_i32 = arith.constant 0 : i32
    %c0_i32_0 = arith.constant 0 : i32
    %c0_i32_1 = arith.constant 0 : i32
    return %c0_i32, %c0_i32_0 : i32, i32
  }
  func.func @transform_1(%arg0: i32) -> (i32, i32) {
    %c0_i32 = arith.constant 0 : i32
    %c0_i32_0 = arith.constant 0 : i32
    %c0_i32_1 = arith.constant 0 : i32
    return %c0_i32, %c0_i32_0 : i32, i32
  }
  func.func @transform_2(%arg0: i32) -> (i32, i32) {
    %c0_i32 = arith.constant 0 : i32
    %c0_i32_0 = arith.constant 0 : i32
    %c0_i32_1 = arith.constant 0 : i32
    return %c0_i32, %c0_i32_0 : i32, i32
  }
  func.func @transform_3(%arg0: i32) -> (i32, i32) {
    %c0_i32 = arith.constant 0 : i32
    %c0_i32_0 = arith.constant 0 : i32
    %c0_i32_1 = arith.constant 0 : i32
    return %c0_i32, %c0_i32_0 : i32, i32
  }
  func.func @transform_4(%arg0: i32) -> (i32, i32) {
    %c0_i32 = arith.constant 0 : i32
    %c0_i32_0 = arith.constant 0 : i32
    %c0_i32_1 = arith.constant 0 : i32
    return %c0_i32, %c0_i32_0 : i32, i32
  }
  func.func @transform_5(%arg0: i32) -> (i32, i32) {
    %c0_i32 = arith.constant 0 : i32
    %c0_i32_0 = arith.constant 0 : i32
    %c0_i32_1 = arith.constant 0 : i32
    return %c0_i32, %c0_i32_0 : i32, i32
  }
  func.func @transform_6(%arg0: i32) -> (i32, i32) {
    %c0_i32 = arith.constant 0 : i32
    %c0_i32_0 = arith.constant 0 : i32
    %c0_i32_1 = arith.constant 0 : i32
    return %c0_i32, %c0_i32_0 : i32, i32
  }
  func.func @transform_7(%arg0: i32) -> (i32, i32) {
    %c0_i32 = arith.constant 0 : i32
    %c0_i32_0 = arith.constant 0 : i32
    %c0_i32_1 = arith.constant 0 : i32
    return %c0_i32, %c0_i32_0 : i32, i32
  }
}

</mosaic_0001>

<bundles_post_ra>
// kernel: forward.3
= control target key start
LH: loop header
LB: loop body
LE: loop exit
PB: predicated region body
PF: predicated region fallthrough
CT: control target
= control target key end

     0   :  { %s1508_s12 = smov 0   ;;  %s1510_s13 = smov 0   ;;  %s2253_s0 = inlined_call_operand.vmem [shape: f32[8,56], index: 0, kind: input, shape index: {}]   ;;  %s2254_s1 = inlined_call_operand.vmem [shape: f32[56,10368], index: 1, kind: input, shape index: {}]   ;;  %s2255_s2 = inlined_call_operand.vmem [shape: f32[8,1], index: 2, kind: input, shape index: {}]   ;;  %s2256_s3 = inlined_call_operand.vmem [shape: f32[8,10368], index: 3, kind: output, shape index: {}]  }
   0x1   :  { %s1512_s14 = smov 0  }
   0x2 LB: > { %s1398_s15 = sadd.s32 4294967295, %s1485_s14   ;;  %s1525_s16 = sadd.s32 1, %s1485_s14   ;;  %s1485_s14 = sphi %s1512_s14, %s2259_s14   ;;  %s1481_s13 = sphi %s1510_s13, %s2258_s13   ;;  %s1477_s12 = sphi %s1508_s12, %s2257_s12  }
   0x3   : > { %s38_s17 = ssub.s32 %s1485_s14, %s1525_s16  ;;  %s41_s18 = sadd.s32 1, %s1481_s13 }
   0x4   : > { %p39_p0 = scmp.eq.s32.totalorder %s38_s17, 0  ;;  %p48_p1 = scmp.ne.s32.totalorder %s1481_s13, %s1477_s12 }
   0x5   : > { %p49_p2 = scmp.eq.s32.totalorder %s1485_s14, 0  ;;  %p1401_p4 = scmp.ge.s32.totalorder %s1485_s14, 3 }
   0x6   : > { %s1534_s19 = scalar_select %p39_p0, %s1481_s13, %s41_s18  }
   0x7   : > { %p50_p3 = por %p49_p2, %p48_p1  ;;  %127 = sbr.rel (%p1401_p4) target bundleno = 206 (0xce), region = 24 }
   0xc   : > { %130 = sbr.rel (!%p50_p3) target bundleno = 206 (0xce), region = 28  ;;  %s132_s20 = sand.u32 (%p50_p3), 1, %s1481_s13  }
   0xd   : > { %s1434_s21 = smul.u32 (%p50_p3), 216, %s1485_s14 }
   0xe   : > { %s1435_s22 = smul.u32 (%p50_p3), 1512, %s132_s20 }
   0xf   : > { %s1542_s25 = scalar_lea.vmem (%p50_p3), %s2254_s1, %s1434_s21 }
  0x10   : > { %v150_v0 = vld [vmem:[%s1542_s25] sm:$0xff] (%p50_p3)  ;;  %v152_v1 = vld [vmem:[%s1542_s25 + $0x8] sm:$0xff] (%p50_p3)  ;;  %v154_v2 = vld [vmem:[%s1542_s25 + $0x10] sm:$0xff] (%p50_p3)  ;;  %s1547_s26 = scalar_lea.vmem (%p50_p3), [#allocation2], %s1435_s22 }
  0x11   : > { %151 = vst [vmem:[%s1547_s26] sm:$0xff] %v150_v0  ;;  %v156_v3 = vld [vmem:[%s1542_s25 + $0x18] sm:$0xff]  ;;  %v158_v4 = vld [vmem:[%s1542_s25 + $0x20] sm:$0xff]  ;;  %v160_v5 = vld [vmem:[%s1542_s25 + $0x28] sm:$0xff] }
  0x12   : > { %153 = vst [vmem:[%s1547_s26 + $0x8] sm:$0xff] %v152_v1  ;;  %v162_v6 = vld [vmem:[%s1542_s25 + $0x30] sm:$0xff]  ;;  %v164_v7 = vld [vmem:[%s1542_s25 + $0x38] sm:$0xff]  ;;  %v166_v8 = vld [vmem:[%s1542_s25 + $0x40] sm:$0xff] }
  0x13   : > { %155 = vst [vmem:[%s1547_s26 + $0x10] sm:$0xff] %v154_v2  ;;  %v168_v9 = vld [vmem:[%s1542_s25 + $0x48] sm:$0xff]  ;;  %v170_v10 = vld [vmem:[%s1542_s25 + $0x50] sm:$0xff]  ;;  %v172_v11 = vld [vmem:[%s1542_s25 + $0x58] sm:$0xff] }
  0x14   : > { %157 = vst [vmem:[%s1547_s26 + $0x18] sm:$0xff] %v156_v3  ;;  %v174_v12 = vld [vmem:[%s1542_s25 + $0x60] sm:$0xff]  ;;  %v176_v13 = vld [vmem:[%s1542_s25 + $0x68] sm:$0xff]  ;;  %v178_v14 = vld [vmem:[%s1542_s25 + $0x70] sm:$0xff] }
  0x15   : > { %159 = vst [vmem:[%s1547_s26 + $0x20] sm:$0xff] %v158_v4  ;;  %v180_v15 = vld [vmem:[%s1542_s25 + $0x78] sm:$0xff]  ;;  %v182_v16 = vld [vmem:[%s1542_s25 + $0x80] sm:$0xff]  ;;  %v184_v17 = vld [vmem:[%s1542_s25 + $0x88] sm:$0xff] }
  0x16   : > { %161 = vst [vmem:[%s1547_s26 + $0x28] sm:$0xff] %v160_v5  ;;  %v186_v18 = vld [vmem:[%s1542_s25 + $0x90] sm:$0xff]  ;;  %v188_v19 = vld [vmem:[%s1542_s25 + $0x98] sm:$0xff]  ;;  %v190_v20 = vld [vmem:[%s1542_s25 + $0xa0] sm:$0xff] }
  0x17   : > { %163 = vst [vmem:[%s1547_s26 + $0x30] sm:$0xff] %v162_v6  ;;  %v192_v21 = vld [vmem:[%s1542_s25 + $0xa8] sm:$0xff]  ;;  %v194_v22 = vld [vmem:[%s1542_s25 + $0xb0] sm:$0xff]  ;;  %v196_v23 = vld [vmem:[%s1542_s25 + $0xb8] sm:$0xff] }
  0x18   : > { %165 = vst [vmem:[%s1547_s26 + $0x38] sm:$0xff] %v164_v7  ;;  %v198_v24 = vld [vmem:[%s1542_s25 + $0xc0] sm:$0xff]  ;;  %v200_v25 = vld [vmem:[%s1542_s25 + $0xc8] sm:$0xff]  ;;  %v202_v26 = vld [vmem:[%s1542_s25 + $0xd0] sm:$0xff] }
  0x19   : > { %167 = vst [vmem:[%s1547_s26 + $0x40] sm:$0xff] %v166_v8  ;;  %v204_v27 = vld [vmem:[%s1542_s25 + $0x288] sm:$0xff]  ;;  %v206_v28 = vld [vmem:[%s1542_s25 + $0x290] sm:$0xff]  ;;  %v208_v29 = vld [vmem:[%s1542_s25 + $0x298] sm:$0xff] }
  0x1a   : > { %169 = vst [vmem:[%s1547_s26 + $0x48] sm:$0xff] %v168_v9  ;;  %v210_v30 = vld [vmem:[%s1542_s25 + $0x2a0] sm:$0xff]  ;;  %v212_v31 = vld [vmem:[%s1542_s25 + $0x2a8] sm:$0xff]  ;;  %v214_v32 = vld [vmem:[%s1542_s25 + $0x2b0] sm:$0xff] }
  0x1b   : > { %171 = vst [vmem:[%s1547_s26 + $0x50] sm:$0xff] %v170_v10  ;;  %v216_v33 = vld [vmem:[%s1542_s25 + $0x2b8] sm:$0xff]  ;;  %v218_v34 = vld [vmem:[%s1542_s25 + $0x2c0] sm:$0xff]  ;;  %v220_v35 = vld [vmem:[%s1542_s25 + $0x2c8] sm:$0xff] }
  0x1c   : > { %173 = vst [vmem:[%s1547_s26 + $0x58] sm:$0xff] %v172_v11  ;;  %v222_v36 = vld [vmem:[%s1542_s25 + $0x2d0] sm:$0xff]  ;;  %v224_v37 = vld [vmem:[%s1542_s25 + $0x2d8] sm:$0xff]  ;;  %v226_v38 = vld [vmem:[%s1542_s25 + $0x2e0] sm:$0xff] }
  0x1d   : > { %175 = vst [vmem:[%s1547_s26 + $0x60] sm:$0xff] %v174_v12  ;;  %v228_v39 = vld [vmem:[%s1542_s25 + $0x2e8] sm:$0xff]  ;;  %v230_v40 = vld [vmem:[%s1542_s25 + $0x2f0] sm:$0xff]  ;;  %v232_v41 = vld [vmem:[%s1542_s25 + $0x2f8] sm:$0xff] }
  0x1e   : > { %177 = vst [vmem:[%s1547_s26 + $0x68] sm:$0xff] %v176_v13  ;;  %v234_v42 = vld [vmem:[%s1542_s25 + $0x300] sm:$0xff]  ;;  %v236_v43 = vld [vmem:[%s1542_s25 + $0x308] sm:$0xff]  ;;  %v238_v44 = vld [vmem:[%s1542_s25 + $0x310] sm:$0xff] }
  0x1f   : > { %179 = vst [vmem:[%s1547_s26 + $0x70] sm:$0xff] %v178_v14  ;;  %v240_v45 = vld [vmem:[%s1542_s25 + $0x318] sm:$0xff]  ;;  %v242_v46 = vld [vmem:[%s1542_s25 + $0x320] sm:$0xff]  ;;  %v244_v47 = vld [vmem:[%s1542_s25 + $0x328] sm:$0xff] }
  0x20   : > { %181 = vst [vmem:[%s1547_s26 + $0x78] sm:$0xff] %v180_v15  ;;  %v246_v48 = vld [vmem:[%s1542_s25 + $0x330] sm:$0xff]  ;;  %v248_v49 = vld [vmem:[%s1542_s25 + $0x338] sm:$0xff]  ;;  %v250_v50 = vld [vmem:[%s1542_s25 + $0x340] sm:$0xff] }
  0x21   : > { %183 = vst [vmem:[%s1547_s26 + $0x80] sm:$0xff] %v182_v16  ;;  %v252_v51 = vld [vmem:[%s1542_s25 + $0x348] sm:$0xff]  ;;  %v254_v52 = vld [vmem:[%s1542_s25 + $0x350] sm:$0xff]  ;;  %v256_v53 = vld [vmem:[%s1542_s25 + $0x358] sm:$0xff] }
  0x22   : > { %185 = vst [vmem:[%s1547_s26 + $0x88] sm:$0xff] %v184_v17  ;;  %v258_v54 = vld [vmem:[%s1542_s25 + $0x510] sm:$0xff]  ;;  %v260_v55 = vld [vmem:[%s1542_s25 + $0x518] sm:$0xff]  ;;  %v262_v56 = vld [vmem:[%s1542_s25 + $0x520] sm:$0xff] }
  0x23   : > { %187 = vst [vmem:[%s1547_s26 + $0x90] sm:$0xff] %v186_v18  ;;  %v264_v57 = vld [vmem:[%s1542_s25 + $0x528] sm:$0xff]  ;;  %v266_v58 = vld [vmem:[%s1542_s25 + $0x530] sm:$0xff]  ;;  %v268_v59 = vld [vmem:[%s1542_s25 + $0x538] sm:$0xff] }
  0x24   : > { %189 = vst [vmem:[%s1547_s26 + $0x98] sm:$0xff] %v188_v19  ;;  %v270_v60 = vld [vmem:[%s1542_s25 + $0x540] sm:$0xff]  ;;  %v272_v61 = vld [vmem:[%s1542_s25 + $0x548] sm:$0xff]  ;;  %v274_v62 = vld [vmem:[%s1542_s25 + $0x550] sm:$0xff] }
  0x25   : > { %191 = vst [vmem:[%s1547_s26 + $0xa0] sm:$0xff] %v190_v20  ;;  %v276_v63 = vld [vmem:[%s1542_s25 + $0x558] sm:$0xff]  ;;  %v278_v0 = vld [vmem:[%s1542_s25 + $0x560] sm:$0xff]  ;;  %v280_v1 = vld [vmem:[%s1542_s25 + $0x568] sm:$0xff] }
  0x26   : > { %193 = vst [vmem:[%s1547_s26 + $0xa8] sm:$0xff] %v192_v21  ;;  %v282_v2 = vld [vmem:[%s1542_s25 + $0x570] sm:$0xff]  ;;  %v284_v3 = vld [vmem:[%s1542_s25 + $0x578] sm:$0xff]  ;;  %v286_v4 = vld [vmem:[%s1542_s25 + $0x580] sm:$0xff] }
  0x27   : > { %195 = vst [vmem:[%s1547_s26 + $0xb0] sm:$0xff] %v194_v22  ;;  %v288_v5 = vld [vmem:[%s1542_s25 + $0x588] sm:$0xff]  ;;  %v290_v6 = vld [vmem:[%s1542_s25 + $0x590] sm:$0xff]  ;;  %v292_v7 = vld [vmem:[%s1542_s25 + $0x598] sm:$0xff] }
  0x28   : > { %197 = vst [vmem:[%s1547_s26 + $0xb8] sm:$0xff] %v196_v23  ;;  %v294_v8 = vld [vmem:[%s1542_s25 + $0x5a0] sm:$0xff]  ;;  %v296_v9 = vld [vmem:[%s1542_s25 + $0x5a8] sm:$0xff]  ;;  %v298_v10 = vld [vmem:[%s1542_s25 + $0x5b0] sm:$0xff] }
  0x29   : > { %199 = vst [vmem:[%s1547_s26 + $0xc0] sm:$0xff] %v198_v24  ;;  %v300_v11 = vld [vmem:[%s1542_s25 + $0x5b8] sm:$0xff]  ;;  %v302_v12 = vld [vmem:[%s1542_s25 + $0x5c0] sm:$0xff]  ;;  %v304_v13 = vld [vmem:[%s1542_s25 + $0x5c8] sm:$0xff] }
  0x2a   : > { %201 = vst [vmem:[%s1547_s26 + $0xc8] sm:$0xff] %v200_v25  ;;  %v306_v14 = vld [vmem:[%s1542_s25 + $0x5d0] sm:$0xff]  ;;  %v308_v15 = vld [vmem:[%s1542_s25 + $0x5d8] sm:$0xff]  ;;  %v310_v16 = vld [vmem:[%s1542_s25 + $0x5e0] sm:$0xff] }
  0x2b   : > { %203 = vst [vmem:[%s1547_s26 + $0xd0] sm:$0xff] %v202_v26  ;;  %v312_v17 = vld [vmem:[%s1542_s25 + $0x798] sm:$0xff]  ;;  %v314_v18 = vld [vmem:[%s1542_s25 + $0x7a0] sm:$0xff]  ;;  %v316_v19 = vld [vmem:[%s1542_s25 + $0x7a8] sm:$0xff] }
  0x2c   : > { %205 = vst [vmem:[%s1547_s26 + $0xd8] sm:$0xff] %v204_v27  ;;  %v318_v20 = vld [vmem:[%s1542_s25 + $0x7b0] sm:$0xff]  ;;  %v320_v21 = vld [vmem:[%s1542_s25 + $0x7b8] sm:$0xff]  ;;  %v322_v22 = vld [vmem:[%s1542_s25 + $0x7c0] sm:$0xff] }
  0x2d   : > { %207 = vst [vmem:[%s1547_s26 + $0xe0] sm:$0xff] %v206_v28  ;;  %v324_v23 = vld [vmem:[%s1542_s25 + $0x7c8] sm:$0xff]  ;;  %v326_v24 = vld [vmem:[%s1542_s25 + $0x7d0] sm:$0xff]  ;;  %v328_v25 = vld [vmem:[%s1542_s25 + $0x7d8] sm:$0xff] }
  0x2e   : > { %209 = vst [vmem:[%s1547_s26 + $0xe8] sm:$0xff] %v208_v29  ;;  %v330_v26 = vld [vmem:[%s1542_s25 + $0x7e0] sm:$0xff]  ;;  %v332_v27 = vld [vmem:[%s1542_s25 + $0x7e8] sm:$0xff]  ;;  %v334_v28 = vld [vmem:[%s1542_s25 + $0x7f0] sm:$0xff] }
  0x2f   : > { %211 = vst [vmem:[%s1547_s26 + $0xf0] sm:$0xff] %v210_v30  ;;  %v336_v29 = vld [vmem:[%s1542_s25 + $0x7f8] sm:$0xff]  ;;  %v338_v30 = vld [vmem:[%s1542_s25 + $0x800] sm:$0xff] }
  0x30   : > { %213 = vst [vmem:[%s1547_s26 + $0xf8] sm:$0xff] %v212_v31  ;;  %v340_v31 = vld [vmem:[%s1542_s25 + $0x808] sm:$0xff] }
  0x31   : > { %215 = vst [vmem:[%s1547_s26 + $0x100] sm:$0xff] %v214_v32  ;;  %v342_v32 = vld [vmem:[%s1542_s25 + $0x810] sm:$0xff] }
  0x32   : > { %217 = vst [vmem:[%s1547_s26 + $0x108] sm:$0xff] %v216_v33  ;;  %v344_v33 = vld [vmem:[%s1542_s25 + $0x818] sm:$0xff] }
  0x33   : > { %219 = vst [vmem:[%s1547_s26 + $0x110] sm:$0xff] %v218_v34  ;;  %v346_v34 = vld [vmem:[%s1542_s25 + $0x820] sm:$0xff] }
  0x34   : > { %221 = vst [vmem:[%s1547_s26 + $0x118] sm:$0xff] %v220_v35  ;;  %v348_v35 = vld [vmem:[%s1542_s25 + $0x828] sm:$0xff] }
  0x35   : > { %223 = vst [vmem:[%s1547_s26 + $0x120] sm:$0xff] %v222_v36  ;;  %v350_v36 = vld [vmem:[%s1542_s25 + $0x830] sm:$0xff] }
  0x36   : > { %225 = vst [vmem:[%s1547_s26 + $0x128] sm:$0xff] %v224_v37  ;;  %v352_v37 = vld [vmem:[%s1542_s25 + $0x838] sm:$0xff] }
  0x37   : > { %227 = vst [vmem:[%s1547_s26 + $0x130] sm:$0xff] %v226_v38  ;;  %v354_v38 = vld [vmem:[%s1542_s25 + $0x840] sm:$0xff] }
  0x38   : > { %229 = vst [vmem:[%s1547_s26 + $0x138] sm:$0xff] %v228_v39  ;;  %v356_v39 = vld [vmem:[%s1542_s25 + $0x848] sm:$0xff] }
  0x39   : > { %231 = vst [vmem:[%s1547_s26 + $0x140] sm:$0xff] %v230_v40  ;;  %v358_v40 = vld [vmem:[%s1542_s25 + $0x850] sm:$0xff] }
  0x3a   : > { %233 = vst [vmem:[%s1547_s26 + $0x148] sm:$0xff] %v232_v41  ;;  %v360_v41 = vld [vmem:[%s1542_s25 + $0x858] sm:$0xff] }
  0x3b   : > { %235 = vst [vmem:[%s1547_s26 + $0x150] sm:$0xff] %v234_v42  ;;  %v362_v42 = vld [vmem:[%s1542_s25 + $0x860] sm:$0xff] }
  0x3c   : > { %237 = vst [vmem:[%s1547_s26 + $0x158] sm:$0xff] %v236_v43  ;;  %v364_v43 = vld [vmem:[%s1542_s25 + $0x868] sm:$0xff] }
  0x3d   : > { %239 = vst [vmem:[%s1547_s26 + $0x160] sm:$0xff] %v238_v44  ;;  %v366_v44 = vld [vmem:[%s1542_s25 + $0xa20] sm:$0xff] }
  0x3e   : > { %241 = vst [vmem:[%s1547_s26 + $0x168] sm:$0xff] %v240_v45  ;;  %v368_v45 = vld [vmem:[%s1542_s25 + $0xa28] sm:$0xff] }
  0x3f   : > { %243 = vst [vmem:[%s1547_s26 + $0x170] sm:$0xff] %v242_v46  ;;  %v370_v46 = vld [vmem:[%s1542_s25 + $0xa30] sm:$0xff] }
  0x40   : > { %245 = vst [vmem:[%s1547_s26 + $0x178] sm:$0xff] %v244_v47  ;;  %v372_v47 = vld [vmem:[%s1542_s25 + $0xa38] sm:$0xff] }
  0x41   : > { %247 = vst [vmem:[%s1547_s26 + $0x180] sm:$0xff] %v246_v48  ;;  %v374_v48 = vld [vmem:[%s1542_s25 + $0xa40] sm:$0xff] }
  0x42   : > { %249 = vst [vmem:[%s1547_s26 + $0x188] sm:$0xff] %v248_v49  ;;  %v376_v49 = vld [vmem:[%s1542_s25 + $0xa48] sm:$0xff] }
  0x43   : > { %251 = vst [vmem:[%s1547_s26 + $0x190] sm:$0xff] %v250_v50  ;;  %v378_v50 = vld [vmem:[%s1542_s25 + $0xa50] sm:$0xff] }
  0x44   : > { %253 = vst [vmem:[%s1547_s26 + $0x198] sm:$0xff] %v252_v51  ;;  %v380_v51 = vld [vmem:[%s1542_s25 + $0xa58] sm:$0xff] }
  0x45   : > { %255 = vst [vmem:[%s1547_s26 + $0x1a0] sm:$0xff] %v254_v52  ;;  %v382_v52 = vld [vmem:[%s1542_s25 + $0xa60] sm:$0xff] }
  0x46   : > { %257 = vst [vmem:[%s1547_s26 + $0x1a8] sm:$0xff] %v256_v53  ;;  %v384_v53 = vld [vmem:[%s1542_s25 + $0xa68] sm:$0xff] }
  0x47   : > { %259 = vst [vmem:[%s1547_s26 + $0x1b0] sm:$0xff] %v258_v54  ;;  %v386_v54 = vld [vmem:[%s1542_s25 + $0xa70] sm:$0xff] }
  0x48   : > { %261 = vst [vmem:[%s1547_s26 + $0x1b8] sm:$0xff] %v260_v55  ;;  %v388_v55 = vld [vmem:[%s1542_s25 + $0xa78] sm:$0xff] }
  0x49   : > { %263 = vst [vmem:[%s1547_s26 + $0x1c0] sm:$0xff] %v262_v56  ;;  %v390_v56 = vld [vmem:[%s1542_s25 + $0xa80] sm:$0xff] }
  0x4a   : > { %265 = vst [vmem:[%s1547_s26 + $0x1c8] sm:$0xff] %v264_v57  ;;  %v392_v57 = vld [vmem:[%s1542_s25 + $0xa88] sm:$0xff] }
  0x4b   : > { %267 = vst [vmem:[%s1547_s26 + $0x1d0] sm:$0xff] %v266_v58  ;;  %v394_v58 = vld [vmem:[%s1542_s25 + $0xa90] sm:$0xff] }
  0x4c   : > { %269 = vst [vmem:[%s1547_s26 + $0x1d8] sm:$0xff] %v268_v59  ;;  %v396_v59 = vld [vmem:[%s1542_s25 + $0xa98] sm:$0xff] }
  0x4d   : > { %271 = vst [vmem:[%s1547_s26 + $0x1e0] sm:$0xff] %v270_v60  ;;  %v398_v60 = vld [vmem:[%s1542_s25 + $0xaa0] sm:$0xff] }
  0x4e   : > { %273 = vst [vmem:[%s1547_s26 + $0x1e8] sm:$0xff] %v272_v61  ;;  %v400_v61 = vld [vmem:[%s1542_s25 + $0xaa8] sm:$0xff] }
  0x4f   : > { %275 = vst [vmem:[%s1547_s26 + $0x1f0] sm:$0xff] %v274_v62  ;;  %v402_v62 = vld [vmem:[%s1542_s25 + $0xab0] sm:$0xff] }
  0x50   : > { %277 = vst [vmem:[%s1547_s26 + $0x1f8] sm:$0xff] %v276_v63  ;;  %v404_v63 = vld [vmem:[%s1542_s25 + $0xab8] sm:$0xff] }
  0x51   : > { %279 = vst [vmem:[%s1547_s26 + $0x200] sm:$0xff] %v278_v0  ;;  %v406_v0 = vld [vmem:[%s1542_s25 + $0xac0] sm:$0xff] }
  0x52   : > { %281 = vst [vmem:[%s1547_s26 + $0x208] sm:$0xff] %v280_v1  ;;  %v408_v1 = vld [vmem:[%s1542_s25 + $0xac8] sm:$0xff] }
  0x53   : > { %283 = vst [vmem:[%s1547_s26 + $0x210] sm:$0xff] %v282_v2  ;;  %v410_v2 = vld [vmem:[%s1542_s25 + $0xad0] sm:$0xff] }
  0x54   : > { %285 = vst [vmem:[%s1547_s26 + $0x218] sm:$0xff] %v284_v3  ;;  %v412_v3 = vld [vmem:[%s1542_s25 + $0xad8] sm:$0xff] }
  0x55   : > { %287 = vst [vmem:[%s1547_s26 + $0x220] sm:$0xff] %v286_v4  ;;  %v414_v4 = vld [vmem:[%s1542_s25 + $0xae0] sm:$0xff] }
  0x56   : > { %289 = vst [vmem:[%s1547_s26 + $0x228] sm:$0xff] %v288_v5  ;;  %v416_v5 = vld [vmem:[%s1542_s25 + $0xae8] sm:$0xff] }
  0x57   : > { %291 = vst [vmem:[%s1547_s26 + $0x230] sm:$0xff] %v290_v6  ;;  %v418_v6 = vld [vmem:[%s1542_s25 + $0xaf0] sm:$0xff] }
  0x58   : > { %293 = vst [vmem:[%s1547_s26 + $0x238] sm:$0xff] %v292_v7  ;;  %v420_v7 = vld [vmem:[%s1542_s25 + $0xca8] sm:$0xff] }
  0x59   : > { %295 = vst [vmem:[%s1547_s26 + $0x240] sm:$0xff] %v294_v8  ;;  %v422_v8 = vld [vmem:[%s1542_s25 + $0xcb0] sm:$0xff] }
  0x5a   : > { %297 = vst [vmem:[%s1547_s26 + $0x248] sm:$0xff] %v296_v9  ;;  %v424_v9 = vld [vmem:[%s1542_s25 + $0xcb8] sm:$0xff] }
  0x5b   : > { %299 = vst [vmem:[%s1547_s26 + $0x250] sm:$0xff] %v298_v10  ;;  %v426_v10 = vld [vmem:[%s1542_s25 + $0xcc0] sm:$0xff] }
  0x5c   : > { %301 = vst [vmem:[%s1547_s26 + $0x258] sm:$0xff] %v300_v11  ;;  %v428_v11 = vld [vmem:[%s1542_s25 + $0xcc8] sm:$0xff] }
  0x5d   : > { %303 = vst [vmem:[%s1547_s26 + $0x260] sm:$0xff] %v302_v12  ;;  %v430_v12 = vld [vmem:[%s1542_s25 + $0xcd0] sm:$0xff] }
  0x5e   : > { %305 = vst [vmem:[%s1547_s26 + $0x268] sm:$0xff] %v304_v13  ;;  %v432_v13 = vld [vmem:[%s1542_s25 + $0xcd8] sm:$0xff] }
  0x5f   : > { %307 = vst [vmem:[%s1547_s26 + $0x270] sm:$0xff] %v306_v14  ;;  %v434_v14 = vld [vmem:[%s1542_s25 + $0xce0] sm:$0xff] }
  0x60   : > { %309 = vst [vmem:[%s1547_s26 + $0x278] sm:$0xff] %v308_v15  ;;  %v436_v15 = vld [vmem:[%s1542_s25 + $0xce8] sm:$0xff] }
  0x61   : > { %311 = vst [vmem:[%s1547_s26 + $0x280] sm:$0xff] %v310_v16  ;;  %v438_v16 = vld [vmem:[%s1542_s25 + $0xcf0] sm:$0xff] }
  0x62   : > { %313 = vst [vmem:[%s1547_s26 + $0x288] sm:$0xff] %v312_v17  ;;  %v440_v17 = vld [vmem:[%s1542_s25 + $0xcf8] sm:$0xff] }
  0x63   : > { %315 = vst [vmem:[%s1547_s26 + $0x290] sm:$0xff] %v314_v18  ;;  %v442_v18 = vld [vmem:[%s1542_s25 + $0xd00] sm:$0xff] }
  0x64   : > { %317 = vst [vmem:[%s1547_s26 + $0x298] sm:$0xff] %v316_v19  ;;  %v444_v19 = vld [vmem:[%s1542_s25 + $0xd08] sm:$0xff] }
  0x65   : > { %319 = vst [vmem:[%s1547_s26 + $0x2a0] sm:$0xff] %v318_v20  ;;  %v446_v20 = vld [vmem:[%s1542_s25 + $0xd10] sm:$0xff] }
  0x66   : > { %321 = vst [vmem:[%s1547_s26 + $0x2a8] sm:$0xff] %v320_v21  ;;  %v448_v21 = vld [vmem:[%s1542_s25 + $0xd18] sm:$0xff] }
  0x67   : > { %323 = vst [vmem:[%s1547_s26 + $0x2b0] sm:$0xff] %v322_v22  ;;  %v450_v22 = vld [vmem:[%s1542_s25 + $0xd20] sm:$0xff] }
  0x68   : > { %325 = vst [vmem:[%s1547_s26 + $0x2b8] sm:$0xff] %v324_v23  ;;  %v452_v23 = vld [vmem:[%s1542_s25 + $0xd28] sm:$0xff] }
  0x69   : > { %327 = vst [vmem:[%s1547_s26 + $0x2c0] sm:$0xff] %v326_v24  ;;  %v454_v24 = vld [vmem:[%s1542_s25 + $0xd30] sm:$0xff] }
  0x6a   : > { %329 = vst [vmem:[%s1547_s26 + $0x2c8] sm:$0xff] %v328_v25  ;;  %v456_v25 = vld [vmem:[%s1542_s25 + $0xd38] sm:$0xff] }
  0x6b   : > { %331 = vst [vmem:[%s1547_s26 + $0x2d0] sm:$0xff] %v330_v26  ;;  %v458_v26 = vld [vmem:[%s1542_s25 + $0xd40] sm:$0xff] }
  0x6c   : > { %333 = vst [vmem:[%s1547_s26 + $0x2d8] sm:$0xff] %v332_v27  ;;  %v460_v27 = vld [vmem:[%s1542_s25 + $0xd48] sm:$0xff] }
  0x6d   : > { %335 = vst [vmem:[%s1547_s26 + $0x2e0] sm:$0xff] %v334_v28  ;;  %v462_v28 = vld [vmem:[%s1542_s25 + $0xd50] sm:$0xff] }
  0x6e   : > { %337 = vst [vmem:[%s1547_s26 + $0x2e8] sm:$0xff] %v336_v29  ;;  %v464_v29 = vld [vmem:[%s1542_s25 + $0xd58] sm:$0xff] }
  0x6f   : > { %339 = vst [vmem:[%s1547_s26 + $0x2f0] sm:$0xff] %v338_v30  ;;  %v466_v30 = vld [vmem:[%s1542_s25 + $0xd60] sm:$0xff] }
  0x70   : > { %341 = vst [vmem:[%s1547_s26 + $0x2f8] sm:$0xff] %v340_v31  ;;  %v468_v31 = vld [vmem:[%s1542_s25 + $0xd68] sm:$0xff] }
  0x71   : > { %343 = vst [vmem:[%s1547_s26 + $0x300] sm:$0xff] %v342_v32  ;;  %v470_v32 = vld [vmem:[%s1542_s25 + $0xd70] sm:$0xff] }
  0x72   : > { %345 = vst [vmem:[%s1547_s26 + $0x308] sm:$0xff] %v344_v33  ;;  %v472_v33 = vld [vmem:[%s1542_s25 + $0xd78] sm:$0xff] }
  0x73   : > { %347 = vst [vmem:[%s1547_s26 + $0x310] sm:$0xff] %v346_v34  ;;  %v474_v34 = vld [vmem:[%s1542_s25 + $0xf30] sm:$0xff] }
  0x74   : > { %349 = vst [vmem:[%s1547_s26 + $0x318] sm:$0xff] %v348_v35  ;;  %v476_v35 = vld [vmem:[%s1542_s25 + $0xf38] sm:$0xff] }
  0x75   : > { %351 = vst [vmem:[%s1547_s26 + $0x320] sm:$0xff] %v350_v36  ;;  %v478_v36 = vld [vmem:[%s1542_s25 + $0xf40] sm:$0xff] }
  0x76   : > { %353 = vst [vmem:[%s1547_s26 + $0x328] sm:$0xff] %v352_v37  ;;  %v480_v37 = vld [vmem:[%s1542_s25 + $0xf48] sm:$0xff] }
  0x77   : > { %355 = vst [vmem:[%s1547_s26 + $0x330] sm:$0xff] %v354_v38  ;;  %v482_v38 = vld [vmem:[%s1542_s25 + $0xf50] sm:$0xff] }
  0x78   : > { %357 = vst [vmem:[%s1547_s26 + $0x338] sm:$0xff] %v356_v39  ;;  %v484_v39 = vld [vmem:[%s1542_s25 + $0xf58] sm:$0xff] }
  0x79   : > { %359 = vst [vmem:[%s1547_s26 + $0x340] sm:$0xff] %v358_v40  ;;  %v486_v40 = vld [vmem:[%s1542_s25 + $0xf60] sm:$0xff] }
  0x7a   : > { %361 = vst [vmem:[%s1547_s26 + $0x348] sm:$0xff] %v360_v41  ;;  %v488_v41 = vld [vmem:[%s1542_s25 + $0xf68] sm:$0xff] }
  0x7b   : > { %363 = vst [vmem:[%s1547_s26 + $0x350] sm:$0xff] %v362_v42  ;;  %v490_v42 = vld [vmem:[%s1542_s25 + $0xf70] sm:$0xff] }
  0x7c   : > { %365 = vst [vmem:[%s1547_s26 + $0x358] sm:$0xff] %v364_v43  ;;  %v492_v43 = vld [vmem:[%s1542_s25 + $0xf78] sm:$0xff] }
  0x7d   : > { %367 = vst [vmem:[%s1547_s26 + $0x360] sm:$0xff] %v366_v44  ;;  %v494_v44 = vld [vmem:[%s1542_s25 + $0xf80] sm:$0xff] }
  0x7e   : > { %369 = vst [vmem:[%s1547_s26 + $0x368] sm:$0xff] %v368_v45  ;;  %v496_v45 = vld [vmem:[%s1542_s25 + $0xf88] sm:$0xff] }
  0x7f   : > { %371 = vst [vmem:[%s1547_s26 + $0x370] sm:$0xff] %v370_v46  ;;  %v498_v46 = vld [vmem:[%s1542_s25 + $0xf90] sm:$0xff] }
  0x80   : > { %373 = vst [vmem:[%s1547_s26 + $0x378] sm:$0xff] %v372_v47  ;;  %v500_v47 = vld [vmem:[%s1542_s25 + $0xf98] sm:$0xff] }
  0x81   : > { %375 = vst [vmem:[%s1547_s26 + $0x380] sm:$0xff] %v374_v48  ;;  %v502_v48 = vld [vmem:[%s1542_s25 + $0xfa0] sm:$0xff] }
  0x82   : > { %377 = vst [vmem:[%s1547_s26 + $0x388] sm:$0xff] %v376_v49  ;;  %v504_v49 = vld [vmem:[%s1542_s25 + $0xfa8] sm:$0xff] }
  0x83   : > { %379 = vst [vmem:[%s1547_s26 + $0x390] sm:$0xff] %v378_v50  ;;  %v506_v50 = vld [vmem:[%s1542_s25 + $0xfb0] sm:$0xff] }
  0x84   : > { %381 = vst [vmem:[%s1547_s26 + $0x398] sm:$0xff] %v380_v51  ;;  %v508_v51 = vld [vmem:[%s1542_s25 + $0xfb8] sm:$0xff] }
  0x85   : > { %383 = vst [vmem:[%s1547_s26 + $0x3a0] sm:$0xff] %v382_v52  ;;  %v510_v52 = vld [vmem:[%s1542_s25 + $0xfc0] sm:$0xff] }
  0x86   : > { %385 = vst [vmem:[%s1547_s26 + $0x3a8] sm:$0xff] %v384_v53  ;;  %v512_v53 = vld [vmem:[%s1542_s25 + $0xfc8] sm:$0xff] }
  0x87   : > { %387 = vst [vmem:[%s1547_s26 + $0x3b0] sm:$0xff] %v386_v54  ;;  %v514_v54 = vld [vmem:[%s1542_s25 + $0xfd0] sm:$0xff] }
  0x88   : > { %389 = vst [vmem:[%s1547_s26 + $0x3b8] sm:$0xff] %v388_v55  ;;  %v516_v55 = vld [vmem:[%s1542_s25 + $0xfd8] sm:$0xff] }
  0x89   : > { %391 = vst [vmem:[%s1547_s26 + $0x3c0] sm:$0xff] %v390_v56  ;;  %v518_v56 = vld [vmem:[%s1542_s25 + $0xfe0] sm:$0xff] }
  0x8a   : > { %393 = vst [vmem:[%s1547_s26 + $0x3c8] sm:$0xff] %v392_v57  ;;  %v520_v57 = vld [vmem:[%s1542_s25 + $0xfe8] sm:$0xff] }
  0x8b   : > { %395 = vst [vmem:[%s1547_s26 + $0x3d0] sm:$0xff] %v394_v58  ;;  %v522_v58 = vld [vmem:[%s1542_s25 + $0xff0] sm:$0xff] }
  0x8c   : > { %397 = vst [vmem:[%s1547_s26 + $0x3d8] sm:$0xff] %v396_v59  ;;  %v524_v59 = vld [vmem:[%s1542_s25 + $0xff8] sm:$0xff] }
  0x8d   : > { %399 = vst [vmem:[%s1547_s26 + $0x3e0] sm:$0xff] %v398_v60  ;;  %v526_v60 = vld [vmem:[%s1542_s25 + $0x1000] sm:$0xff] }
  0x8e   : > { %401 = vst [vmem:[%s1547_s26 + $0x3e8] sm:$0xff] %v400_v61 }
  0x8f   : > { %403 = vst [vmem:[%s1547_s26 + $0x3f0] sm:$0xff] %v402_v62 }
  0x90   : > { %405 = vst [vmem:[%s1547_s26 + $0x3f8] sm:$0xff] %v404_v63 }
  0x91   : > { %407 = vst [vmem:[%s1547_s26 + $0x400] sm:$0xff] %v406_v0 }
  0x92   : > { %409 = vst [vmem:[%s1547_s26 + $0x408] sm:$0xff] %v408_v1 }
  0x93   : > { %411 = vst [vmem:[%s1547_s26 + $0x410] sm:$0xff] %v410_v2 }
  0x94   : > { %413 = vst [vmem:[%s1547_s26 + $0x418] sm:$0xff] %v412_v3 }
  0x95   : > { %415 = vst [vmem:[%s1547_s26 + $0x420] sm:$0xff] %v414_v4 }
  0x96   : > { %417 = vst [vmem:[%s1547_s26 + $0x428] sm:$0xff] %v416_v5 }
  0x97   : > { %419 = vst [vmem:[%s1547_s26 + $0x430] sm:$0xff] %v418_v6 }
  0x98   : > { %421 = vst [vmem:[%s1547_s26 + $0x438] sm:$0xff] %v420_v7 }
  0x99   : > { %423 = vst [vmem:[%s1547_s26 + $0x440] sm:$0xff] %v422_v8 }
  0x9a   : > { %425 = vst [vmem:[%s1547_s26 + $0x448] sm:$0xff] %v424_v9 }
  0x9b   : > { %427 = vst [vmem:[%s1547_s26 + $0x450] sm:$0xff] %v426_v10 }
  0x9c   : > { %429 = vst [vmem:[%s1547_s26 + $0x458] sm:$0xff] %v428_v11 }
  0x9d   : > { %431 = vst [vmem:[%s1547_s26 + $0x460] sm:$0xff] %v430_v12 }
  0x9e   : > { %433 = vst [vmem:[%s1547_s26 + $0x468] sm:$0xff] %v432_v13 }
  0x9f   : > { %435 = vst [vmem:[%s1547_s26 + $0x470] sm:$0xff] %v434_v14 }
  0xa0   : > { %437 = vst [vmem:[%s1547_s26 + $0x478] sm:$0xff] %v436_v15 }
  0xa1   : > { %439 = vst [vmem:[%s1547_s26 + $0x480] sm:$0xff] %v438_v16 }
  0xa2   : > { %441 = vst [vmem:[%s1547_s26 + $0x488] sm:$0xff] %v440_v17 }
  0xa3   : > { %443 = vst [vmem:[%s1547_s26 + $0x490] sm:$0xff] %v442_v18 }
  0xa4   : > { %445 = vst [vmem:[%s1547_s26 + $0x498] sm:$0xff] %v444_v19 }
  0xa5   : > { %447 = vst [vmem:[%s1547_s26 + $0x4a0] sm:$0xff] %v446_v20 }
  0xa6   : > { %449 = vst [vmem:[%s1547_s26 + $0x4a8] sm:$0xff] %v448_v21 }
  0xa7   : > { %451 = vst [vmem:[%s1547_s26 + $0x4b0] sm:$0xff] %v450_v22 }
  0xa8   : > { %453 = vst [vmem:[%s1547_s26 + $0x4b8] sm:$0xff] %v452_v23 }
  0xa9   : > { %455 = vst [vmem:[%s1547_s26 + $0x4c0] sm:$0xff] %v454_v24 }
  0xaa   : > { %457 = vst [vmem:[%s1547_s26 + $0x4c8] sm:$0xff] %v456_v25 }
  0xab   : > { %459 = vst [vmem:[%s1547_s26 + $0x4d0] sm:$0xff] %v458_v26 }
  0xac   : > { %461 = vst [vmem:[%s1547_s26 + $0x4d8] sm:$0xff] %v460_v27 }
  0xad   : > { %463 = vst [vmem:[%s1547_s26 + $0x4e0] sm:$0xff] %v462_v28 }
  0xae   : > { %465 = vst [vmem:[%s1547_s26 + $0x4e8] sm:$0xff] %v464_v29 }
  0xaf   : > { %467 = vst [vmem:[%s1547_s26 + $0x4f0] sm:$0xff] %v466_v30 }
  0xb0   : > { %469 = vst [vmem:[%s1547_s26 + $0x4f8] sm:$0xff] %v468_v31 }
  0xb1   : > { %471 = vst [vmem:[%s1547_s26 + $0x500] sm:$0xff] %v470_v32 }
  0xb2   : > { %473 = vst [vmem:[%s1547_s26 + $0x508] sm:$0xff] %v472_v33 }
  0xb3   : > { %475 = vst [vmem:[%s1547_s26 + $0x510] sm:$0xff] %v474_v34 }
  0xb4   : > { %477 = vst [vmem:[%s1547_s26 + $0x518] sm:$0xff] %v476_v35 }
  0xb5   : > { %479 = vst [vmem:[%s1547_s26 + $0x520] sm:$0xff] %v478_v36 }
  0xb6   : > { %481 = vst [vmem:[%s1547_s26 + $0x528] sm:$0xff] %v480_v37 }
  0xb7   : > { %483 = vst [vmem:[%s1547_s26 + $0x530] sm:$0xff] %v482_v38 }
  0xb8   : > { %485 = vst [vmem:[%s1547_s26 + $0x538] sm:$0xff] %v484_v39 }
  0xb9   : > { %487 = vst [vmem:[%s1547_s26 + $0x540] sm:$0xff] %v486_v40 }
  0xba   : > { %489 = vst [vmem:[%s1547_s26 + $0x548] sm:$0xff] %v488_v41 }
  0xbb   : > { %491 = vst [vmem:[%s1547_s26 + $0x550] sm:$0xff] %v490_v42 }
  0xbc   : > { %493 = vst [vmem:[%s1547_s26 + $0x558] sm:$0xff] %v492_v43 }
  0xbd   : > { %495 = vst [vmem:[%s1547_s26 + $0x560] sm:$0xff] %v494_v44 }
  0xbe   : > { %497 = vst [vmem:[%s1547_s26 + $0x568] sm:$0xff] %v496_v45 }
  0xbf   : > { %499 = vst [vmem:[%s1547_s26 + $0x570] sm:$0xff] %v498_v46 }
  0xc0   : > { %501 = vst [vmem:[%s1547_s26 + $0x578] sm:$0xff] %v500_v47 }
  0xc1   : > { %503 = vst [vmem:[%s1547_s26 + $0x580] sm:$0xff] %v502_v48 }
  0xc2   : > { %505 = vst [vmem:[%s1547_s26 + $0x588] sm:$0xff] %v504_v49 }
  0xc3   : > { %507 = vst [vmem:[%s1547_s26 + $0x590] sm:$0xff] %v506_v50 }
  0xc4   : > { %509 = vst [vmem:[%s1547_s26 + $0x598] sm:$0xff] %v508_v51 }
  0xc5   : > { %511 = vst [vmem:[%s1547_s26 + $0x5a0] sm:$0xff] %v510_v52 }
  0xc6   : > { %513 = vst [vmem:[%s1547_s26 + $0x5a8] sm:$0xff] %v512_v53 }
  0xc7   : > { %515 = vst [vmem:[%s1547_s26 + $0x5b0] sm:$0xff] %v514_v54 }
  0xc8   : > { %517 = vst [vmem:[%s1547_s26 + $0x5b8] sm:$0xff] %v516_v55 }
  0xc9   : > { %519 = vst [vmem:[%s1547_s26 + $0x5c0] sm:$0xff] %v518_v56 }
  0xca   : > { %521 = vst [vmem:[%s1547_s26 + $0x5c8] sm:$0xff] %v520_v57 }
  0xcb   : > { %523 = vst [vmem:[%s1547_s26 + $0x5d0] sm:$0xff] %v522_v58 }
  0xcc   : > { %525 = vst [vmem:[%s1547_s26 + $0x5d8] sm:$0xff] %v524_v59 }
  0xcd   : > { %527 = vst [vmem:[%s1547_s26 + $0x5e0] sm:$0xff] %v526_v60 }
  0xce PF: > { %p1403_p5 = scmp.ge.s32.totalorder %s1485_s14, 1  ;;  %p532_p6 = scmp.lt.s32.totalorder %s1485_s14, 4 }
  0xd0   : > { %p533_p7 = pnand %p1403_p5, %p532_p6 }
  0xd1   : > { %s539_s27 = sand.u32 (!%p533_p7), 1, %s1477_s12   ;;  %s563_s7 = smul.u32 (!%p533_p7), 27, %s1398_s15 }
  0xd2   : > { %536 = sbr.rel (%p533_p7) target bundleno = 459 (0x1cb), region = 51 }
  0xd3   : > { %s1436_s28 = smul.u32 (!%p533_p7), 1512, %s539_s27  ;;  %p564_p8 = scmp.lt.s32.totalorder (!%p533_p7), %s563_s7, 80 }
  0xd5   : > { %s1927_s29 = scalar_lea.vmem (!%p533_p7), [#allocation2], %s1436_s28 }
  0xd7   : > { %v734_v61 = vld [vmem:[%s1927_s29 + $0x520] sm:$0xff]  ;;  %v707_v62 = vld [vmem:[%s1927_s29 + $0x448] sm:$0xff]  ;;  %v732_v63 = vld [vmem:[%s1927_s29 + $0x510] sm:$0xff]  ;;  %vm765_vm0 = vcmask 457728   ;;  %s2261_s7 = smov (!%p564_p8, %s563_s7), 80 }
  0xd8   : > { %818 = vmatpush.msra.mxu2 %v734_v61  ;;  %v733_v0 = vld [vmem:[%s1927_s29 + $0x518] sm:$0xff]  ;;  %v680_v1 = vld [vmem:[%s1927_s29 + $0x370] sm:$0xff]  ;;  %778 = vmatpush.msra.mxu0 %v732_v63  ;;  %v706_v3 = vld [vmem:[%s1927_s29 + $0x440] sm:$0xff]  ;;  %s1404_s8 = sshll.u32 %s2261_s7, 3 }
  0xd9   : > { %798 = vmatpush.msra.mxu1 %v733_v0  ;;  %v705_v2 = vld [vmem:[%s1927_s29 + $0x438] sm:$0xff]  ;;  %v678_v4 = vld [vmem:[%s1927_s29 + $0x360] sm:$0xff]  ;;  %v679_v5 = vld [vmem:[%s1927_s29 + $0x368] sm:$0xff]  ;;  %s2187_s11 = scalar_lea.vmem %s2256_s3, %s1404_s8 }
  0xda   : > { %819 = vmatpush.msra.mxu2 %v707_v62  ;;  %v653_v6 = vld [vmem:[%s1927_s29 + $0x298] sm:$0xff]  ;;  %779 = vmatpush.msra.mxu0 %v705_v2  ;;  %v651_v7 = vld [vmem:[%s1927_s29 + $0x288] sm:$0xff]  ;;  %v652_v8 = vld [vmem:[%s1927_s29 + $0x290] sm:$0xff] }
  0xdb   : > { %799 = vmatpush.msra.mxu1 %v706_v3  ;;  %v735_v9 = vld [vmem:[%s1927_s29 + $0x528] sm:$0xff]  ;;  %v626_v10 = vld [vmem:[%s1927_s29 + $0x1c0] sm:$0xff]  ;;  %v708_v11 = vld [vmem:[%s1927_s29 + $0x450] sm:$0xff] }
  0xdc   : > { %820 = vmatpush.msra.mxu2 %v680_v1  ;;  %780 = vmatpush.msra.mxu0 %v678_v4  ;;  %v624_v12 = vld [vmem:[%s1927_s29 + $0x1b0] sm:$0xff]  ;;  %v625_v13 = vld [vmem:[%s1927_s29 + $0x1b8] sm:$0xff]  ;;  %v599_v14 = vld [vmem:[%s1927_s29 + $0xe8] sm:$0xff] }
  0xdd   : > { %800 = vmatpush.msra.mxu1 %v679_v5  ;;  %838 = vmatpush.msra.mxu3 %v735_v9  ;;  %v681_v15 = vld [vmem:[%s1927_s29 + $0x378] sm:$0xff]  ;;  %v598_v17 = vld [vmem:[%s1927_s29 + $0xe0] sm:$0xff]  ;;  %v572_v18 = vld [vmem:[%s1927_s29 + $0x10] sm:$0xff] }
  0xde   : > { %821 = vmatpush.msra.mxu2 %v653_v6  ;;  %781 = vmatpush.msra.mxu0 %v651_v7  ;;  %v597_v16 = vld [vmem:[%s1927_s29 + $0xd8] sm:$0xff]  ;;  %v654_v19 = vld [vmem:[%s1927_s29 + $0x2a0] sm:$0xff]  ;;  %v571_v22 = vld [vmem:[%s1927_s29 + $0x8] sm:$0xff] }
  0xdf   : > { %801 = vmatpush.msra.mxu1 %v652_v8  ;;  %839 = vmatpush.msra.mxu3 %v708_v11  ;;  %v738_v20 = vld [vmem:[%s1927_s29 + $0x540] sm:$0xff]  ;;  %v736_v23 = vld [vmem:[%s1927_s29 + $0x530] sm:$0xff]  ;;  %v711_v24 = vld [vmem:[%s1927_s29 + $0x468] sm:$0xff] }
  0xe0   : > { %822 = vmatpush.msra.mxu2 %v626_v10  ;;  %782 = vmatpush.msra.mxu0 %v624_v12  ;;  %v570_v21 = vld [vmem:[%s1927_s29] sm:$0xff]  ;;  %v737_v25 = vld [vmem:[%s1927_s29 + $0x538] sm:$0xff]  ;;  %v627_v26 = vld [vmem:[%s1927_s29 + $0x1c8] sm:$0xff] }
  0xe1   : > { %802 = vmatpush.msra.mxu1 %v625_v13  ;;  %840 = vmatpush.msra.mxu3 %v681_v15  ;;  %v709_v27 = vld [vmem:[%s1927_s29 + $0x458] sm:$0xff]  ;;  %v684_v28 = vld [vmem:[%s1927_s29 + $0x390] sm:$0xff]  ;;  %v710_v29 = vld [vmem:[%s1927_s29 + $0x460] sm:$0xff]  ;;  %v1487_v15 = vmov 0  }
  0xe2   : > { %823 = vmatpush.msra.mxu2 %v599_v14  ;;  %783 = vmatpush.msra.mxu0 %v597_v16  ;;  %v600_v30 = vld [vmem:[%s1927_s29 + $0xf0] sm:$0xff]  ;;  %v682_v31 = vld [vmem:[%s1927_s29 + $0x380] sm:$0xff]  ;;  %v657_v32 = vld [vmem:[%s1927_s29 + $0x2b8] sm:$0xff] }
  0xe3   : > { %803 = vmatpush.msra.mxu1 %v598_v17  ;;  %841 = vmatpush.msra.mxu3 %v654_v19  ;;  %v683_v33 = vld [vmem:[%s1927_s29 + $0x388] sm:$0xff]  ;;  %v573_v34 = vld [vmem:[%s1927_s29 + $0x18] sm:$0xff]  ;;  %v630_v36 = vld [vmem:[%s1927_s29 + $0x1e0] sm:$0xff] }
  0xe4   : > { %824 = vmatpush.msra.mxu2 %v572_v18  ;;  %784 = vmatpush.msra.mxu0 %v570_v21  ;;  %v655_v35 = vld [vmem:[%s1927_s29 + $0x2a8] sm:$0xff]  ;;  %v656_v37 = vld [vmem:[%s1927_s29 + $0x2b0] sm:$0xff]  ;;  %v1973_v38 = vld [vmem:[%s2253_s0] sm:$0xff] }
  0xe5   : > { %804 = vmatpush.msra.mxu1 %v571_v22  ;;  %842 = vmatpush.msra.mxu3 %v627_v26  ;;  %v739_v39 = vld [vmem:[%s1927_s29 + $0x548] sm:$0xff]  ;;  %v628_v41 = vld [vmem:[%s1927_s29 + $0x1d0] sm:$0xff]  ;;  %v629_v42 = vld [vmem:[%s1927_s29 + $0x1d8] sm:$0xff] }
  0xe6   : > { %898 = vmatpush.msrb.mxu2 %v738_v20  ;;  %858 = vmatpush.msrb.mxu0 %v736_v23  ;;  %v603_v40 = vld [vmem:[%s1927_s29 + $0x108] sm:$0xff]  ;;  %v712_v43 = vld [vmem:[%s1927_s29 + $0x470] sm:$0xff]  ;;  %v601_v45 = vld [vmem:[%s1927_s29 + $0xf8] sm:$0xff] }
  0xe7   : > { %878 = vmatpush.msrb.mxu1 %v737_v25  ;;  %843 = vmatpush.msra.mxu3 %v600_v30  ;;  %v576_v44 = vld [vmem:[%s1927_s29 + $0x30] sm:$0xff]  ;;  %v742_v46 = vld [vmem:[%s1927_s29 + $0x560] sm:$0xff]  ;;  %v685_v48 = vld [vmem:[%s1927_s29 + $0x398] sm:$0xff] }
  0xe8   : > { %899 = vmatpush.msrb.mxu2 %v711_v24  ;;  %859 = vmatpush.msrb.mxu0 %v709_v27  ;;  %v602_v47 = vld [vmem:[%s1927_s29 + $0x100] sm:$0xff]  ;;  %v715_v50 = vld [vmem:[%s1927_s29 + $0x488] sm:$0xff]  ;;  %v688_v52 = vld [vmem:[%s1927_s29 + $0x3b0] sm:$0xff] }
  0xe9   : > { %879 = vmatpush.msrb.mxu1 %v710_v29  ;;  %844 = vmatpush.msra.mxu3 %v573_v34  ;;  %v574_v49 = vld [vmem:[%s1927_s29 + $0x20] sm:$0xff]  ;;  %v575_v51 = vld [vmem:[%s1927_s29 + $0x28] sm:$0xff]  ;;  %v740_v54 = vld [vmem:[%s1927_s29 + $0x550] sm:$0xff] }
  0xea   : > { %900 = vmatpush.msrb.mxu2 %v684_v28  ;;  %860 = vmatpush.msrb.mxu0 %v682_v31  ;;  %v658_v53 = vld [vmem:[%s1927_s29 + $0x2c0] sm:$0xff]  ;;  %v741_v55 = vld [vmem:[%s1927_s29 + $0x558] sm:$0xff]  ;;  %v631_v57 = vld [vmem:[%s1927_s29 + $0x1e8] sm:$0xff] }
  0xeb   : > { %880 = vmatpush.msrb.mxu1 %v683_v33  ;;  %1407 = vmatmul.msk.f32.vlgmr.msra.gmra.mxu2 %vm765_vm0, %v1973_v38  ;;  %v661_v56 = vld [vmem:[%s1927_s29 + $0x2d8] sm:$0xff]  ;;  %v714_v59 = vld [vmem:[%s1927_s29 + $0x480] sm:$0xff]  ;;  %v604_v61 = vld [vmem:[%s1927_s29 + $0x110] sm:$0xff] }
  0xec   : > { %901 = vmatpush.msrb.mxu2 %v657_v32  ;;  %861 = vmatpush.msrb.mxu0 %v655_v35  ;;  %v713_v58 = vld [vmem:[%s1927_s29 + $0x478] sm:$0xff]  ;;  %v634_v60 = vld [vmem:[%s1927_s29 + $0x200] sm:$0xff]  ;;  %v687_v63 = vld [vmem:[%s1927_s29 + $0x3a8] sm:$0xff] }
  0xed   : > { %881 = vmatpush.msrb.mxu1 %v656_v37  ;;  %918 = vmatpush.msrb.mxu3 %v739_v39  ;;  %v686_v62 = vld [vmem:[%s1927_s29 + $0x3a0] sm:$0xff]  ;;  %v607_v0 = vld [vmem:[%s1927_s29 + $0x128] sm:$0xff]  ;;  %v577_v1 = vld [vmem:[%s1927_s29 + $0x38] sm:$0xff] }
  0xee   : > { %902 = vmatpush.msrb.mxu2 %v630_v36  ;;  %862 = vmatpush.msrb.mxu0 %v628_v41  ;;  %v659_v2 = vld [vmem:[%s1927_s29 + $0x2c8] sm:$0xff]  ;;  %v660_v3 = vld [vmem:[%s1927_s29 + $0x2d0] sm:$0xff]  ;;  %v746_v6 = vld [vmem:[%s1927_s29 + $0x580] sm:$0xff] }
  0xef   : > { %882 = vmatpush.msrb.mxu1 %v629_v42  ;;  %919 = vmatpush.msrb.mxu3 %v712_v43  ;;  %v580_v4 = vld [vmem:[%s1927_s29 + $0x50] sm:$0xff]  ;;  %v743_v5 = vld [vmem:[%s1927_s29 + $0x568] sm:$0xff]  ;;  %v633_v8 = vld [vmem:[%s1927_s29 + $0x1f8] sm:$0xff] }
  0xf0   : > { %903 = vmatpush.msrb.mxu2 %v603_v40  ;;  %863 = vmatpush.msrb.mxu0 %v601_v45  ;;  %v632_v7 = vld [vmem:[%s1927_s29 + $0x1f0] sm:$0xff]  ;;  %v719_v10 = vld [vmem:[%s1927_s29 + $0x4a8] sm:$0xff]  ;;  %v605_v11 = vld [vmem:[%s1927_s29 + $0x118] sm:$0xff] }
  0xf1   : > { %883 = vmatpush.msrb.mxu1 %v602_v47  ;;  %920 = vmatpush.msrb.mxu3 %v685_v48  ;;  %v716_v9 = vld [vmem:[%s1927_s29 + $0x490] sm:$0xff]  ;;  %v606_v12 = vld [vmem:[%s1927_s29 + $0x120] sm:$0xff]  ;;  %v689_v14 = vld [vmem:[%s1927_s29 + $0x3b8] sm:$0xff] }
  0xf2   : > { %904 = vmatpush.msrb.mxu2 %v576_v44  ;;  %864 = vmatpush.msrb.mxu0 %v574_v49  ;;  %v759_v13 = vld [vmem:[%s2255_s2] sm:$0xff]  ;;  %v692_v16 = vld [vmem:[%s1927_s29 + $0x3d0] sm:$0xff]  ;;  %v579_v18 = vld [vmem:[%s1927_s29 + $0x48] sm:$0xff] }
  0xf3   : > { %884 = vmatpush.msrb.mxu1 %v575_v51  ;;  %1405 = vmatmul.msk.f32.vlgmr.msra.gmra.mxu0 %vm765_vm0, %v1973_v38  ;;  %v578_v17 = vld [vmem:[%s1927_s29 + $0x40] sm:$0xff]  ;;  %v744_v20 = vld [vmem:[%s1927_s29 + $0x570] sm:$0xff]  ;;  %v745_v21 = vld [vmem:[%s1927_s29 + $0x578] sm:$0xff] }
  0xf4   : > { %978 = vmatpush.msra.mxu2 %v742_v46  ;;  %1406 = vmatmul.msk.f32.vlgmr.msra.gmra.mxu1 %vm765_vm0, %v1973_v38  ;;  %v662_v19 = vld [vmem:[%s1927_s29 + $0x2e0] sm:$0xff]  ;;  %v665_v22 = vld [vmem:[%s1927_s29 + $0x2f8] sm:$0xff]  ;;  %v635_v23 = vld [vmem:[%s1927_s29 + $0x208] sm:$0xff] }
  0xf5   : > { %921 = vmatpush.msrb.mxu3 %v658_v53  ;;  %938 = vmatpush.msra.mxu0 %v740_v54  ;;  %v717_v24 = vld [vmem:[%s1927_s29 + $0x498] sm:$0xff]  ;;  %v718_v25 = vld [vmem:[%s1927_s29 + $0x4a0] sm:$0xff]  ;;  %v608_v27 = vld [vmem:[%s1927_s29 + $0x130] sm:$0xff] }
  0xf6   : > { %979 = vmatpush.msra.mxu2 %v715_v50  ;;  %958 = vmatpush.msra.mxu1 %v741_v55  ;;  %v638_v26 = vld [vmem:[%s1927_s29 + $0x220] sm:$0xff]  ;;  %v691_v29 = vld [vmem:[%s1927_s29 + $0x3c8] sm:$0xff]  ;;  %v581_v31 = vld [vmem:[%s1927_s29 + $0x58] sm:$0xff] }
  0xf7   : > { %922 = vmatpush.msrb.mxu3 %v631_v57  ;;  %939 = vmatpush.msra.mxu0 %v713_v58  ;;  %v690_v28 = vld [vmem:[%s1927_s29 + $0x3c0] sm:$0xff]  ;;  %v611_v30 = vld [vmem:[%s1927_s29 + $0x148] sm:$0xff]  ;;  %v664_v33 = vld [vmem:[%s1927_s29 + $0x2f0] sm:$0xff] }
  0xf8   : > { %980 = vmatpush.msra.mxu2 %v688_v52  ;;  %959 = vmatpush.msra.mxu1 %v714_v59  ;;  %v663_v32 = vld [vmem:[%s1927_s29 + $0x2e8] sm:$0xff]  ;;  %v584_v34 = vld [vmem:[%s1927_s29 + $0x70] sm:$0xff]  ;;  %v750_v36 = vld [vmem:[%s1927_s29 + $0x5a0] sm:$0xff] }
  0xf9   : > { %923 = vmatpush.msrb.mxu3 %v604_v61  ;;  %940 = vmatpush.msra.mxu0 %v686_v62  ;;  %v747_v35 = vld [vmem:[%s1927_s29 + $0x588] sm:$0xff]  ;;  %v636_v37 = vld [vmem:[%s1927_s29 + $0x210] sm:$0xff]  ;;  %v637_v39 = vld [vmem:[%s1927_s29 + $0x218] sm:$0xff] }
  0xfa   : > { %981 = vmatpush.msra.mxu2 %v661_v56  ;;  %960 = vmatpush.msra.mxu1 %v687_v63  ;;  %v720_v40 = vld [vmem:[%s1927_s29 + $0x4b0] sm:$0xff]  ;;  %v723_v41 = vld [vmem:[%s1927_s29 + $0x4c8] sm:$0xff]  ;;  %v609_v42 = vld [vmem:[%s1927_s29 + $0x138] sm:$0xff] }
  0xfb   : > { %924 = vmatpush.msrb.mxu3 %v577_v1  ;;  %941 = vmatpush.msra.mxu0 %v659_v2  ;;  %v610_v43 = vld [vmem:[%s1927_s29 + $0x140] sm:$0xff]  ;;  %v693_v44 = vld [vmem:[%s1927_s29 + $0x3d8] sm:$0xff]  ;;  %v696_v45 = vld [vmem:[%s1927_s29 + $0x3f0] sm:$0xff] }
  0xfc   : > { %982 = vmatpush.msra.mxu2 %v634_v60  ;;  %961 = vmatpush.msra.mxu1 %v660_v3  ;;  %v582_v46 = vld [vmem:[%s1927_s29 + $0x60] sm:$0xff]  ;;  %v583_v47 = vld [vmem:[%s1927_s29 + $0x68] sm:$0xff]  ;;  %v748_v49 = vld [vmem:[%s1927_s29 + $0x590] sm:$0xff] }
  0xfd   : > { %1408 = vmatmul.msk.f32.vlgmr.msra.gmra.mxu3 %vm765_vm0, %v1973_v38  ;;  %1411 = vmatmul.msk.f32.vlgmr.msrb.gmra.mxu2 %vm765_vm0, %v1973_v38  ;;  %v666_v48 = vld [vmem:[%s1927_s29 + $0x300] sm:$0xff]  ;;  %v749_v50 = vld [vmem:[%s1927_s29 + $0x598] sm:$0xff]  ;;  %v639_v52 = vld [vmem:[%s1927_s29 + $0x228] sm:$0xff] }
  0xfe   : > { %983 = vmatpush.msra.mxu2 %v607_v0  ;;  %998 = vmatpush.msra.mxu3 %v743_v5  ;;  %v669_v51 = vld [vmem:[%s1927_s29 + $0x318] sm:$0xff]  ;;  %v722_v54 = vld [vmem:[%s1927_s29 + $0x4c0] sm:$0xff]  ;;  %v612_v56 = vld [vmem:[%s1927_s29 + $0x150] sm:$0xff] }
  0xff   : > { %942 = vmatpush.msra.mxu0 %v632_v7  ;;  %962 = vmatpush.msra.mxu1 %v633_v8  ;;  %v721_v53 = vld [vmem:[%s1927_s29 + $0x4b8] sm:$0xff]  ;;  %v642_v55 = vld [vmem:[%s1927_s29 + $0x240] sm:$0xff]  ;;  %v695_v58 = vld [vmem:[%s1927_s29 + $0x3e8] sm:$0xff] }
 0x100   : > { %984 = vmatpush.msra.mxu2 %v580_v4  ;;  %999 = vmatpush.msra.mxu3 %v716_v9  ;;  %v694_v57 = vld [vmem:[%s1927_s29 + $0x3e0] sm:$0xff]  ;;  %v615_v59 = vld [vmem:[%s1927_s29 + $0x168] sm:$0xff]  ;;  %v585_v60 = vld [vmem:[%s1927_s29 + $0x78] sm:$0xff] }
 0x101   : > { %1462 = vset.pattern.permute.xlu0 %v1487_v15  ;;  %943 = vmatpush.msra.mxu0 %v605_v11  ;;  %v667_v61 = vld [vmem:[%s1927_s29 + $0x308] sm:$0xff]  ;;  %v668_v62 = vld [vmem:[%s1927_s29 + $0x310] sm:$0xff]  ;;  %v754_v1 = vld [vmem:[%s1927_s29 + $0x5c0] sm:$0xff] }
 0x102   : > { %1058 = vmatpush.msrb.mxu2 %v746_v6  ;;  %963 = vmatpush.msra.mxu1 %v606_v12  ;;  %v588_v63 = vld [vmem:[%s1927_s29 + $0x90] sm:$0xff]  ;;  %v751_v0 = vld [vmem:[%s1927_s29 + $0x5a8] sm:$0xff]  ;;  %v641_v3 = vld [vmem:[%s1927_s29 + $0x238] sm:$0xff] }
 0x103   : > { %762 = vperm.xlu0 %1462, %v759_v13   ;;  %1000 = vmatpush.msra.mxu3 %v689_v14  ;;  %v640_v2 = vld [vmem:[%s1927_s29 + $0x230] sm:$0xff]  ;;  %v727_v5 = vld [vmem:[%s1927_s29 + $0x4e8] sm:$0xff]  ;;  %v613_v6 = vld [vmem:[%s1927_s29 + $0x158] sm:$0xff] }
 0x104   : > { %1059 = vmatpush.msrb.mxu2 %v719_v10  ;;  %944 = vmatpush.msra.mxu0 %v578_v17  ;;  %v724_v4 = vld [vmem:[%s1927_s29 + $0x4d0] sm:$0xff]  ;;  %v614_v7 = vld [vmem:[%s1927_s29 + $0x160] sm:$0xff]  ;;  %v697_v8 = vld [vmem:[%s1927_s29 + $0x3f8] sm:$0xff] }
 0x105   : > { %964 = vmatpush.msra.mxu1 %v579_v18  ;;  %1409 = vmatmul.msk.f32.vlgmr.msrb.gmra.mxu0 %vm765_vm0, %v1973_v38  ;;  %v700_v9 = vld [vmem:[%s1927_s29 + $0x410] sm:$0xff]  ;;  %v586_v10 = vld [vmem:[%s1927_s29 + $0x80] sm:$0xff]  ;;  %v587_v11 = vld [vmem:[%s1927_s29 + $0x88] sm:$0xff] }
 0x106   : > { %1060 = vmatpush.msrb.mxu2 %v692_v16  ;;  %1410 = vmatmul.msk.f32.vlgmr.msrb.gmra.mxu1 %vm765_vm0, %v1973_v38  ;;  %v670_v12 = vld [vmem:[%s1927_s29 + $0x320] sm:$0xff]  ;;  %v752_v13 = vld [vmem:[%s1927_s29 + $0x5b0] sm:$0xff]  ;;  %v753_v14 = vld [vmem:[%s1927_s29 + $0x5b8] sm:$0xff] }
 0x107   : > { %1001 = vmatpush.msra.mxu3 %v662_v19  ;;  %1018 = vmatpush.msrb.mxu0 %v744_v20  ;;  %v673_v15 = vld [vmem:[%s1927_s29 + $0x338] sm:$0xff]  ;;  %v643_v16 = vld [vmem:[%s1927_s29 + $0x248] sm:$0xff]  ;;  %v726_v18 = vld [vmem:[%s1927_s29 + $0x4e0] sm:$0xff] }
 0x108   : > { %1038 = vmatpush.msrb.mxu1 %v745_v21  ;;  %1061 = vmatpush.msrb.mxu2 %v665_v22  ;;  %v725_v17 = vld [vmem:[%s1927_s29 + $0x4d8] sm:$0xff]  ;;  %v646_v19 = vld [vmem:[%s1927_s29 + $0x260] sm:$0xff]  ;;  %v616_v20 = vld [vmem:[%s1927_s29 + $0x170] sm:$0xff] }
 0x109   : > { %1002 = vmatpush.msra.mxu3 %v635_v23  ;;  %1019 = vmatpush.msrb.mxu0 %v717_v24  ;;  %v698_v21 = vld [vmem:[%s1927_s29 + $0x400] sm:$0xff]  ;;  %v699_v22 = vld [vmem:[%s1927_s29 + $0x408] sm:$0xff]  ;;  %v589_v24 = vld [vmem:[%s1927_s29 + $0x98] sm:$0xff] }
 0x10a   : > { %1039 = vmatpush.msrb.mxu1 %v718_v25  ;;  %1062 = vmatpush.msrb.mxu2 %v638_v26  ;;  %v619_v23 = vld [vmem:[%s1927_s29 + $0x188] sm:$0xff]  ;;  %v672_v26 = vld [vmem:[%s1927_s29 + $0x330] sm:$0xff] }
 0x10b   : > { %1003 = vmatpush.msra.mxu3 %v608_v27  ;;  %1020 = vmatpush.msrb.mxu0 %v690_v28  ;;  %v671_v25 = vld [vmem:[%s1927_s29 + $0x328] sm:$0xff]  ;;  %v592_v27 = vld [vmem:[%s1927_s29 + $0xb0] sm:$0xff] }
 0x10c   : > { %1040 = vmatpush.msrb.mxu1 %v691_v29  ;;  %1063 = vmatpush.msrb.mxu2 %v611_v30  ;;  %v755_v28 = vld [vmem:[%s1927_s29 + $0x5c8] sm:$0xff]  ;;  %v758_v29 = vld [vmem:[%s1927_s29 + $0x5e0] sm:$0xff]  ;;  %v644_v30 = vld [vmem:[%s1927_s29 + $0x250] sm:$0xff] }
 0x10d   : > { %1004 = vmatpush.msra.mxu3 %v581_v31  ;;  %1021 = vmatpush.msrb.mxu0 %v663_v32  ;;  %v645_v31 = vld [vmem:[%s1927_s29 + $0x258] sm:$0xff]  ;;  %v728_v32 = vld [vmem:[%s1927_s29 + $0x4f0] sm:$0xff] }
 0x10e   : > { %1041 = vmatpush.msrb.mxu1 %v664_v33  ;;  %1064 = vmatpush.msrb.mxu2 %v584_v34  ;;  %v731_v33 = vld [vmem:[%s1927_s29 + $0x508] sm:$0xff]  ;;  %v617_v34 = vld [vmem:[%s1927_s29 + $0x178] sm:$0xff] }
 0x10f   : > { %1412 = vmatmul.msk.f32.vlgmr.msrb.gmra.mxu3 %vm765_vm0, %v1973_v38  ;;  %1415 = vmatmul.msk.f32.vlgmr.msra.gmra.mxu2 %vm765_vm0, %v1973_v38 }
 0x110   : > { %1078 = vmatpush.msrb.mxu3 %v747_v35  ;;  %1138 = vmatpush.msra.mxu2 %v750_v36  ;;  %v618_v35 = vld [vmem:[%s1927_s29 + $0x180] sm:$0xff]  ;;  %v701_v36 = vld [vmem:[%s1927_s29 + $0x418] sm:$0xff] }
 0x111   : > { %1022 = vmatpush.msrb.mxu0 %v636_v37  ;;  %1042 = vmatpush.msrb.mxu1 %v637_v39  ;;  %v704_v37 = vld [vmem:[%s1927_s29 + $0x430] sm:$0xff]  ;;  %v590_v39 = vld [vmem:[%s1927_s29 + $0xa0] sm:$0xff] }
 0x112   : > { %1079 = vmatpush.msrb.mxu3 %v720_v40  ;;  %1139 = vmatpush.msra.mxu2 %v723_v41  ;;  %v591_v40 = vld [vmem:[%s1927_s29 + $0xa8] sm:$0xff]  ;;  %v674_v41 = vld [vmem:[%s1927_s29 + $0x340] sm:$0xff] }
 0x113   : > { %1023 = vmatpush.msrb.mxu0 %v609_v42  ;;  %1043 = vmatpush.msrb.mxu1 %v610_v43  ;;  %v756_v42 = vld [vmem:[%s1927_s29 + $0x5d0] sm:$0xff]  ;;  %v757_v43 = vld [vmem:[%s1927_s29 + $0x5d8] sm:$0xff] }
 0x114   : > { %1080 = vmatpush.msrb.mxu3 %v693_v44  ;;  %1140 = vmatpush.msra.mxu2 %v696_v45  ;;  %v677_v44 = vld [vmem:[%s1927_s29 + $0x358] sm:$0xff]  ;;  %v647_v45 = vld [vmem:[%s1927_s29 + $0x268] sm:$0xff] }
 0x115   : > { %1024 = vmatpush.msrb.mxu0 %v582_v46  ;;  %1044 = vmatpush.msrb.mxu1 %v583_v47  ;;  %v729_v46 = vld [vmem:[%s1927_s29 + $0x4f8] sm:$0xff]  ;;  %v730_v47 = vld [vmem:[%s1927_s29 + $0x500] sm:$0xff] }
 0x116   : > { %1413 = vmatmul.msk.f32.vlgmr.msra.gmra.mxu0 %vm765_vm0, %v1973_v38  ;;  %1414 = vmatmul.msk.f32.vlgmr.msra.gmra.mxu1 %vm765_vm0, %v1973_v38 }
 0x117   : > { %1081 = vmatpush.msrb.mxu3 %v666_v48  ;;  %1098 = vmatpush.msra.mxu0 %v748_v49  ;;  %v650_v48 = vld [vmem:[%s1927_s29 + $0x280] sm:$0xff]  ;;  %v620_v49 = vld [vmem:[%s1927_s29 + $0x190] sm:$0xff] }
 0x118   : > { %1118 = vmatpush.msra.mxu1 %v749_v50  ;;  %1141 = vmatpush.msra.mxu2 %v669_v51  ;;  %v702_v50 = vld [vmem:[%s1927_s29 + $0x420] sm:$0xff]  ;;  %v703_v51 = vld [vmem:[%s1927_s29 + $0x428] sm:$0xff] }
 0x119   : > { %1082 = vmatpush.msrb.mxu3 %v639_v52  ;;  %1099 = vmatpush.msra.mxu0 %v721_v53  ;;  %v623_v52 = vld [vmem:[%s1927_s29 + $0x1a8] sm:$0xff]  ;;  %v593_v53 = vld [vmem:[%s1927_s29 + $0xb8] sm:$0xff] }
 0x11a   : > { %1119 = vmatpush.msra.mxu1 %v722_v54  ;;  %1142 = vmatpush.msra.mxu2 %v642_v55  ;;  %v675_v54 = vld [vmem:[%s1927_s29 + $0x348] sm:$0xff]  ;;  %v676_v55 = vld [vmem:[%s1927_s29 + $0x350] sm:$0xff] }
 0x11b   : > { %1083 = vmatpush.msrb.mxu3 %v612_v56  ;;  %1100 = vmatpush.msra.mxu0 %v694_v57  ;;  %v596_v56 = vld [vmem:[%s1927_s29 + $0xd0] sm:$0xff] }
 0x11c   : > { %1120 = vmatpush.msra.mxu1 %v695_v58  ;;  %1143 = vmatpush.msra.mxu2 %v615_v59  ;;  %v648_v57 = vld [vmem:[%s1927_s29 + $0x270] sm:$0xff]  ;;  %v649_v58 = vld [vmem:[%s1927_s29 + $0x278] sm:$0xff] }
 0x11d   : > { %1084 = vmatpush.msrb.mxu3 %v585_v60  ;;  %1101 = vmatpush.msra.mxu0 %v667_v61  ;;  %v621_v59 = vld [vmem:[%s1927_s29 + $0x198] sm:$0xff]  ;;  %v622_v60 = vld [vmem:[%s1927_s29 + $0x1a0] sm:$0xff] }
 0x11e   : > { %1121 = vmatpush.msra.mxu1 %v668_v62  ;;  %1144 = vmatpush.msra.mxu2 %v588_v63  ;;  %v594_v61 = vld [vmem:[%s1927_s29 + $0xc0] sm:$0xff]  ;;  %v595_v62 = vld [vmem:[%s1927_s29 + $0xc8] sm:$0xff] }
 0x11f   : > { %1416 = vmatmul.msk.f32.vlgmr.msra.gmra.mxu3 %vm765_vm0, %v1973_v38  ;;  %1419 = vmatmul.msk.f32.vlgmr.msrb.gmra.mxu2 %vm765_vm0, %v1973_v38 }
 0x120   : > { %1158 = vmatpush.msra.mxu3 %v751_v0  ;;  %1218 = vmatpush.msrb.mxu2 %v754_v1 }
 0x121   : > { %1102 = vmatpush.msra.mxu0 %v640_v2  ;;  %1122 = vmatpush.msra.mxu1 %v641_v3 }
 0x122   : > { %1159 = vmatpush.msra.mxu3 %v724_v4  ;;  %1219 = vmatpush.msrb.mxu2 %v727_v5 }
 0x123   : > { %1103 = vmatpush.msra.mxu0 %v613_v6  ;;  %1123 = vmatpush.msra.mxu1 %v614_v7 }
 0x124   : > { %1160 = vmatpush.msra.mxu3 %v697_v8  ;;  %1220 = vmatpush.msrb.mxu2 %v700_v9 }
 0x125   : > { %1104 = vmatpush.msra.mxu0 %v586_v10  ;;  %1124 = vmatpush.msra.mxu1 %v587_v11 }
 0x126   : > { %1417 = vmatmul.msk.f32.vlgmr.msrb.gmra.mxu0 %vm765_vm0, %v1973_v38  ;;  %1418 = vmatmul.msk.f32.vlgmr.msrb.gmra.mxu1 %vm765_vm0, %v1973_v38 }
 0x127   : > { %1161 = vmatpush.msra.mxu3 %v670_v12  ;;  %1178 = vmatpush.msrb.mxu0 %v752_v13 }
 0x128   : > { %1198 = vmatpush.msrb.mxu1 %v753_v14  ;;  %1221 = vmatpush.msrb.mxu2 %v673_v15 }
 0x129   : > { %1162 = vmatpush.msra.mxu3 %v643_v16  ;;  %1179 = vmatpush.msrb.mxu0 %v725_v17 }
 0x12a   : > { %1199 = vmatpush.msrb.mxu1 %v726_v18  ;;  %1222 = vmatpush.msrb.mxu2 %v646_v19 }
 0x12b   : > { %1420 = vmatmul.msk.f32.vlgmr.msrb.gmra.mxu3 %vm765_vm0, %v1973_v38  ;;  %1423 = vmatmul.msk.f32.vlgmr.msra.gmra.mxu2 %vm765_vm0, %v1973_v38 }
 0x12c   : > { %1163 = vmatpush.msra.mxu3 %v616_v20  ;;  %1180 = vmatpush.msrb.mxu0 %v698_v21 }
 0x12d   : > { %1200 = vmatpush.msrb.mxu1 %v699_v22  ;;  %1223 = vmatpush.msrb.mxu2 %v619_v23 }
 0x12e   : > { %1164 = vmatpush.msra.mxu3 %v589_v24  ;;  %1181 = vmatpush.msrb.mxu0 %v671_v25 }
 0x12f   : > { %1201 = vmatpush.msrb.mxu1 %v672_v26  ;;  %1224 = vmatpush.msrb.mxu2 %v592_v27 }
 0x130   : > { %1238 = vmatpush.msrb.mxu3 %v755_v28  ;;  %1182 = vmatpush.msrb.mxu0 %v644_v30 }
 0x131   : > { %1298 = vmatpush.msra.mxu2 %v758_v29  ;;  %1202 = vmatpush.msrb.mxu1 %v645_v31 }
 0x132   : > { %1239 = vmatpush.msrb.mxu3 %v728_v32  ;;  %1421 = vmatmul.msk.f32.vlgmr.msra.gmra.mxu0 %vm765_vm0, %v1973_v38 }
 0x133   : > { %1299 = vmatpush.msra.mxu2 %v731_v33  ;;  %1422 = vmatmul.msk.f32.vlgmr.msra.gmra.mxu1 %vm765_vm0, %v1973_v38 }
 0x134   : > { %1183 = vmatpush.msrb.mxu0 %v617_v34  ;;  %1203 = vmatpush.msrb.mxu1 %v618_v35 }
 0x135   : > { %1240 = vmatpush.msrb.mxu3 %v701_v36  ;;  %1300 = vmatpush.msra.mxu2 %v704_v37 }
 0x136   : > { %1424 = vmatmul.msk.f32.vlgmr.msra.gmra.mxu3 %vm765_vm0, %v1973_v38  ;;  %1184 = vmatpush.msrb.mxu0 %v590_v39 }
 0x137   : > { %1204 = vmatpush.msrb.mxu1 %v591_v40  ;;  %1427 = vmatmul.msk.f32.vlgmr.msrb.gmra.mxu2 %vm765_vm0, %v1973_v38 }
 0x138   : > { %1241 = vmatpush.msrb.mxu3 %v674_v41  ;;  %1258 = vmatpush.msra.mxu0 %v756_v42 }
 0x139   : > { %1278 = vmatpush.msra.mxu1 %v757_v43  ;;  %1301 = vmatpush.msra.mxu2 %v677_v44 }
 0x13a   : > { %1242 = vmatpush.msrb.mxu3 %v647_v45  ;;  %1259 = vmatpush.msra.mxu0 %v729_v46 }
 0x13b   : > { %1279 = vmatpush.msra.mxu1 %v730_v47  ;;  %1302 = vmatpush.msra.mxu2 %v650_v48 }
 0x13c   : > { %1243 = vmatpush.msrb.mxu3 %v620_v49  ;;  %1260 = vmatpush.msra.mxu0 %v702_v50 }
 0x13d   : > { %1280 = vmatpush.msra.mxu1 %v703_v51  ;;  %1303 = vmatpush.msra.mxu2 %v623_v52 }
 0x13e   : > { %1425 = vmatmul.msk.f32.vlgmr.msrb.gmra.mxu0 %vm765_vm0, %v1973_v38  ;;  %1426 = vmatmul.msk.f32.vlgmr.msrb.gmra.mxu1 %vm765_vm0, %v1973_v38 }
 0x13f   : > { %1244 = vmatpush.msrb.mxu3 %v593_v53  ;;  %1261 = vmatpush.msra.mxu0 %v675_v54 }
 0x140   : > { %1281 = vmatpush.msra.mxu1 %v676_v55  ;;  %1304 = vmatpush.msra.mxu2 %v596_v56 }
 0x141   : > { %1428 = vmatmul.msk.f32.vlgmr.msrb.gmra.mxu3 %vm765_vm0, %v1973_v38  ;;  %1431 = vmatmul.msk.f32.vlgmr.msra.gmra.mxu2 %vm765_vm0, %v1973_v38 }
 0x142   : > { %1262 = vmatpush.msra.mxu0 %v648_v57  ;;  %1282 = vmatpush.msra.mxu1 %v649_v58 }
 0x144   : > { %1263 = vmatpush.msra.mxu0 %v621_v59  ;;  %1283 = vmatpush.msra.mxu1 %v622_v60 }
 0x146   : > { %1264 = vmatpush.msra.mxu0 %v594_v61  ;;  %1284 = vmatpush.msra.mxu1 %v595_v62 }
 0x147   : > { %1429 = vmatmul.msk.f32.vlgmr.msra.gmra.mxu0 %vm765_vm0, %v1973_v38  ;;  %1430 = vmatmul.msk.f32.vlgmr.msra.gmra.mxu1 %vm765_vm0, %v1973_v38 }
 0x16e   : > { %v826_v63 = vpop.f32.mrf.mxu2 }
 0x170   : > { %v786_v0 = vpop.f32.mrf.mxu0 }
 0x171   : > { %v806_v1 = vpop.f32.mrf.mxu1 }
 0x175   : > { %v2182_v2 = vpop.permute.xlu0 %762 }
 0x176   : > { %v787_v38 = vadd.f32 %v786_v0, %v2182_v2  ;;  %v807_v3 = vadd.f32 %v806_v1, %v2182_v2  ;;  %v827_v4 = vadd.f32 %v826_v63, %v2182_v2 }
 0x178   : > { %1309 = vst [vmem:[%s2187_s11] sm:$0xff] %v787_v38 }
 0x179   : > { %1310 = vst [vmem:[%s2187_s11 + $0x8] sm:$0xff] %v807_v3 }
 0x17a   : > { %1311 = vst [vmem:[%s2187_s11 + $0x10] sm:$0xff] %v827_v4 }
 0x180   : > { %v846_v5 = vpop.f32.mrf.mxu3  ;;  %v906_v7 = vpop.f32.mrf.mxu2 }
 0x181   : > { %v847_v6 = vadd.f32 %v846_v5, %v2182_v2  ;;  %v907_v9 = vadd.f32 %v906_v7, %v2182_v2 }
 0x182   : > { %v866_v8 = vpop.f32.mrf.mxu0 }
 0x183   : > { %1312 = vst [vmem:[%s2187_s11 + $0x18] sm:$0xff] %v847_v6  ;;  %v867_v10 = vadd.f32 %v866_v8, %v2182_v2  ;;  %v886_v11 = vpop.f32.mrf.mxu1 }
 0x184   : > { %v887_v12 = vadd.f32 %v886_v11, %v2182_v2  ;;  %1315 = vst [vmem:[%s2187_s11 + $0x30] sm:$0xff] %v907_v9 }
 0x185   : > { %1313 = vst [vmem:[%s2187_s11 + $0x20] sm:$0xff] %v867_v10 }
 0x186   : > { %1314 = vst [vmem:[%s2187_s11 + $0x28] sm:$0xff] %v887_v12 }
 0x192   : > { %v926_v13 = vpop.f32.mrf.mxu3  ;;  %v986_v16 = vpop.f32.mrf.mxu2 }
 0x193   : > { %v927_v14 = vadd.f32 %v926_v13, %v2182_v2  ;;  %v946_v15 = vpop.f32.mrf.mxu0  ;;  %v966_v18 = vpop.f32.mrf.mxu1  ;;  %v987_v19 = vadd.f32 %v986_v16, %v2182_v2 }
 0x194   : > { %v947_v17 = vadd.f32 %v946_v15, %v2182_v2  ;;  %v967_v20 = vadd.f32 %v966_v18, %v2182_v2 }
 0x195   : > { %1316 = vst [vmem:[%s2187_s11 + $0x38] sm:$0xff] %v927_v14 }
 0x196   : > { %1317 = vst [vmem:[%s2187_s11 + $0x40] sm:$0xff] %v947_v17 }
 0x197   : > { %1318 = vst [vmem:[%s2187_s11 + $0x48] sm:$0xff] %v967_v20 }
 0x198   : > { %1319 = vst [vmem:[%s2187_s11 + $0x50] sm:$0xff] %v987_v19 }
 0x1a2   : > { %v1006_v21 = vpop.f32.mrf.mxu3  ;;  %v1066_v24 = vpop.f32.mrf.mxu2 }
 0x1a3   : > { %v1007_v22 = vadd.f32 %v1006_v21, %v2182_v2  ;;  %v1026_v23 = vpop.f32.mrf.mxu0  ;;  %v1046_v26 = vpop.f32.mrf.mxu1  ;;  %v1067_v27 = vadd.f32 %v1066_v24, %v2182_v2 }
 0x1a4   : > { %v1027_v25 = vadd.f32 %v1026_v23, %v2182_v2  ;;  %v1047_v28 = vadd.f32 %v1046_v26, %v2182_v2 }
 0x1a5   : > { %1320 = vst [vmem:[%s2187_s11 + $0x58] sm:$0xff] %v1007_v22 }
 0x1a6   : > { %1321 = vst [vmem:[%s2187_s11 + $0x60] sm:$0xff] %v1027_v25 }
 0x1a7   : > { %1322 = vst [vmem:[%s2187_s11 + $0x68] sm:$0xff] %v1047_v28 }
 0x1a8   : > { %1323 = vst [vmem:[%s2187_s11 + $0x70] sm:$0xff] %v1067_v27 }
 0x1ae   : > { %v1086_v29 = vpop.f32.mrf.mxu3  ;;  %v1146_v31 = vpop.f32.mrf.mxu2 }
 0x1af   : > { %v1087_v30 = vadd.f32 %v1086_v29, %v2182_v2  ;;  %v1106_v32 = vpop.f32.mrf.mxu0  ;;  %v1147_v33 = vadd.f32 %v1146_v31, %v2182_v2 }
 0x1b0   : > { %v1107_v34 = vadd.f32 %v1106_v32, %v2182_v2  ;;  %v1126_v35 = vpop.f32.mrf.mxu1 }
 0x1b1   : > { %1324 = vst [vmem:[%s2187_s11 + $0x78] sm:$0xff] %v1087_v30  ;;  %v1127_v36 = vadd.f32 %v1126_v35, %v2182_v2 }
 0x1b2   : > { %1327 = vst [vmem:[%s2187_s11 + $0x90] sm:$0xff] %v1147_v33 }
 0x1b3   : > { %1325 = vst [vmem:[%s2187_s11 + $0x80] sm:$0xff] %v1107_v34 }
 0x1b4   : > { %1326 = vst [vmem:[%s2187_s11 + $0x88] sm:$0xff] %v1127_v36 }
 0x1b9   : > { %v1166_v37 = vpop.f32.mrf.mxu3 }
 0x1ba   : > { %v1167_v39 = vadd.f32 %v1166_v37, %v2182_v2  ;;  %v1226_v41 = vpop.f32.mrf.mxu2 }
 0x1bb   : > { %v1186_v40 = vpop.f32.mrf.mxu0  ;;  %v1206_v43 = vpop.f32.mrf.mxu1  ;;  %v1227_v44 = vadd.f32 %v1226_v41, %v2182_v2 }
 0x1bc   : > { %1328 = vst [vmem:[%s2187_s11 + $0x98] sm:$0xff] %v1167_v39  ;;  %v1187_v42 = vadd.f32 %v1186_v40, %v2182_v2  ;;  %v1207_v45 = vadd.f32 %v1206_v43, %v2182_v2 }
 0x1bd   : > { %1331 = vst [vmem:[%s2187_s11 + $0xb0] sm:$0xff] %v1227_v44 }
 0x1be   : > { %1329 = vst [vmem:[%s2187_s11 + $0xa0] sm:$0xff] %v1187_v42 }
 0x1bf   : > { %1330 = vst [vmem:[%s2187_s11 + $0xa8] sm:$0xff] %v1207_v45 }
 0x1c4   : > { %v1246_v46 = vpop.f32.mrf.mxu3  ;;  %v1266_v47 = vpop.f32.mrf.mxu0 }
 0x1c5   : > { %v1247_v48 = vadd.f32 %v1246_v46, %v2182_v2  ;;  %v1267_v49 = vadd.f32 %v1266_v47, %v2182_v2  ;;  %v1286_v50 = vpop.f32.mrf.mxu1  ;;  %v1306_v51 = vpop.f32.mrf.mxu2 }
 0x1c6   : > { %v1287_v52 = vadd.f32 %v1286_v50, %v2182_v2  ;;  %v1307_v53 = vadd.f32 %v1306_v51, %v2182_v2 }
 0x1c7   : > { %1332 = vst [vmem:[%s2187_s11 + $0xb8] sm:$0xff] %v1247_v48 }
 0x1c8   : > { %1333 = vst [vmem:[%s2187_s11 + $0xc0] sm:$0xff] %v1267_v49 }
 0x1c9   : > { %1334 = vst [vmem:[%s2187_s11 + $0xc8] sm:$0xff] %v1287_v52 }
 0x1ca   : > { %1335 = vst [vmem:[%s2187_s11 + $0xd0] sm:$0xff] %v1307_v53 }
 0x1cb PF: > { %p10_p9 = scmp.ge.s32.totalorder %s1525_s16, 5   ;;  %s2257_s12 = smov %s1481_s13 }
 0x1cc   : > { %s2258_s13 = smov %s1534_s19  ;;  %s2259_s14 = smov %s1525_s16 }
 0x1cd   :  { %12 = sbr.rel (!%p10_p9) target bundleno = 2 (0x2), region = 90 }

// kernel: forward.4
= control target key start
LH: loop header
LB: loop body
LE: loop exit
PB: predicated region body
PF: predicated region fallthrough
CT: control target
= control target key end

     0   :  { %vm827_vm0 = vcmask 146432   ;;  %s2056_s1 = inlined_call_operand.vmem [shape: f32[128,2450], index: 1, kind: input, shape index: {}]   ;;  %s2057_s0 = inlined_call_operand.vmem [shape: f32[16,128], index: 0, kind: input, shape index: {}]   ;;  %s2058_s2 = inlined_call_operand.vmem [shape: f32[16,1], index: 2, kind: input, shape index: {}]   ;;  %s2059_s3 = inlined_call_operand.vmem [shape: f32[16,2450], index: 3, kind: output, shape index: {}]  }
   0x1   :  { %v316_v0 = vld [vmem:[%s2056_s1 + $0x960] sm:$0xff]  ;;  %v317_v1 = vld [vmem:[%s2056_s1 + $0x968] sm:$0xff]  ;;  %v318_v2 = vld [vmem:[%s2056_s1 + $0x970] sm:$0xff] }
   0x2   :  { %348 = vmatpush.msra.mxu0 %v316_v0  ;;  %371 = vmatpush.msra.mxu1 %v317_v1  ;;  %v319_v3 = vld [vmem:[%s2056_s1 + $0x978] sm:$0xff]  ;;  %v296_v4 = vld [vmem:[%s2056_s1 + $0x8c0] sm:$0xff]  ;;  %v297_v5 = vld [vmem:[%s2056_s1 + $0x8c8] sm:$0xff] }
   0x3   :  { %394 = vmatpush.msra.mxu2 %v318_v2  ;;  %417 = vmatpush.msra.mxu3 %v319_v3  ;;  %v298_v6 = vld [vmem:[%s2056_s1 + $0x8d0] sm:$0xff]  ;;  %v299_v7 = vld [vmem:[%s2056_s1 + $0x8d8] sm:$0xff]  ;;  %v276_v8 = vld [vmem:[%s2056_s1 + $0x820] sm:$0xff] }
   0x4   :  { %349 = vmatpush.msra.mxu0 %v296_v4  ;;  %372 = vmatpush.msra.mxu1 %v297_v5  ;;  %v277_v9 = vld [vmem:[%s2056_s1 + $0x828] sm:$0xff]  ;;  %v278_v10 = vld [vmem:[%s2056_s1 + $0x830] sm:$0xff]  ;;  %v279_v11 = vld [vmem:[%s2056_s1 + $0x838] sm:$0xff] }
   0x5   :  { %395 = vmatpush.msra.mxu2 %v298_v6  ;;  %418 = vmatpush.msra.mxu3 %v299_v7  ;;  %v256_v12 = vld [vmem:[%s2056_s1 + $0x780] sm:$0xff]  ;;  %v257_v13 = vld [vmem:[%s2056_s1 + $0x788] sm:$0xff]  ;;  %v258_v14 = vld [vmem:[%s2056_s1 + $0x790] sm:$0xff] }
   0x6   :  { %350 = vmatpush.msra.mxu0 %v276_v8  ;;  %373 = vmatpush.msra.mxu1 %v277_v9  ;;  %v259_v15 = vld [vmem:[%s2056_s1 + $0x798] sm:$0xff]  ;;  %v236_v16 = vld [vmem:[%s2056_s1 + $0x6e0] sm:$0xff]  ;;  %v237_v17 = vld [vmem:[%s2056_s1 + $0x6e8] sm:$0xff] }
   0x7   :  { %396 = vmatpush.msra.mxu2 %v278_v10  ;;  %419 = vmatpush.msra.mxu3 %v279_v11  ;;  %v238_v18 = vld [vmem:[%s2056_s1 + $0x6f0] sm:$0xff]  ;;  %v239_v19 = vld [vmem:[%s2056_s1 + $0x6f8] sm:$0xff]  ;;  %v216_v20 = vld [vmem:[%s2056_s1 + $0x640] sm:$0xff] }
   0x8   :  { %351 = vmatpush.msra.mxu0 %v256_v12  ;;  %374 = vmatpush.msra.mxu1 %v257_v13  ;;  %v217_v21 = vld [vmem:[%s2056_s1 + $0x648] sm:$0xff]  ;;  %v218_v22 = vld [vmem:[%s2056_s1 + $0x650] sm:$0xff]  ;;  %v219_v23 = vld [vmem:[%s2056_s1 + $0x658] sm:$0xff] }
   0x9   :  { %397 = vmatpush.msra.mxu2 %v258_v14  ;;  %420 = vmatpush.msra.mxu3 %v259_v15  ;;  %v196_v24 = vld [vmem:[%s2056_s1 + $0x5a0] sm:$0xff]  ;;  %v197_v25 = vld [vmem:[%s2056_s1 + $0x5a8] sm:$0xff]  ;;  %v198_v26 = vld [vmem:[%s2056_s1 + $0x5b0] sm:$0xff] }
   0xa   :  { %352 = vmatpush.msra.mxu0 %v236_v16  ;;  %375 = vmatpush.msra.mxu1 %v237_v17  ;;  %v199_v27 = vld [vmem:[%s2056_s1 + $0x5b8] sm:$0xff]  ;;  %v176_v28 = vld [vmem:[%s2056_s1 + $0x500] sm:$0xff]  ;;  %v177_v29 = vld [vmem:[%s2056_s1 + $0x508] sm:$0xff] }
   0xb   :  { %398 = vmatpush.msra.mxu2 %v238_v18  ;;  %421 = vmatpush.msra.mxu3 %v239_v19  ;;  %v178_v30 = vld [vmem:[%s2056_s1 + $0x510] sm:$0xff]  ;;  %v179_v31 = vld [vmem:[%s2056_s1 + $0x518] sm:$0xff]  ;;  %v156_v32 = vld [vmem:[%s2056_s1 + $0x460] sm:$0xff] }
   0xc   :  { %353 = vmatpush.msra.mxu0 %v216_v20  ;;  %376 = vmatpush.msra.mxu1 %v217_v21  ;;  %v157_v33 = vld [vmem:[%s2056_s1 + $0x468] sm:$0xff]  ;;  %v158_v34 = vld [vmem:[%s2056_s1 + $0x470] sm:$0xff]  ;;  %v159_v35 = vld [vmem:[%s2056_s1 + $0x478] sm:$0xff] }
   0xd   :  { %399 = vmatpush.msra.mxu2 %v218_v22  ;;  %422 = vmatpush.msra.mxu3 %v219_v23  ;;  %v136_v36 = vld [vmem:[%s2056_s1 + $0x3c0] sm:$0xff]  ;;  %v137_v37 = vld [vmem:[%s2056_s1 + $0x3c8] sm:$0xff]  ;;  %v138_v38 = vld [vmem:[%s2056_s1 + $0x3d0] sm:$0xff] }
   0xe   :  { %354 = vmatpush.msra.mxu0 %v196_v24  ;;  %377 = vmatpush.msra.mxu1 %v197_v25  ;;  %v139_v39 = vld [vmem:[%s2056_s1 + $0x3d8] sm:$0xff]  ;;  %v116_v40 = vld [vmem:[%s2056_s1 + $0x320] sm:$0xff]  ;;  %v117_v41 = vld [vmem:[%s2056_s1 + $0x328] sm:$0xff] }
   0xf   :  { %400 = vmatpush.msra.mxu2 %v198_v26  ;;  %423 = vmatpush.msra.mxu3 %v199_v27  ;;  %v118_v42 = vld [vmem:[%s2056_s1 + $0x330] sm:$0xff]  ;;  %v119_v43 = vld [vmem:[%s2056_s1 + $0x338] sm:$0xff]  ;;  %v96_v44 = vld [vmem:[%s2056_s1 + $0x280] sm:$0xff] }
  0x10   :  { %355 = vmatpush.msra.mxu0 %v176_v28  ;;  %378 = vmatpush.msra.mxu1 %v177_v29  ;;  %v97_v45 = vld [vmem:[%s2056_s1 + $0x288] sm:$0xff]  ;;  %v98_v46 = vld [vmem:[%s2056_s1 + $0x290] sm:$0xff]  ;;  %v99_v47 = vld [vmem:[%s2056_s1 + $0x298] sm:$0xff] }
  0x11   :  { %401 = vmatpush.msra.mxu2 %v178_v30  ;;  %424 = vmatpush.msra.mxu3 %v179_v31  ;;  %v76_v48 = vld [vmem:[%s2056_s1 + $0x1e0] sm:$0xff]  ;;  %v77_v49 = vld [vmem:[%s2056_s1 + $0x1e8] sm:$0xff]  ;;  %v78_v50 = vld [vmem:[%s2056_s1 + $0x1f0] sm:$0xff] }
  0x12   :  { %356 = vmatpush.msra.mxu0 %v156_v32  ;;  %379 = vmatpush.msra.mxu1 %v157_v33  ;;  %v79_v51 = vld [vmem:[%s2056_s1 + $0x1f8] sm:$0xff]  ;;  %v56_v52 = vld [vmem:[%s2056_s1 + $0x140] sm:$0xff]  ;;  %v57_v53 = vld [vmem:[%s2056_s1 + $0x148] sm:$0xff] }
  0x13   :  { %402 = vmatpush.msra.mxu2 %v158_v34  ;;  %425 = vmatpush.msra.mxu3 %v159_v35  ;;  %v58_v54 = vld [vmem:[%s2056_s1 + $0x150] sm:$0xff]  ;;  %v59_v55 = vld [vmem:[%s2056_s1 + $0x158] sm:$0xff]  ;;  %v36_v56 = vld [vmem:[%s2056_s1 + $0xa0] sm:$0xff] }
  0x14   :  { %357 = vmatpush.msra.mxu0 %v136_v36  ;;  %380 = vmatpush.msra.mxu1 %v137_v37  ;;  %v37_v57 = vld [vmem:[%s2056_s1 + $0xa8] sm:$0xff]  ;;  %v38_v58 = vld [vmem:[%s2056_s1 + $0xb0] sm:$0xff]  ;;  %v39_v59 = vld [vmem:[%s2056_s1 + $0xb8] sm:$0xff] }
  0x15   :  { %403 = vmatpush.msra.mxu2 %v138_v38  ;;  %426 = vmatpush.msra.mxu3 %v139_v39  ;;  %v16_v60 = vld [vmem:[%s2056_s1] sm:$0xff]  ;;  %v17_v61 = vld [vmem:[%s2056_s1 + $0x8] sm:$0xff]  ;;  %v18_v62 = vld [vmem:[%s2056_s1 + $0x10] sm:$0xff] }
  0x16   :  { %358 = vmatpush.msra.mxu0 %v116_v40  ;;  %381 = vmatpush.msra.mxu1 %v117_v41  ;;  %v19_v63 = vld [vmem:[%s2056_s1 + $0x18] sm:$0xff]  ;;  %v320_v0 = vld [vmem:[%s2056_s1 + $0x980] sm:$0xff]  ;;  %v321_v1 = vld [vmem:[%s2056_s1 + $0x988] sm:$0xff] }
  0x17   :  { %404 = vmatpush.msra.mxu2 %v118_v42  ;;  %427 = vmatpush.msra.mxu3 %v119_v43  ;;  %v322_v2 = vld [vmem:[%s2056_s1 + $0x990] sm:$0xff]  ;;  %v323_v3 = vld [vmem:[%s2056_s1 + $0x998] sm:$0xff]  ;;  %v300_v4 = vld [vmem:[%s2056_s1 + $0x8e0] sm:$0xff] }
  0x18   :  { %359 = vmatpush.msra.mxu0 %v96_v44  ;;  %382 = vmatpush.msra.mxu1 %v97_v45  ;;  %v301_v5 = vld [vmem:[%s2056_s1 + $0x8e8] sm:$0xff]  ;;  %v302_v6 = vld [vmem:[%s2056_s1 + $0x8f0] sm:$0xff]  ;;  %v303_v7 = vld [vmem:[%s2056_s1 + $0x8f8] sm:$0xff] }
  0x19   :  { %405 = vmatpush.msra.mxu2 %v98_v46  ;;  %428 = vmatpush.msra.mxu3 %v99_v47  ;;  %v280_v8 = vld [vmem:[%s2056_s1 + $0x840] sm:$0xff]  ;;  %v281_v9 = vld [vmem:[%s2056_s1 + $0x848] sm:$0xff]  ;;  %v282_v10 = vld [vmem:[%s2056_s1 + $0x850] sm:$0xff] }
  0x1a   :  { %360 = vmatpush.msra.mxu0 %v76_v48  ;;  %383 = vmatpush.msra.mxu1 %v77_v49  ;;  %v283_v11 = vld [vmem:[%s2056_s1 + $0x858] sm:$0xff]  ;;  %v260_v12 = vld [vmem:[%s2056_s1 + $0x7a0] sm:$0xff]  ;;  %v261_v13 = vld [vmem:[%s2056_s1 + $0x7a8] sm:$0xff] }
  0x1b   :  { %406 = vmatpush.msra.mxu2 %v78_v50  ;;  %429 = vmatpush.msra.mxu3 %v79_v51  ;;  %v262_v14 = vld [vmem:[%s2056_s1 + $0x7b0] sm:$0xff]  ;;  %v263_v15 = vld [vmem:[%s2056_s1 + $0x7b8] sm:$0xff]  ;;  %v240_v16 = vld [vmem:[%s2056_s1 + $0x700] sm:$0xff] }
  0x1c   :  { %361 = vmatpush.msra.mxu0 %v56_v52  ;;  %384 = vmatpush.msra.mxu1 %v57_v53  ;;  %v241_v17 = vld [vmem:[%s2056_s1 + $0x708] sm:$0xff]  ;;  %v242_v18 = vld [vmem:[%s2056_s1 + $0x710] sm:$0xff]  ;;  %v243_v19 = vld [vmem:[%s2056_s1 + $0x718] sm:$0xff] }
  0x1d   :  { %407 = vmatpush.msra.mxu2 %v58_v54  ;;  %430 = vmatpush.msra.mxu3 %v59_v55  ;;  %v220_v20 = vld [vmem:[%s2056_s1 + $0x660] sm:$0xff]  ;;  %v221_v21 = vld [vmem:[%s2056_s1 + $0x668] sm:$0xff]  ;;  %v222_v22 = vld [vmem:[%s2056_s1 + $0x670] sm:$0xff] }
  0x1e   :  { %362 = vmatpush.msra.mxu0 %v36_v56  ;;  %385 = vmatpush.msra.mxu1 %v37_v57  ;;  %v223_v23 = vld [vmem:[%s2056_s1 + $0x678] sm:$0xff]  ;;  %v200_v24 = vld [vmem:[%s2056_s1 + $0x5c0] sm:$0xff]  ;;  %v201_v25 = vld [vmem:[%s2056_s1 + $0x5c8] sm:$0xff] }
  0x1f   :  { %408 = vmatpush.msra.mxu2 %v38_v58  ;;  %431 = vmatpush.msra.mxu3 %v39_v59  ;;  %v202_v26 = vld [vmem:[%s2056_s1 + $0x5d0] sm:$0xff]  ;;  %v203_v27 = vld [vmem:[%s2056_s1 + $0x5d8] sm:$0xff]  ;;  %v180_v28 = vld [vmem:[%s2056_s1 + $0x520] sm:$0xff] }
  0x20   :  { %363 = vmatpush.msra.mxu0 %v16_v60  ;;  %386 = vmatpush.msra.mxu1 %v17_v61  ;;  %v181_v29 = vld [vmem:[%s2056_s1 + $0x528] sm:$0xff]  ;;  %v182_v30 = vld [vmem:[%s2056_s1 + $0x530] sm:$0xff]  ;;  %v183_v31 = vld [vmem:[%s2056_s1 + $0x538] sm:$0xff] }
  0x21   :  { %409 = vmatpush.msra.mxu2 %v18_v62  ;;  %432 = vmatpush.msra.mxu3 %v19_v63  ;;  %v160_v32 = vld [vmem:[%s2056_s1 + $0x480] sm:$0xff]  ;;  %v161_v33 = vld [vmem:[%s2056_s1 + $0x488] sm:$0xff]  ;;  %v162_v34 = vld [vmem:[%s2056_s1 + $0x490] sm:$0xff] }
  0x22   :  { %440 = vmatpush.msrb.mxu0 %v320_v0  ;;  %463 = vmatpush.msrb.mxu1 %v321_v1  ;;  %v163_v35 = vld [vmem:[%s2056_s1 + $0x498] sm:$0xff]  ;;  %v140_v36 = vld [vmem:[%s2056_s1 + $0x3e0] sm:$0xff]  ;;  %v141_v37 = vld [vmem:[%s2056_s1 + $0x3e8] sm:$0xff] }
  0x23   :  { %486 = vmatpush.msrb.mxu2 %v322_v2  ;;  %509 = vmatpush.msrb.mxu3 %v323_v3  ;;  %v142_v38 = vld [vmem:[%s2056_s1 + $0x3f0] sm:$0xff]  ;;  %v143_v39 = vld [vmem:[%s2056_s1 + $0x3f8] sm:$0xff]  ;;  %v120_v40 = vld [vmem:[%s2056_s1 + $0x340] sm:$0xff] }
  0x24   :  { %441 = vmatpush.msrb.mxu0 %v300_v4  ;;  %464 = vmatpush.msrb.mxu1 %v301_v5  ;;  %v121_v41 = vld [vmem:[%s2056_s1 + $0x348] sm:$0xff]  ;;  %v122_v42 = vld [vmem:[%s2056_s1 + $0x350] sm:$0xff]  ;;  %v123_v43 = vld [vmem:[%s2056_s1 + $0x358] sm:$0xff] }
  0x25   :  { %487 = vmatpush.msrb.mxu2 %v302_v6  ;;  %510 = vmatpush.msrb.mxu3 %v303_v7  ;;  %v100_v44 = vld [vmem:[%s2056_s1 + $0x2a0] sm:$0xff]  ;;  %v101_v45 = vld [vmem:[%s2056_s1 + $0x2a8] sm:$0xff]  ;;  %v102_v46 = vld [vmem:[%s2056_s1 + $0x2b0] sm:$0xff] }
  0x26   :  { %442 = vmatpush.msrb.mxu0 %v280_v8  ;;  %465 = vmatpush.msrb.mxu1 %v281_v9  ;;  %v103_v47 = vld [vmem:[%s2056_s1 + $0x2b8] sm:$0xff]  ;;  %v80_v48 = vld [vmem:[%s2056_s1 + $0x200] sm:$0xff]  ;;  %v81_v49 = vld [vmem:[%s2056_s1 + $0x208] sm:$0xff] }
  0x27   :  { %488 = vmatpush.msrb.mxu2 %v282_v10  ;;  %511 = vmatpush.msrb.mxu3 %v283_v11  ;;  %v82_v50 = vld [vmem:[%s2056_s1 + $0x210] sm:$0xff]  ;;  %v83_v51 = vld [vmem:[%s2056_s1 + $0x218] sm:$0xff]  ;;  %v60_v52 = vld [vmem:[%s2056_s1 + $0x160] sm:$0xff] }
  0x28   :  { %443 = vmatpush.msrb.mxu0 %v260_v12  ;;  %466 = vmatpush.msrb.mxu1 %v261_v13  ;;  %v61_v53 = vld [vmem:[%s2056_s1 + $0x168] sm:$0xff]  ;;  %v62_v54 = vld [vmem:[%s2056_s1 + $0x170] sm:$0xff]  ;;  %v63_v55 = vld [vmem:[%s2056_s1 + $0x178] sm:$0xff] }
  0x29   :  { %489 = vmatpush.msrb.mxu2 %v262_v14  ;;  %512 = vmatpush.msrb.mxu3 %v263_v15  ;;  %v40_v56 = vld [vmem:[%s2056_s1 + $0xc0] sm:$0xff]  ;;  %v41_v57 = vld [vmem:[%s2056_s1 + $0xc8] sm:$0xff]  ;;  %v42_v58 = vld [vmem:[%s2056_s1 + $0xd0] sm:$0xff] }
  0x2a   :  { %444 = vmatpush.msrb.mxu0 %v240_v16  ;;  %467 = vmatpush.msrb.mxu1 %v241_v17  ;;  %v43_v59 = vld [vmem:[%s2056_s1 + $0xd8] sm:$0xff]  ;;  %v20_v60 = vld [vmem:[%s2056_s1 + $0x20] sm:$0xff]  ;;  %v21_v61 = vld [vmem:[%s2056_s1 + $0x28] sm:$0xff] }
  0x2b   :  { %490 = vmatpush.msrb.mxu2 %v242_v18  ;;  %513 = vmatpush.msrb.mxu3 %v243_v19  ;;  %v22_v62 = vld [vmem:[%s2056_s1 + $0x30] sm:$0xff]  ;;  %v23_v63 = vld [vmem:[%s2056_s1 + $0x38] sm:$0xff]  ;;  %v1263_v0 = vld [vmem:[%s2057_s0] sm:$0xff] }
  0x2c   :  { %445 = vmatpush.msrb.mxu0 %v220_v20  ;;  %468 = vmatpush.msrb.mxu1 %v221_v21  ;;  %v324_v1 = vld [vmem:[%s2056_s1 + $0x9a0] sm:$0xff]  ;;  %v325_v2 = vld [vmem:[%s2056_s1 + $0x9a8] sm:$0xff]  ;;  %v326_v3 = vld [vmem:[%s2056_s1 + $0x9b0] sm:$0xff] }
  0x2d   :  { %491 = vmatpush.msrb.mxu2 %v222_v22  ;;  %514 = vmatpush.msrb.mxu3 %v223_v23  ;;  %v327_v4 = vld [vmem:[%s2056_s1 + $0x9b8] sm:$0xff]  ;;  %v304_v5 = vld [vmem:[%s2056_s1 + $0x900] sm:$0xff]  ;;  %v305_v6 = vld [vmem:[%s2056_s1 + $0x908] sm:$0xff] }
  0x2e   :  { %446 = vmatpush.msrb.mxu0 %v200_v24  ;;  %469 = vmatpush.msrb.mxu1 %v201_v25  ;;  %v306_v7 = vld [vmem:[%s2056_s1 + $0x910] sm:$0xff]  ;;  %v307_v8 = vld [vmem:[%s2056_s1 + $0x918] sm:$0xff]  ;;  %v284_v9 = vld [vmem:[%s2056_s1 + $0x860] sm:$0xff] }
  0x2f   :  { %492 = vmatpush.msrb.mxu2 %v202_v26  ;;  %515 = vmatpush.msrb.mxu3 %v203_v27  ;;  %v285_v10 = vld [vmem:[%s2056_s1 + $0x868] sm:$0xff]  ;;  %v286_v11 = vld [vmem:[%s2056_s1 + $0x870] sm:$0xff]  ;;  %v287_v12 = vld [vmem:[%s2056_s1 + $0x878] sm:$0xff] }
  0x30   :  { %447 = vmatpush.msrb.mxu0 %v180_v28  ;;  %470 = vmatpush.msrb.mxu1 %v181_v29  ;;  %v264_v13 = vld [vmem:[%s2056_s1 + $0x7c0] sm:$0xff]  ;;  %v265_v14 = vld [vmem:[%s2056_s1 + $0x7c8] sm:$0xff]  ;;  %v266_v15 = vld [vmem:[%s2056_s1 + $0x7d0] sm:$0xff] }
  0x31   :  { %493 = vmatpush.msrb.mxu2 %v182_v30  ;;  %516 = vmatpush.msrb.mxu3 %v183_v31  ;;  %v267_v16 = vld [vmem:[%s2056_s1 + $0x7d8] sm:$0xff]  ;;  %v244_v17 = vld [vmem:[%s2056_s1 + $0x720] sm:$0xff]  ;;  %v245_v18 = vld [vmem:[%s2056_s1 + $0x728] sm:$0xff] }
  0x32   :  { %448 = vmatpush.msrb.mxu0 %v160_v32  ;;  %471 = vmatpush.msrb.mxu1 %v161_v33  ;;  %v246_v19 = vld [vmem:[%s2056_s1 + $0x730] sm:$0xff]  ;;  %v247_v20 = vld [vmem:[%s2056_s1 + $0x738] sm:$0xff]  ;;  %v224_v21 = vld [vmem:[%s2056_s1 + $0x680] sm:$0xff] }
  0x33   :  { %494 = vmatpush.msrb.mxu2 %v162_v34  ;;  %517 = vmatpush.msrb.mxu3 %v163_v35  ;;  %v225_v22 = vld [vmem:[%s2056_s1 + $0x688] sm:$0xff]  ;;  %v226_v23 = vld [vmem:[%s2056_s1 + $0x690] sm:$0xff]  ;;  %v227_v24 = vld [vmem:[%s2056_s1 + $0x698] sm:$0xff] }
  0x34   :  { %449 = vmatpush.msrb.mxu0 %v140_v36  ;;  %472 = vmatpush.msrb.mxu1 %v141_v37  ;;  %v204_v25 = vld [vmem:[%s2056_s1 + $0x5e0] sm:$0xff]  ;;  %v205_v26 = vld [vmem:[%s2056_s1 + $0x5e8] sm:$0xff]  ;;  %v206_v27 = vld [vmem:[%s2056_s1 + $0x5f0] sm:$0xff] }
  0x35   :  { %495 = vmatpush.msrb.mxu2 %v142_v38  ;;  %518 = vmatpush.msrb.mxu3 %v143_v39  ;;  %v207_v28 = vld [vmem:[%s2056_s1 + $0x5f8] sm:$0xff]  ;;  %v184_v29 = vld [vmem:[%s2056_s1 + $0x540] sm:$0xff]  ;;  %v185_v30 = vld [vmem:[%s2056_s1 + $0x548] sm:$0xff]  ;;  %v855_v38 = vmov 0  }
  0x36   :  { %450 = vmatpush.msrb.mxu0 %v120_v40  ;;  %473 = vmatpush.msrb.mxu1 %v121_v41  ;;  %v186_v31 = vld [vmem:[%s2056_s1 + $0x550] sm:$0xff]  ;;  %v187_v32 = vld [vmem:[%s2056_s1 + $0x558] sm:$0xff]  ;;  %v164_v33 = vld [vmem:[%s2056_s1 + $0x4a0] sm:$0xff] }
  0x37   :  { %496 = vmatpush.msrb.mxu2 %v122_v42  ;;  %519 = vmatpush.msrb.mxu3 %v123_v43  ;;  %v165_v34 = vld [vmem:[%s2056_s1 + $0x4a8] sm:$0xff]  ;;  %v166_v35 = vld [vmem:[%s2056_s1 + $0x4b0] sm:$0xff]  ;;  %v167_v36 = vld [vmem:[%s2056_s1 + $0x4b8] sm:$0xff] }
  0x38   :  { %451 = vmatpush.msrb.mxu0 %v100_v44  ;;  %474 = vmatpush.msrb.mxu1 %v101_v45  ;;  %v336_v37 = vld [vmem:[%s2058_s2] sm:$0xff]  ;;  %v145_v40 = vld [vmem:[%s2056_s1 + $0x408] sm:$0xff]  ;;  %v146_v41 = vld [vmem:[%s2056_s1 + $0x410] sm:$0xff] }
  0x39   :  { %497 = vmatpush.msrb.mxu2 %v102_v46  ;;  %520 = vmatpush.msrb.mxu3 %v103_v47  ;;  %v144_v39 = vld [vmem:[%s2056_s1 + $0x400] sm:$0xff]  ;;  %v147_v42 = vld [vmem:[%s2056_s1 + $0x418] sm:$0xff]  ;;  %v125_v44 = vld [vmem:[%s2056_s1 + $0x368] sm:$0xff] }
  0x3a   :  { %452 = vmatpush.msrb.mxu0 %v80_v48  ;;  %475 = vmatpush.msrb.mxu1 %v81_v49  ;;  %v124_v43 = vld [vmem:[%s2056_s1 + $0x360] sm:$0xff]  ;;  %v126_v45 = vld [vmem:[%s2056_s1 + $0x370] sm:$0xff]  ;;  %v127_v46 = vld [vmem:[%s2056_s1 + $0x378] sm:$0xff] }
  0x3b   :  { %498 = vmatpush.msrb.mxu2 %v82_v50  ;;  %521 = vmatpush.msrb.mxu3 %v83_v51  ;;  %v104_v47 = vld [vmem:[%s2056_s1 + $0x2c0] sm:$0xff]  ;;  %v105_v48 = vld [vmem:[%s2056_s1 + $0x2c8] sm:$0xff]  ;;  %v106_v49 = vld [vmem:[%s2056_s1 + $0x2d0] sm:$0xff] }
  0x3c   :  { %453 = vmatpush.msrb.mxu0 %v60_v52  ;;  %476 = vmatpush.msrb.mxu1 %v61_v53  ;;  %v107_v50 = vld [vmem:[%s2056_s1 + $0x2d8] sm:$0xff]  ;;  %v1419_v51 = vld [vmem:[%s2057_s0 + $0x8] sm:$0xff]  ;;  %v84_v52 = vld [vmem:[%s2056_s1 + $0x220] sm:$0xff] }
  0x3d   :  { %499 = vmatpush.msrb.mxu2 %v62_v54  ;;  %522 = vmatpush.msrb.mxu3 %v63_v55  ;;  %v85_v53 = vld [vmem:[%s2056_s1 + $0x228] sm:$0xff]  ;;  %v86_v54 = vld [vmem:[%s2056_s1 + $0x230] sm:$0xff]  ;;  %v87_v55 = vld [vmem:[%s2056_s1 + $0x238] sm:$0xff] }
  0x3e   :  { %454 = vmatpush.msrb.mxu0 %v40_v56  ;;  %477 = vmatpush.msrb.mxu1 %v41_v57  ;;  %v64_v56 = vld [vmem:[%s2056_s1 + $0x180] sm:$0xff]  ;;  %v65_v57 = vld [vmem:[%s2056_s1 + $0x188] sm:$0xff] }
  0x3f   :  { %500 = vmatpush.msrb.mxu2 %v42_v58  ;;  %523 = vmatpush.msrb.mxu3 %v43_v59  ;;  %v66_v58 = vld [vmem:[%s2056_s1 + $0x190] sm:$0xff]  ;;  %v67_v59 = vld [vmem:[%s2056_s1 + $0x198] sm:$0xff] }
  0x40   :  { %455 = vmatpush.msrb.mxu0 %v20_v60  ;;  %478 = vmatpush.msrb.mxu1 %v21_v61  ;;  %v44_v60 = vld [vmem:[%s2056_s1 + $0xe0] sm:$0xff]  ;;  %v45_v61 = vld [vmem:[%s2056_s1 + $0xe8] sm:$0xff] }
  0x41   :  { %501 = vmatpush.msrb.mxu2 %v22_v62  ;;  %524 = vmatpush.msrb.mxu3 %v23_v63  ;;  %v46_v62 = vld [vmem:[%s2056_s1 + $0xf0] sm:$0xff]  ;;  %v47_v63 = vld [vmem:[%s2056_s1 + $0xf8] sm:$0xff] }
  0x42   :  { %364 = vmatmul.f32.vlgmr.msra.gmra.mxu0 %v1263_v0  ;;  %387 = vmatmul.f32.vlgmr.msra.gmra.mxu1 %v1263_v0 }
  0x43   :  { %410 = vmatmul.f32.vlgmr.msra.gmra.mxu2 %v1263_v0  ;;  %433 = vmatmul.f32.vlgmr.msra.gmra.mxu3 %v1263_v0 }
  0x44   :  { %532 = vmatpush.msra.mxu0 %v324_v1  ;;  %555 = vmatpush.msra.mxu1 %v325_v2  ;;  %v24_v1 = vld [vmem:[%s2056_s1 + $0x40] sm:$0xff]  ;;  %v25_v2 = vld [vmem:[%s2056_s1 + $0x48] sm:$0xff] }
  0x45   :  { %578 = vmatpush.msra.mxu2 %v326_v3  ;;  %601 = vmatpush.msra.mxu3 %v327_v4  ;;  %v26_v3 = vld [vmem:[%s2056_s1 + $0x50] sm:$0xff]  ;;  %v27_v4 = vld [vmem:[%s2056_s1 + $0x58] sm:$0xff] }
  0x46   :  { %533 = vmatpush.msra.mxu0 %v304_v5  ;;  %556 = vmatpush.msra.mxu1 %v305_v6  ;;  %v328_v5 = vld [vmem:[%s2056_s1 + $0x9c0] sm:$0xff]  ;;  %v329_v6 = vld [vmem:[%s2056_s1 + $0x9c8] sm:$0xff] }
  0x47   :  { %579 = vmatpush.msra.mxu2 %v306_v7  ;;  %602 = vmatpush.msra.mxu3 %v307_v8  ;;  %v330_v7 = vld [vmem:[%s2056_s1 + $0x9d0] sm:$0xff]  ;;  %v331_v8 = vld [vmem:[%s2056_s1 + $0x9d8] sm:$0xff] }
  0x48   :  { %534 = vmatpush.msra.mxu0 %v284_v9  ;;  %557 = vmatpush.msra.mxu1 %v285_v10  ;;  %v308_v9 = vld [vmem:[%s2056_s1 + $0x920] sm:$0xff]  ;;  %v309_v10 = vld [vmem:[%s2056_s1 + $0x928] sm:$0xff] }
  0x49   :  { %580 = vmatpush.msra.mxu2 %v286_v11  ;;  %603 = vmatpush.msra.mxu3 %v287_v12  ;;  %v310_v11 = vld [vmem:[%s2056_s1 + $0x930] sm:$0xff]  ;;  %v311_v12 = vld [vmem:[%s2056_s1 + $0x938] sm:$0xff] }
  0x4a   :  { %535 = vmatpush.msra.mxu0 %v264_v13  ;;  %558 = vmatpush.msra.mxu1 %v265_v14  ;;  %v288_v13 = vld [vmem:[%s2056_s1 + $0x880] sm:$0xff]  ;;  %v289_v14 = vld [vmem:[%s2056_s1 + $0x888] sm:$0xff] }
  0x4b   :  { %581 = vmatpush.msra.mxu2 %v266_v15  ;;  %604 = vmatpush.msra.mxu3 %v267_v16  ;;  %v290_v15 = vld [vmem:[%s2056_s1 + $0x890] sm:$0xff]  ;;  %v291_v16 = vld [vmem:[%s2056_s1 + $0x898] sm:$0xff] }
  0x4c   :  { %536 = vmatpush.msra.mxu0 %v244_v17  ;;  %559 = vmatpush.msra.mxu1 %v245_v18  ;;  %v268_v17 = vld [vmem:[%s2056_s1 + $0x7e0] sm:$0xff]  ;;  %v269_v18 = vld [vmem:[%s2056_s1 + $0x7e8] sm:$0xff] }
  0x4d   :  { %582 = vmatpush.msra.mxu2 %v246_v19  ;;  %605 = vmatpush.msra.mxu3 %v247_v20  ;;  %v270_v19 = vld [vmem:[%s2056_s1 + $0x7f0] sm:$0xff]  ;;  %v271_v20 = vld [vmem:[%s2056_s1 + $0x7f8] sm:$0xff] }
  0x4e   :  { %537 = vmatpush.msra.mxu0 %v224_v21  ;;  %560 = vmatpush.msra.mxu1 %v225_v22  ;;  %v248_v21 = vld [vmem:[%s2056_s1 + $0x740] sm:$0xff]  ;;  %v249_v22 = vld [vmem:[%s2056_s1 + $0x748] sm:$0xff] }
  0x4f   :  { %583 = vmatpush.msra.mxu2 %v226_v23  ;;  %606 = vmatpush.msra.mxu3 %v227_v24  ;;  %v250_v23 = vld [vmem:[%s2056_s1 + $0x750] sm:$0xff]  ;;  %v251_v24 = vld [vmem:[%s2056_s1 + $0x758] sm:$0xff] }
  0x50   :  { %538 = vmatpush.msra.mxu0 %v204_v25  ;;  %561 = vmatpush.msra.mxu1 %v205_v26  ;;  %v337_v25 = vld [vmem:[%s2058_s2 + $0x8] sm:$0xff]  ;;  %v228_v26 = vld [vmem:[%s2056_s1 + $0x6a0] sm:$0xff] }
  0x51   :  { %584 = vmatpush.msra.mxu2 %v206_v27  ;;  %607 = vmatpush.msra.mxu3 %v207_v28  ;;  %v229_v27 = vld [vmem:[%s2056_s1 + $0x6a8] sm:$0xff]  ;;  %v230_v28 = vld [vmem:[%s2056_s1 + $0x6b0] sm:$0xff] }
  0x52   :  { %539 = vmatpush.msra.mxu0 %v184_v29  ;;  %562 = vmatpush.msra.mxu1 %v185_v30  ;;  %v231_v29 = vld [vmem:[%s2056_s1 + $0x6b8] sm:$0xff]  ;;  %v208_v30 = vld [vmem:[%s2056_s1 + $0x600] sm:$0xff] }
  0x53   :  { %585 = vmatpush.msra.mxu2 %v186_v31  ;;  %608 = vmatpush.msra.mxu3 %v187_v32  ;;  %v209_v31 = vld [vmem:[%s2056_s1 + $0x608] sm:$0xff]  ;;  %v210_v32 = vld [vmem:[%s2056_s1 + $0x610] sm:$0xff] }
  0x54   :  { %854 = vset.pattern.permute.xlu0 %v855_v38  ;;  %540 = vmatpush.msra.mxu0 %v164_v33  ;;  %v211_v33 = vld [vmem:[%s2056_s1 + $0x618] sm:$0xff]  ;;  %v168_v38 = vld [vmem:[%s2056_s1 + $0x4c0] sm:$0xff] }
  0x55   :  { %563 = vmatpush.msra.mxu1 %v165_v34  ;;  %586 = vmatpush.msra.mxu2 %v166_v35  ;;  %v188_v34 = vld [vmem:[%s2056_s1 + $0x560] sm:$0xff]  ;;  %v189_v35 = vld [vmem:[%s2056_s1 + $0x568] sm:$0xff] }
  0x56   :  { %609 = vmatpush.msra.mxu3 %v167_v36  ;;  %340 = vperm.xlu0 %854, %v336_v37   ;;  %v190_v36 = vld [vmem:[%s2056_s1 + $0x570] sm:$0xff]  ;;  %v191_v37 = vld [vmem:[%s2056_s1 + $0x578] sm:$0xff] }
  0x57   :  { %541 = vmatpush.msra.mxu0 %v144_v39  ;;  %564 = vmatpush.msra.mxu1 %v145_v40  ;;  %v169_v39 = vld [vmem:[%s2056_s1 + $0x4c8] sm:$0xff]  ;;  %v170_v40 = vld [vmem:[%s2056_s1 + $0x4d0] sm:$0xff] }
  0x58   :  { %587 = vmatpush.msra.mxu2 %v146_v41  ;;  %610 = vmatpush.msra.mxu3 %v147_v42  ;;  %v171_v41 = vld [vmem:[%s2056_s1 + $0x4d8] sm:$0xff]  ;;  %v148_v42 = vld [vmem:[%s2056_s1 + $0x420] sm:$0xff] }
  0x59   :  { %542 = vmatpush.msra.mxu0 %v124_v43  ;;  %565 = vmatpush.msra.mxu1 %v125_v44  ;;  %v149_v43 = vld [vmem:[%s2056_s1 + $0x428] sm:$0xff]  ;;  %v150_v44 = vld [vmem:[%s2056_s1 + $0x430] sm:$0xff] }
  0x5a   :  { %588 = vmatpush.msra.mxu2 %v126_v45  ;;  %611 = vmatpush.msra.mxu3 %v127_v46  ;;  %v151_v45 = vld [vmem:[%s2056_s1 + $0x438] sm:$0xff]  ;;  %v128_v46 = vld [vmem:[%s2056_s1 + $0x380] sm:$0xff] }
  0x5b   :  { %543 = vmatpush.msra.mxu0 %v104_v47  ;;  %566 = vmatpush.msra.mxu1 %v105_v48  ;;  %v129_v47 = vld [vmem:[%s2056_s1 + $0x388] sm:$0xff]  ;;  %v130_v48 = vld [vmem:[%s2056_s1 + $0x390] sm:$0xff] }
  0x5c   :  { %589 = vmatpush.msra.mxu2 %v106_v49  ;;  %612 = vmatpush.msra.mxu3 %v107_v50  ;;  %v131_v49 = vld [vmem:[%s2056_s1 + $0x398] sm:$0xff]  ;;  %v108_v50 = vld [vmem:[%s2056_s1 + $0x2e0] sm:$0xff] }
  0x5d   :  { %367 = vmatmul.f32.gmra.mxu0 %v1419_v51  ;;  %390 = vmatmul.f32.gmra.mxu1 %v1419_v51 }
  0x5e   :  { %413 = vmatmul.f32.gmra.mxu2 %v1419_v51  ;;  %436 = vmatmul.f32.gmra.mxu3 %v1419_v51 }
  0x5f   :  { %544 = vmatpush.msra.mxu0 %v84_v52  ;;  %567 = vmatpush.msra.mxu1 %v85_v53  ;;  %v109_v52 = vld [vmem:[%s2056_s1 + $0x2e8] sm:$0xff]  ;;  %v110_v53 = vld [vmem:[%s2056_s1 + $0x2f0] sm:$0xff] }
  0x60   :  { %590 = vmatpush.msra.mxu2 %v86_v54  ;;  %613 = vmatpush.msra.mxu3 %v87_v55  ;;  %v111_v54 = vld [vmem:[%s2056_s1 + $0x2f8] sm:$0xff]  ;;  %v88_v55 = vld [vmem:[%s2056_s1 + $0x240] sm:$0xff] }
  0x61   :  { %545 = vmatpush.msra.mxu0 %v64_v56  ;;  %568 = vmatpush.msra.mxu1 %v65_v57  ;;  %v89_v56 = vld [vmem:[%s2056_s1 + $0x248] sm:$0xff]  ;;  %v90_v57 = vld [vmem:[%s2056_s1 + $0x250] sm:$0xff] }
  0x62   :  { %591 = vmatpush.msra.mxu2 %v66_v58  ;;  %614 = vmatpush.msra.mxu3 %v67_v59  ;;  %v91_v58 = vld [vmem:[%s2056_s1 + $0x258] sm:$0xff]  ;;  %v68_v59 = vld [vmem:[%s2056_s1 + $0x1a0] sm:$0xff] }
  0x63   :  { %546 = vmatpush.msra.mxu0 %v44_v60  ;;  %569 = vmatpush.msra.mxu1 %v45_v61  ;;  %v69_v60 = vld [vmem:[%s2056_s1 + $0x1a8] sm:$0xff]  ;;  %v70_v61 = vld [vmem:[%s2056_s1 + $0x1b0] sm:$0xff] }
  0x64   :  { %592 = vmatpush.msra.mxu2 %v46_v62  ;;  %615 = vmatpush.msra.mxu3 %v47_v63  ;;  %v71_v62 = vld [vmem:[%s2056_s1 + $0x1b8] sm:$0xff]  ;;  %v48_v63 = vld [vmem:[%s2056_s1 + $0x100] sm:$0xff] }
  0x65   :  { %547 = vmatpush.msra.mxu0 %v24_v1  ;;  %570 = vmatpush.msra.mxu1 %v25_v2  ;;  %v49_v1 = vld [vmem:[%s2056_s1 + $0x108] sm:$0xff]  ;;  %v50_v2 = vld [vmem:[%s2056_s1 + $0x110] sm:$0xff] }
  0x66   :  { %593 = vmatpush.msra.mxu2 %v26_v3  ;;  %616 = vmatpush.msra.mxu3 %v27_v4  ;;  %v51_v3 = vld [vmem:[%s2056_s1 + $0x118] sm:$0xff]  ;;  %v28_v4 = vld [vmem:[%s2056_s1 + $0x60] sm:$0xff] }
  0x67   :  { %456 = vmatmul.f32.vlgmr.msrb.gmra.mxu0 %v1263_v0  ;;  %479 = vmatmul.f32.vlgmr.msrb.gmra.mxu1 %v1263_v0 }
  0x68   :  { %502 = vmatmul.f32.vlgmr.msrb.gmra.mxu2 %v1263_v0  ;;  %525 = vmatmul.f32.vlgmr.msrb.gmra.mxu3 %v1263_v0 }
  0x69   :  { %624 = vmatpush.msrb.mxu0 %v328_v5  ;;  %647 = vmatpush.msrb.mxu1 %v329_v6  ;;  %v29_v5 = vld [vmem:[%s2056_s1 + $0x68] sm:$0xff]  ;;  %v30_v6 = vld [vmem:[%s2056_s1 + $0x70] sm:$0xff] }
  0x6a   :  { %670 = vmatpush.msrb.mxu2 %v330_v7  ;;  %693 = vmatpush.msrb.mxu3 %v331_v8  ;;  %v31_v7 = vld [vmem:[%s2056_s1 + $0x78] sm:$0xff]  ;;  %v332_v8 = vld [vmem:[%s2056_s1 + $0x9e0] sm:$0xff] }
  0x6b   :  { %625 = vmatpush.msrb.mxu0 %v308_v9  ;;  %648 = vmatpush.msrb.mxu1 %v309_v10  ;;  %v333_v9 = vld [vmem:[%s2056_s1 + $0x9e8] sm:$0xff]  ;;  %v334_v10 = vld [vmem:[%s2056_s1 + $0x9f0] sm:$0xff] }
  0x6c   :  { %671 = vmatpush.msrb.mxu2 %v310_v11  ;;  %694 = vmatpush.msrb.mxu3 %v311_v12  ;;  %v335_v11 = vld [vmem:[%s2056_s1 + $0x9f8] sm:$0xff]  ;;  %v312_v12 = vld [vmem:[%s2056_s1 + $0x940] sm:$0xff] }
  0x6d   :  { %626 = vmatpush.msrb.mxu0 %v288_v13  ;;  %649 = vmatpush.msrb.mxu1 %v289_v14  ;;  %v313_v13 = vld [vmem:[%s2056_s1 + $0x948] sm:$0xff]  ;;  %v314_v14 = vld [vmem:[%s2056_s1 + $0x950] sm:$0xff] }
  0x6e   :  { %672 = vmatpush.msrb.mxu2 %v290_v15  ;;  %695 = vmatpush.msrb.mxu3 %v291_v16  ;;  %v315_v15 = vld [vmem:[%s2056_s1 + $0x958] sm:$0xff]  ;;  %v292_v16 = vld [vmem:[%s2056_s1 + $0x8a0] sm:$0xff] }
  0x6f   :  { %627 = vmatpush.msrb.mxu0 %v268_v17  ;;  %650 = vmatpush.msrb.mxu1 %v269_v18  ;;  %v293_v17 = vld [vmem:[%s2056_s1 + $0x8a8] sm:$0xff]  ;;  %v294_v18 = vld [vmem:[%s2056_s1 + $0x8b0] sm:$0xff] }
  0x70   :  { %673 = vmatpush.msrb.mxu2 %v270_v19  ;;  %696 = vmatpush.msrb.mxu3 %v271_v20  ;;  %v295_v19 = vld [vmem:[%s2056_s1 + $0x8b8] sm:$0xff]  ;;  %v272_v20 = vld [vmem:[%s2056_s1 + $0x800] sm:$0xff] }
  0x71   :  { %628 = vmatpush.msrb.mxu0 %v248_v21  ;;  %651 = vmatpush.msrb.mxu1 %v249_v22  ;;  %v273_v21 = vld [vmem:[%s2056_s1 + $0x808] sm:$0xff]  ;;  %v274_v22 = vld [vmem:[%s2056_s1 + $0x810] sm:$0xff] }
  0x72   :  { %674 = vmatpush.msrb.mxu2 %v250_v23  ;;  %697 = vmatpush.msrb.mxu3 %v251_v24  ;;  %v275_v23 = vld [vmem:[%s2056_s1 + $0x818] sm:$0xff]  ;;  %v252_v24 = vld [vmem:[%s2056_s1 + $0x760] sm:$0xff] }
  0x73   :  { %345 = vperm.xlu0 %854, %v337_v25   ;;  %629 = vmatpush.msrb.mxu0 %v228_v26  ;;  %v253_v25 = vld [vmem:[%s2056_s1 + $0x768] sm:$0xff]  ;;  %v254_v26 = vld [vmem:[%s2056_s1 + $0x770] sm:$0xff] }
  0x74   :  { %652 = vmatpush.msrb.mxu1 %v229_v27  ;;  %675 = vmatpush.msrb.mxu2 %v230_v28  ;;  %v255_v27 = vld [vmem:[%s2056_s1 + $0x778] sm:$0xff]  ;;  %v232_v28 = vld [vmem:[%s2056_s1 + $0x6c0] sm:$0xff] }
  0x75   :  { %698 = vmatpush.msrb.mxu3 %v231_v29  ;;  %630 = vmatpush.msrb.mxu0 %v208_v30  ;;  %v233_v29 = vld [vmem:[%s2056_s1 + $0x6c8] sm:$0xff]  ;;  %v234_v30 = vld [vmem:[%s2056_s1 + $0x6d0] sm:$0xff] }
  0x76   :  { %653 = vmatpush.msrb.mxu1 %v209_v31  ;;  %676 = vmatpush.msrb.mxu2 %v210_v32  ;;  %v235_v31 = vld [vmem:[%s2056_s1 + $0x6d8] sm:$0xff]  ;;  %v212_v32 = vld [vmem:[%s2056_s1 + $0x620] sm:$0xff] }
  0x77   :  { %699 = vmatpush.msrb.mxu3 %v211_v33  ;;  %631 = vmatpush.msrb.mxu0 %v188_v34  ;;  %v213_v33 = vld [vmem:[%s2056_s1 + $0x628] sm:$0xff]  ;;  %v214_v34 = vld [vmem:[%s2056_s1 + $0x630] sm:$0xff] }
  0x78   :  { %654 = vmatpush.msrb.mxu1 %v189_v35  ;;  %677 = vmatpush.msrb.mxu2 %v190_v36  ;;  %v215_v35 = vld [vmem:[%s2056_s1 + $0x638] sm:$0xff]  ;;  %v192_v36 = vld [vmem:[%s2056_s1 + $0x580] sm:$0xff] }
  0x79   :  { %700 = vmatpush.msrb.mxu3 %v191_v37  ;;  %632 = vmatpush.msrb.mxu0 %v168_v38  ;;  %v193_v37 = vld [vmem:[%s2056_s1 + $0x588] sm:$0xff]  ;;  %v194_v38 = vld [vmem:[%s2056_s1 + $0x590] sm:$0xff] }
  0x7a   :  { %655 = vmatpush.msrb.mxu1 %v169_v39  ;;  %678 = vmatpush.msrb.mxu2 %v170_v40  ;;  %v195_v39 = vld [vmem:[%s2056_s1 + $0x598] sm:$0xff]  ;;  %v172_v40 = vld [vmem:[%s2056_s1 + $0x4e0] sm:$0xff] }
  0x7b   :  { %701 = vmatpush.msrb.mxu3 %v171_v41  ;;  %633 = vmatpush.msrb.mxu0 %v148_v42  ;;  %v173_v41 = vld [vmem:[%s2056_s1 + $0x4e8] sm:$0xff]  ;;  %v174_v42 = vld [vmem:[%s2056_s1 + $0x4f0] sm:$0xff] }
  0x7c   :  { %656 = vmatpush.msrb.mxu1 %v149_v43  ;;  %679 = vmatpush.msrb.mxu2 %v150_v44  ;;  %v175_v43 = vld [vmem:[%s2056_s1 + $0x4f8] sm:$0xff]  ;;  %v152_v44 = vld [vmem:[%s2056_s1 + $0x440] sm:$0xff] }
  0x7d   :  { %702 = vmatpush.msrb.mxu3 %v151_v45  ;;  %634 = vmatpush.msrb.mxu0 %v128_v46  ;;  %v153_v45 = vld [vmem:[%s2056_s1 + $0x448] sm:$0xff]  ;;  %v154_v46 = vld [vmem:[%s2056_s1 + $0x450] sm:$0xff] }
  0x7e   :  { %657 = vmatpush.msrb.mxu1 %v129_v47  ;;  %680 = vmatpush.msrb.mxu2 %v130_v48  ;;  %v155_v47 = vld [vmem:[%s2056_s1 + $0x458] sm:$0xff]  ;;  %v132_v48 = vld [vmem:[%s2056_s1 + $0x3a0] sm:$0xff] }
  0x7f   :  { %703 = vmatpush.msrb.mxu3 %v131_v49  ;;  %459 = vmatmul.f32.gmra.mxu0 %v1419_v51  ;;  %v133_v49 = vld [vmem:[%s2056_s1 + $0x3a8] sm:$0xff] }
  0x80   :  { %482 = vmatmul.f32.gmra.mxu1 %v1419_v51  ;;  %505 = vmatmul.f32.gmra.mxu2 %v1419_v51 }
  0x81   :  { %528 = vmatmul.f32.gmra.mxu3 %v1419_v51  ;;  %635 = vmatpush.msrb.mxu0 %v108_v50  ;;  %v134_v50 = vld [vmem:[%s2056_s1 + $0x3b0] sm:$0xff] }
  0x82   :  { %658 = vmatpush.msrb.mxu1 %v109_v52  ;;  %681 = vmatpush.msrb.mxu2 %v110_v53  ;;  %v135_v52 = vld [vmem:[%s2056_s1 + $0x3b8] sm:$0xff]  ;;  %v112_v53 = vld [vmem:[%s2056_s1 + $0x300] sm:$0xff] }
  0x83   :  { %704 = vmatpush.msrb.mxu3 %v111_v54  ;;  %636 = vmatpush.msrb.mxu0 %v88_v55  ;;  %v113_v54 = vld [vmem:[%s2056_s1 + $0x308] sm:$0xff]  ;;  %v114_v55 = vld [vmem:[%s2056_s1 + $0x310] sm:$0xff] }
  0x84   :  { %659 = vmatpush.msrb.mxu1 %v89_v56  ;;  %682 = vmatpush.msrb.mxu2 %v90_v57  ;;  %v115_v56 = vld [vmem:[%s2056_s1 + $0x318] sm:$0xff]  ;;  %v92_v57 = vld [vmem:[%s2056_s1 + $0x260] sm:$0xff] }
  0x85   :  { %705 = vmatpush.msrb.mxu3 %v91_v58  ;;  %637 = vmatpush.msrb.mxu0 %v68_v59  ;;  %v93_v58 = vld [vmem:[%s2056_s1 + $0x268] sm:$0xff]  ;;  %v94_v59 = vld [vmem:[%s2056_s1 + $0x270] sm:$0xff] }
  0x86   :  { %660 = vmatpush.msrb.mxu1 %v69_v60  ;;  %683 = vmatpush.msrb.mxu2 %v70_v61  ;;  %v95_v60 = vld [vmem:[%s2056_s1 + $0x278] sm:$0xff]  ;;  %v72_v61 = vld [vmem:[%s2056_s1 + $0x1c0] sm:$0xff] }
  0x87   :  { %706 = vmatpush.msrb.mxu3 %v71_v62  ;;  %638 = vmatpush.msrb.mxu0 %v48_v63  ;;  %v73_v62 = vld [vmem:[%s2056_s1 + $0x1c8] sm:$0xff]  ;;  %v74_v63 = vld [vmem:[%s2056_s1 + $0x1d0] sm:$0xff] }
  0x88   :  { %661 = vmatpush.msrb.mxu1 %v49_v1  ;;  %684 = vmatpush.msrb.mxu2 %v50_v2  ;;  %v75_v1 = vld [vmem:[%s2056_s1 + $0x1d8] sm:$0xff]  ;;  %v52_v2 = vld [vmem:[%s2056_s1 + $0x120] sm:$0xff] }
  0x89   :  { %707 = vmatpush.msrb.mxu3 %v51_v3  ;;  %548 = vmatmul.f32.vlgmr.msra.gmra.mxu0 %v1263_v0  ;;  %v53_v3 = vld [vmem:[%s2056_s1 + $0x128] sm:$0xff] }
  0x8a   :  { %571 = vmatmul.f32.vlgmr.msra.gmra.mxu1 %v1263_v0  ;;  %594 = vmatmul.f32.vlgmr.msra.gmra.mxu2 %v1263_v0 }
  0x8b   :  { %617 = vmatmul.f32.vlgmr.msra.gmra.mxu3 %v1263_v0  ;;  %639 = vmatpush.msrb.mxu0 %v28_v4  ;;  %v54_v4 = vld [vmem:[%s2056_s1 + $0x130] sm:$0xff] }
  0x8c   :  { %662 = vmatpush.msrb.mxu1 %v29_v5  ;;  %685 = vmatpush.msrb.mxu2 %v30_v6  ;;  %v55_v5 = vld [vmem:[%s2056_s1 + $0x138] sm:$0xff]  ;;  %v32_v6 = vld [vmem:[%s2056_s1 + $0x80] sm:$0xff] }
  0x8d   :  { %708 = vmatpush.msrb.mxu3 %v31_v7  ;;  %716 = vmatpush.msra.mxu0 %v332_v8  ;;  %v33_v7 = vld [vmem:[%s2056_s1 + $0x88] sm:$0xff]  ;;  %v34_v8 = vld [vmem:[%s2056_s1 + $0x90] sm:$0xff] }
  0x8e   :  { %739 = vmatpush.msra.mxu1 %v333_v9  ;;  %762 = vmatpush.msra.mxu2 %v334_v10  ;;  %v35_v9 = vld [vmem:[%s2056_s1 + $0x98] sm:$0xff] }
  0x8f   :  { %785 = vmatpush.msra.mxu3 %v335_v11  ;;  %717 = vmatpush.msra.mxu0 %v312_v12 }
  0x90   :  { %740 = vmatpush.msra.mxu1 %v313_v13  ;;  %763 = vmatpush.msra.mxu2 %v314_v14 }
  0x91   :  { %786 = vmatpush.msra.mxu3 %v315_v15  ;;  %718 = vmatpush.msra.mxu0 %v292_v16 }
  0x92   :  { %741 = vmatpush.msra.mxu1 %v293_v17  ;;  %764 = vmatpush.msra.mxu2 %v294_v18 }
  0x93   :  { %787 = vmatpush.msra.mxu3 %v295_v19  ;;  %719 = vmatpush.msra.mxu0 %v272_v20 }
  0x94   :  { %742 = vmatpush.msra.mxu1 %v273_v21  ;;  %765 = vmatpush.msra.mxu2 %v274_v22 }
  0x95   :  { %788 = vmatpush.msra.mxu3 %v275_v23  ;;  %551 = vmatmul.f32.gmra.mxu0 %v1419_v51 }
  0x96   :  { %574 = vmatmul.f32.gmra.mxu1 %v1419_v51  ;;  %597 = vmatmul.f32.gmra.mxu2 %v1419_v51 }
  0x97   :  { %620 = vmatmul.f32.gmra.mxu3 %v1419_v51  ;;  %720 = vmatpush.msra.mxu0 %v252_v24 }
  0x98   :  { %743 = vmatpush.msra.mxu1 %v253_v25  ;;  %766 = vmatpush.msra.mxu2 %v254_v26 }
  0x99   :  { %789 = vmatpush.msra.mxu3 %v255_v27  ;;  %721 = vmatpush.msra.mxu0 %v232_v28 }
  0x9a   :  { %744 = vmatpush.msra.mxu1 %v233_v29  ;;  %767 = vmatpush.msra.mxu2 %v234_v30 }
  0x9b   :  { %790 = vmatpush.msra.mxu3 %v235_v31  ;;  %722 = vmatpush.msra.mxu0 %v212_v32 }
  0x9c   :  { %745 = vmatpush.msra.mxu1 %v213_v33  ;;  %768 = vmatpush.msra.mxu2 %v214_v34 }
  0x9d   :  { %791 = vmatpush.msra.mxu3 %v215_v35  ;;  %723 = vmatpush.msra.mxu0 %v192_v36 }
  0x9e   :  { %746 = vmatpush.msra.mxu1 %v193_v37  ;;  %769 = vmatpush.msra.mxu2 %v194_v38 }
  0x9f   :  { %792 = vmatpush.msra.mxu3 %v195_v39  ;;  %640 = vmatmul.f32.vlgmr.msrb.gmra.mxu0 %v1263_v0 }
  0xa0   :  { %663 = vmatmul.f32.vlgmr.msrb.gmra.mxu1 %v1263_v0  ;;  %686 = vmatmul.f32.vlgmr.msrb.gmra.mxu2 %v1263_v0 }
  0xa1   :  { %709 = vmatmul.f32.vlgmr.msrb.gmra.mxu3 %v1263_v0  ;;  %724 = vmatpush.msra.mxu0 %v172_v40 }
  0xa2   :  { %747 = vmatpush.msra.mxu1 %v173_v41  ;;  %770 = vmatpush.msra.mxu2 %v174_v42 }
  0xa3   :  { %793 = vmatpush.msra.mxu3 %v175_v43  ;;  %725 = vmatpush.msra.mxu0 %v152_v44 }
  0xa4   :  { %748 = vmatpush.msra.mxu1 %v153_v45  ;;  %771 = vmatpush.msra.mxu2 %v154_v46 }
  0xa5   :  { %794 = vmatpush.msra.mxu3 %v155_v47  ;;  %726 = vmatpush.msra.mxu0 %v132_v48 }
  0xa6   :  { %749 = vmatpush.msra.mxu1 %v133_v49  ;;  %772 = vmatpush.msra.mxu2 %v134_v50 }
  0xa7   :  { %795 = vmatpush.msra.mxu3 %v135_v52  ;;  %727 = vmatpush.msra.mxu0 %v112_v53 }
  0xa8   :  { %750 = vmatpush.msra.mxu1 %v113_v54  ;;  %773 = vmatpush.msra.mxu2 %v114_v55 }
  0xa9   :  { %796 = vmatpush.msra.mxu3 %v115_v56  ;;  %643 = vmatmul.f32.gmra.mxu0 %v1419_v51 }
  0xaa   :  { %666 = vmatmul.f32.gmra.mxu1 %v1419_v51  ;;  %689 = vmatmul.f32.gmra.mxu2 %v1419_v51 }
  0xab   :  { %712 = vmatmul.f32.gmra.mxu3 %v1419_v51  ;;  %728 = vmatpush.msra.mxu0 %v92_v57 }
  0xac   :  { %751 = vmatpush.msra.mxu1 %v93_v58  ;;  %774 = vmatpush.msra.mxu2 %v94_v59 }
  0xad   :  { %797 = vmatpush.msra.mxu3 %v95_v60  ;;  %729 = vmatpush.msra.mxu0 %v72_v61 }
  0xae   :  { %752 = vmatpush.msra.mxu1 %v73_v62  ;;  %775 = vmatpush.msra.mxu2 %v74_v63 }
  0xaf   :  { %798 = vmatpush.msra.mxu3 %v75_v1  ;;  %730 = vmatpush.msra.mxu0 %v52_v2 }
  0xb0   :  { %753 = vmatpush.msra.mxu1 %v53_v3  ;;  %776 = vmatpush.msra.mxu2 %v54_v4 }
  0xb1   :  { %799 = vmatpush.msra.mxu3 %v55_v5  ;;  %731 = vmatpush.msra.mxu0 %v32_v6 }
  0xb2   :  { %754 = vmatpush.msra.mxu1 %v33_v7  ;;  %777 = vmatpush.msra.mxu2 %v34_v8 }
  0xb3   :  { %800 = vmatpush.msra.mxu3 %v35_v9  ;;  %732 = vmatmul.f32.vlgmr.msra.gmra.mxu0 %v1263_v0 }
  0xb4   :  { %755 = vmatmul.f32.vlgmr.msra.gmra.mxu1 %v1263_v0  ;;  %778 = vmatmul.f32.vlgmr.msra.gmra.mxu2 %v1263_v0 }
  0xb5   :  { %801 = vmatmul.f32.vlgmr.msra.gmra.mxu3 %v1263_v0 }
  0xbb   :  { %735 = vmatmul.f32.gmra.mxu0 %v1419_v51 }
  0xbc   :  { %758 = vmatmul.f32.gmra.mxu1 %v1419_v51  ;;  %781 = vmatmul.f32.gmra.mxu2 %v1419_v51 }
  0xbd   :  { %804 = vmatmul.f32.gmra.mxu3 %v1419_v51 }
  0xbf   :  { %v365_v10 = vpop.f32.mrf.mxu0  ;;  %v388_v11 = vpop.f32.mrf.mxu1 }
  0xc6   :  { %v411_v12 = vpop.f32.mrf.mxu2  ;;  %v434_v13 = vpop.f32.mrf.mxu3 }
  0xc8   :  { %v1892_v14 = vpop.permute.xlu0 %340 }
  0xc9   :  { %v366_v15 = vadd.f32 %v365_v10, %v1892_v14  ;;  %v389_v16 = vadd.f32 %v388_v11, %v1892_v14  ;;  %v412_v0 = vadd.f32 %v411_v12, %v1892_v14  ;;  %v435_v17 = vadd.f32 %v434_v13, %v1892_v14 }
  0xcb   :  { %808 = vst [vmem:[%s2059_s3] sm:$0xff] %v366_v15 }
  0xcc   :  { %809 = vst [vmem:[%s2059_s3 + $0x8] sm:$0xff] %v389_v16 }
  0xcd   :  { %810 = vst [vmem:[%s2059_s3 + $0x10] sm:$0xff] %v412_v0 }
  0xce   :  { %811 = vst [vmem:[%s2059_s3 + $0x18] sm:$0xff] %v435_v17 }
  0xda   :  { %v368_v51 = vpop.f32.mrf.mxu0  ;;  %v391_v18 = vpop.f32.mrf.mxu1 }
  0xe1   :  { %v414_v19 = vpop.f32.mrf.mxu2  ;;  %v437_v20 = vpop.f32.mrf.mxu3 }
  0xe4   :  { %v457_v21 = vpop.f32.mrf.mxu0  ;;  %v480_v24 = vpop.f32.mrf.mxu1 }
  0xe5   :  { %v1910_v22 = vpop.permute.xlu0 %345  ;;  %v458_v23 = vadd.f32 %v457_v21, %v1892_v14  ;;  %v481_v29 = vadd.f32 %v480_v24, %v1892_v14 }
  0xe6   :  { %v369_v25 = vadd.f32 %v368_v51, %v1910_v22  ;;  %v392_v26 = vadd.f32 %v391_v18, %v1910_v22  ;;  %v415_v27 = vadd.f32 %v414_v19, %v1910_v22  ;;  %v438_v28 = vadd.f32 %v437_v20, %v1910_v22 }
  0xe7   :  { %812 = vst [vmem:[%s2059_s3 + $0x20] sm:$0xff] %v458_v23 }
  0xe8   :  { %829 = vst [vmem:[%s2059_s3 + $0xa0] sm:$0xff] %v369_v25 }
  0xe9   :  { %830 = vst [vmem:[%s2059_s3 + $0xa8] sm:$0xff] %v392_v26 }
  0xea   :  { %831 = vst [vmem:[%s2059_s3 + $0xb0] sm:$0xff] %v415_v27 }
  0xeb   :  { %832 = vst [vmem:[%s2059_s3 + $0xb8] sm:$0xff] %v438_v28  ;;  %v503_v30 = vpop.f32.mrf.mxu2  ;;  %v526_v31 = vpop.f32.mrf.mxu3 }
  0xec   :  { %813 = vst [vmem:[%s2059_s3 + $0x28] sm:$0xff] %v481_v29  ;;  %v504_v32 = vadd.f32 %v503_v30, %v1892_v14  ;;  %v527_v33 = vadd.f32 %v526_v31, %v1892_v14 }
  0xee   :  { %814 = vst [vmem:[%s2059_s3 + $0x30] sm:$0xff] %v504_v32 }
  0xef   :  { %815 = vst [vmem:[%s2059_s3 + $0x38] sm:$0xff] %v527_v33 }
  0xfc   :  { %v460_v34 = vpop.f32.mrf.mxu0 }
  0xfd   :  { %v461_v35 = vadd.f32 %v460_v34, %v1910_v22  ;;  %v483_v36 = vpop.f32.mrf.mxu1 }
  0xfe   :  { %v484_v37 = vadd.f32 %v483_v36, %v1910_v22 }
  0xff   :  { %833 = vst [vmem:[%s2059_s3 + $0xc0] sm:$0xff] %v461_v35 }
 0x100   :  { %834 = vst [vmem:[%s2059_s3 + $0xc8] sm:$0xff] %v484_v37 }
 0x103   :  { %v506_v38 = vpop.f32.mrf.mxu2 }
 0x104   :  { %v507_v39 = vadd.f32 %v506_v38, %v1910_v22  ;;  %v529_v40 = vpop.f32.mrf.mxu3 }
 0x105   :  { %v530_v41 = vadd.f32 %v529_v40, %v1910_v22 }
 0x106   :  { %835 = vst [vmem:[%s2059_s3 + $0xd0] sm:$0xff] %v507_v39  ;;  %v549_v42 = vpop.f32.mrf.mxu0 }
 0x107   :  { %836 = vst [vmem:[%s2059_s3 + $0xd8] sm:$0xff] %v530_v41  ;;  %v550_v43 = vadd.f32 %v549_v42, %v1892_v14  ;;  %v572_v44 = vpop.f32.mrf.mxu1 }
 0x108   :  { %v573_v45 = vadd.f32 %v572_v44, %v1892_v14 }
 0x109   :  { %816 = vst [vmem:[%s2059_s3 + $0x40] sm:$0xff] %v550_v43 }
 0x10a   :  { %817 = vst [vmem:[%s2059_s3 + $0x48] sm:$0xff] %v573_v45 }
 0x10d   :  { %v595_v46 = vpop.f32.mrf.mxu2 }
 0x10e   :  { %v596_v47 = vadd.f32 %v595_v46, %v1892_v14  ;;  %v618_v48 = vpop.f32.mrf.mxu3 }
 0x10f   :  { %v619_v49 = vadd.f32 %v618_v48, %v1892_v14 }
 0x110   :  { %818 = vst [vmem:[%s2059_s3 + $0x50] sm:$0xff] %v596_v47 }
 0x111   :  { %819 = vst [vmem:[%s2059_s3 + $0x58] sm:$0xff] %v619_v49 }
 0x112   :  { %v552_v50 = vpop.f32.mrf.mxu0 }
 0x113   :  { %v553_v52 = vadd.f32 %v552_v50, %v1910_v22  ;;  %v575_v53 = vpop.f32.mrf.mxu1 }
 0x114   :  { %v576_v54 = vadd.f32 %v575_v53, %v1910_v22 }
 0x115   :  { %837 = vst [vmem:[%s2059_s3 + $0xe0] sm:$0xff] %v553_v52 }
 0x116   :  { %838 = vst [vmem:[%s2059_s3 + $0xe8] sm:$0xff] %v576_v54 }
 0x119   :  { %v598_v55 = vpop.f32.mrf.mxu2 }
 0x11a   :  { %v599_v56 = vadd.f32 %v598_v55, %v1910_v22  ;;  %v621_v57 = vpop.f32.mrf.mxu3 }
 0x11b   :  { %v622_v58 = vadd.f32 %v621_v57, %v1910_v22 }
 0x11c   :  { %839 = vst [vmem:[%s2059_s3 + $0xf0] sm:$0xff] %v599_v56  ;;  %v641_v59 = vpop.f32.mrf.mxu0 }
 0x11d   :  { %840 = vst [vmem:[%s2059_s3 + $0xf8] sm:$0xff] %v622_v58  ;;  %v642_v60 = vadd.f32 %v641_v59, %v1892_v14  ;;  %v664_v61 = vpop.f32.mrf.mxu1 }
 0x11e   :  { %v665_v62 = vadd.f32 %v664_v61, %v1892_v14 }
 0x11f   :  { %820 = vst [vmem:[%s2059_s3 + $0x60] sm:$0xff] %v642_v60 }
 0x120   :  { %821 = vst [vmem:[%s2059_s3 + $0x68] sm:$0xff] %v665_v62 }
 0x123   :  { %v687_v63 = vpop.f32.mrf.mxu2 }
 0x124   :  { %v688_v1 = vadd.f32 %v687_v63, %v1892_v14  ;;  %v710_v2 = vpop.f32.mrf.mxu3 }
 0x125   :  { %v711_v3 = vadd.f32 %v710_v2, %v1892_v14 }
 0x126   :  { %822 = vst [vmem:[%s2059_s3 + $0x70] sm:$0xff] %v688_v1  ;;  %v644_v4 = vpop.f32.mrf.mxu0 }
 0x127   :  { %823 = vst [vmem:[%s2059_s3 + $0x78] sm:$0xff] %v711_v3  ;;  %v645_v5 = vadd.f32 %v644_v4, %v1910_v22  ;;  %v667_v6 = vpop.f32.mrf.mxu1 }
 0x128   :  { %v668_v7 = vadd.f32 %v667_v6, %v1910_v22 }
 0x129   :  { %841 = vst [vmem:[%s2059_s3 + $0x100] sm:$0xff] %v645_v5 }
 0x12a   :  { %842 = vst [vmem:[%s2059_s3 + $0x108] sm:$0xff] %v668_v7 }
 0x12d   :  { %v690_v8 = vpop.f32.mrf.mxu2 }
 0x12e   :  { %v691_v9 = vadd.f32 %v690_v8, %v1910_v22  ;;  %v713_v10 = vpop.f32.mrf.mxu3 }
 0x12f   :  { %v714_v11 = vadd.f32 %v713_v10, %v1910_v22 }
 0x130   :  { %843 = vst [vmem:[%s2059_s3 + $0x110] sm:$0xff] %v691_v9  ;;  %v733_v12 = vpop.f32.mrf.mxu0 }
 0x131   :  { %844 = vst [vmem:[%s2059_s3 + $0x118] sm:$0xff] %v714_v11  ;;  %v734_v13 = vadd.f32 %v733_v12, %v1892_v14  ;;  %v756_v15 = vpop.f32.mrf.mxu1 }
 0x132   :  { %v757_v16 = vadd.f32 %v756_v15, %v1892_v14 }
 0x133   :  { %824 = vst [vmem:[%s2059_s3 + $0x80] sm:$0xff] %v734_v13 }
 0x134   :  { %825 = vst [vmem:[%s2059_s3 + $0x88] sm:$0xff] %v757_v16 }
 0x137   :  { %v779_v0 = vpop.f32.mrf.mxu2 }
 0x138   :  { %v780_v17 = vadd.f32 %v779_v0, %v1892_v14  ;;  %v802_v51 = vpop.f32.mrf.mxu3  ;;  %v736_v18 = vpop.f32.mrf.mxu0 }
 0x139   :  { %v803_v19 = vadd.f32 %v802_v51, %v1892_v14  ;;  %v737_v20 = vadd.f32 %v736_v18, %v1910_v22  ;;  %v759_v21 = vpop.f32.mrf.mxu1 }
 0x13a   :  { %826 = vst [vmem:[%s2059_s3 + $0x90] sm:$0xff] %v780_v17  ;;  %v760_v23 = vadd.f32 %v759_v21, %v1910_v22 }
 0x13b   :  { %828 = vst.msk [vmem:[%s2059_s3 + $0x98] sm:$0xff] %vm827_vm0, %v803_v19 }
 0x13c   :  { %845 = vst [vmem:[%s2059_s3 + $0x120] sm:$0xff] %v737_v20 }
 0x13d   :  { %846 = vst [vmem:[%s2059_s3 + $0x128] sm:$0xff] %v760_v23 }
 0x13f   :  { %v782_v14 = vpop.f32.mrf.mxu2 }
 0x140   :  { %v783_v24 = vadd.f32 %v782_v14, %v1910_v22  ;;  %v805_v25 = vpop.f32.mrf.mxu3 }
 0x141   :  { %v806_v26 = vadd.f32 %v805_v25, %v1910_v22 }
 0x142   :  { %847 = vst [vmem:[%s2059_s3 + $0x130] sm:$0xff] %v783_v24 }
 0x143   :  { %848 = vst.msk [vmem:[%s2059_s3 + $0x138] sm:$0xff] %vm827_vm0, %v806_v26 }

// kernel: forward.5
= control target key start
LH: loop header
LB: loop body
LE: loop exit
PB: predicated region body
PF: predicated region fallthrough
CT: control target
= control target key end

     0   :  { %12 = vsyncpa [#allocation3], 0  ;;  %s6489_s0 = inlined_call_operand.vmem [shape: f32[2,19600], index: 0, kind: input, shape index: {}]   ;;  %s6490_s1 = inlined_call_operand.hbm [shape: f32[19600,128], index: 1, kind: input, shape index: {}]   ;;  %s6491_s2 = inlined_call_operand.vmem [shape: f32[1,128], index: 2, kind: input, shape index: {}]   ;;  %s6492_s3 = inlined_call_operand.vmem [shape: f32[128,64], index: 3, kind: input, shape index: {}]   ;;  %s6493_s4 = inlined_call_operand.vmem [shape: f32[1,64], index: 4, kind: input, shape index: {}]   ;;  %s6494_s5 = inlined_call_operand.vmem [shape: f32[64,10], index: 5, kind: input, shape index: {}]   ;;  %s6495_s6 = inlined_call_operand.vmem [shape: f32[1,10], index: 6, kind: input, shape index: {}]   ;;  %s6496_s7 = inlined_call_operand.hbm [shape: f32[2,10], index: 7, kind: output, shape index: {}]  }
   0x1   :  { %13 = vsyncpa [#allocation4], 0  ;;  %s20_s26 = sshll.u32 %s6490_s1, 4  ;;  %s6163_s27 = smov [#allocation2]   ;;  %s21_s26 = int_to_ptr.hbm [resolvable:$true] %s20_s26 }
   0x2   :  { %s22_s28 = sshll.u32 %s6163_s27, 4  ;;  %s6164_s29 = smov 128   ;;  %s23_s28 = int_to_ptr.vmem [resolvable:$true] %s22_s28 }
   0x3   :  { %s6165_s30 = smov 8  }
   0x4   :  { %28 = dma.hbm_to_vmem [thread:$0]  %s21_s26, 313600, %s23_s28, [#allocation3], %s6164_s29, %s6164_s29, %s6165_s30  }
   0x5   :  { %6159 = dma.done.wait [#allocation3], 313600  }
   0x6   :  { %6160 = vsyncadd [#allocation3], 4294653696  ;;  %v97_v0 = vld [vmem:[#allocation2 + $0x78] sm:$0xff]  ;;  %v96_v2 = vld [vmem:[#allocation2 + $0x70] sm:$0xff]  ;;  %vm2922_vm0 = vcmask 130048   ;;  %vm6059_vm1 = vcmask 523264  }
   0x7   :  { %v129_v1 = vld [vmem:[#allocation2 + $0x178] sm:$0xff]  ;;  %2925 = vmatpush.msra.mxu0 %v97_v0  ;;  %v128_v4 = vld [vmem:[#allocation2 + $0x170] sm:$0xff]  ;;  %v95_v6 = vld [vmem:[#allocation2 + $0x68] sm:$0xff]  ;;  %s6166_s13 = smov [#allocation5]   ;;  %vm6083_vm2 = vcmask 74752  }
   0x8   :  { %2965 = vmatpush.msra.mxu2 %v129_v1  ;;  %v113_v3 = vld [vmem:[#allocation2 + $0xf8] sm:$0xff]  ;;  %v112_v7 = vld [vmem:[#allocation2 + $0xf0] sm:$0xff]  ;;  %v127_v8 = vld [vmem:[#allocation2 + $0x168] sm:$0xff] }
   0x9   :  { %v145_v5 = vld [vmem:[#allocation2 + $0x1f8] sm:$0xff]  ;;  %2945 = vmatpush.msra.mxu1 %v113_v3  ;;  %2926 = vmatpush.msra.mxu0 %v96_v2  ;;  %v144_v9 = vld [vmem:[#allocation2 + $0x1f0] sm:$0xff]  ;;  %v111_v10 = vld [vmem:[#allocation2 + $0xe8] sm:$0xff] }
   0xa   :  { %2985 = vmatpush.msra.mxu3 %v145_v5  ;;  %2966 = vmatpush.msra.mxu2 %v128_v4  ;;  %v94_v11 = vld [vmem:[#allocation2 + $0x60] sm:$0xff]  ;;  %v143_v13 = vld [vmem:[#allocation2 + $0x1e8] sm:$0xff]  ;;  %v93_v16 = vld [vmem:[#allocation2 + $0x58] sm:$0xff] }
   0xb   :  { %2946 = vmatpush.msra.mxu1 %v112_v7  ;;  %v126_v12 = vld [vmem:[#allocation2 + $0x160] sm:$0xff]  ;;  %2927 = vmatpush.msra.mxu0 %v95_v6  ;;  %v125_v17 = vld [vmem:[#allocation2 + $0x158] sm:$0xff]  ;;  %v92_v20 = vld [vmem:[#allocation2 + $0x50] sm:$0xff] }
   0xc   :  { %2986 = vmatpush.msra.mxu3 %v144_v9  ;;  %2967 = vmatpush.msra.mxu2 %v127_v8  ;;  %v110_v14 = vld [vmem:[#allocation2 + $0xe0] sm:$0xff]  ;;  %v109_v18 = vld [vmem:[#allocation2 + $0xd8] sm:$0xff]  ;;  %v124_v21 = vld [vmem:[#allocation2 + $0x150] sm:$0xff] }
   0xd   :  { %v142_v15 = vld [vmem:[#allocation2 + $0x1e0] sm:$0xff]  ;;  %2947 = vmatpush.msra.mxu1 %v111_v10  ;;  %2928 = vmatpush.msra.mxu0 %v94_v11  ;;  %v141_v19 = vld [vmem:[#allocation2 + $0x1d8] sm:$0xff]  ;;  %v108_v22 = vld [vmem:[#allocation2 + $0xd0] sm:$0xff] }
   0xe   :  { %2987 = vmatpush.msra.mxu3 %v143_v13  ;;  %2968 = vmatpush.msra.mxu2 %v126_v12  ;;  %v140_v23 = vld [vmem:[#allocation2 + $0x1d0] sm:$0xff]  ;;  %v91_v24 = vld [vmem:[#allocation2 + $0x48] sm:$0xff]  ;;  %v90_v28 = vld [vmem:[#allocation2 + $0x40] sm:$0xff] }
   0xf   :  { %2948 = vmatpush.msra.mxu1 %v110_v14  ;;  %2929 = vmatpush.msra.mxu0 %v93_v16  ;;  %v123_v25 = vld [vmem:[#allocation2 + $0x148] sm:$0xff]  ;;  %v122_v29 = vld [vmem:[#allocation2 + $0x140] sm:$0xff]  ;;  %v89_v32 = vld [vmem:[#allocation2 + $0x38] sm:$0xff] }
  0x10   :  { %2988 = vmatpush.msra.mxu3 %v142_v15  ;;  %2969 = vmatpush.msra.mxu2 %v125_v17  ;;  %v107_v26 = vld [vmem:[#allocation2 + $0xc8] sm:$0xff]  ;;  %v106_v30 = vld [vmem:[#allocation2 + $0xc0] sm:$0xff]  ;;  %v121_v33 = vld [vmem:[#allocation2 + $0x138] sm:$0xff] }
  0x11   :  { %2949 = vmatpush.msra.mxu1 %v109_v18  ;;  %2930 = vmatpush.msra.mxu0 %v92_v20  ;;  %v139_v27 = vld [vmem:[#allocation2 + $0x1c8] sm:$0xff]  ;;  %v138_v31 = vld [vmem:[#allocation2 + $0x1c0] sm:$0xff]  ;;  %v105_v34 = vld [vmem:[#allocation2 + $0xb8] sm:$0xff] }
  0x12   :  { %2989 = vmatpush.msra.mxu3 %v141_v19  ;;  %2970 = vmatpush.msra.mxu2 %v124_v21  ;;  %v137_v35 = vld [vmem:[#allocation2 + $0x1b8] sm:$0xff]  ;;  %v88_v36 = vld [vmem:[#allocation2 + $0x30] sm:$0xff]  ;;  %v87_v40 = vld [vmem:[#allocation2 + $0x28] sm:$0xff] }
  0x13   :  { %2950 = vmatpush.msra.mxu1 %v108_v22  ;;  %2931 = vmatpush.msra.mxu0 %v91_v24  ;;  %v120_v37 = vld [vmem:[#allocation2 + $0x130] sm:$0xff]  ;;  %v119_v41 = vld [vmem:[#allocation2 + $0x128] sm:$0xff]  ;;  %v86_v44 = vld [vmem:[#allocation2 + $0x20] sm:$0xff] }
  0x14   :  { %2990 = vmatpush.msra.mxu3 %v140_v23  ;;  %2971 = vmatpush.msra.mxu2 %v123_v25  ;;  %v104_v38 = vld [vmem:[#allocation2 + $0xb0] sm:$0xff]  ;;  %v103_v42 = vld [vmem:[#allocation2 + $0xa8] sm:$0xff]  ;;  %v118_v45 = vld [vmem:[#allocation2 + $0x120] sm:$0xff] }
  0x15   :  { %2951 = vmatpush.msra.mxu1 %v107_v26  ;;  %2932 = vmatpush.msra.mxu0 %v90_v28  ;;  %v136_v39 = vld [vmem:[#allocation2 + $0x1b0] sm:$0xff]  ;;  %v135_v43 = vld [vmem:[#allocation2 + $0x1a8] sm:$0xff]  ;;  %v102_v46 = vld [vmem:[#allocation2 + $0xa0] sm:$0xff] }
  0x16   :  { %2991 = vmatpush.msra.mxu3 %v139_v27  ;;  %2972 = vmatpush.msra.mxu2 %v122_v29  ;;  %v134_v47 = vld [vmem:[#allocation2 + $0x1a0] sm:$0xff]  ;;  %v85_v48 = vld [vmem:[#allocation2 + $0x18] sm:$0xff]  ;;  %v84_v52 = vld [vmem:[#allocation2 + $0x10] sm:$0xff] }
  0x17   :  { %2952 = vmatpush.msra.mxu1 %v106_v30  ;;  %2933 = vmatpush.msra.mxu0 %v89_v32  ;;  %v117_v49 = vld [vmem:[#allocation2 + $0x118] sm:$0xff]  ;;  %v116_v53 = vld [vmem:[#allocation2 + $0x110] sm:$0xff]  ;;  %v83_v56 = vld [vmem:[#allocation2 + $0x8] sm:$0xff] }
  0x18   :  { %2992 = vmatpush.msra.mxu3 %v138_v31  ;;  %2973 = vmatpush.msra.mxu2 %v121_v33  ;;  %v101_v50 = vld [vmem:[#allocation2 + $0x98] sm:$0xff]  ;;  %v100_v54 = vld [vmem:[#allocation2 + $0x90] sm:$0xff]  ;;  %v115_v57 = vld [vmem:[#allocation2 + $0x108] sm:$0xff] }
  0x19   :  { %2953 = vmatpush.msra.mxu1 %v105_v34  ;;  %2934 = vmatpush.msra.mxu0 %v88_v36  ;;  %v133_v51 = vld [vmem:[#allocation2 + $0x198] sm:$0xff]  ;;  %v132_v55 = vld [vmem:[#allocation2 + $0x190] sm:$0xff]  ;;  %v99_v58 = vld [vmem:[#allocation2 + $0x88] sm:$0xff] }
  0x1a   :  { %2993 = vmatpush.msra.mxu3 %v137_v35  ;;  %2974 = vmatpush.msra.mxu2 %v120_v37  ;;  %v131_v59 = vld [vmem:[#allocation2 + $0x188] sm:$0xff]  ;;  %v82_v60 = vld [vmem:[#allocation2] sm:$0xff]  ;;  %v161_v62 = vld [vmem:[#allocation2 + $0x278] sm:$0xff] }
  0x1b   :  { %2954 = vmatpush.msra.mxu1 %v104_v38  ;;  %2935 = vmatpush.msra.mxu0 %v87_v40  ;;  %v114_v61 = vld [vmem:[#allocation2 + $0x100] sm:$0xff]  ;;  %v193_v63 = vld [vmem:[#allocation2 + $0x378] sm:$0xff]  ;;  %v160_v2 = vld [vmem:[#allocation2 + $0x270] sm:$0xff] }
  0x1c   :  { %2994 = vmatpush.msra.mxu3 %v136_v39  ;;  %2975 = vmatpush.msra.mxu2 %v119_v41  ;;  %v98_v0 = vld [vmem:[#allocation2 + $0x80] sm:$0xff]  ;;  %v177_v3 = vld [vmem:[#allocation2 + $0x2f8] sm:$0xff]  ;;  %v192_v4 = vld [vmem:[#allocation2 + $0x370] sm:$0xff] }
  0x1d   :  { %2955 = vmatpush.msra.mxu1 %v103_v42  ;;  %2936 = vmatpush.msra.mxu0 %v86_v44  ;;  %v130_v1 = vld [vmem:[#allocation2 + $0x180] sm:$0xff]  ;;  %v209_v5 = vld [vmem:[#allocation2 + $0x3f8] sm:$0xff]  ;;  %v159_v6 = vld [vmem:[#allocation2 + $0x268] sm:$0xff] }
  0x1e   :  { %2995 = vmatpush.msra.mxu3 %v135_v43  ;;  %2976 = vmatpush.msra.mxu2 %v118_v45  ;;  %v176_v7 = vld [vmem:[#allocation2 + $0x2f0] sm:$0xff]  ;;  %v191_v8 = vld [vmem:[#allocation2 + $0x368] sm:$0xff]  ;;  %v158_v10 = vld [vmem:[#allocation2 + $0x260] sm:$0xff] }
  0x1f   :  { %2956 = vmatpush.msra.mxu1 %v102_v46  ;;  %2937 = vmatpush.msra.mxu0 %v85_v48  ;;  %v208_v9 = vld [vmem:[#allocation2 + $0x3f0] sm:$0xff]  ;;  %v175_v11 = vld [vmem:[#allocation2 + $0x2e8] sm:$0xff]  ;;  %v190_v12 = vld [vmem:[#allocation2 + $0x360] sm:$0xff] }
  0x20   :  { %2996 = vmatpush.msra.mxu3 %v134_v47  ;;  %2977 = vmatpush.msra.mxu2 %v117_v49  ;;  %v207_v13 = vld [vmem:[#allocation2 + $0x3e8] sm:$0xff]  ;;  %v157_v14 = vld [vmem:[#allocation2 + $0x258] sm:$0xff]  ;;  %v174_v15 = vld [vmem:[#allocation2 + $0x2e0] sm:$0xff] }
  0x21   :  { %2957 = vmatpush.msra.mxu1 %v101_v50  ;;  %2938 = vmatpush.msra.mxu0 %v84_v52  ;;  %v189_v16 = vld [vmem:[#allocation2 + $0x358] sm:$0xff]  ;;  %v206_v17 = vld [vmem:[#allocation2 + $0x3e0] sm:$0xff]  ;;  %v156_v18 = vld [vmem:[#allocation2 + $0x250] sm:$0xff] }
  0x22   :  { %2997 = vmatpush.msra.mxu3 %v133_v51  ;;  %2978 = vmatpush.msra.mxu2 %v116_v53  ;;  %v173_v19 = vld [vmem:[#allocation2 + $0x2d8] sm:$0xff]  ;;  %v188_v20 = vld [vmem:[#allocation2 + $0x350] sm:$0xff]  ;;  %v155_v23 = vld [vmem:[#allocation2 + $0x248] sm:$0xff] }
  0x23   :  { %2958 = vmatpush.msra.mxu1 %v100_v54  ;;  %2939 = vmatpush.msra.mxu0 %v83_v56  ;;  %v205_v21 = vld [vmem:[#allocation2 + $0x3d8] sm:$0xff]  ;;  %v172_v24 = vld [vmem:[#allocation2 + $0x2d0] sm:$0xff]  ;;  %v187_v25 = vld [vmem:[#allocation2 + $0x348] sm:$0xff] }
  0x24   :  { %2998 = vmatpush.msra.mxu3 %v132_v55  ;;  %2979 = vmatpush.msra.mxu2 %v115_v57  ;;  %v43_v22 = vld [vmem:[%s6489_s0] sm:$0xff]  ;;  %v204_v26 = vld [vmem:[#allocation2 + $0x3d0] sm:$0xff]  ;;  %v154_v27 = vld [vmem:[#allocation2 + $0x240] sm:$0xff] }
  0x25   :  { %2959 = vmatpush.msra.mxu1 %v99_v58  ;;  %2940 = vmatpush.msra.mxu0 %v82_v60  ;;  %2575 = vst [vmem:[#allocation1] ss:$4 sm:$0xff] %v43_v22  ;;  %v171_v28 = vld [vmem:[#allocation2 + $0x2c8] sm:$0xff]  ;;  %v186_v29 = vld [vmem:[#allocation2 + $0x340] sm:$0xff]  ;;  %v153_v31 = vld [vmem:[#allocation2 + $0x238] sm:$0xff] }
  0x26   :  { %2999 = vmatpush.msra.mxu3 %v131_v59  ;;  %2980 = vmatpush.msra.mxu2 %v114_v61  ;;  %v203_v30 = vld [vmem:[#allocation2 + $0x3c8] sm:$0xff]  ;;  %v170_v32 = vld [vmem:[#allocation2 + $0x2c0] sm:$0xff]  ;;  %v185_v33 = vld [vmem:[#allocation2 + $0x338] sm:$0xff] }
  0x27   :  { %3005 = vmatpush.msrb.mxu0 %v161_v62  ;;  %2960 = vmatpush.msra.mxu1 %v98_v0  ;;  %v202_v34 = vld [vmem:[#allocation2 + $0x3c0] sm:$0xff]  ;;  %v152_v36 = vld [vmem:[#allocation2 + $0x230] sm:$0xff]  ;;  %v169_v37 = vld [vmem:[#allocation2 + $0x2b8] sm:$0xff] }
  0x28   :  { %3045 = vmatpush.msrb.mxu2 %v193_v63  ;;  %3000 = vmatpush.msra.mxu3 %v130_v1  ;;  %v44_v35 = vld [vmem:[%s6489_s0 + $0x8] sm:$0xff]  ;;  %v184_v38 = vld [vmem:[#allocation2 + $0x330] sm:$0xff]  ;;  %v201_v39 = vld [vmem:[#allocation2 + $0x3b8] sm:$0xff] }
  0x29   :  { %3006 = vmatpush.msrb.mxu0 %v160_v2  ;;  %3025 = vmatpush.msrb.mxu1 %v177_v3  ;;  %2577 = vst [vmem:[#allocation1 + $0x20] ss:$4 sm:$0xff] %v44_v35  ;;  %v151_v40 = vld [vmem:[#allocation2 + $0x228] sm:$0xff]  ;;  %v168_v41 = vld [vmem:[#allocation2 + $0x2b0] sm:$0xff]  ;;  %v150_v44 = vld [vmem:[#allocation2 + $0x220] sm:$0xff] }
  0x2a   :  { %3046 = vmatpush.msrb.mxu2 %v192_v4  ;;  %3065 = vmatpush.msrb.mxu3 %v209_v5  ;;  %v183_v42 = vld [vmem:[#allocation2 + $0x328] sm:$0xff]  ;;  %v200_v43 = vld [vmem:[#allocation2 + $0x3b0] sm:$0xff]  ;;  %v182_v46 = vld [vmem:[#allocation2 + $0x320] sm:$0xff] }
  0x2b   :  { %3007 = vmatpush.msrb.mxu0 %v159_v6  ;;  %3026 = vmatpush.msrb.mxu1 %v176_v7  ;;  %v167_v45 = vld [vmem:[#allocation2 + $0x2a8] sm:$0xff]  ;;  %v149_v48 = vld [vmem:[#allocation2 + $0x218] sm:$0xff]  ;;  %v166_v49 = vld [vmem:[#allocation2 + $0x2a0] sm:$0xff] }
  0x2c   :  { %3047 = vmatpush.msrb.mxu2 %v191_v8  ;;  %3066 = vmatpush.msrb.mxu3 %v208_v9  ;;  %v199_v47 = vld [vmem:[#allocation2 + $0x3a8] sm:$0xff]  ;;  %v181_v50 = vld [vmem:[#allocation2 + $0x318] sm:$0xff]  ;;  %v198_v51 = vld [vmem:[#allocation2 + $0x3a0] sm:$0xff] }
  0x2d   :  { %3008 = vmatpush.msrb.mxu0 %v158_v10  ;;  %3027 = vmatpush.msrb.mxu1 %v175_v11  ;;  %v148_v52 = vld [vmem:[#allocation2 + $0x210] sm:$0xff]  ;;  %v165_v53 = vld [vmem:[#allocation2 + $0x298] sm:$0xff]  ;;  %v147_v56 = vld [vmem:[#allocation2 + $0x208] sm:$0xff] }
  0x2e   :  { %3048 = vmatpush.msrb.mxu2 %v190_v12  ;;  %3067 = vmatpush.msrb.mxu3 %v207_v13  ;;  %v180_v54 = vld [vmem:[#allocation2 + $0x310] sm:$0xff]  ;;  %v197_v55 = vld [vmem:[#allocation2 + $0x398] sm:$0xff]  ;;  %v179_v58 = vld [vmem:[#allocation2 + $0x308] sm:$0xff] }
  0x2f   :  { %3009 = vmatpush.msrb.mxu0 %v157_v14  ;;  %3028 = vmatpush.msrb.mxu1 %v174_v15  ;;  %v164_v57 = vld [vmem:[#allocation2 + $0x290] sm:$0xff]  ;;  %v2580_v60 = vld.sshfl [vmem:[#allocation1 + $0x10] sm:$0xff pattern:$0x73625140]  ;;  %v146_v61 = vld [vmem:[#allocation2 + $0x200] sm:$0xff] }
  0x30   :  { %3049 = vmatpush.msrb.mxu2 %v189_v16  ;;  %3068 = vmatpush.msrb.mxu3 %v206_v17  ;;  %v196_v59 = vld [vmem:[#allocation2 + $0x390] sm:$0xff]  ;;  %v163_v62 = vld [vmem:[#allocation2 + $0x288] sm:$0xff]  ;;  %v178_v63 = vld [vmem:[#allocation2 + $0x300] sm:$0xff] }
  0x31   :  { %3010 = vmatpush.msrb.mxu0 %v156_v18  ;;  %3029 = vmatpush.msrb.mxu1 %v173_v19  ;;  %v195_v0 = vld [vmem:[#allocation2 + $0x388] sm:$0xff]  ;;  %v2578_v1 = vld.sshfl [vmem:[#allocation1] sm:$0xff pattern:$0x73625140]  ;;  %v162_v5 = vld [vmem:[#allocation2 + $0x280] sm:$0xff] }
  0x32   :  { %3050 = vmatpush.msrb.mxu2 %v188_v20  ;;  %3069 = vmatpush.msrb.mxu3 %v205_v21  ;;  %v2581_v2 = vld.sshfl [vmem:[#allocation1 + $0x18] sm:$0xff pattern:$0x73625140]  ;;  %v225_v3 = vld [vmem:[#allocation2 + $0x478] sm:$0xff]  ;;  %v194_v6 = vld [vmem:[#allocation2 + $0x380] sm:$0xff] }
  0x33   :  { %3011 = vmatpush.msrb.mxu0 %v155_v23  ;;  %3030 = vmatpush.msrb.mxu1 %v172_v24  ;;  %v257_v4 = vld [vmem:[#allocation2 + $0x578] sm:$0xff]  ;;  %v2579_v7 = vld.sshfl [vmem:[#allocation1 + $0x8] sm:$0xff pattern:$0x73625140]  ;;  %v224_v8 = vld [vmem:[#allocation2 + $0x470] sm:$0xff] }
  0x34   :  { %3051 = vmatpush.msrb.mxu2 %v187_v25  ;;  %3070 = vmatpush.msrb.mxu3 %v204_v26  ;;  %v241_v9 = vld [vmem:[#allocation2 + $0x4f8] sm:$0xff]  ;;  %v256_v10 = vld [vmem:[#allocation2 + $0x570] sm:$0xff]  ;;  %v223_v12 = vld [vmem:[#allocation2 + $0x468] sm:$0xff] }
  0x35   :  { %3012 = vmatpush.msrb.mxu0 %v154_v27  ;;  %3031 = vmatpush.msrb.mxu1 %v171_v28  ;;  %v273_v11 = vld [vmem:[#allocation2 + $0x5f8] sm:$0xff]  ;;  %v240_v13 = vld [vmem:[#allocation2 + $0x4f0] sm:$0xff]  ;;  %v255_v14 = vld [vmem:[#allocation2 + $0x568] sm:$0xff] }
  0x36   :  { %3052 = vmatpush.msrb.mxu2 %v186_v29  ;;  %3071 = vmatpush.msrb.mxu3 %v203_v30  ;;  %v272_v15 = vld [vmem:[#allocation2 + $0x5f0] sm:$0xff]  ;;  %v2584_v16 = vld.sshfl [vmem:[#allocation1 + $0x30] sm:$0xff pattern:$0x73625140]  ;;  %v222_v18 = vld [vmem:[#allocation2 + $0x460] sm:$0xff] }
  0x37   :  { %3013 = vmatpush.msrb.mxu0 %v153_v31  ;;  %3032 = vmatpush.msrb.mxu1 %v170_v32  ;;  %v45_v17 = vld [vmem:[%s6489_s0 + $0x10] sm:$0xff]  ;;  %v254_v20 = vld [vmem:[#allocation2 + $0x560] sm:$0xff]  ;;  %v2582_v22 = vld.sshfl [vmem:[#allocation1 + $0x20] sm:$0xff pattern:$0x73625140] }
  0x38   :  { %3053 = vmatpush.msrb.mxu2 %v185_v33  ;;  %3072 = vmatpush.msrb.mxu3 %v202_v34  ;;  %v239_v19 = vld [vmem:[#allocation2 + $0x4e8] sm:$0xff]  ;;  %2586 = vst [vmem:[#allocation1] ss:$4 sm:$0xff] %v45_v17  ;;  %v2585_v23 = vld.sshfl [vmem:[#allocation1 + $0x38] sm:$0xff pattern:$0x73625140] }
  0x39   :  { %3014 = vmatpush.msrb.mxu0 %v152_v36  ;;  %3033 = vmatpush.msrb.mxu1 %v169_v37  ;;  %v271_v21 = vld [vmem:[#allocation2 + $0x5e8] sm:$0xff]  ;;  %v221_v24 = vld [vmem:[#allocation2 + $0x458] sm:$0xff]  ;;  %v238_v25 = vld [vmem:[#allocation2 + $0x4e0] sm:$0xff] }
  0x3a   :  { %3054 = vmatpush.msrb.mxu2 %v184_v38  ;;  %3073 = vmatpush.msrb.mxu3 %v201_v39  ;;  %v253_v26 = vld [vmem:[#allocation2 + $0x558] sm:$0xff]  ;;  %v270_v27 = vld [vmem:[#allocation2 + $0x5e0] sm:$0xff]  ;;  %v220_v29 = vld [vmem:[#allocation2 + $0x450] sm:$0xff] }
  0x3b   :  { %3015 = vmatpush.msrb.mxu0 %v151_v40  ;;  %3034 = vmatpush.msrb.mxu1 %v168_v41  ;;  %v2583_v28 = vld.sshfl [vmem:[#allocation1 + $0x28] sm:$0xff pattern:$0x73625140]  ;;  %v237_v30 = vld [vmem:[#allocation2 + $0x4d8] sm:$0xff]  ;;  %v252_v31 = vld [vmem:[#allocation2 + $0x550] sm:$0xff] }
  0x3c   :  { %3055 = vmatpush.msrb.mxu2 %v183_v42  ;;  %3074 = vmatpush.msrb.mxu3 %v200_v43  ;;  %v269_v32 = vld [vmem:[#allocation2 + $0x5d8] sm:$0xff]  ;;  %v219_v33 = vld [vmem:[#allocation2 + $0x448] sm:$0xff]  ;;  %v236_v34 = vld [vmem:[#allocation2 + $0x4d0] sm:$0xff] }
  0x3d   :  { %3016 = vmatpush.msrb.mxu0 %v150_v44  ;;  %3035 = vmatpush.msrb.mxu1 %v167_v45  ;;  %v251_v35 = vld [vmem:[#allocation2 + $0x548] sm:$0xff]  ;;  %v268_v36 = vld [vmem:[#allocation2 + $0x5d0] sm:$0xff]  ;;  %v218_v37 = vld [vmem:[#allocation2 + $0x440] sm:$0xff] }
  0x3e   :  { %3056 = vmatpush.msrb.mxu2 %v182_v46  ;;  %3075 = vmatpush.msrb.mxu3 %v199_v47  ;;  %v235_v38 = vld [vmem:[#allocation2 + $0x4c8] sm:$0xff]  ;;  %v250_v39 = vld [vmem:[#allocation2 + $0x540] sm:$0xff]  ;;  %v217_v41 = vld [vmem:[#allocation2 + $0x438] sm:$0xff] }
  0x3f   :  { %3017 = vmatpush.msrb.mxu0 %v149_v48  ;;  %3036 = vmatpush.msrb.mxu1 %v166_v49  ;;  %v267_v40 = vld [vmem:[#allocation2 + $0x5c8] sm:$0xff]  ;;  %v234_v42 = vld [vmem:[#allocation2 + $0x4c0] sm:$0xff]  ;;  %v249_v43 = vld [vmem:[#allocation2 + $0x538] sm:$0xff] }
  0x40   :  { %3057 = vmatpush.msrb.mxu2 %v181_v50  ;;  %3076 = vmatpush.msrb.mxu3 %v198_v51  ;;  %v266_v44 = vld [vmem:[#allocation2 + $0x5c0] sm:$0xff]  ;;  %v216_v45 = vld [vmem:[#allocation2 + $0x430] sm:$0xff]  ;;  %v233_v46 = vld [vmem:[#allocation2 + $0x4b8] sm:$0xff] }
  0x41   :  { %3018 = vmatpush.msrb.mxu0 %v148_v52  ;;  %3037 = vmatpush.msrb.mxu1 %v165_v53  ;;  %v248_v47 = vld [vmem:[#allocation2 + $0x530] sm:$0xff]  ;;  %v265_v48 = vld [vmem:[#allocation2 + $0x5b8] sm:$0xff]  ;;  %v215_v49 = vld [vmem:[#allocation2 + $0x428] sm:$0xff] }
  0x42   :  { %3058 = vmatpush.msrb.mxu2 %v180_v54  ;;  %3077 = vmatpush.msrb.mxu3 %v197_v55  ;;  %v232_v50 = vld [vmem:[#allocation2 + $0x4b0] sm:$0xff]  ;;  %v247_v51 = vld [vmem:[#allocation2 + $0x528] sm:$0xff]  ;;  %v214_v53 = vld [vmem:[#allocation2 + $0x420] sm:$0xff] }
  0x43   :  { %3019 = vmatpush.msrb.mxu0 %v147_v56  ;;  %3038 = vmatpush.msrb.mxu1 %v164_v57  ;;  %v264_v52 = vld [vmem:[#allocation2 + $0x5b0] sm:$0xff]  ;;  %v231_v54 = vld [vmem:[#allocation2 + $0x4a8] sm:$0xff]  ;;  %v246_v55 = vld [vmem:[#allocation2 + $0x520] sm:$0xff] }
  0x44   :  { %3059 = vmatpush.msrb.mxu2 %v179_v58  ;;  %3078 = vmatpush.msrb.mxu3 %v196_v59  ;;  %v263_v56 = vld [vmem:[#allocation2 + $0x5a8] sm:$0xff]  ;;  %v213_v57 = vld [vmem:[#allocation2 + $0x418] sm:$0xff]  ;;  %v230_v58 = vld [vmem:[#allocation2 + $0x4a0] sm:$0xff] }
  0x45   :  { %2981 = vmatmul.f32.vlgmr.msra.gmra.mxu2 %v2580_v60  ;;  %3020 = vmatpush.msrb.mxu0 %v146_v61  ;;  %v245_v59 = vld [vmem:[#allocation2 + $0x518] sm:$0xff]  ;;  %v262_v60 = vld [vmem:[#allocation2 + $0x5a0] sm:$0xff]  ;;  %v212_v61 = vld [vmem:[#allocation2 + $0x410] sm:$0xff] }
  0x46   :  { %3039 = vmatpush.msrb.mxu1 %v163_v62  ;;  %3060 = vmatpush.msrb.mxu2 %v178_v63  ;;  %v229_v62 = vld [vmem:[#allocation2 + $0x498] sm:$0xff]  ;;  %v244_v63 = vld [vmem:[#allocation2 + $0x510] sm:$0xff] }
  0x47   :  { %3079 = vmatpush.msrb.mxu3 %v195_v0  ;;  %2941 = vmatmul.f32.vlgmr.msra.gmra.mxu0 %v2578_v1  ;;  %v261_v0 = vld [vmem:[#allocation2 + $0x598] sm:$0xff]  ;;  %v211_v1 = vld [vmem:[#allocation2 + $0x408] sm:$0xff]  ;;  %v2591_v17 = vld.sshfl [vmem:[#allocation1 + $0x18] sm:$0xff pattern:$0x73625140] }
  0x48   :  { %3001 = vmatmul.f32.vlgmr.msra.gmra.mxu3 %v2581_v2  ;;  %3085 = vmatpush.msra.mxu0 %v225_v3  ;;  %v228_v2 = vld [vmem:[#allocation2 + $0x490] sm:$0xff] }
  0x49   :  { %3125 = vmatpush.msra.mxu2 %v257_v4  ;;  %3040 = vmatpush.msrb.mxu1 %v162_v5  ;;  %v46_v3 = vld [vmem:[%s6489_s0 + $0x18] sm:$0xff]  ;;  %v243_v4 = vld [vmem:[#allocation2 + $0x508] sm:$0xff] }
  0x4a   :  { %3080 = vmatpush.msrb.mxu3 %v194_v6  ;;  %2961 = vmatmul.f32.vlgmr.msra.gmra.mxu1 %v2579_v7  ;;  %v260_v5 = vld [vmem:[#allocation2 + $0x590] sm:$0xff]  ;;  %2587 = vst [vmem:[#allocation1 + $0x20] ss:$4 sm:$0xff] %v46_v3  ;;  %v210_v6 = vld [vmem:[#allocation2 + $0x400] sm:$0xff]  ;;  %v227_v7 = vld [vmem:[#allocation2 + $0x488] sm:$0xff] }
  0x4b   :  { %3086 = vmatpush.msra.mxu0 %v224_v8  ;;  %3105 = vmatpush.msra.mxu1 %v241_v9  ;;  %v242_v8 = vld [vmem:[#allocation2 + $0x500] sm:$0xff]  ;;  %v259_v9 = vld [vmem:[#allocation2 + $0x588] sm:$0xff]  ;;  %v293_v3 = vld [vmem:[#allocation2 + $0x698] sm:$0xff] }
  0x4c   :  { %3126 = vmatpush.msra.mxu2 %v256_v10  ;;  %3145 = vmatpush.msra.mxu3 %v273_v11  ;;  %v2588_v10 = vld.sshfl [vmem:[#allocation1] sm:$0xff pattern:$0x73625140]  ;;  %v2590_v11 = vld.sshfl [vmem:[#allocation1 + $0x10] sm:$0xff pattern:$0x73625140] }
  0x4d   :  { %3087 = vmatpush.msra.mxu0 %v223_v12  ;;  %3106 = vmatpush.msra.mxu1 %v240_v13  ;;  %v289_v12 = vld [vmem:[#allocation2 + $0x678] sm:$0xff] }
  0x4e   :  { %3127 = vmatpush.msra.mxu2 %v255_v14  ;;  %3146 = vmatpush.msra.mxu3 %v272_v15  ;;  %v321_v13 = vld [vmem:[#allocation2 + $0x778] sm:$0xff]  ;;  %v226_v14 = vld [vmem:[#allocation2 + $0x480] sm:$0xff] }
  0x4f   :  { %3061 = vmatmul.f32.vlgmr.msrb.gmra.mxu2 %v2584_v16  ;;  %3088 = vmatpush.msra.mxu0 %v222_v18  ;;  %v258_v15 = vld [vmem:[#allocation2 + $0x580] sm:$0xff]  ;;  %v288_v18 = vld [vmem:[#allocation2 + $0x670] sm:$0xff] }
  0x50   :  { %3107 = vmatpush.msra.mxu1 %v239_v19  ;;  %3128 = vmatpush.msra.mxu2 %v254_v20  ;;  %v2589_v16 = vld.sshfl [vmem:[#allocation1 + $0x8] sm:$0xff pattern:$0x73625140]  ;;  %v305_v19 = vld [vmem:[#allocation2 + $0x6f8] sm:$0xff]  ;;  %v320_v20 = vld [vmem:[#allocation2 + $0x770] sm:$0xff] }
  0x51   :  { %3147 = vmatpush.msra.mxu3 %v271_v21  ;;  %3021 = vmatmul.f32.vlgmr.msrb.gmra.mxu0 %v2582_v22  ;;  %v337_v21 = vld [vmem:[#allocation2 + $0x7f8] sm:$0xff]  ;;  %v287_v22 = vld [vmem:[#allocation2 + $0x668] sm:$0xff] }
  0x52   :  { %3081 = vmatmul.f32.vlgmr.msrb.gmra.mxu3 %v2585_v23  ;;  %3089 = vmatpush.msra.mxu0 %v221_v24  ;;  %v304_v23 = vld [vmem:[#allocation2 + $0x6f0] sm:$0xff]  ;;  %v319_v24 = vld [vmem:[#allocation2 + $0x768] sm:$0xff] }
  0x53   :  { %3108 = vmatpush.msra.mxu1 %v238_v25  ;;  %3129 = vmatpush.msra.mxu2 %v253_v26  ;;  %v336_v25 = vld [vmem:[#allocation2 + $0x7f0] sm:$0xff]  ;;  %v286_v26 = vld [vmem:[#allocation2 + $0x660] sm:$0xff] }
  0x54   :  { %3148 = vmatpush.msra.mxu3 %v270_v27  ;;  %3041 = vmatmul.f32.vlgmr.msrb.gmra.mxu1 %v2583_v28  ;;  %v303_v27 = vld [vmem:[#allocation2 + $0x6e8] sm:$0xff]  ;;  %v318_v28 = vld [vmem:[#allocation2 + $0x760] sm:$0xff] }
  0x55   :  { %3090 = vmatpush.msra.mxu0 %v220_v29  ;;  %3109 = vmatpush.msra.mxu1 %v237_v30  ;;  %v335_v29 = vld [vmem:[#allocation2 + $0x7e8] sm:$0xff]  ;;  %v285_v30 = vld [vmem:[#allocation2 + $0x658] sm:$0xff] }
  0x56   :  { %3130 = vmatpush.msra.mxu2 %v252_v31  ;;  %3149 = vmatpush.msra.mxu3 %v269_v32  ;;  %v302_v31 = vld [vmem:[#allocation2 + $0x6e0] sm:$0xff]  ;;  %v317_v32 = vld [vmem:[#allocation2 + $0x758] sm:$0xff] }
  0x57   :  { %3091 = vmatpush.msra.mxu0 %v219_v33  ;;  %3110 = vmatpush.msra.mxu1 %v236_v34  ;;  %v334_v33 = vld [vmem:[#allocation2 + $0x7e0] sm:$0xff]  ;;  %v284_v34 = vld [vmem:[#allocation2 + $0x650] sm:$0xff] }
  0x58   :  { %3131 = vmatpush.msra.mxu2 %v251_v35  ;;  %3150 = vmatpush.msra.mxu3 %v268_v36  ;;  %v301_v35 = vld [vmem:[#allocation2 + $0x6d8] sm:$0xff]  ;;  %v316_v36 = vld [vmem:[#allocation2 + $0x750] sm:$0xff] }
  0x59   :  { %3092 = vmatpush.msra.mxu0 %v218_v37  ;;  %3111 = vmatpush.msra.mxu1 %v235_v38  ;;  %v333_v37 = vld [vmem:[#allocation2 + $0x7d8] sm:$0xff]  ;;  %v283_v38 = vld [vmem:[#allocation2 + $0x648] sm:$0xff] }
  0x5a   :  { %3132 = vmatpush.msra.mxu2 %v250_v39  ;;  %3151 = vmatpush.msra.mxu3 %v267_v40  ;;  %v300_v39 = vld [vmem:[#allocation2 + $0x6d0] sm:$0xff]  ;;  %v315_v40 = vld [vmem:[#allocation2 + $0x748] sm:$0xff] }
  0x5b   :  { %3093 = vmatpush.msra.mxu0 %v217_v41  ;;  %3112 = vmatpush.msra.mxu1 %v234_v42  ;;  %v332_v41 = vld [vmem:[#allocation2 + $0x7d0] sm:$0xff]  ;;  %v282_v42 = vld [vmem:[#allocation2 + $0x640] sm:$0xff] }
  0x5c   :  { %3133 = vmatpush.msra.mxu2 %v249_v43  ;;  %3152 = vmatpush.msra.mxu3 %v266_v44  ;;  %v299_v43 = vld [vmem:[#allocation2 + $0x6c8] sm:$0xff]  ;;  %v314_v44 = vld [vmem:[#allocation2 + $0x740] sm:$0xff] }
  0x5d   :  { %3094 = vmatpush.msra.mxu0 %v216_v45  ;;  %3113 = vmatpush.msra.mxu1 %v233_v46  ;;  %v331_v45 = vld [vmem:[#allocation2 + $0x7c8] sm:$0xff]  ;;  %v281_v46 = vld [vmem:[#allocation2 + $0x638] sm:$0xff] }
  0x5e   :  { %3134 = vmatpush.msra.mxu2 %v248_v47  ;;  %3153 = vmatpush.msra.mxu3 %v265_v48  ;;  %v298_v47 = vld [vmem:[#allocation2 + $0x6c0] sm:$0xff]  ;;  %v313_v48 = vld [vmem:[#allocation2 + $0x738] sm:$0xff] }
  0x5f   :  { %3095 = vmatpush.msra.mxu0 %v215_v49  ;;  %3114 = vmatpush.msra.mxu1 %v232_v50  ;;  %v330_v49 = vld [vmem:[#allocation2 + $0x7c0] sm:$0xff]  ;;  %v280_v50 = vld [vmem:[#allocation2 + $0x630] sm:$0xff] }
  0x60   :  { %3135 = vmatpush.msra.mxu2 %v247_v51  ;;  %3154 = vmatpush.msra.mxu3 %v264_v52  ;;  %v297_v51 = vld [vmem:[#allocation2 + $0x6b8] sm:$0xff]  ;;  %v312_v52 = vld [vmem:[#allocation2 + $0x730] sm:$0xff] }
  0x61   :  { %3096 = vmatpush.msra.mxu0 %v214_v53  ;;  %3115 = vmatpush.msra.mxu1 %v231_v54  ;;  %v329_v53 = vld [vmem:[#allocation2 + $0x7b8] sm:$0xff]  ;;  %v279_v54 = vld [vmem:[#allocation2 + $0x628] sm:$0xff] }
  0x62   :  { %3136 = vmatpush.msra.mxu2 %v246_v55  ;;  %3155 = vmatpush.msra.mxu3 %v263_v56  ;;  %v296_v55 = vld [vmem:[#allocation2 + $0x6b0] sm:$0xff]  ;;  %v311_v56 = vld [vmem:[#allocation2 + $0x728] sm:$0xff] }
  0x63   :  { %3097 = vmatpush.msra.mxu0 %v213_v57  ;;  %3116 = vmatpush.msra.mxu1 %v230_v58  ;;  %v328_v57 = vld [vmem:[#allocation2 + $0x7b0] sm:$0xff]  ;;  %v278_v58 = vld [vmem:[#allocation2 + $0x620] sm:$0xff] }
  0x64   :  { %3137 = vmatpush.msra.mxu2 %v245_v59  ;;  %3156 = vmatpush.msra.mxu3 %v262_v60  ;;  %v295_v59 = vld [vmem:[#allocation2 + $0x6a8] sm:$0xff]  ;;  %v310_v60 = vld [vmem:[#allocation2 + $0x720] sm:$0xff] }
  0x65   :  { %3098 = vmatpush.msra.mxu0 %v212_v61  ;;  %3117 = vmatpush.msra.mxu1 %v229_v62  ;;  %v327_v61 = vld [vmem:[#allocation2 + $0x7a8] sm:$0xff]  ;;  %v277_v62 = vld [vmem:[#allocation2 + $0x618] sm:$0xff] }
  0x66   :  { %3138 = vmatpush.msra.mxu2 %v244_v63  ;;  %3157 = vmatpush.msra.mxu3 %v261_v0  ;;  %v294_v63 = vld [vmem:[#allocation2 + $0x6a0] sm:$0xff]  ;;  %v309_v0 = vld [vmem:[#allocation2 + $0x718] sm:$0xff] }
  0x67   :  { %3099 = vmatpush.msra.mxu0 %v211_v1  ;;  %3118 = vmatpush.msra.mxu1 %v228_v2  ;;  %v326_v1 = vld [vmem:[#allocation2 + $0x7a0] sm:$0xff]  ;;  %v276_v2 = vld [vmem:[#allocation2 + $0x610] sm:$0xff] }
  0x68   :  { %3139 = vmatpush.msra.mxu2 %v243_v4  ;;  %3158 = vmatpush.msra.mxu3 %v260_v5  ;;  %v308_v4 = vld [vmem:[#allocation2 + $0x710] sm:$0xff]  ;;  %v325_v5 = vld [vmem:[#allocation2 + $0x798] sm:$0xff] }
  0x69   :  { %3100 = vmatpush.msra.mxu0 %v210_v6  ;;  %3119 = vmatpush.msra.mxu1 %v227_v7  ;;  %v275_v6 = vld [vmem:[#allocation2 + $0x608] sm:$0xff]  ;;  %v292_v7 = vld [vmem:[#allocation2 + $0x690] sm:$0xff] }
  0x6a   :  { %3140 = vmatpush.msra.mxu2 %v242_v8  ;;  %3159 = vmatpush.msra.mxu3 %v259_v9  ;;  %v47_v8 = vld [vmem:[%s6489_s0 + $0x20] sm:$0xff]  ;;  %v307_v9 = vld [vmem:[#allocation2 + $0x708] sm:$0xff] }
  0x6b   :  { %3101 = vmatmul.f32.vlgmr.msra.gmra.mxu0 %v2588_v10  ;;  %3141 = vmatmul.f32.vlgmr.msra.gmra.mxu2 %v2590_v11  ;;  %v324_v10 = vld [vmem:[#allocation2 + $0x790] sm:$0xff]  ;;  %2596 = vst [vmem:[#allocation1] ss:$4 sm:$0xff] %v47_v8  ;;  %v274_v11 = vld [vmem:[#allocation2 + $0x600] sm:$0xff]  ;;  %v357_v8 = vld [vmem:[#allocation2 + $0x898] sm:$0xff] }
  0x6c   :  { %3165 = vmatpush.msrb.mxu0 %v289_v12  ;;  %3205 = vmatpush.msrb.mxu2 %v321_v13  ;;  %v291_v12 = vld [vmem:[#allocation2 + $0x688] sm:$0xff]  ;;  %v306_v13 = vld [vmem:[#allocation2 + $0x700] sm:$0xff] }
  0x6d   :  { %3120 = vmatpush.msra.mxu1 %v226_v14  ;;  %3160 = vmatpush.msra.mxu3 %v258_v15  ;;  %v323_v14 = vld [vmem:[#allocation2 + $0x788] sm:$0xff]  ;;  %v2592_v15 = vld.sshfl [vmem:[#allocation1 + $0x20] sm:$0xff pattern:$0x73625140] }
  0x6e   :  { %3121 = vmatmul.f32.vlgmr.msra.gmra.mxu1 %v2589_v16  ;;  %3161 = vmatmul.f32.vlgmr.msra.gmra.mxu3 %v2591_v17  ;;  %v2594_v16 = vld.sshfl [vmem:[#allocation1 + $0x30] sm:$0xff pattern:$0x73625140]  ;;  %v353_v17 = vld [vmem:[#allocation2 + $0x878] sm:$0xff] }
  0x6f   :  { %3166 = vmatpush.msrb.mxu0 %v288_v18  ;;  %3185 = vmatpush.msrb.mxu1 %v305_v19  ;;  %v385_v18 = vld [vmem:[#allocation2 + $0x978] sm:$0xff]  ;;  %v290_v19 = vld [vmem:[#allocation2 + $0x680] sm:$0xff] }
  0x70   :  { %3206 = vmatpush.msrb.mxu2 %v320_v20  ;;  %3225 = vmatpush.msrb.mxu3 %v337_v21  ;;  %v322_v20 = vld [vmem:[#allocation2 + $0x780] sm:$0xff] }
  0x71   :  { %3167 = vmatpush.msrb.mxu0 %v287_v22  ;;  %3186 = vmatpush.msrb.mxu1 %v304_v23  ;;  %v2593_v21 = vld.sshfl [vmem:[#allocation1 + $0x28] sm:$0xff pattern:$0x73625140]  ;;  %v2595_v22 = vld.sshfl [vmem:[#allocation1 + $0x38] sm:$0xff pattern:$0x73625140] }
  0x72   :  { %3207 = vmatpush.msrb.mxu2 %v319_v24  ;;  %3226 = vmatpush.msrb.mxu3 %v336_v25  ;;  %v352_v23 = vld [vmem:[#allocation2 + $0x870] sm:$0xff]  ;;  %v369_v24 = vld [vmem:[#allocation2 + $0x8f8] sm:$0xff] }
  0x73   :  { %3168 = vmatpush.msrb.mxu0 %v286_v26  ;;  %3187 = vmatpush.msrb.mxu1 %v303_v27  ;;  %v384_v25 = vld [vmem:[#allocation2 + $0x970] sm:$0xff]  ;;  %v401_v26 = vld [vmem:[#allocation2 + $0x9f8] sm:$0xff]  ;;  %v351_v27 = vld [vmem:[#allocation2 + $0x868] sm:$0xff] }
  0x74   :  { %3208 = vmatpush.msrb.mxu2 %v318_v28  ;;  %3227 = vmatpush.msrb.mxu3 %v335_v29  ;;  %v368_v28 = vld [vmem:[#allocation2 + $0x8f0] sm:$0xff]  ;;  %v383_v29 = vld [vmem:[#allocation2 + $0x968] sm:$0xff] }
  0x75   :  { %3169 = vmatpush.msrb.mxu0 %v285_v30  ;;  %3188 = vmatpush.msrb.mxu1 %v302_v31  ;;  %v400_v30 = vld [vmem:[#allocation2 + $0x9f0] sm:$0xff]  ;;  %v350_v31 = vld [vmem:[#allocation2 + $0x860] sm:$0xff] }
  0x76   :  { %3209 = vmatpush.msrb.mxu2 %v317_v32  ;;  %3228 = vmatpush.msrb.mxu3 %v334_v33  ;;  %v367_v32 = vld [vmem:[#allocation2 + $0x8e8] sm:$0xff]  ;;  %v382_v33 = vld [vmem:[#allocation2 + $0x960] sm:$0xff] }
  0x77   :  { %3170 = vmatpush.msrb.mxu0 %v284_v34  ;;  %3189 = vmatpush.msrb.mxu1 %v301_v35  ;;  %v399_v34 = vld [vmem:[#allocation2 + $0x9e8] sm:$0xff]  ;;  %v349_v35 = vld [vmem:[#allocation2 + $0x858] sm:$0xff] }
  0x78   :  { %3210 = vmatpush.msrb.mxu2 %v316_v36  ;;  %3229 = vmatpush.msrb.mxu3 %v333_v37  ;;  %v366_v36 = vld [vmem:[#allocation2 + $0x8e0] sm:$0xff]  ;;  %v381_v37 = vld [vmem:[#allocation2 + $0x958] sm:$0xff] }
  0x79   :  { %3171 = vmatpush.msrb.mxu0 %v283_v38  ;;  %3190 = vmatpush.msrb.mxu1 %v300_v39  ;;  %v398_v38 = vld [vmem:[#allocation2 + $0x9e0] sm:$0xff]  ;;  %v348_v39 = vld [vmem:[#allocation2 + $0x850] sm:$0xff] }
  0x7a   :  { %3211 = vmatpush.msrb.mxu2 %v315_v40  ;;  %3230 = vmatpush.msrb.mxu3 %v332_v41  ;;  %v365_v40 = vld [vmem:[#allocation2 + $0x8d8] sm:$0xff]  ;;  %v380_v41 = vld [vmem:[#allocation2 + $0x950] sm:$0xff] }
  0x7b   :  { %3172 = vmatpush.msrb.mxu0 %v282_v42  ;;  %3191 = vmatpush.msrb.mxu1 %v299_v43  ;;  %v397_v42 = vld [vmem:[#allocation2 + $0x9d8] sm:$0xff]  ;;  %v347_v43 = vld [vmem:[#allocation2 + $0x848] sm:$0xff] }
  0x7c   :  { %3212 = vmatpush.msrb.mxu2 %v314_v44  ;;  %3231 = vmatpush.msrb.mxu3 %v331_v45  ;;  %v364_v44 = vld [vmem:[#allocation2 + $0x8d0] sm:$0xff]  ;;  %v379_v45 = vld [vmem:[#allocation2 + $0x948] sm:$0xff] }
  0x7d   :  { %3173 = vmatpush.msrb.mxu0 %v281_v46  ;;  %3192 = vmatpush.msrb.mxu1 %v298_v47  ;;  %v396_v46 = vld [vmem:[#allocation2 + $0x9d0] sm:$0xff]  ;;  %v346_v47 = vld [vmem:[#allocation2 + $0x840] sm:$0xff] }
  0x7e   :  { %3213 = vmatpush.msrb.mxu2 %v313_v48  ;;  %3232 = vmatpush.msrb.mxu3 %v330_v49  ;;  %v363_v48 = vld [vmem:[#allocation2 + $0x8c8] sm:$0xff]  ;;  %v378_v49 = vld [vmem:[#allocation2 + $0x940] sm:$0xff] }
  0x7f   :  { %3174 = vmatpush.msrb.mxu0 %v280_v50  ;;  %3193 = vmatpush.msrb.mxu1 %v297_v51  ;;  %v395_v50 = vld [vmem:[#allocation2 + $0x9c8] sm:$0xff]  ;;  %v345_v51 = vld [vmem:[#allocation2 + $0x838] sm:$0xff] }
  0x80   :  { %3214 = vmatpush.msrb.mxu2 %v312_v52  ;;  %3233 = vmatpush.msrb.mxu3 %v329_v53  ;;  %v362_v52 = vld [vmem:[#allocation2 + $0x8c0] sm:$0xff]  ;;  %v377_v53 = vld [vmem:[#allocation2 + $0x938] sm:$0xff] }
  0x81   :  { %3175 = vmatpush.msrb.mxu0 %v279_v54  ;;  %3194 = vmatpush.msrb.mxu1 %v296_v55  ;;  %v394_v54 = vld [vmem:[#allocation2 + $0x9c0] sm:$0xff]  ;;  %v344_v55 = vld [vmem:[#allocation2 + $0x830] sm:$0xff] }
  0x82   :  { %3215 = vmatpush.msrb.mxu2 %v311_v56  ;;  %3234 = vmatpush.msrb.mxu3 %v328_v57  ;;  %v361_v56 = vld [vmem:[#allocation2 + $0x8b8] sm:$0xff]  ;;  %v376_v57 = vld [vmem:[#allocation2 + $0x930] sm:$0xff] }
  0x83   :  { %3176 = vmatpush.msrb.mxu0 %v278_v58  ;;  %3195 = vmatpush.msrb.mxu1 %v295_v59  ;;  %v393_v58 = vld [vmem:[#allocation2 + $0x9b8] sm:$0xff]  ;;  %v343_v59 = vld [vmem:[#allocation2 + $0x828] sm:$0xff] }
  0x84   :  { %3216 = vmatpush.msrb.mxu2 %v310_v60  ;;  %3235 = vmatpush.msrb.mxu3 %v327_v61  ;;  %v360_v60 = vld [vmem:[#allocation2 + $0x8b0] sm:$0xff]  ;;  %v375_v61 = vld [vmem:[#allocation2 + $0x928] sm:$0xff] }
  0x85   :  { %3177 = vmatpush.msrb.mxu0 %v277_v62  ;;  %3196 = vmatpush.msrb.mxu1 %v294_v63  ;;  %v392_v62 = vld [vmem:[#allocation2 + $0x9b0] sm:$0xff]  ;;  %v342_v63 = vld [vmem:[#allocation2 + $0x820] sm:$0xff] }
  0x86   :  { %3217 = vmatpush.msrb.mxu2 %v309_v0  ;;  %3236 = vmatpush.msrb.mxu3 %v326_v1  ;;  %v359_v0 = vld [vmem:[#allocation2 + $0x8a8] sm:$0xff]  ;;  %v374_v1 = vld [vmem:[#allocation2 + $0x920] sm:$0xff] }
  0x87   :  { %3178 = vmatpush.msrb.mxu0 %v276_v2  ;;  %3197 = vmatpush.msrb.mxu1 %v293_v3  ;;  %v391_v2 = vld [vmem:[#allocation2 + $0x9a8] sm:$0xff]  ;;  %v341_v3 = vld [vmem:[#allocation2 + $0x818] sm:$0xff] }
  0x88   :  { %3218 = vmatpush.msrb.mxu2 %v308_v4  ;;  %3237 = vmatpush.msrb.mxu3 %v325_v5  ;;  %v358_v4 = vld [vmem:[#allocation2 + $0x8a0] sm:$0xff]  ;;  %v373_v5 = vld [vmem:[#allocation2 + $0x918] sm:$0xff] }
  0x89   :  { %3179 = vmatpush.msrb.mxu0 %v275_v6  ;;  %3198 = vmatpush.msrb.mxu1 %v292_v7  ;;  %v390_v6 = vld [vmem:[#allocation2 + $0x9a0] sm:$0xff]  ;;  %v340_v7 = vld [vmem:[#allocation2 + $0x810] sm:$0xff] }
  0x8a   :  { %3219 = vmatpush.msrb.mxu2 %v307_v9  ;;  %3238 = vmatpush.msrb.mxu3 %v324_v10  ;;  %v372_v9 = vld [vmem:[#allocation2 + $0x910] sm:$0xff]  ;;  %v389_v10 = vld [vmem:[#allocation2 + $0x998] sm:$0xff] }
  0x8b   :  { %3180 = vmatpush.msrb.mxu0 %v274_v11  ;;  %3199 = vmatpush.msrb.mxu1 %v291_v12  ;;  %v339_v11 = vld [vmem:[#allocation2 + $0x808] sm:$0xff]  ;;  %v356_v12 = vld [vmem:[#allocation2 + $0x890] sm:$0xff] }
  0x8c   :  { %3220 = vmatpush.msrb.mxu2 %v306_v13  ;;  %3239 = vmatpush.msrb.mxu3 %v323_v14  ;;  %v48_v13 = vld [vmem:[%s6489_s0 + $0x28] sm:$0xff]  ;;  %v371_v14 = vld [vmem:[#allocation2 + $0x908] sm:$0xff] }
  0x8d   :  { %3181 = vmatmul.f32.vlgmr.msrb.gmra.mxu0 %v2592_v15  ;;  %3221 = vmatmul.f32.vlgmr.msrb.gmra.mxu2 %v2594_v16  ;;  %v388_v15 = vld [vmem:[#allocation2 + $0x990] sm:$0xff]  ;;  %2597 = vst [vmem:[#allocation1 + $0x20] ss:$4 sm:$0xff] %v48_v13  ;;  %v338_v16 = vld [vmem:[#allocation2 + $0x800] sm:$0xff]  ;;  %v421_v13 = vld [vmem:[#allocation2 + $0xa98] sm:$0xff] }
  0x8e   :  { %3245 = vmatpush.msra.mxu0 %v353_v17  ;;  %3285 = vmatpush.msra.mxu2 %v385_v18  ;;  %v355_v17 = vld [vmem:[#allocation2 + $0x888] sm:$0xff]  ;;  %v370_v18 = vld [vmem:[#allocation2 + $0x900] sm:$0xff] }
  0x8f   :  { %3200 = vmatpush.msrb.mxu1 %v290_v19  ;;  %3240 = vmatpush.msrb.mxu3 %v322_v20  ;;  %v387_v19 = vld [vmem:[#allocation2 + $0x988] sm:$0xff]  ;;  %v2598_v20 = vld.sshfl [vmem:[#allocation1] sm:$0xff pattern:$0x73625140] }
  0x90   :  { %3201 = vmatmul.f32.vlgmr.msrb.gmra.mxu1 %v2593_v21  ;;  %3241 = vmatmul.f32.vlgmr.msrb.gmra.mxu3 %v2595_v22  ;;  %v2600_v21 = vld.sshfl [vmem:[#allocation1 + $0x10] sm:$0xff pattern:$0x73625140]  ;;  %v417_v22 = vld [vmem:[#allocation2 + $0xa78] sm:$0xff] }
  0x91   :  { %3246 = vmatpush.msra.mxu0 %v352_v23  ;;  %3265 = vmatpush.msra.mxu1 %v369_v24  ;;  %v449_v23 = vld [vmem:[#allocation2 + $0xb78] sm:$0xff]  ;;  %v354_v24 = vld [vmem:[#allocation2 + $0x880] sm:$0xff] }
  0x92   :  { %3286 = vmatpush.msra.mxu2 %v384_v25  ;;  %3305 = vmatpush.msra.mxu3 %v401_v26  ;;  %v386_v25 = vld [vmem:[#allocation2 + $0x980] sm:$0xff] }
  0x93   :  { %3247 = vmatpush.msra.mxu0 %v351_v27  ;;  %3266 = vmatpush.msra.mxu1 %v368_v28  ;;  %v2599_v26 = vld.sshfl [vmem:[#allocation1 + $0x8] sm:$0xff pattern:$0x73625140]  ;;  %v2601_v27 = vld.sshfl [vmem:[#allocation1 + $0x18] sm:$0xff pattern:$0x73625140] }
  0x94   :  { %3287 = vmatpush.msra.mxu2 %v383_v29  ;;  %3306 = vmatpush.msra.mxu3 %v400_v30  ;;  %v416_v28 = vld [vmem:[#allocation2 + $0xa70] sm:$0xff]  ;;  %v433_v29 = vld [vmem:[#allocation2 + $0xaf8] sm:$0xff] }
  0x95   :  { %3248 = vmatpush.msra.mxu0 %v350_v31  ;;  %3267 = vmatpush.msra.mxu1 %v367_v32  ;;  %v448_v30 = vld [vmem:[#allocation2 + $0xb70] sm:$0xff]  ;;  %v465_v31 = vld [vmem:[#allocation2 + $0xbf8] sm:$0xff]  ;;  %v415_v32 = vld [vmem:[#allocation2 + $0xa68] sm:$0xff] }
  0x96   :  { %3288 = vmatpush.msra.mxu2 %v382_v33  ;;  %3307 = vmatpush.msra.mxu3 %v399_v34  ;;  %v432_v33 = vld [vmem:[#allocation2 + $0xaf0] sm:$0xff]  ;;  %v447_v34 = vld [vmem:[#allocation2 + $0xb68] sm:$0xff] }
  0x97   :  { %3249 = vmatpush.msra.mxu0 %v349_v35  ;;  %3268 = vmatpush.msra.mxu1 %v366_v36  ;;  %v464_v35 = vld [vmem:[#allocation2 + $0xbf0] sm:$0xff]  ;;  %v414_v36 = vld [vmem:[#allocation2 + $0xa60] sm:$0xff] }
  0x98   :  { %3289 = vmatpush.msra.mxu2 %v381_v37  ;;  %3308 = vmatpush.msra.mxu3 %v398_v38  ;;  %v431_v37 = vld [vmem:[#allocation2 + $0xae8] sm:$0xff]  ;;  %v446_v38 = vld [vmem:[#allocation2 + $0xb60] sm:$0xff] }
  0x99   :  { %3250 = vmatpush.msra.mxu0 %v348_v39  ;;  %3269 = vmatpush.msra.mxu1 %v365_v40  ;;  %v463_v39 = vld [vmem:[#allocation2 + $0xbe8] sm:$0xff]  ;;  %v413_v40 = vld [vmem:[#allocation2 + $0xa58] sm:$0xff] }
  0x9a   :  { %3290 = vmatpush.msra.mxu2 %v380_v41  ;;  %3309 = vmatpush.msra.mxu3 %v397_v42  ;;  %v430_v41 = vld [vmem:[#allocation2 + $0xae0] sm:$0xff]  ;;  %v445_v42 = vld [vmem:[#allocation2 + $0xb58] sm:$0xff] }
  0x9b   :  { %3251 = vmatpush.msra.mxu0 %v347_v43  ;;  %3270 = vmatpush.msra.mxu1 %v364_v44  ;;  %v462_v43 = vld [vmem:[#allocation2 + $0xbe0] sm:$0xff]  ;;  %v412_v44 = vld [vmem:[#allocation2 + $0xa50] sm:$0xff] }
  0x9c   :  { %3291 = vmatpush.msra.mxu2 %v379_v45  ;;  %3310 = vmatpush.msra.mxu3 %v396_v46  ;;  %v429_v45 = vld [vmem:[#allocation2 + $0xad8] sm:$0xff]  ;;  %v444_v46 = vld [vmem:[#allocation2 + $0xb50] sm:$0xff] }
  0x9d   :  { %3252 = vmatpush.msra.mxu0 %v346_v47  ;;  %3271 = vmatpush.msra.mxu1 %v363_v48  ;;  %v461_v47 = vld [vmem:[#allocation2 + $0xbd8] sm:$0xff]  ;;  %v411_v48 = vld [vmem:[#allocation2 + $0xa48] sm:$0xff] }
  0x9e   :  { %3292 = vmatpush.msra.mxu2 %v378_v49  ;;  %3311 = vmatpush.msra.mxu3 %v395_v50  ;;  %v428_v49 = vld [vmem:[#allocation2 + $0xad0] sm:$0xff]  ;;  %v443_v50 = vld [vmem:[#allocation2 + $0xb48] sm:$0xff] }
  0x9f   :  { %3253 = vmatpush.msra.mxu0 %v345_v51  ;;  %3272 = vmatpush.msra.mxu1 %v362_v52  ;;  %v460_v51 = vld [vmem:[#allocation2 + $0xbd0] sm:$0xff]  ;;  %v410_v52 = vld [vmem:[#allocation2 + $0xa40] sm:$0xff] }
  0xa0   :  { %3293 = vmatpush.msra.mxu2 %v377_v53  ;;  %3312 = vmatpush.msra.mxu3 %v394_v54  ;;  %v427_v53 = vld [vmem:[#allocation2 + $0xac8] sm:$0xff]  ;;  %v442_v54 = vld [vmem:[#allocation2 + $0xb40] sm:$0xff] }
  0xa1   :  { %3254 = vmatpush.msra.mxu0 %v344_v55  ;;  %3273 = vmatpush.msra.mxu1 %v361_v56  ;;  %v459_v55 = vld [vmem:[#allocation2 + $0xbc8] sm:$0xff]  ;;  %v409_v56 = vld [vmem:[#allocation2 + $0xa38] sm:$0xff] }
  0xa2   :  { %3294 = vmatpush.msra.mxu2 %v376_v57  ;;  %3313 = vmatpush.msra.mxu3 %v393_v58  ;;  %v426_v57 = vld [vmem:[#allocation2 + $0xac0] sm:$0xff]  ;;  %v441_v58 = vld [vmem:[#allocation2 + $0xb38] sm:$0xff] }
  0xa3   :  { %3255 = vmatpush.msra.mxu0 %v343_v59  ;;  %3274 = vmatpush.msra.mxu1 %v360_v60  ;;  %v458_v59 = vld [vmem:[#allocation2 + $0xbc0] sm:$0xff]  ;;  %v408_v60 = vld [vmem:[#allocation2 + $0xa30] sm:$0xff] }
  0xa4   :  { %3295 = vmatpush.msra.mxu2 %v375_v61  ;;  %3314 = vmatpush.msra.mxu3 %v392_v62  ;;  %v425_v61 = vld [vmem:[#allocation2 + $0xab8] sm:$0xff]  ;;  %v440_v62 = vld [vmem:[#allocation2 + $0xb30] sm:$0xff] }
  0xa5   :  { %3256 = vmatpush.msra.mxu0 %v342_v63  ;;  %3275 = vmatpush.msra.mxu1 %v359_v0  ;;  %v457_v63 = vld [vmem:[#allocation2 + $0xbb8] sm:$0xff]  ;;  %v407_v0 = vld [vmem:[#allocation2 + $0xa28] sm:$0xff] }
  0xa6   :  { %3296 = vmatpush.msra.mxu2 %v374_v1  ;;  %3315 = vmatpush.msra.mxu3 %v391_v2  ;;  %v424_v1 = vld [vmem:[#allocation2 + $0xab0] sm:$0xff]  ;;  %v439_v2 = vld [vmem:[#allocation2 + $0xb28] sm:$0xff] }
  0xa7   :  { %3257 = vmatpush.msra.mxu0 %v341_v3  ;;  %3276 = vmatpush.msra.mxu1 %v358_v4  ;;  %v456_v3 = vld [vmem:[#allocation2 + $0xbb0] sm:$0xff]  ;;  %v406_v4 = vld [vmem:[#allocation2 + $0xa20] sm:$0xff] }
  0xa8   :  { %3297 = vmatpush.msra.mxu2 %v373_v5  ;;  %3316 = vmatpush.msra.mxu3 %v390_v6  ;;  %v423_v5 = vld [vmem:[#allocation2 + $0xaa8] sm:$0xff]  ;;  %v438_v6 = vld [vmem:[#allocation2 + $0xb20] sm:$0xff] }
  0xa9   :  { %3258 = vmatpush.msra.mxu0 %v340_v7  ;;  %3277 = vmatpush.msra.mxu1 %v357_v8  ;;  %v455_v7 = vld [vmem:[#allocation2 + $0xba8] sm:$0xff]  ;;  %v405_v8 = vld [vmem:[#allocation2 + $0xa18] sm:$0xff] }
  0xaa   :  { %3298 = vmatpush.msra.mxu2 %v372_v9  ;;  %3317 = vmatpush.msra.mxu3 %v389_v10  ;;  %v422_v9 = vld [vmem:[#allocation2 + $0xaa0] sm:$0xff]  ;;  %v437_v10 = vld [vmem:[#allocation2 + $0xb18] sm:$0xff] }
  0xab   :  { %3259 = vmatpush.msra.mxu0 %v339_v11  ;;  %3278 = vmatpush.msra.mxu1 %v356_v12  ;;  %v454_v11 = vld [vmem:[#allocation2 + $0xba0] sm:$0xff]  ;;  %v404_v12 = vld [vmem:[#allocation2 + $0xa10] sm:$0xff] }
  0xac   :  { %3299 = vmatpush.msra.mxu2 %v371_v14  ;;  %3318 = vmatpush.msra.mxu3 %v388_v15  ;;  %v436_v14 = vld [vmem:[#allocation2 + $0xb10] sm:$0xff]  ;;  %v453_v15 = vld [vmem:[#allocation2 + $0xb98] sm:$0xff] }
  0xad   :  { %3260 = vmatpush.msra.mxu0 %v338_v16  ;;  %3279 = vmatpush.msra.mxu1 %v355_v17  ;;  %v403_v16 = vld [vmem:[#allocation2 + $0xa08] sm:$0xff]  ;;  %v420_v17 = vld [vmem:[#allocation2 + $0xa90] sm:$0xff] }
  0xae   :  { %3300 = vmatpush.msra.mxu2 %v370_v18  ;;  %3319 = vmatpush.msra.mxu3 %v387_v19  ;;  %v49_v18 = vld [vmem:[%s6489_s0 + $0x30] sm:$0xff] }
  0xaf   :  { %3261 = vmatmul.f32.vlgmr.msra.gmra.mxu0 %v2598_v20  ;;  %3301 = vmatmul.f32.vlgmr.msra.gmra.mxu2 %v2600_v21  ;;  %v435_v19 = vld [vmem:[#allocation2 + $0xb08] sm:$0xff]  ;;  %v452_v20 = vld [vmem:[#allocation2 + $0xb90] sm:$0xff]  ;;  %2606 = vst [vmem:[#allocation1] ss:$4 sm:$0xff] %v49_v18  ;;  %v402_v21 = vld [vmem:[#allocation2 + $0xa00] sm:$0xff] }
  0xb0   :  { %3325 = vmatpush.msrb.mxu0 %v417_v22  ;;  %3365 = vmatpush.msrb.mxu2 %v449_v23  ;;  %v419_v22 = vld [vmem:[#allocation2 + $0xa88] sm:$0xff]  ;;  %v434_v23 = vld [vmem:[#allocation2 + $0xb00] sm:$0xff]  ;;  %v485_v18 = vld [vmem:[#allocation2 + $0xc98] sm:$0xff] }
  0xb1   :  { %3280 = vmatpush.msra.mxu1 %v354_v24  ;;  %3320 = vmatpush.msra.mxu3 %v386_v25  ;;  %v451_v24 = vld [vmem:[#allocation2 + $0xb88] sm:$0xff]  ;;  %v2602_v25 = vld.sshfl [vmem:[#allocation1 + $0x20] sm:$0xff pattern:$0x73625140] }
  0xb2   :  { %3281 = vmatmul.f32.vlgmr.msra.gmra.mxu1 %v2599_v26  ;;  %3321 = vmatmul.f32.vlgmr.msra.gmra.mxu3 %v2601_v27  ;;  %v2604_v26 = vld.sshfl [vmem:[#allocation1 + $0x30] sm:$0xff pattern:$0x73625140]  ;;  %v481_v27 = vld [vmem:[#allocation2 + $0xc78] sm:$0xff] }
  0xb3   :  { %3326 = vmatpush.msrb.mxu0 %v416_v28  ;;  %3345 = vmatpush.msrb.mxu1 %v433_v29  ;;  %v513_v28 = vld [vmem:[#allocation2 + $0xd78] sm:$0xff]  ;;  %v418_v29 = vld [vmem:[#allocation2 + $0xa80] sm:$0xff] }
  0xb4   :  { %3366 = vmatpush.msrb.mxu2 %v448_v30  ;;  %3385 = vmatpush.msrb.mxu3 %v465_v31  ;;  %v450_v30 = vld [vmem:[#allocation2 + $0xb80] sm:$0xff] }
  0xb5   :  { %3327 = vmatpush.msrb.mxu0 %v415_v32  ;;  %3346 = vmatpush.msrb.mxu1 %v432_v33  ;;  %v2603_v31 = vld.sshfl [vmem:[#allocation1 + $0x28] sm:$0xff pattern:$0x73625140]  ;;  %v2605_v32 = vld.sshfl [vmem:[#allocation1 + $0x38] sm:$0xff pattern:$0x73625140] }
  0xb6   :  { %3367 = vmatpush.msrb.mxu2 %v447_v34  ;;  %3386 = vmatpush.msrb.mxu3 %v464_v35  ;;  %v480_v33 = vld [vmem:[#allocation2 + $0xc70] sm:$0xff]  ;;  %v497_v34 = vld [vmem:[#allocation2 + $0xcf8] sm:$0xff] }
  0xb7   :  { %3328 = vmatpush.msrb.mxu0 %v414_v36  ;;  %3347 = vmatpush.msrb.mxu1 %v431_v37  ;;  %v512_v35 = vld [vmem:[#allocation2 + $0xd70] sm:$0xff]  ;;  %v529_v36 = vld [vmem:[#allocation2 + $0xdf8] sm:$0xff]  ;;  %v479_v37 = vld [vmem:[#allocation2 + $0xc68] sm:$0xff] }
  0xb8   :  { %3368 = vmatpush.msrb.mxu2 %v446_v38  ;;  %3387 = vmatpush.msrb.mxu3 %v463_v39  ;;  %v496_v38 = vld [vmem:[#allocation2 + $0xcf0] sm:$0xff]  ;;  %v511_v39 = vld [vmem:[#allocation2 + $0xd68] sm:$0xff] }
  0xb9   :  { %3329 = vmatpush.msrb.mxu0 %v413_v40  ;;  %3348 = vmatpush.msrb.mxu1 %v430_v41  ;;  %v528_v40 = vld [vmem:[#allocation2 + $0xdf0] sm:$0xff]  ;;  %v478_v41 = vld [vmem:[#allocation2 + $0xc60] sm:$0xff] }
  0xba   :  { %3369 = vmatpush.msrb.mxu2 %v445_v42  ;;  %3388 = vmatpush.msrb.mxu3 %v462_v43  ;;  %v495_v42 = vld [vmem:[#allocation2 + $0xce8] sm:$0xff]  ;;  %v510_v43 = vld [vmem:[#allocation2 + $0xd60] sm:$0xff] }
  0xbb   :  { %3330 = vmatpush.msrb.mxu0 %v412_v44  ;;  %3349 = vmatpush.msrb.mxu1 %v429_v45  ;;  %v527_v44 = vld [vmem:[#allocation2 + $0xde8] sm:$0xff]  ;;  %v477_v45 = vld [vmem:[#allocation2 + $0xc58] sm:$0xff] }
  0xbc   :  { %3370 = vmatpush.msrb.mxu2 %v444_v46  ;;  %3389 = vmatpush.msrb.mxu3 %v461_v47  ;;  %v494_v46 = vld [vmem:[#allocation2 + $0xce0] sm:$0xff]  ;;  %v509_v47 = vld [vmem:[#allocation2 + $0xd58] sm:$0xff] }
  0xbd   :  { %3331 = vmatpush.msrb.mxu0 %v411_v48  ;;  %3350 = vmatpush.msrb.mxu1 %v428_v49  ;;  %v526_v48 = vld [vmem:[#allocation2 + $0xde0] sm:$0xff]  ;;  %v476_v49 = vld [vmem:[#allocation2 + $0xc50] sm:$0xff] }
  0xbe   :  { %3371 = vmatpush.msrb.mxu2 %v443_v50  ;;  %3390 = vmatpush.msrb.mxu3 %v460_v51  ;;  %v493_v50 = vld [vmem:[#allocation2 + $0xcd8] sm:$0xff]  ;;  %v508_v51 = vld [vmem:[#allocation2 + $0xd50] sm:$0xff] }
  0xbf   :  { %3332 = vmatpush.msrb.mxu0 %v410_v52  ;;  %3351 = vmatpush.msrb.mxu1 %v427_v53  ;;  %v525_v52 = vld [vmem:[#allocation2 + $0xdd8] sm:$0xff]  ;;  %v475_v53 = vld [vmem:[#allocation2 + $0xc48] sm:$0xff] }
  0xc0   :  { %3372 = vmatpush.msrb.mxu2 %v442_v54  ;;  %3391 = vmatpush.msrb.mxu3 %v459_v55  ;;  %v492_v54 = vld [vmem:[#allocation2 + $0xcd0] sm:$0xff]  ;;  %v507_v55 = vld [vmem:[#allocation2 + $0xd48] sm:$0xff] }
  0xc1   :  { %3333 = vmatpush.msrb.mxu0 %v409_v56  ;;  %3352 = vmatpush.msrb.mxu1 %v426_v57  ;;  %v524_v56 = vld [vmem:[#allocation2 + $0xdd0] sm:$0xff]  ;;  %v474_v57 = vld [vmem:[#allocation2 + $0xc40] sm:$0xff] }
  0xc2   :  { %3373 = vmatpush.msrb.mxu2 %v441_v58  ;;  %3392 = vmatpush.msrb.mxu3 %v458_v59  ;;  %v491_v58 = vld [vmem:[#allocation2 + $0xcc8] sm:$0xff]  ;;  %v506_v59 = vld [vmem:[#allocation2 + $0xd40] sm:$0xff] }
  0xc3   :  { %3334 = vmatpush.msrb.mxu0 %v408_v60  ;;  %3353 = vmatpush.msrb.mxu1 %v425_v61  ;;  %v523_v60 = vld [vmem:[#allocation2 + $0xdc8] sm:$0xff]  ;;  %v473_v61 = vld [vmem:[#allocation2 + $0xc38] sm:$0xff] }
  0xc4   :  { %3374 = vmatpush.msrb.mxu2 %v440_v62  ;;  %3393 = vmatpush.msrb.mxu3 %v457_v63  ;;  %v490_v62 = vld [vmem:[#allocation2 + $0xcc0] sm:$0xff]  ;;  %v505_v63 = vld [vmem:[#allocation2 + $0xd38] sm:$0xff] }
  0xc5   :  { %3335 = vmatpush.msrb.mxu0 %v407_v0  ;;  %3354 = vmatpush.msrb.mxu1 %v424_v1  ;;  %v522_v0 = vld [vmem:[#allocation2 + $0xdc0] sm:$0xff]  ;;  %v472_v1 = vld [vmem:[#allocation2 + $0xc30] sm:$0xff] }
  0xc6   :  { %3375 = vmatpush.msrb.mxu2 %v439_v2  ;;  %3394 = vmatpush.msrb.mxu3 %v456_v3  ;;  %v489_v2 = vld [vmem:[#allocation2 + $0xcb8] sm:$0xff]  ;;  %v504_v3 = vld [vmem:[#allocation2 + $0xd30] sm:$0xff] }
  0xc7   :  { %3336 = vmatpush.msrb.mxu0 %v406_v4  ;;  %3355 = vmatpush.msrb.mxu1 %v423_v5  ;;  %v521_v4 = vld [vmem:[#allocation2 + $0xdb8] sm:$0xff]  ;;  %v471_v5 = vld [vmem:[#allocation2 + $0xc28] sm:$0xff] }
  0xc8   :  { %3376 = vmatpush.msrb.mxu2 %v438_v6  ;;  %3395 = vmatpush.msrb.mxu3 %v455_v7  ;;  %v488_v6 = vld [vmem:[#allocation2 + $0xcb0] sm:$0xff]  ;;  %v503_v7 = vld [vmem:[#allocation2 + $0xd28] sm:$0xff] }
  0xc9   :  { %3337 = vmatpush.msrb.mxu0 %v405_v8  ;;  %3356 = vmatpush.msrb.mxu1 %v422_v9  ;;  %v520_v8 = vld [vmem:[#allocation2 + $0xdb0] sm:$0xff]  ;;  %v470_v9 = vld [vmem:[#allocation2 + $0xc20] sm:$0xff] }
  0xca   :  { %3377 = vmatpush.msrb.mxu2 %v437_v10  ;;  %3396 = vmatpush.msrb.mxu3 %v454_v11  ;;  %v487_v10 = vld [vmem:[#allocation2 + $0xca8] sm:$0xff]  ;;  %v502_v11 = vld [vmem:[#allocation2 + $0xd20] sm:$0xff] }
  0xcb   :  { %3338 = vmatpush.msrb.mxu0 %v404_v12  ;;  %3357 = vmatpush.msrb.mxu1 %v421_v13  ;;  %v519_v12 = vld [vmem:[#allocation2 + $0xda8] sm:$0xff]  ;;  %v469_v13 = vld [vmem:[#allocation2 + $0xc18] sm:$0xff] }
  0xcc   :  { %3378 = vmatpush.msrb.mxu2 %v436_v14  ;;  %3397 = vmatpush.msrb.mxu3 %v453_v15  ;;  %v486_v14 = vld [vmem:[#allocation2 + $0xca0] sm:$0xff]  ;;  %v501_v15 = vld [vmem:[#allocation2 + $0xd18] sm:$0xff] }
  0xcd   :  { %3339 = vmatpush.msrb.mxu0 %v403_v16  ;;  %3358 = vmatpush.msrb.mxu1 %v420_v17  ;;  %v518_v16 = vld [vmem:[#allocation2 + $0xda0] sm:$0xff]  ;;  %v468_v17 = vld [vmem:[#allocation2 + $0xc10] sm:$0xff] }
  0xce   :  { %3379 = vmatpush.msrb.mxu2 %v435_v19  ;;  %3398 = vmatpush.msrb.mxu3 %v452_v20  ;;  %v500_v19 = vld [vmem:[#allocation2 + $0xd10] sm:$0xff]  ;;  %v517_v20 = vld [vmem:[#allocation2 + $0xd98] sm:$0xff] }
  0xcf   :  { %3340 = vmatpush.msrb.mxu0 %v402_v21  ;;  %3359 = vmatpush.msrb.mxu1 %v419_v22  ;;  %v467_v21 = vld [vmem:[#allocation2 + $0xc08] sm:$0xff]  ;;  %v484_v22 = vld [vmem:[#allocation2 + $0xc90] sm:$0xff] }
  0xd0   :  { %3380 = vmatpush.msrb.mxu2 %v434_v23  ;;  %3399 = vmatpush.msrb.mxu3 %v451_v24  ;;  %v50_v23 = vld [vmem:[%s6489_s0 + $0x38] sm:$0xff]  ;;  %v499_v24 = vld [vmem:[#allocation2 + $0xd08] sm:$0xff] }
  0xd1   :  { %3341 = vmatmul.f32.vlgmr.msrb.gmra.mxu0 %v2602_v25  ;;  %3381 = vmatmul.f32.vlgmr.msrb.gmra.mxu2 %v2604_v26  ;;  %v516_v25 = vld [vmem:[#allocation2 + $0xd90] sm:$0xff]  ;;  %2607 = vst [vmem:[#allocation1 + $0x20] ss:$4 sm:$0xff] %v50_v23  ;;  %v466_v26 = vld [vmem:[#allocation2 + $0xc00] sm:$0xff]  ;;  %v549_v23 = vld [vmem:[#allocation2 + $0xe98] sm:$0xff] }
  0xd2   :  { %3405 = vmatpush.msra.mxu0 %v481_v27  ;;  %3445 = vmatpush.msra.mxu2 %v513_v28  ;;  %v483_v27 = vld [vmem:[#allocation2 + $0xc88] sm:$0xff]  ;;  %v498_v28 = vld [vmem:[#allocation2 + $0xd00] sm:$0xff] }
  0xd3   :  { %3360 = vmatpush.msrb.mxu1 %v418_v29  ;;  %3400 = vmatpush.msrb.mxu3 %v450_v30  ;;  %v515_v29 = vld [vmem:[#allocation2 + $0xd88] sm:$0xff]  ;;  %v2608_v30 = vld.sshfl [vmem:[#allocation1] sm:$0xff pattern:$0x73625140] }
  0xd4   :  { %3361 = vmatmul.f32.vlgmr.msrb.gmra.mxu1 %v2603_v31  ;;  %3401 = vmatmul.f32.vlgmr.msrb.gmra.mxu3 %v2605_v32  ;;  %v2610_v31 = vld.sshfl [vmem:[#allocation1 + $0x10] sm:$0xff pattern:$0x73625140]  ;;  %v545_v32 = vld [vmem:[#allocation2 + $0xe78] sm:$0xff] }
  0xd5   :  { %3406 = vmatpush.msra.mxu0 %v480_v33  ;;  %3425 = vmatpush.msra.mxu1 %v497_v34  ;;  %v577_v33 = vld [vmem:[#allocation2 + $0xf78] sm:$0xff]  ;;  %v482_v34 = vld [vmem:[#allocation2 + $0xc80] sm:$0xff] }
  0xd6   :  { %3446 = vmatpush.msra.mxu2 %v512_v35  ;;  %3465 = vmatpush.msra.mxu3 %v529_v36  ;;  %v514_v35 = vld [vmem:[#allocation2 + $0xd80] sm:$0xff] }
  0xd7   :  { %3407 = vmatpush.msra.mxu0 %v479_v37  ;;  %3426 = vmatpush.msra.mxu1 %v496_v38  ;;  %v2609_v36 = vld.sshfl [vmem:[#allocation1 + $0x8] sm:$0xff pattern:$0x73625140]  ;;  %v2611_v37 = vld.sshfl [vmem:[#allocation1 + $0x18] sm:$0xff pattern:$0x73625140] }
  0xd8   :  { %3447 = vmatpush.msra.mxu2 %v511_v39  ;;  %3466 = vmatpush.msra.mxu3 %v528_v40  ;;  %v544_v38 = vld [vmem:[#allocation2 + $0xe70] sm:$0xff]  ;;  %v561_v39 = vld [vmem:[#allocation2 + $0xef8] sm:$0xff] }
  0xd9   :  { %3408 = vmatpush.msra.mxu0 %v478_v41  ;;  %3427 = vmatpush.msra.mxu1 %v495_v42  ;;  %v576_v40 = vld [vmem:[#allocation2 + $0xf70] sm:$0xff]  ;;  %v593_v41 = vld [vmem:[#allocation2 + $0xff8] sm:$0xff]  ;;  %v543_v42 = vld [vmem:[#allocation2 + $0xe68] sm:$0xff] }
  0xda   :  { %3448 = vmatpush.msra.mxu2 %v510_v43  ;;  %3467 = vmatpush.msra.mxu3 %v527_v44  ;;  %v560_v43 = vld [vmem:[#allocation2 + $0xef0] sm:$0xff]  ;;  %v575_v44 = vld [vmem:[#allocation2 + $0xf68] sm:$0xff] }
  0xdb   :  { %3409 = vmatpush.msra.mxu0 %v477_v45  ;;  %3428 = vmatpush.msra.mxu1 %v494_v46  ;;  %v592_v45 = vld [vmem:[#allocation2 + $0xff0] sm:$0xff]  ;;  %v542_v46 = vld [vmem:[#allocation2 + $0xe60] sm:$0xff] }
  0xdc   :  { %3449 = vmatpush.msra.mxu2 %v509_v47  ;;  %3468 = vmatpush.msra.mxu3 %v526_v48  ;;  %v559_v47 = vld [vmem:[#allocation2 + $0xee8] sm:$0xff]  ;;  %v574_v48 = vld [vmem:[#allocation2 + $0xf60] sm:$0xff] }
  0xdd   :  { %3410 = vmatpush.msra.mxu0 %v476_v49  ;;  %3429 = vmatpush.msra.mxu1 %v493_v50  ;;  %v591_v49 = vld [vmem:[#allocation2 + $0xfe8] sm:$0xff]  ;;  %v541_v50 = vld [vmem:[#allocation2 + $0xe58] sm:$0xff] }
  0xde   :  { %3450 = vmatpush.msra.mxu2 %v508_v51  ;;  %3469 = vmatpush.msra.mxu3 %v525_v52  ;;  %v558_v51 = vld [vmem:[#allocation2 + $0xee0] sm:$0xff]  ;;  %v573_v52 = vld [vmem:[#allocation2 + $0xf58] sm:$0xff] }
  0xdf   :  { %3411 = vmatpush.msra.mxu0 %v475_v53  ;;  %3430 = vmatpush.msra.mxu1 %v492_v54  ;;  %v590_v53 = vld [vmem:[#allocation2 + $0xfe0] sm:$0xff]  ;;  %v540_v54 = vld [vmem:[#allocation2 + $0xe50] sm:$0xff] }
  0xe0   :  { %3451 = vmatpush.msra.mxu2 %v507_v55  ;;  %3470 = vmatpush.msra.mxu3 %v524_v56  ;;  %v557_v55 = vld [vmem:[#allocation2 + $0xed8] sm:$0xff]  ;;  %v572_v56 = vld [vmem:[#allocation2 + $0xf50] sm:$0xff] }
  0xe1   :  { %3412 = vmatpush.msra.mxu0 %v474_v57  ;;  %3431 = vmatpush.msra.mxu1 %v491_v58  ;;  %v589_v57 = vld [vmem:[#allocation2 + $0xfd8] sm:$0xff]  ;;  %v539_v58 = vld [vmem:[#allocation2 + $0xe48] sm:$0xff] }
  0xe2   :  { %3452 = vmatpush.msra.mxu2 %v506_v59  ;;  %3471 = vmatpush.msra.mxu3 %v523_v60  ;;  %v556_v59 = vld [vmem:[#allocation2 + $0xed0] sm:$0xff]  ;;  %v571_v60 = vld [vmem:[#allocation2 + $0xf48] sm:$0xff] }
  0xe3   :  { %3413 = vmatpush.msra.mxu0 %v473_v61  ;;  %3432 = vmatpush.msra.mxu1 %v490_v62  ;;  %v588_v61 = vld [vmem:[#allocation2 + $0xfd0] sm:$0xff]  ;;  %v538_v62 = vld [vmem:[#allocation2 + $0xe40] sm:$0xff] }
  0xe4   :  { %3453 = vmatpush.msra.mxu2 %v505_v63  ;;  %3472 = vmatpush.msra.mxu3 %v522_v0  ;;  %v555_v63 = vld [vmem:[#allocation2 + $0xec8] sm:$0xff]  ;;  %v570_v0 = vld [vmem:[#allocation2 + $0xf40] sm:$0xff] }
  0xe5   :  { %3414 = vmatpush.msra.mxu0 %v472_v1  ;;  %3433 = vmatpush.msra.mxu1 %v489_v2  ;;  %v587_v1 = vld [vmem:[#allocation2 + $0xfc8] sm:$0xff]  ;;  %v537_v2 = vld [vmem:[#allocation2 + $0xe38] sm:$0xff] }
  0xe6   :  { %3454 = vmatpush.msra.mxu2 %v504_v3  ;;  %3473 = vmatpush.msra.mxu3 %v521_v4  ;;  %v554_v3 = vld [vmem:[#allocation2 + $0xec0] sm:$0xff]  ;;  %v569_v4 = vld [vmem:[#allocation2 + $0xf38] sm:$0xff] }
  0xe7   :  { %3415 = vmatpush.msra.mxu0 %v471_v5  ;;  %3434 = vmatpush.msra.mxu1 %v488_v6  ;;  %v586_v5 = vld [vmem:[#allocation2 + $0xfc0] sm:$0xff]  ;;  %v536_v6 = vld [vmem:[#allocation2 + $0xe30] sm:$0xff] }
  0xe8   :  { %3455 = vmatpush.msra.mxu2 %v503_v7  ;;  %3474 = vmatpush.msra.mxu3 %v520_v8  ;;  %v553_v7 = vld [vmem:[#allocation2 + $0xeb8] sm:$0xff]  ;;  %v568_v8 = vld [vmem:[#allocation2 + $0xf30] sm:$0xff] }
  0xe9   :  { %3416 = vmatpush.msra.mxu0 %v470_v9  ;;  %3435 = vmatpush.msra.mxu1 %v487_v10  ;;  %v585_v9 = vld [vmem:[#allocation2 + $0xfb8] sm:$0xff]  ;;  %v535_v10 = vld [vmem:[#allocation2 + $0xe28] sm:$0xff] }
  0xea   :  { %3456 = vmatpush.msra.mxu2 %v502_v11  ;;  %3475 = vmatpush.msra.mxu3 %v519_v12  ;;  %v552_v11 = vld [vmem:[#allocation2 + $0xeb0] sm:$0xff]  ;;  %v567_v12 = vld [vmem:[#allocation2 + $0xf28] sm:$0xff] }
  0xeb   :  { %3417 = vmatpush.msra.mxu0 %v469_v13  ;;  %3436 = vmatpush.msra.mxu1 %v486_v14  ;;  %v584_v13 = vld [vmem:[#allocation2 + $0xfb0] sm:$0xff]  ;;  %v534_v14 = vld [vmem:[#allocation2 + $0xe20] sm:$0xff] }
  0xec   :  { %3457 = vmatpush.msra.mxu2 %v501_v15  ;;  %3476 = vmatpush.msra.mxu3 %v518_v16  ;;  %v551_v15 = vld [vmem:[#allocation2 + $0xea8] sm:$0xff]  ;;  %v566_v16 = vld [vmem:[#allocation2 + $0xf20] sm:$0xff] }
  0xed   :  { %3418 = vmatpush.msra.mxu0 %v468_v17  ;;  %3437 = vmatpush.msra.mxu1 %v485_v18  ;;  %v583_v17 = vld [vmem:[#allocation2 + $0xfa8] sm:$0xff]  ;;  %v533_v18 = vld [vmem:[#allocation2 + $0xe18] sm:$0xff] }
  0xee   :  { %3458 = vmatpush.msra.mxu2 %v500_v19  ;;  %3477 = vmatpush.msra.mxu3 %v517_v20  ;;  %v550_v19 = vld [vmem:[#allocation2 + $0xea0] sm:$0xff]  ;;  %v565_v20 = vld [vmem:[#allocation2 + $0xf18] sm:$0xff] }
  0xef   :  { %3419 = vmatpush.msra.mxu0 %v467_v21  ;;  %3438 = vmatpush.msra.mxu1 %v484_v22  ;;  %v582_v21 = vld [vmem:[#allocation2 + $0xfa0] sm:$0xff]  ;;  %v532_v22 = vld [vmem:[#allocation2 + $0xe10] sm:$0xff] }
  0xf0   :  { %3459 = vmatpush.msra.mxu2 %v499_v24  ;;  %3478 = vmatpush.msra.mxu3 %v516_v25  ;;  %v564_v24 = vld [vmem:[#allocation2 + $0xf10] sm:$0xff]  ;;  %v581_v25 = vld [vmem:[#allocation2 + $0xf98] sm:$0xff] }
  0xf1   :  { %3420 = vmatpush.msra.mxu0 %v466_v26  ;;  %3439 = vmatpush.msra.mxu1 %v483_v27  ;;  %v531_v26 = vld [vmem:[#allocation2 + $0xe08] sm:$0xff]  ;;  %v548_v27 = vld [vmem:[#allocation2 + $0xe90] sm:$0xff] }
  0xf2   :  { %3460 = vmatpush.msra.mxu2 %v498_v28  ;;  %3479 = vmatpush.msra.mxu3 %v515_v29  ;;  %v51_v28 = vld [vmem:[%s6489_s0 + $0x40] sm:$0xff]  ;;  %v563_v29 = vld [vmem:[#allocation2 + $0xf08] sm:$0xff] }
  0xf3   :  { %3421 = vmatmul.f32.vlgmr.msra.gmra.mxu0 %v2608_v30  ;;  %3461 = vmatmul.f32.vlgmr.msra.gmra.mxu2 %v2610_v31  ;;  %v580_v30 = vld [vmem:[#allocation2 + $0xf90] sm:$0xff]  ;;  %2616 = vst [vmem:[#allocation1] ss:$4 sm:$0xff] %v51_v28  ;;  %v530_v31 = vld [vmem:[#allocation2 + $0xe00] sm:$0xff]  ;;  %v613_v28 = vld [vmem:[#allocation2 + $0x1098] sm:$0xff] }
  0xf4   :  { %3485 = vmatpush.msrb.mxu0 %v545_v32  ;;  %3525 = vmatpush.msrb.mxu2 %v577_v33  ;;  %v547_v32 = vld [vmem:[#allocation2 + $0xe88] sm:$0xff]  ;;  %v562_v33 = vld [vmem:[#allocation2 + $0xf00] sm:$0xff] }
  0xf5   :  { %3440 = vmatpush.msra.mxu1 %v482_v34  ;;  %3480 = vmatpush.msra.mxu3 %v514_v35  ;;  %v579_v34 = vld [vmem:[#allocation2 + $0xf88] sm:$0xff]  ;;  %v2612_v35 = vld.sshfl [vmem:[#allocation1 + $0x20] sm:$0xff pattern:$0x73625140] }
  0xf6   :  { %3441 = vmatmul.f32.vlgmr.msra.gmra.mxu1 %v2609_v36  ;;  %3481 = vmatmul.f32.vlgmr.msra.gmra.mxu3 %v2611_v37  ;;  %v2614_v36 = vld.sshfl [vmem:[#allocation1 + $0x30] sm:$0xff pattern:$0x73625140]  ;;  %v609_v37 = vld [vmem:[#allocation2 + $0x1078] sm:$0xff] }
  0xf7   :  { %3486 = vmatpush.msrb.mxu0 %v544_v38  ;;  %3505 = vmatpush.msrb.mxu1 %v561_v39  ;;  %v641_v38 = vld [vmem:[#allocation2 + $0x1178] sm:$0xff]  ;;  %v546_v39 = vld [vmem:[#allocation2 + $0xe80] sm:$0xff] }
  0xf8   :  { %3526 = vmatpush.msrb.mxu2 %v576_v40  ;;  %3545 = vmatpush.msrb.mxu3 %v593_v41  ;;  %v578_v40 = vld [vmem:[#allocation2 + $0xf80] sm:$0xff] }
  0xf9   :  { %3487 = vmatpush.msrb.mxu0 %v543_v42  ;;  %3506 = vmatpush.msrb.mxu1 %v560_v43  ;;  %v2613_v41 = vld.sshfl [vmem:[#allocation1 + $0x28] sm:$0xff pattern:$0x73625140]  ;;  %v2615_v42 = vld.sshfl [vmem:[#allocation1 + $0x38] sm:$0xff pattern:$0x73625140] }
  0xfa   :  { %3527 = vmatpush.msrb.mxu2 %v575_v44  ;;  %3546 = vmatpush.msrb.mxu3 %v592_v45  ;;  %v608_v43 = vld [vmem:[#allocation2 + $0x1070] sm:$0xff]  ;;  %v625_v44 = vld [vmem:[#allocation2 + $0x10f8] sm:$0xff] }
  0xfb   :  { %3488 = vmatpush.msrb.mxu0 %v542_v46  ;;  %3507 = vmatpush.msrb.mxu1 %v559_v47  ;;  %v640_v45 = vld [vmem:[#allocation2 + $0x1170] sm:$0xff]  ;;  %v657_v46 = vld [vmem:[#allocation2 + $0x11f8] sm:$0xff]  ;;  %v607_v47 = vld [vmem:[#allocation2 + $0x1068] sm:$0xff] }
  0xfc   :  { %3528 = vmatpush.msrb.mxu2 %v574_v48  ;;  %3547 = vmatpush.msrb.mxu3 %v591_v49  ;;  %v624_v48 = vld [vmem:[#allocation2 + $0x10f0] sm:$0xff]  ;;  %v639_v49 = vld [vmem:[#allocation2 + $0x1168] sm:$0xff] }
  0xfd   :  { %3489 = vmatpush.msrb.mxu0 %v541_v50  ;;  %3508 = vmatpush.msrb.mxu1 %v558_v51  ;;  %v656_v50 = vld [vmem:[#allocation2 + $0x11f0] sm:$0xff]  ;;  %v606_v51 = vld [vmem:[#allocation2 + $0x1060] sm:$0xff] }
  0xfe   :  { %3529 = vmatpush.msrb.mxu2 %v573_v52  ;;  %3548 = vmatpush.msrb.mxu3 %v590_v53  ;;  %v623_v52 = vld [vmem:[#allocation2 + $0x10e8] sm:$0xff]  ;;  %v638_v53 = vld [vmem:[#allocation2 + $0x1160] sm:$0xff] }
  0xff   :  { %3490 = vmatpush.msrb.mxu0 %v540_v54  ;;  %3509 = vmatpush.msrb.mxu1 %v557_v55  ;;  %v655_v54 = vld [vmem:[#allocation2 + $0x11e8] sm:$0xff]  ;;  %v605_v55 = vld [vmem:[#allocation2 + $0x1058] sm:$0xff] }
 0x100   :  { %3530 = vmatpush.msrb.mxu2 %v572_v56  ;;  %3549 = vmatpush.msrb.mxu3 %v589_v57  ;;  %v622_v56 = vld [vmem:[#allocation2 + $0x10e0] sm:$0xff]  ;;  %v637_v57 = vld [vmem:[#allocation2 + $0x1158] sm:$0xff] }
 0x101   :  { %3491 = vmatpush.msrb.mxu0 %v539_v58  ;;  %3510 = vmatpush.msrb.mxu1 %v556_v59  ;;  %v654_v58 = vld [vmem:[#allocation2 + $0x11e0] sm:$0xff]  ;;  %v604_v59 = vld [vmem:[#allocation2 + $0x1050] sm:$0xff] }
 0x102   :  { %3531 = vmatpush.msrb.mxu2 %v571_v60  ;;  %3550 = vmatpush.msrb.mxu3 %v588_v61  ;;  %v621_v60 = vld [vmem:[#allocation2 + $0x10d8] sm:$0xff]  ;;  %v636_v61 = vld [vmem:[#allocation2 + $0x1150] sm:$0xff] }
 0x103   :  { %3492 = vmatpush.msrb.mxu0 %v538_v62  ;;  %3511 = vmatpush.msrb.mxu1 %v555_v63  ;;  %v653_v62 = vld [vmem:[#allocation2 + $0x11d8] sm:$0xff]  ;;  %v603_v63 = vld [vmem:[#allocation2 + $0x1048] sm:$0xff] }
 0x104   :  { %3532 = vmatpush.msrb.mxu2 %v570_v0  ;;  %3551 = vmatpush.msrb.mxu3 %v587_v1  ;;  %v620_v0 = vld [vmem:[#allocation2 + $0x10d0] sm:$0xff]  ;;  %v635_v1 = vld [vmem:[#allocation2 + $0x1148] sm:$0xff] }
 0x105   :  { %3493 = vmatpush.msrb.mxu0 %v537_v2  ;;  %3512 = vmatpush.msrb.mxu1 %v554_v3  ;;  %v652_v2 = vld [vmem:[#allocation2 + $0x11d0] sm:$0xff]  ;;  %v602_v3 = vld [vmem:[#allocation2 + $0x1040] sm:$0xff] }
 0x106   :  { %3533 = vmatpush.msrb.mxu2 %v569_v4  ;;  %3552 = vmatpush.msrb.mxu3 %v586_v5  ;;  %v619_v4 = vld [vmem:[#allocation2 + $0x10c8] sm:$0xff]  ;;  %v634_v5 = vld [vmem:[#allocation2 + $0x1140] sm:$0xff] }
 0x107   :  { %3494 = vmatpush.msrb.mxu0 %v536_v6  ;;  %3513 = vmatpush.msrb.mxu1 %v553_v7  ;;  %v651_v6 = vld [vmem:[#allocation2 + $0x11c8] sm:$0xff]  ;;  %v601_v7 = vld [vmem:[#allocation2 + $0x1038] sm:$0xff] }
 0x108   :  { %3534 = vmatpush.msrb.mxu2 %v568_v8  ;;  %3553 = vmatpush.msrb.mxu3 %v585_v9  ;;  %v618_v8 = vld [vmem:[#allocation2 + $0x10c0] sm:$0xff]  ;;  %v633_v9 = vld [vmem:[#allocation2 + $0x1138] sm:$0xff] }
 0x109   :  { %3495 = vmatpush.msrb.mxu0 %v535_v10  ;;  %3514 = vmatpush.msrb.mxu1 %v552_v11  ;;  %v650_v10 = vld [vmem:[#allocation2 + $0x11c0] sm:$0xff]  ;;  %v600_v11 = vld [vmem:[#allocation2 + $0x1030] sm:$0xff] }
 0x10a   :  { %3535 = vmatpush.msrb.mxu2 %v567_v12  ;;  %3554 = vmatpush.msrb.mxu3 %v584_v13  ;;  %v617_v12 = vld [vmem:[#allocation2 + $0x10b8] sm:$0xff]  ;;  %v632_v13 = vld [vmem:[#allocation2 + $0x1130] sm:$0xff] }
 0x10b   :  { %3496 = vmatpush.msrb.mxu0 %v534_v14  ;;  %3515 = vmatpush.msrb.mxu1 %v551_v15  ;;  %v649_v14 = vld [vmem:[#allocation2 + $0x11b8] sm:$0xff]  ;;  %v599_v15 = vld [vmem:[#allocation2 + $0x1028] sm:$0xff] }
 0x10c   :  { %3536 = vmatpush.msrb.mxu2 %v566_v16  ;;  %3555 = vmatpush.msrb.mxu3 %v583_v17  ;;  %v616_v16 = vld [vmem:[#allocation2 + $0x10b0] sm:$0xff]  ;;  %v631_v17 = vld [vmem:[#allocation2 + $0x1128] sm:$0xff] }
 0x10d   :  { %3497 = vmatpush.msrb.mxu0 %v533_v18  ;;  %3516 = vmatpush.msrb.mxu1 %v550_v19  ;;  %v648_v18 = vld [vmem:[#allocation2 + $0x11b0] sm:$0xff]  ;;  %v598_v19 = vld [vmem:[#allocation2 + $0x1020] sm:$0xff] }
 0x10e   :  { %3537 = vmatpush.msrb.mxu2 %v565_v20  ;;  %3556 = vmatpush.msrb.mxu3 %v582_v21  ;;  %v615_v20 = vld [vmem:[#allocation2 + $0x10a8] sm:$0xff]  ;;  %v630_v21 = vld [vmem:[#allocation2 + $0x1120] sm:$0xff] }
 0x10f   :  { %3498 = vmatpush.msrb.mxu0 %v532_v22  ;;  %3517 = vmatpush.msrb.mxu1 %v549_v23  ;;  %v647_v22 = vld [vmem:[#allocation2 + $0x11a8] sm:$0xff]  ;;  %v597_v23 = vld [vmem:[#allocation2 + $0x1018] sm:$0xff] }
 0x110   :  { %3538 = vmatpush.msrb.mxu2 %v564_v24  ;;  %3557 = vmatpush.msrb.mxu3 %v581_v25  ;;  %v614_v24 = vld [vmem:[#allocation2 + $0x10a0] sm:$0xff]  ;;  %v629_v25 = vld [vmem:[#allocation2 + $0x1118] sm:$0xff] }
 0x111   :  { %3499 = vmatpush.msrb.mxu0 %v531_v26  ;;  %3518 = vmatpush.msrb.mxu1 %v548_v27  ;;  %v646_v26 = vld [vmem:[#allocation2 + $0x11a0] sm:$0xff]  ;;  %v596_v27 = vld [vmem:[#allocation2 + $0x1010] sm:$0xff] }
 0x112   :  { %3539 = vmatpush.msrb.mxu2 %v563_v29  ;;  %3558 = vmatpush.msrb.mxu3 %v580_v30  ;;  %v628_v29 = vld [vmem:[#allocation2 + $0x1110] sm:$0xff]  ;;  %v645_v30 = vld [vmem:[#allocation2 + $0x1198] sm:$0xff] }
 0x113   :  { %3500 = vmatpush.msrb.mxu0 %v530_v31  ;;  %3519 = vmatpush.msrb.mxu1 %v547_v32  ;;  %v595_v31 = vld [vmem:[#allocation2 + $0x1008] sm:$0xff]  ;;  %v612_v32 = vld [vmem:[#allocation2 + $0x1090] sm:$0xff] }
 0x114   :  { %3540 = vmatpush.msrb.mxu2 %v562_v33  ;;  %3559 = vmatpush.msrb.mxu3 %v579_v34  ;;  %v52_v33 = vld [vmem:[%s6489_s0 + $0x48] sm:$0xff]  ;;  %v627_v34 = vld [vmem:[#allocation2 + $0x1108] sm:$0xff] }
 0x115   :  { %3501 = vmatmul.f32.vlgmr.msrb.gmra.mxu0 %v2612_v35  ;;  %3541 = vmatmul.f32.vlgmr.msrb.gmra.mxu2 %v2614_v36  ;;  %v644_v35 = vld [vmem:[#allocation2 + $0x1190] sm:$0xff]  ;;  %2617 = vst [vmem:[#allocation1 + $0x20] ss:$4 sm:$0xff] %v52_v33  ;;  %v594_v36 = vld [vmem:[#allocation2 + $0x1000] sm:$0xff]  ;;  %v677_v33 = vld [vmem:[#allocation2 + $0x1298] sm:$0xff] }
 0x116   :  { %3565 = vmatpush.msra.mxu0 %v609_v37  ;;  %3605 = vmatpush.msra.mxu2 %v641_v38  ;;  %v611_v37 = vld [vmem:[#allocation2 + $0x1088] sm:$0xff]  ;;  %v626_v38 = vld [vmem:[#allocation2 + $0x1100] sm:$0xff] }
 0x117   :  { %3520 = vmatpush.msrb.mxu1 %v546_v39  ;;  %3560 = vmatpush.msrb.mxu3 %v578_v40  ;;  %v643_v39 = vld [vmem:[#allocation2 + $0x1188] sm:$0xff]  ;;  %v2618_v40 = vld.sshfl [vmem:[#allocation1] sm:$0xff pattern:$0x73625140] }
 0x118   :  { %3521 = vmatmul.f32.vlgmr.msrb.gmra.mxu1 %v2613_v41  ;;  %3561 = vmatmul.f32.vlgmr.msrb.gmra.mxu3 %v2615_v42  ;;  %v2620_v41 = vld.sshfl [vmem:[#allocation1 + $0x10] sm:$0xff pattern:$0x73625140]  ;;  %v673_v42 = vld [vmem:[#allocation2 + $0x1278] sm:$0xff] }
 0x119   :  { %3566 = vmatpush.msra.mxu0 %v608_v43  ;;  %3585 = vmatpush.msra.mxu1 %v625_v44  ;;  %v705_v43 = vld [vmem:[#allocation2 + $0x1378] sm:$0xff]  ;;  %v610_v44 = vld [vmem:[#allocation2 + $0x1080] sm:$0xff] }
 0x11a   :  { %3606 = vmatpush.msra.mxu2 %v640_v45  ;;  %3625 = vmatpush.msra.mxu3 %v657_v46  ;;  %v642_v45 = vld [vmem:[#allocation2 + $0x1180] sm:$0xff] }
 0x11b   :  { %3567 = vmatpush.msra.mxu0 %v607_v47  ;;  %3586 = vmatpush.msra.mxu1 %v624_v48  ;;  %v2619_v46 = vld.sshfl [vmem:[#allocation1 + $0x8] sm:$0xff pattern:$0x73625140]  ;;  %v2621_v47 = vld.sshfl [vmem:[#allocation1 + $0x18] sm:$0xff pattern:$0x73625140] }
 0x11c   :  { %3607 = vmatpush.msra.mxu2 %v639_v49  ;;  %3626 = vmatpush.msra.mxu3 %v656_v50  ;;  %v672_v48 = vld [vmem:[#allocation2 + $0x1270] sm:$0xff]  ;;  %v689_v49 = vld [vmem:[#allocation2 + $0x12f8] sm:$0xff] }
 0x11d   :  { %3568 = vmatpush.msra.mxu0 %v606_v51  ;;  %3587 = vmatpush.msra.mxu1 %v623_v52  ;;  %v704_v50 = vld [vmem:[#allocation2 + $0x1370] sm:$0xff]  ;;  %v721_v51 = vld [vmem:[#allocation2 + $0x13f8] sm:$0xff]  ;;  %v671_v52 = vld [vmem:[#allocation2 + $0x1268] sm:$0xff] }
 0x11e   :  { %3608 = vmatpush.msra.mxu2 %v638_v53  ;;  %3627 = vmatpush.msra.mxu3 %v655_v54  ;;  %v688_v53 = vld [vmem:[#allocation2 + $0x12f0] sm:$0xff]  ;;  %v703_v54 = vld [vmem:[#allocation2 + $0x1368] sm:$0xff] }
 0x11f   :  { %3569 = vmatpush.msra.mxu0 %v605_v55  ;;  %3588 = vmatpush.msra.mxu1 %v622_v56  ;;  %v720_v55 = vld [vmem:[#allocation2 + $0x13f0] sm:$0xff]  ;;  %v670_v56 = vld [vmem:[#allocation2 + $0x1260] sm:$0xff] }
 0x120   :  { %3609 = vmatpush.msra.mxu2 %v637_v57  ;;  %3628 = vmatpush.msra.mxu3 %v654_v58  ;;  %v687_v57 = vld [vmem:[#allocation2 + $0x12e8] sm:$0xff]  ;;  %v702_v58 = vld [vmem:[#allocation2 + $0x1360] sm:$0xff] }
 0x121   :  { %3570 = vmatpush.msra.mxu0 %v604_v59  ;;  %3589 = vmatpush.msra.mxu1 %v621_v60  ;;  %v719_v59 = vld [vmem:[#allocation2 + $0x13e8] sm:$0xff]  ;;  %v669_v60 = vld [vmem:[#allocation2 + $0x1258] sm:$0xff] }
 0x122   :  { %3610 = vmatpush.msra.mxu2 %v636_v61  ;;  %3629 = vmatpush.msra.mxu3 %v653_v62  ;;  %v686_v61 = vld [vmem:[#allocation2 + $0x12e0] sm:$0xff]  ;;  %v701_v62 = vld [vmem:[#allocation2 + $0x1358] sm:$0xff] }
 0x123   :  { %3571 = vmatpush.msra.mxu0 %v603_v63  ;;  %3590 = vmatpush.msra.mxu1 %v620_v0  ;;  %v718_v63 = vld [vmem:[#allocation2 + $0x13e0] sm:$0xff]  ;;  %v668_v0 = vld [vmem:[#allocation2 + $0x1250] sm:$0xff] }
 0x124   :  { %3611 = vmatpush.msra.mxu2 %v635_v1  ;;  %3630 = vmatpush.msra.mxu3 %v652_v2  ;;  %v685_v1 = vld [vmem:[#allocation2 + $0x12d8] sm:$0xff]  ;;  %v700_v2 = vld [vmem:[#allocation2 + $0x1350] sm:$0xff] }
 0x125   :  { %3572 = vmatpush.msra.mxu0 %v602_v3  ;;  %3591 = vmatpush.msra.mxu1 %v619_v4  ;;  %v717_v3 = vld [vmem:[#allocation2 + $0x13d8] sm:$0xff]  ;;  %v667_v4 = vld [vmem:[#allocation2 + $0x1248] sm:$0xff] }
 0x126   :  { %3612 = vmatpush.msra.mxu2 %v634_v5  ;;  %3631 = vmatpush.msra.mxu3 %v651_v6  ;;  %v684_v5 = vld [vmem:[#allocation2 + $0x12d0] sm:$0xff]  ;;  %v699_v6 = vld [vmem:[#allocation2 + $0x1348] sm:$0xff] }
 0x127   :  { %3573 = vmatpush.msra.mxu0 %v601_v7  ;;  %3592 = vmatpush.msra.mxu1 %v618_v8  ;;  %v716_v7 = vld [vmem:[#allocation2 + $0x13d0] sm:$0xff]  ;;  %v666_v8 = vld [vmem:[#allocation2 + $0x1240] sm:$0xff] }
 0x128   :  { %3613 = vmatpush.msra.mxu2 %v633_v9  ;;  %3632 = vmatpush.msra.mxu3 %v650_v10  ;;  %v683_v9 = vld [vmem:[#allocation2 + $0x12c8] sm:$0xff]  ;;  %v698_v10 = vld [vmem:[#allocation2 + $0x1340] sm:$0xff] }
 0x129   :  { %3574 = vmatpush.msra.mxu0 %v600_v11  ;;  %3593 = vmatpush.msra.mxu1 %v617_v12  ;;  %v715_v11 = vld [vmem:[#allocation2 + $0x13c8] sm:$0xff]  ;;  %v665_v12 = vld [vmem:[#allocation2 + $0x1238] sm:$0xff] }
 0x12a   :  { %3614 = vmatpush.msra.mxu2 %v632_v13  ;;  %3633 = vmatpush.msra.mxu3 %v649_v14  ;;  %v682_v13 = vld [vmem:[#allocation2 + $0x12c0] sm:$0xff]  ;;  %v697_v14 = vld [vmem:[#allocation2 + $0x1338] sm:$0xff] }
 0x12b   :  { %3575 = vmatpush.msra.mxu0 %v599_v15  ;;  %3594 = vmatpush.msra.mxu1 %v616_v16  ;;  %v714_v15 = vld [vmem:[#allocation2 + $0x13c0] sm:$0xff]  ;;  %v664_v16 = vld [vmem:[#allocation2 + $0x1230] sm:$0xff] }
 0x12c   :  { %3615 = vmatpush.msra.mxu2 %v631_v17  ;;  %3634 = vmatpush.msra.mxu3 %v648_v18  ;;  %v681_v17 = vld [vmem:[#allocation2 + $0x12b8] sm:$0xff]  ;;  %v696_v18 = vld [vmem:[#allocation2 + $0x1330] sm:$0xff] }
 0x12d   :  { %3576 = vmatpush.msra.mxu0 %v598_v19  ;;  %3595 = vmatpush.msra.mxu1 %v615_v20  ;;  %v713_v19 = vld [vmem:[#allocation2 + $0x13b8] sm:$0xff]  ;;  %v663_v20 = vld [vmem:[#allocation2 + $0x1228] sm:$0xff] }
 0x12e   :  { %3616 = vmatpush.msra.mxu2 %v630_v21  ;;  %3635 = vmatpush.msra.mxu3 %v647_v22  ;;  %v680_v21 = vld [vmem:[#allocation2 + $0x12b0] sm:$0xff]  ;;  %v695_v22 = vld [vmem:[#allocation2 + $0x1328] sm:$0xff] }
 0x12f   :  { %3577 = vmatpush.msra.mxu0 %v597_v23  ;;  %3596 = vmatpush.msra.mxu1 %v614_v24  ;;  %v712_v23 = vld [vmem:[#allocation2 + $0x13b0] sm:$0xff]  ;;  %v662_v24 = vld [vmem:[#allocation2 + $0x1220] sm:$0xff] }
 0x130   :  { %3617 = vmatpush.msra.mxu2 %v629_v25  ;;  %3636 = vmatpush.msra.mxu3 %v646_v26  ;;  %v679_v25 = vld [vmem:[#allocation2 + $0x12a8] sm:$0xff]  ;;  %v694_v26 = vld [vmem:[#allocation2 + $0x1320] sm:$0xff] }
 0x131   :  { %3578 = vmatpush.msra.mxu0 %v596_v27  ;;  %3597 = vmatpush.msra.mxu1 %v613_v28  ;;  %v711_v27 = vld [vmem:[#allocation2 + $0x13a8] sm:$0xff]  ;;  %v661_v28 = vld [vmem:[#allocation2 + $0x1218] sm:$0xff] }
 0x132   :  { %3618 = vmatpush.msra.mxu2 %v628_v29  ;;  %3637 = vmatpush.msra.mxu3 %v645_v30  ;;  %v678_v29 = vld [vmem:[#allocation2 + $0x12a0] sm:$0xff]  ;;  %v693_v30 = vld [vmem:[#allocation2 + $0x1318] sm:$0xff] }
 0x133   :  { %3579 = vmatpush.msra.mxu0 %v595_v31  ;;  %3598 = vmatpush.msra.mxu1 %v612_v32  ;;  %v710_v31 = vld [vmem:[#allocation2 + $0x13a0] sm:$0xff]  ;;  %v660_v32 = vld [vmem:[#allocation2 + $0x1210] sm:$0xff] }
 0x134   :  { %3619 = vmatpush.msra.mxu2 %v627_v34  ;;  %3638 = vmatpush.msra.mxu3 %v644_v35  ;;  %v692_v34 = vld [vmem:[#allocation2 + $0x1310] sm:$0xff]  ;;  %v709_v35 = vld [vmem:[#allocation2 + $0x1398] sm:$0xff] }
 0x135   :  { %3580 = vmatpush.msra.mxu0 %v594_v36  ;;  %3599 = vmatpush.msra.mxu1 %v611_v37  ;;  %v659_v36 = vld [vmem:[#allocation2 + $0x1208] sm:$0xff]  ;;  %v676_v37 = vld [vmem:[#allocation2 + $0x1290] sm:$0xff] }
 0x136   :  { %3620 = vmatpush.msra.mxu2 %v626_v38  ;;  %3639 = vmatpush.msra.mxu3 %v643_v39  ;;  %v53_v38 = vld [vmem:[%s6489_s0 + $0x50] sm:$0xff] }
 0x137   :  { %3581 = vmatmul.f32.vlgmr.msra.gmra.mxu0 %v2618_v40  ;;  %3621 = vmatmul.f32.vlgmr.msra.gmra.mxu2 %v2620_v41  ;;  %v691_v39 = vld [vmem:[#allocation2 + $0x1308] sm:$0xff]  ;;  %v708_v40 = vld [vmem:[#allocation2 + $0x1390] sm:$0xff]  ;;  %2626 = vst [vmem:[#allocation1] ss:$4 sm:$0xff] %v53_v38  ;;  %v658_v41 = vld [vmem:[#allocation2 + $0x1200] sm:$0xff] }
 0x138   :  { %3645 = vmatpush.msrb.mxu0 %v673_v42  ;;  %3685 = vmatpush.msrb.mxu2 %v705_v43  ;;  %v675_v42 = vld [vmem:[#allocation2 + $0x1288] sm:$0xff]  ;;  %v690_v43 = vld [vmem:[#allocation2 + $0x1300] sm:$0xff]  ;;  %v741_v38 = vld [vmem:[#allocation2 + $0x1498] sm:$0xff] }
 0x139   :  { %3600 = vmatpush.msra.mxu1 %v610_v44  ;;  %3640 = vmatpush.msra.mxu3 %v642_v45  ;;  %v707_v44 = vld [vmem:[#allocation2 + $0x1388] sm:$0xff]  ;;  %v2622_v45 = vld.sshfl [vmem:[#allocation1 + $0x20] sm:$0xff pattern:$0x73625140] }
 0x13a   :  { %3601 = vmatmul.f32.vlgmr.msra.gmra.mxu1 %v2619_v46  ;;  %3641 = vmatmul.f32.vlgmr.msra.gmra.mxu3 %v2621_v47  ;;  %v2624_v46 = vld.sshfl [vmem:[#allocation1 + $0x30] sm:$0xff pattern:$0x73625140]  ;;  %v737_v47 = vld [vmem:[#allocation2 + $0x1478] sm:$0xff] }
 0x13b   :  { %3646 = vmatpush.msrb.mxu0 %v672_v48  ;;  %3665 = vmatpush.msrb.mxu1 %v689_v49  ;;  %v769_v48 = vld [vmem:[#allocation2 + $0x1578] sm:$0xff]  ;;  %v674_v49 = vld [vmem:[#allocation2 + $0x1280] sm:$0xff] }
 0x13c   :  { %3686 = vmatpush.msrb.mxu2 %v704_v50  ;;  %3705 = vmatpush.msrb.mxu3 %v721_v51  ;;  %v706_v50 = vld [vmem:[#allocation2 + $0x1380] sm:$0xff] }
 0x13d   :  { %3647 = vmatpush.msrb.mxu0 %v671_v52  ;;  %3666 = vmatpush.msrb.mxu1 %v688_v53  ;;  %v2623_v51 = vld.sshfl [vmem:[#allocation1 + $0x28] sm:$0xff pattern:$0x73625140]  ;;  %v2625_v52 = vld.sshfl [vmem:[#allocation1 + $0x38] sm:$0xff pattern:$0x73625140] }
 0x13e   :  { %3687 = vmatpush.msrb.mxu2 %v703_v54  ;;  %3706 = vmatpush.msrb.mxu3 %v720_v55  ;;  %v736_v53 = vld [vmem:[#allocation2 + $0x1470] sm:$0xff]  ;;  %v753_v54 = vld [vmem:[#allocation2 + $0x14f8] sm:$0xff] }
 0x13f   :  { %3648 = vmatpush.msrb.mxu0 %v670_v56  ;;  %3667 = vmatpush.msrb.mxu1 %v687_v57  ;;  %v768_v55 = vld [vmem:[#allocation2 + $0x1570] sm:$0xff]  ;;  %v785_v56 = vld [vmem:[#allocation2 + $0x15f8] sm:$0xff]  ;;  %v735_v57 = vld [vmem:[#allocation2 + $0x1468] sm:$0xff] }
 0x140   :  { %3688 = vmatpush.msrb.mxu2 %v702_v58  ;;  %3707 = vmatpush.msrb.mxu3 %v719_v59  ;;  %v752_v58 = vld [vmem:[#allocation2 + $0x14f0] sm:$0xff]  ;;  %v767_v59 = vld [vmem:[#allocation2 + $0x1568] sm:$0xff] }
 0x141   :  { %3649 = vmatpush.msrb.mxu0 %v669_v60  ;;  %3668 = vmatpush.msrb.mxu1 %v686_v61  ;;  %v784_v60 = vld [vmem:[#allocation2 + $0x15f0] sm:$0xff]  ;;  %v734_v61 = vld [vmem:[#allocation2 + $0x1460] sm:$0xff] }
 0x142   :  { %3689 = vmatpush.msrb.mxu2 %v701_v62  ;;  %3708 = vmatpush.msrb.mxu3 %v718_v63  ;;  %v751_v62 = vld [vmem:[#allocation2 + $0x14e8] sm:$0xff]  ;;  %v766_v63 = vld [vmem:[#allocation2 + $0x1560] sm:$0xff] }
 0x143   :  { %3650 = vmatpush.msrb.mxu0 %v668_v0  ;;  %3669 = vmatpush.msrb.mxu1 %v685_v1  ;;  %v783_v0 = vld [vmem:[#allocation2 + $0x15e8] sm:$0xff]  ;;  %v733_v1 = vld [vmem:[#allocation2 + $0x1458] sm:$0xff] }
 0x144   :  { %3690 = vmatpush.msrb.mxu2 %v700_v2  ;;  %3709 = vmatpush.msrb.mxu3 %v717_v3  ;;  %v750_v2 = vld [vmem:[#allocation2 + $0x14e0] sm:$0xff]  ;;  %v765_v3 = vld [vmem:[#allocation2 + $0x1558] sm:$0xff] }
 0x145   :  { %3651 = vmatpush.msrb.mxu0 %v667_v4  ;;  %3670 = vmatpush.msrb.mxu1 %v684_v5  ;;  %v782_v4 = vld [vmem:[#allocation2 + $0x15e0] sm:$0xff]  ;;  %v732_v5 = vld [vmem:[#allocation2 + $0x1450] sm:$0xff] }
 0x146   :  { %3691 = vmatpush.msrb.mxu2 %v699_v6  ;;  %3710 = vmatpush.msrb.mxu3 %v716_v7  ;;  %v749_v6 = vld [vmem:[#allocation2 + $0x14d8] sm:$0xff]  ;;  %v764_v7 = vld [vmem:[#allocation2 + $0x1550] sm:$0xff] }
 0x147   :  { %3652 = vmatpush.msrb.mxu0 %v666_v8  ;;  %3671 = vmatpush.msrb.mxu1 %v683_v9  ;;  %v781_v8 = vld [vmem:[#allocation2 + $0x15d8] sm:$0xff]  ;;  %v731_v9 = vld [vmem:[#allocation2 + $0x1448] sm:$0xff] }
 0x148   :  { %3692 = vmatpush.msrb.mxu2 %v698_v10  ;;  %3711 = vmatpush.msrb.mxu3 %v715_v11  ;;  %v748_v10 = vld [vmem:[#allocation2 + $0x14d0] sm:$0xff]  ;;  %v763_v11 = vld [vmem:[#allocation2 + $0x1548] sm:$0xff] }
 0x149   :  { %3653 = vmatpush.msrb.mxu0 %v665_v12  ;;  %3672 = vmatpush.msrb.mxu1 %v682_v13  ;;  %v780_v12 = vld [vmem:[#allocation2 + $0x15d0] sm:$0xff]  ;;  %v730_v13 = vld [vmem:[#allocation2 + $0x1440] sm:$0xff] }
 0x14a   :  { %3693 = vmatpush.msrb.mxu2 %v697_v14  ;;  %3712 = vmatpush.msrb.mxu3 %v714_v15  ;;  %v747_v14 = vld [vmem:[#allocation2 + $0x14c8] sm:$0xff]  ;;  %v762_v15 = vld [vmem:[#allocation2 + $0x1540] sm:$0xff] }
 0x14b   :  { %3654 = vmatpush.msrb.mxu0 %v664_v16  ;;  %3673 = vmatpush.msrb.mxu1 %v681_v17  ;;  %v779_v16 = vld [vmem:[#allocation2 + $0x15c8] sm:$0xff]  ;;  %v729_v17 = vld [vmem:[#allocation2 + $0x1438] sm:$0xff] }
 0x14c   :  { %3694 = vmatpush.msrb.mxu2 %v696_v18  ;;  %3713 = vmatpush.msrb.mxu3 %v713_v19  ;;  %v746_v18 = vld [vmem:[#allocation2 + $0x14c0] sm:$0xff]  ;;  %v761_v19 = vld [vmem:[#allocation2 + $0x1538] sm:$0xff] }
 0x14d   :  { %3655 = vmatpush.msrb.mxu0 %v663_v20  ;;  %3674 = vmatpush.msrb.mxu1 %v680_v21  ;;  %v778_v20 = vld [vmem:[#allocation2 + $0x15c0] sm:$0xff]  ;;  %v728_v21 = vld [vmem:[#allocation2 + $0x1430] sm:$0xff] }
 0x14e   :  { %3695 = vmatpush.msrb.mxu2 %v695_v22  ;;  %3714 = vmatpush.msrb.mxu3 %v712_v23  ;;  %v745_v22 = vld [vmem:[#allocation2 + $0x14b8] sm:$0xff]  ;;  %v760_v23 = vld [vmem:[#allocation2 + $0x1530] sm:$0xff] }
 0x14f   :  { %3656 = vmatpush.msrb.mxu0 %v662_v24  ;;  %3675 = vmatpush.msrb.mxu1 %v679_v25  ;;  %v777_v24 = vld [vmem:[#allocation2 + $0x15b8] sm:$0xff]  ;;  %v727_v25 = vld [vmem:[#allocation2 + $0x1428] sm:$0xff] }
 0x150   :  { %3696 = vmatpush.msrb.mxu2 %v694_v26  ;;  %3715 = vmatpush.msrb.mxu3 %v711_v27  ;;  %v744_v26 = vld [vmem:[#allocation2 + $0x14b0] sm:$0xff]  ;;  %v759_v27 = vld [vmem:[#allocation2 + $0x1528] sm:$0xff] }
 0x151   :  { %3657 = vmatpush.msrb.mxu0 %v661_v28  ;;  %3676 = vmatpush.msrb.mxu1 %v678_v29  ;;  %v776_v28 = vld [vmem:[#allocation2 + $0x15b0] sm:$0xff]  ;;  %v726_v29 = vld [vmem:[#allocation2 + $0x1420] sm:$0xff] }
 0x152   :  { %3697 = vmatpush.msrb.mxu2 %v693_v30  ;;  %3716 = vmatpush.msrb.mxu3 %v710_v31  ;;  %v743_v30 = vld [vmem:[#allocation2 + $0x14a8] sm:$0xff]  ;;  %v758_v31 = vld [vmem:[#allocation2 + $0x1520] sm:$0xff] }
 0x153   :  { %3658 = vmatpush.msrb.mxu0 %v660_v32  ;;  %3677 = vmatpush.msrb.mxu1 %v677_v33  ;;  %v775_v32 = vld [vmem:[#allocation2 + $0x15a8] sm:$0xff]  ;;  %v725_v33 = vld [vmem:[#allocation2 + $0x1418] sm:$0xff] }
 0x154   :  { %3698 = vmatpush.msrb.mxu2 %v692_v34  ;;  %3717 = vmatpush.msrb.mxu3 %v709_v35  ;;  %v742_v34 = vld [vmem:[#allocation2 + $0x14a0] sm:$0xff]  ;;  %v757_v35 = vld [vmem:[#allocation2 + $0x1518] sm:$0xff] }
 0x155   :  { %3659 = vmatpush.msrb.mxu0 %v659_v36  ;;  %3678 = vmatpush.msrb.mxu1 %v676_v37  ;;  %v774_v36 = vld [vmem:[#allocation2 + $0x15a0] sm:$0xff]  ;;  %v724_v37 = vld [vmem:[#allocation2 + $0x1410] sm:$0xff] }
 0x156   :  { %3699 = vmatpush.msrb.mxu2 %v691_v39  ;;  %3718 = vmatpush.msrb.mxu3 %v708_v40  ;;  %v756_v39 = vld [vmem:[#allocation2 + $0x1510] sm:$0xff]  ;;  %v773_v40 = vld [vmem:[#allocation2 + $0x1598] sm:$0xff] }
 0x157   :  { %3660 = vmatpush.msrb.mxu0 %v658_v41  ;;  %3679 = vmatpush.msrb.mxu1 %v675_v42  ;;  %v723_v41 = vld [vmem:[#allocation2 + $0x1408] sm:$0xff]  ;;  %v740_v42 = vld [vmem:[#allocation2 + $0x1490] sm:$0xff] }
 0x158   :  { %3700 = vmatpush.msrb.mxu2 %v690_v43  ;;  %3719 = vmatpush.msrb.mxu3 %v707_v44  ;;  %v54_v43 = vld [vmem:[%s6489_s0 + $0x58] sm:$0xff]  ;;  %v755_v44 = vld [vmem:[#allocation2 + $0x1508] sm:$0xff] }
 0x159   :  { %3661 = vmatmul.f32.vlgmr.msrb.gmra.mxu0 %v2622_v45  ;;  %3701 = vmatmul.f32.vlgmr.msrb.gmra.mxu2 %v2624_v46  ;;  %v772_v45 = vld [vmem:[#allocation2 + $0x1590] sm:$0xff]  ;;  %2627 = vst [vmem:[#allocation1 + $0x20] ss:$4 sm:$0xff] %v54_v43  ;;  %v722_v46 = vld [vmem:[#allocation2 + $0x1400] sm:$0xff]  ;;  %v805_v43 = vld [vmem:[#allocation2 + $0x1698] sm:$0xff] }
 0x15a   :  { %3725 = vmatpush.msra.mxu0 %v737_v47  ;;  %3765 = vmatpush.msra.mxu2 %v769_v48  ;;  %v739_v47 = vld [vmem:[#allocation2 + $0x1488] sm:$0xff]  ;;  %v754_v48 = vld [vmem:[#allocation2 + $0x1500] sm:$0xff] }
 0x15b   :  { %3680 = vmatpush.msrb.mxu1 %v674_v49  ;;  %3720 = vmatpush.msrb.mxu3 %v706_v50  ;;  %v771_v49 = vld [vmem:[#allocation2 + $0x1588] sm:$0xff]  ;;  %v2628_v50 = vld.sshfl [vmem:[#allocation1] sm:$0xff pattern:$0x73625140] }
 0x15c   :  { %3681 = vmatmul.f32.vlgmr.msrb.gmra.mxu1 %v2623_v51  ;;  %3721 = vmatmul.f32.vlgmr.msrb.gmra.mxu3 %v2625_v52  ;;  %v2630_v51 = vld.sshfl [vmem:[#allocation1 + $0x10] sm:$0xff pattern:$0x73625140]  ;;  %v801_v52 = vld [vmem:[#allocation2 + $0x1678] sm:$0xff] }
 0x15d   :  { %3726 = vmatpush.msra.mxu0 %v736_v53  ;;  %3745 = vmatpush.msra.mxu1 %v753_v54  ;;  %v833_v53 = vld [vmem:[#allocation2 + $0x1778] sm:$0xff]  ;;  %v738_v54 = vld [vmem:[#allocation2 + $0x1480] sm:$0xff] }
 0x15e   :  { %3766 = vmatpush.msra.mxu2 %v768_v55  ;;  %3785 = vmatpush.msra.mxu3 %v785_v56  ;;  %v770_v55 = vld [vmem:[#allocation2 + $0x1580] sm:$0xff] }
 0x15f   :  { %3727 = vmatpush.msra.mxu0 %v735_v57  ;;  %3746 = vmatpush.msra.mxu1 %v752_v58  ;;  %v2629_v56 = vld.sshfl [vmem:[#allocation1 + $0x8] sm:$0xff pattern:$0x73625140]  ;;  %v2631_v57 = vld.sshfl [vmem:[#allocation1 + $0x18] sm:$0xff pattern:$0x73625140] }
 0x160   :  { %3767 = vmatpush.msra.mxu2 %v767_v59  ;;  %3786 = vmatpush.msra.mxu3 %v784_v60  ;;  %v800_v58 = vld [vmem:[#allocation2 + $0x1670] sm:$0xff]  ;;  %v817_v59 = vld [vmem:[#allocation2 + $0x16f8] sm:$0xff] }
 0x161   :  { %3728 = vmatpush.msra.mxu0 %v734_v61  ;;  %3747 = vmatpush.msra.mxu1 %v751_v62  ;;  %v832_v60 = vld [vmem:[#allocation2 + $0x1770] sm:$0xff]  ;;  %v849_v61 = vld [vmem:[#allocation2 + $0x17f8] sm:$0xff]  ;;  %v799_v62 = vld [vmem:[#allocation2 + $0x1668] sm:$0xff] }
 0x162   :  { %3768 = vmatpush.msra.mxu2 %v766_v63  ;;  %3787 = vmatpush.msra.mxu3 %v783_v0  ;;  %v816_v63 = vld [vmem:[#allocation2 + $0x16f0] sm:$0xff]  ;;  %v831_v0 = vld [vmem:[#allocation2 + $0x1768] sm:$0xff] }
 0x163   :  { %3729 = vmatpush.msra.mxu0 %v733_v1  ;;  %3748 = vmatpush.msra.mxu1 %v750_v2  ;;  %v848_v1 = vld [vmem:[#allocation2 + $0x17f0] sm:$0xff]  ;;  %v798_v2 = vld [vmem:[#allocation2 + $0x1660] sm:$0xff] }
 0x164   :  { %3769 = vmatpush.msra.mxu2 %v765_v3  ;;  %3788 = vmatpush.msra.mxu3 %v782_v4  ;;  %v815_v3 = vld [vmem:[#allocation2 + $0x16e8] sm:$0xff]  ;;  %v830_v4 = vld [vmem:[#allocation2 + $0x1760] sm:$0xff] }
 0x165   :  { %3730 = vmatpush.msra.mxu0 %v732_v5  ;;  %3749 = vmatpush.msra.mxu1 %v749_v6  ;;  %v847_v5 = vld [vmem:[#allocation2 + $0x17e8] sm:$0xff]  ;;  %v797_v6 = vld [vmem:[#allocation2 + $0x1658] sm:$0xff] }
 0x166   :  { %3770 = vmatpush.msra.mxu2 %v764_v7  ;;  %3789 = vmatpush.msra.mxu3 %v781_v8  ;;  %v814_v7 = vld [vmem:[#allocation2 + $0x16e0] sm:$0xff]  ;;  %v829_v8 = vld [vmem:[#allocation2 + $0x1758] sm:$0xff] }
 0x167   :  { %3731 = vmatpush.msra.mxu0 %v731_v9  ;;  %3750 = vmatpush.msra.mxu1 %v748_v10  ;;  %v846_v9 = vld [vmem:[#allocation2 + $0x17e0] sm:$0xff]  ;;  %v796_v10 = vld [vmem:[#allocation2 + $0x1650] sm:$0xff] }
 0x168   :  { %3771 = vmatpush.msra.mxu2 %v763_v11  ;;  %3790 = vmatpush.msra.mxu3 %v780_v12  ;;  %v813_v11 = vld [vmem:[#allocation2 + $0x16d8] sm:$0xff]  ;;  %v828_v12 = vld [vmem:[#allocation2 + $0x1750] sm:$0xff] }
 0x169   :  { %3732 = vmatpush.msra.mxu0 %v730_v13  ;;  %3751 = vmatpush.msra.mxu1 %v747_v14  ;;  %v845_v13 = vld [vmem:[#allocation2 + $0x17d8] sm:$0xff]  ;;  %v795_v14 = vld [vmem:[#allocation2 + $0x1648] sm:$0xff] }
 0x16a   :  { %3772 = vmatpush.msra.mxu2 %v762_v15  ;;  %3791 = vmatpush.msra.mxu3 %v779_v16  ;;  %v812_v15 = vld [vmem:[#allocation2 + $0x16d0] sm:$0xff]  ;;  %v827_v16 = vld [vmem:[#allocation2 + $0x1748] sm:$0xff] }
 0x16b   :  { %3733 = vmatpush.msra.mxu0 %v729_v17  ;;  %3752 = vmatpush.msra.mxu1 %v746_v18  ;;  %v844_v17 = vld [vmem:[#allocation2 + $0x17d0] sm:$0xff]  ;;  %v794_v18 = vld [vmem:[#allocation2 + $0x1640] sm:$0xff] }
 0x16c   :  { %3773 = vmatpush.msra.mxu2 %v761_v19  ;;  %3792 = vmatpush.msra.mxu3 %v778_v20  ;;  %v811_v19 = vld [vmem:[#allocation2 + $0x16c8] sm:$0xff]  ;;  %v826_v20 = vld [vmem:[#allocation2 + $0x1740] sm:$0xff] }
 0x16d   :  { %3734 = vmatpush.msra.mxu0 %v728_v21  ;;  %3753 = vmatpush.msra.mxu1 %v745_v22  ;;  %v843_v21 = vld [vmem:[#allocation2 + $0x17c8] sm:$0xff]  ;;  %v793_v22 = vld [vmem:[#allocation2 + $0x1638] sm:$0xff] }
 0x16e   :  { %3774 = vmatpush.msra.mxu2 %v760_v23  ;;  %3793 = vmatpush.msra.mxu3 %v777_v24  ;;  %v810_v23 = vld [vmem:[#allocation2 + $0x16c0] sm:$0xff]  ;;  %v825_v24 = vld [vmem:[#allocation2 + $0x1738] sm:$0xff] }
 0x16f   :  { %3735 = vmatpush.msra.mxu0 %v727_v25  ;;  %3754 = vmatpush.msra.mxu1 %v744_v26  ;;  %v842_v25 = vld [vmem:[#allocation2 + $0x17c0] sm:$0xff]  ;;  %v792_v26 = vld [vmem:[#allocation2 + $0x1630] sm:$0xff] }
 0x170   :  { %3775 = vmatpush.msra.mxu2 %v759_v27  ;;  %3794 = vmatpush.msra.mxu3 %v776_v28  ;;  %v809_v27 = vld [vmem:[#allocation2 + $0x16b8] sm:$0xff]  ;;  %v824_v28 = vld [vmem:[#allocation2 + $0x1730] sm:$0xff] }
 0x171   :  { %3736 = vmatpush.msra.mxu0 %v726_v29  ;;  %3755 = vmatpush.msra.mxu1 %v743_v30  ;;  %v841_v29 = vld [vmem:[#allocation2 + $0x17b8] sm:$0xff]  ;;  %v791_v30 = vld [vmem:[#allocation2 + $0x1628] sm:$0xff] }
 0x172   :  { %3776 = vmatpush.msra.mxu2 %v758_v31  ;;  %3795 = vmatpush.msra.mxu3 %v775_v32  ;;  %v808_v31 = vld [vmem:[#allocation2 + $0x16b0] sm:$0xff]  ;;  %v823_v32 = vld [vmem:[#allocation2 + $0x1728] sm:$0xff] }
 0x173   :  { %3737 = vmatpush.msra.mxu0 %v725_v33  ;;  %3756 = vmatpush.msra.mxu1 %v742_v34  ;;  %v840_v33 = vld [vmem:[#allocation2 + $0x17b0] sm:$0xff]  ;;  %v790_v34 = vld [vmem:[#allocation2 + $0x1620] sm:$0xff] }
 0x174   :  { %3777 = vmatpush.msra.mxu2 %v757_v35  ;;  %3796 = vmatpush.msra.mxu3 %v774_v36  ;;  %v807_v35 = vld [vmem:[#allocation2 + $0x16a8] sm:$0xff]  ;;  %v822_v36 = vld [vmem:[#allocation2 + $0x1720] sm:$0xff] }
 0x175   :  { %3738 = vmatpush.msra.mxu0 %v724_v37  ;;  %3757 = vmatpush.msra.mxu1 %v741_v38  ;;  %v839_v37 = vld [vmem:[#allocation2 + $0x17a8] sm:$0xff]  ;;  %v789_v38 = vld [vmem:[#allocation2 + $0x1618] sm:$0xff] }
 0x176   :  { %3778 = vmatpush.msra.mxu2 %v756_v39  ;;  %3797 = vmatpush.msra.mxu3 %v773_v40  ;;  %v806_v39 = vld [vmem:[#allocation2 + $0x16a0] sm:$0xff]  ;;  %v821_v40 = vld [vmem:[#allocation2 + $0x1718] sm:$0xff] }
 0x177   :  { %3739 = vmatpush.msra.mxu0 %v723_v41  ;;  %3758 = vmatpush.msra.mxu1 %v740_v42  ;;  %v838_v41 = vld [vmem:[#allocation2 + $0x17a0] sm:$0xff]  ;;  %v788_v42 = vld [vmem:[#allocation2 + $0x1610] sm:$0xff] }
 0x178   :  { %3779 = vmatpush.msra.mxu2 %v755_v44  ;;  %3798 = vmatpush.msra.mxu3 %v772_v45  ;;  %v820_v44 = vld [vmem:[#allocation2 + $0x1710] sm:$0xff]  ;;  %v837_v45 = vld [vmem:[#allocation2 + $0x1798] sm:$0xff] }
 0x179   :  { %3740 = vmatpush.msra.mxu0 %v722_v46  ;;  %3759 = vmatpush.msra.mxu1 %v739_v47  ;;  %v787_v46 = vld [vmem:[#allocation2 + $0x1608] sm:$0xff]  ;;  %v804_v47 = vld [vmem:[#allocation2 + $0x1690] sm:$0xff] }
 0x17a   :  { %3780 = vmatpush.msra.mxu2 %v754_v48  ;;  %3799 = vmatpush.msra.mxu3 %v771_v49  ;;  %v55_v48 = vld [vmem:[%s6489_s0 + $0x60] sm:$0xff]  ;;  %v819_v49 = vld [vmem:[#allocation2 + $0x1708] sm:$0xff] }
 0x17b   :  { %3741 = vmatmul.f32.vlgmr.msra.gmra.mxu0 %v2628_v50  ;;  %3781 = vmatmul.f32.vlgmr.msra.gmra.mxu2 %v2630_v51  ;;  %v836_v50 = vld [vmem:[#allocation2 + $0x1790] sm:$0xff]  ;;  %2636 = vst [vmem:[#allocation1] ss:$4 sm:$0xff] %v55_v48  ;;  %v786_v51 = vld [vmem:[#allocation2 + $0x1600] sm:$0xff]  ;;  %v869_v48 = vld [vmem:[#allocation2 + $0x1898] sm:$0xff] }
 0x17c   :  { %3805 = vmatpush.msrb.mxu0 %v801_v52  ;;  %3845 = vmatpush.msrb.mxu2 %v833_v53  ;;  %v803_v52 = vld [vmem:[#allocation2 + $0x1688] sm:$0xff]  ;;  %v818_v53 = vld [vmem:[#allocation2 + $0x1700] sm:$0xff] }
 0x17d   :  { %3760 = vmatpush.msra.mxu1 %v738_v54  ;;  %3800 = vmatpush.msra.mxu3 %v770_v55  ;;  %v835_v54 = vld [vmem:[#allocation2 + $0x1788] sm:$0xff]  ;;  %v2632_v55 = vld.sshfl [vmem:[#allocation1 + $0x20] sm:$0xff pattern:$0x73625140] }
 0x17e   :  { %3761 = vmatmul.f32.vlgmr.msra.gmra.mxu1 %v2629_v56  ;;  %3801 = vmatmul.f32.vlgmr.msra.gmra.mxu3 %v2631_v57  ;;  %v2634_v56 = vld.sshfl [vmem:[#allocation1 + $0x30] sm:$0xff pattern:$0x73625140]  ;;  %v865_v57 = vld [vmem:[#allocation2 + $0x1878] sm:$0xff] }
 0x17f   :  { %3806 = vmatpush.msrb.mxu0 %v800_v58  ;;  %3825 = vmatpush.msrb.mxu1 %v817_v59  ;;  %v897_v58 = vld [vmem:[#allocation2 + $0x1978] sm:$0xff]  ;;  %v802_v59 = vld [vmem:[#allocation2 + $0x1680] sm:$0xff] }
 0x180   :  { %3846 = vmatpush.msrb.mxu2 %v832_v60  ;;  %3865 = vmatpush.msrb.mxu3 %v849_v61  ;;  %v834_v60 = vld [vmem:[#allocation2 + $0x1780] sm:$0xff] }
 0x181   :  { %3807 = vmatpush.msrb.mxu0 %v799_v62  ;;  %3826 = vmatpush.msrb.mxu1 %v816_v63  ;;  %v2633_v61 = vld.sshfl [vmem:[#allocation1 + $0x28] sm:$0xff pattern:$0x73625140]  ;;  %v2635_v62 = vld.sshfl [vmem:[#allocation1 + $0x38] sm:$0xff pattern:$0x73625140] }
 0x182   :  { %3847 = vmatpush.msrb.mxu2 %v831_v0  ;;  %3866 = vmatpush.msrb.mxu3 %v848_v1  ;;  %v864_v63 = vld [vmem:[#allocation2 + $0x1870] sm:$0xff]  ;;  %v881_v0 = vld [vmem:[#allocation2 + $0x18f8] sm:$0xff] }
 0x183   :  { %3808 = vmatpush.msrb.mxu0 %v798_v2  ;;  %3827 = vmatpush.msrb.mxu1 %v815_v3  ;;  %v896_v1 = vld [vmem:[#allocation2 + $0x1970] sm:$0xff]  ;;  %v913_v2 = vld [vmem:[#allocation2 + $0x19f8] sm:$0xff]  ;;  %v863_v3 = vld [vmem:[#allocation2 + $0x1868] sm:$0xff] }
 0x184   :  { %3848 = vmatpush.msrb.mxu2 %v830_v4  ;;  %3867 = vmatpush.msrb.mxu3 %v847_v5  ;;  %v880_v4 = vld [vmem:[#allocation2 + $0x18f0] sm:$0xff]  ;;  %v895_v5 = vld [vmem:[#allocation2 + $0x1968] sm:$0xff] }
 0x185   :  { %3809 = vmatpush.msrb.mxu0 %v797_v6  ;;  %3828 = vmatpush.msrb.mxu1 %v814_v7  ;;  %v912_v6 = vld [vmem:[#allocation2 + $0x19f0] sm:$0xff]  ;;  %v862_v7 = vld [vmem:[#allocation2 + $0x1860] sm:$0xff] }
 0x186   :  { %3849 = vmatpush.msrb.mxu2 %v829_v8  ;;  %3868 = vmatpush.msrb.mxu3 %v846_v9  ;;  %v879_v8 = vld [vmem:[#allocation2 + $0x18e8] sm:$0xff]  ;;  %v894_v9 = vld [vmem:[#allocation2 + $0x1960] sm:$0xff] }
 0x187   :  { %3810 = vmatpush.msrb.mxu0 %v796_v10  ;;  %3829 = vmatpush.msrb.mxu1 %v813_v11  ;;  %v911_v10 = vld [vmem:[#allocation2 + $0x19e8] sm:$0xff]  ;;  %v861_v11 = vld [vmem:[#allocation2 + $0x1858] sm:$0xff] }
 0x188   :  { %3850 = vmatpush.msrb.mxu2 %v828_v12  ;;  %3869 = vmatpush.msrb.mxu3 %v845_v13  ;;  %v878_v12 = vld [vmem:[#allocation2 + $0x18e0] sm:$0xff]  ;;  %v893_v13 = vld [vmem:[#allocation2 + $0x1958] sm:$0xff] }
 0x189   :  { %3811 = vmatpush.msrb.mxu0 %v795_v14  ;;  %3830 = vmatpush.msrb.mxu1 %v812_v15  ;;  %v910_v14 = vld [vmem:[#allocation2 + $0x19e0] sm:$0xff]  ;;  %v860_v15 = vld [vmem:[#allocation2 + $0x1850] sm:$0xff] }
 0x18a   :  { %3851 = vmatpush.msrb.mxu2 %v827_v16  ;;  %3870 = vmatpush.msrb.mxu3 %v844_v17  ;;  %v877_v16 = vld [vmem:[#allocation2 + $0x18d8] sm:$0xff]  ;;  %v892_v17 = vld [vmem:[#allocation2 + $0x1950] sm:$0xff] }
 0x18b   :  { %3812 = vmatpush.msrb.mxu0 %v794_v18  ;;  %3831 = vmatpush.msrb.mxu1 %v811_v19  ;;  %v909_v18 = vld [vmem:[#allocation2 + $0x19d8] sm:$0xff]  ;;  %v859_v19 = vld [vmem:[#allocation2 + $0x1848] sm:$0xff] }
 0x18c   :  { %3852 = vmatpush.msrb.mxu2 %v826_v20  ;;  %3871 = vmatpush.msrb.mxu3 %v843_v21  ;;  %v876_v20 = vld [vmem:[#allocation2 + $0x18d0] sm:$0xff]  ;;  %v891_v21 = vld [vmem:[#allocation2 + $0x1948] sm:$0xff] }
 0x18d   :  { %3813 = vmatpush.msrb.mxu0 %v793_v22  ;;  %3832 = vmatpush.msrb.mxu1 %v810_v23  ;;  %v908_v22 = vld [vmem:[#allocation2 + $0x19d0] sm:$0xff]  ;;  %v858_v23 = vld [vmem:[#allocation2 + $0x1840] sm:$0xff] }
 0x18e   :  { %3853 = vmatpush.msrb.mxu2 %v825_v24  ;;  %3872 = vmatpush.msrb.mxu3 %v842_v25  ;;  %v875_v24 = vld [vmem:[#allocation2 + $0x18c8] sm:$0xff]  ;;  %v890_v25 = vld [vmem:[#allocation2 + $0x1940] sm:$0xff] }
 0x18f   :  { %3814 = vmatpush.msrb.mxu0 %v792_v26  ;;  %3833 = vmatpush.msrb.mxu1 %v809_v27  ;;  %v907_v26 = vld [vmem:[#allocation2 + $0x19c8] sm:$0xff]  ;;  %v857_v27 = vld [vmem:[#allocation2 + $0x1838] sm:$0xff] }
 0x190   :  { %3854 = vmatpush.msrb.mxu2 %v824_v28  ;;  %3873 = vmatpush.msrb.mxu3 %v841_v29  ;;  %v874_v28 = vld [vmem:[#allocation2 + $0x18c0] sm:$0xff]  ;;  %v889_v29 = vld [vmem:[#allocation2 + $0x1938] sm:$0xff] }
 0x191   :  { %3815 = vmatpush.msrb.mxu0 %v791_v30  ;;  %3834 = vmatpush.msrb.mxu1 %v808_v31  ;;  %v906_v30 = vld [vmem:[#allocation2 + $0x19c0] sm:$0xff]  ;;  %v856_v31 = vld [vmem:[#allocation2 + $0x1830] sm:$0xff] }
 0x192   :  { %3855 = vmatpush.msrb.mxu2 %v823_v32  ;;  %3874 = vmatpush.msrb.mxu3 %v840_v33  ;;  %v873_v32 = vld [vmem:[#allocation2 + $0x18b8] sm:$0xff]  ;;  %v888_v33 = vld [vmem:[#allocation2 + $0x1930] sm:$0xff] }
 0x193   :  { %3816 = vmatpush.msrb.mxu0 %v790_v34  ;;  %3835 = vmatpush.msrb.mxu1 %v807_v35  ;;  %v905_v34 = vld [vmem:[#allocation2 + $0x19b8] sm:$0xff]  ;;  %v855_v35 = vld [vmem:[#allocation2 + $0x1828] sm:$0xff] }
 0x194   :  { %3856 = vmatpush.msrb.mxu2 %v822_v36  ;;  %3875 = vmatpush.msrb.mxu3 %v839_v37  ;;  %v872_v36 = vld [vmem:[#allocation2 + $0x18b0] sm:$0xff]  ;;  %v887_v37 = vld [vmem:[#allocation2 + $0x1928] sm:$0xff] }
 0x195   :  { %3817 = vmatpush.msrb.mxu0 %v789_v38  ;;  %3836 = vmatpush.msrb.mxu1 %v806_v39  ;;  %v904_v38 = vld [vmem:[#allocation2 + $0x19b0] sm:$0xff]  ;;  %v854_v39 = vld [vmem:[#allocation2 + $0x1820] sm:$0xff] }
 0x196   :  { %3857 = vmatpush.msrb.mxu2 %v821_v40  ;;  %3876 = vmatpush.msrb.mxu3 %v838_v41  ;;  %v871_v40 = vld [vmem:[#allocation2 + $0x18a8] sm:$0xff]  ;;  %v886_v41 = vld [vmem:[#allocation2 + $0x1920] sm:$0xff] }
 0x197   :  { %3818 = vmatpush.msrb.mxu0 %v788_v42  ;;  %3837 = vmatpush.msrb.mxu1 %v805_v43  ;;  %v903_v42 = vld [vmem:[#allocation2 + $0x19a8] sm:$0xff]  ;;  %v853_v43 = vld [vmem:[#allocation2 + $0x1818] sm:$0xff] }
 0x198   :  { %3858 = vmatpush.msrb.mxu2 %v820_v44  ;;  %3877 = vmatpush.msrb.mxu3 %v837_v45  ;;  %v870_v44 = vld [vmem:[#allocation2 + $0x18a0] sm:$0xff]  ;;  %v885_v45 = vld [vmem:[#allocation2 + $0x1918] sm:$0xff] }
 0x199   :  { %3819 = vmatpush.msrb.mxu0 %v787_v46  ;;  %3838 = vmatpush.msrb.mxu1 %v804_v47  ;;  %v902_v46 = vld [vmem:[#allocation2 + $0x19a0] sm:$0xff]  ;;  %v852_v47 = vld [vmem:[#allocation2 + $0x1810] sm:$0xff] }
 0x19a   :  { %3859 = vmatpush.msrb.mxu2 %v819_v49  ;;  %3878 = vmatpush.msrb.mxu3 %v836_v50  ;;  %v884_v49 = vld [vmem:[#allocation2 + $0x1910] sm:$0xff]  ;;  %v901_v50 = vld [vmem:[#allocation2 + $0x1998] sm:$0xff] }
 0x19b   :  { %3820 = vmatpush.msrb.mxu0 %v786_v51  ;;  %3839 = vmatpush.msrb.mxu1 %v803_v52  ;;  %v851_v51 = vld [vmem:[#allocation2 + $0x1808] sm:$0xff]  ;;  %v868_v52 = vld [vmem:[#allocation2 + $0x1890] sm:$0xff] }
 0x19c   :  { %3860 = vmatpush.msrb.mxu2 %v818_v53  ;;  %3879 = vmatpush.msrb.mxu3 %v835_v54  ;;  %v56_v53 = vld [vmem:[%s6489_s0 + $0x68] sm:$0xff]  ;;  %v883_v54 = vld [vmem:[#allocation2 + $0x1908] sm:$0xff] }
 0x19d   :  { %3821 = vmatmul.f32.vlgmr.msrb.gmra.mxu0 %v2632_v55  ;;  %3861 = vmatmul.f32.vlgmr.msrb.gmra.mxu2 %v2634_v56  ;;  %v900_v55 = vld [vmem:[#allocation2 + $0x1990] sm:$0xff]  ;;  %2637 = vst [vmem:[#allocation1 + $0x20] ss:$4 sm:$0xff] %v56_v53  ;;  %v850_v56 = vld [vmem:[#allocation2 + $0x1800] sm:$0xff]  ;;  %v933_v53 = vld [vmem:[#allocation2 + $0x1a98] sm:$0xff] }
 0x19e   :  { %3885 = vmatpush.msra.mxu0 %v865_v57  ;;  %3925 = vmatpush.msra.mxu2 %v897_v58  ;;  %v867_v57 = vld [vmem:[#allocation2 + $0x1888] sm:$0xff]  ;;  %v882_v58 = vld [vmem:[#allocation2 + $0x1900] sm:$0xff] }
 0x19f   :  { %3840 = vmatpush.msrb.mxu1 %v802_v59  ;;  %3880 = vmatpush.msrb.mxu3 %v834_v60  ;;  %v899_v59 = vld [vmem:[#allocation2 + $0x1988] sm:$0xff]  ;;  %v2638_v60 = vld.sshfl [vmem:[#allocation1] sm:$0xff pattern:$0x73625140] }
 0x1a0   :  { %3841 = vmatmul.f32.vlgmr.msrb.gmra.mxu1 %v2633_v61  ;;  %3881 = vmatmul.f32.vlgmr.msrb.gmra.mxu3 %v2635_v62  ;;  %v2640_v61 = vld.sshfl [vmem:[#allocation1 + $0x10] sm:$0xff pattern:$0x73625140]  ;;  %v929_v62 = vld [vmem:[#allocation2 + $0x1a78] sm:$0xff] }
 0x1a1   :  { %3886 = vmatpush.msra.mxu0 %v864_v63  ;;  %3905 = vmatpush.msra.mxu1 %v881_v0  ;;  %v961_v63 = vld [vmem:[#allocation2 + $0x1b78] sm:$0xff]  ;;  %v866_v0 = vld [vmem:[#allocation2 + $0x1880] sm:$0xff] }
 0x1a2   :  { %3926 = vmatpush.msra.mxu2 %v896_v1  ;;  %3945 = vmatpush.msra.mxu3 %v913_v2  ;;  %v898_v1 = vld [vmem:[#allocation2 + $0x1980] sm:$0xff] }
 0x1a3   :  { %3887 = vmatpush.msra.mxu0 %v863_v3  ;;  %3906 = vmatpush.msra.mxu1 %v880_v4  ;;  %v2639_v2 = vld.sshfl [vmem:[#allocation1 + $0x8] sm:$0xff pattern:$0x73625140]  ;;  %v2641_v3 = vld.sshfl [vmem:[#allocation1 + $0x18] sm:$0xff pattern:$0x73625140] }
 0x1a4   :  { %3927 = vmatpush.msra.mxu2 %v895_v5  ;;  %3946 = vmatpush.msra.mxu3 %v912_v6  ;;  %v928_v4 = vld [vmem:[#allocation2 + $0x1a70] sm:$0xff]  ;;  %v945_v5 = vld [vmem:[#allocation2 + $0x1af8] sm:$0xff] }
 0x1a5   :  { %3888 = vmatpush.msra.mxu0 %v862_v7  ;;  %3907 = vmatpush.msra.mxu1 %v879_v8  ;;  %v960_v6 = vld [vmem:[#allocation2 + $0x1b70] sm:$0xff]  ;;  %v977_v7 = vld [vmem:[#allocation2 + $0x1bf8] sm:$0xff]  ;;  %v927_v8 = vld [vmem:[#allocation2 + $0x1a68] sm:$0xff] }
 0x1a6   :  { %3928 = vmatpush.msra.mxu2 %v894_v9  ;;  %3947 = vmatpush.msra.mxu3 %v911_v10  ;;  %v944_v9 = vld [vmem:[#allocation2 + $0x1af0] sm:$0xff]  ;;  %v959_v10 = vld [vmem:[#allocation2 + $0x1b68] sm:$0xff] }
 0x1a7   :  { %3889 = vmatpush.msra.mxu0 %v861_v11  ;;  %3908 = vmatpush.msra.mxu1 %v878_v12  ;;  %v976_v11 = vld [vmem:[#allocation2 + $0x1bf0] sm:$0xff]  ;;  %v926_v12 = vld [vmem:[#allocation2 + $0x1a60] sm:$0xff] }
 0x1a8   :  { %3929 = vmatpush.msra.mxu2 %v893_v13  ;;  %3948 = vmatpush.msra.mxu3 %v910_v14  ;;  %v943_v13 = vld [vmem:[#allocation2 + $0x1ae8] sm:$0xff]  ;;  %v958_v14 = vld [vmem:[#allocation2 + $0x1b60] sm:$0xff] }
 0x1a9   :  { %3890 = vmatpush.msra.mxu0 %v860_v15  ;;  %3909 = vmatpush.msra.mxu1 %v877_v16  ;;  %v975_v15 = vld [vmem:[#allocation2 + $0x1be8] sm:$0xff]  ;;  %v925_v16 = vld [vmem:[#allocation2 + $0x1a58] sm:$0xff] }
 0x1aa   :  { %3930 = vmatpush.msra.mxu2 %v892_v17  ;;  %3949 = vmatpush.msra.mxu3 %v909_v18  ;;  %v942_v17 = vld [vmem:[#allocation2 + $0x1ae0] sm:$0xff]  ;;  %v957_v18 = vld [vmem:[#allocation2 + $0x1b58] sm:$0xff] }
 0x1ab   :  { %3891 = vmatpush.msra.mxu0 %v859_v19  ;;  %3910 = vmatpush.msra.mxu1 %v876_v20  ;;  %v974_v19 = vld [vmem:[#allocation2 + $0x1be0] sm:$0xff]  ;;  %v924_v20 = vld [vmem:[#allocation2 + $0x1a50] sm:$0xff] }
 0x1ac   :  { %3931 = vmatpush.msra.mxu2 %v891_v21  ;;  %3950 = vmatpush.msra.mxu3 %v908_v22  ;;  %v941_v21 = vld [vmem:[#allocation2 + $0x1ad8] sm:$0xff]  ;;  %v956_v22 = vld [vmem:[#allocation2 + $0x1b50] sm:$0xff] }
 0x1ad   :  { %3892 = vmatpush.msra.mxu0 %v858_v23  ;;  %3911 = vmatpush.msra.mxu1 %v875_v24  ;;  %v973_v23 = vld [vmem:[#allocation2 + $0x1bd8] sm:$0xff]  ;;  %v923_v24 = vld [vmem:[#allocation2 + $0x1a48] sm:$0xff] }
 0x1ae   :  { %3932 = vmatpush.msra.mxu2 %v890_v25  ;;  %3951 = vmatpush.msra.mxu3 %v907_v26  ;;  %v940_v25 = vld [vmem:[#allocation2 + $0x1ad0] sm:$0xff]  ;;  %v955_v26 = vld [vmem:[#allocation2 + $0x1b48] sm:$0xff] }
 0x1af   :  { %3893 = vmatpush.msra.mxu0 %v857_v27  ;;  %3912 = vmatpush.msra.mxu1 %v874_v28  ;;  %v972_v27 = vld [vmem:[#allocation2 + $0x1bd0] sm:$0xff]  ;;  %v922_v28 = vld [vmem:[#allocation2 + $0x1a40] sm:$0xff] }
 0x1b0   :  { %3933 = vmatpush.msra.mxu2 %v889_v29  ;;  %3952 = vmatpush.msra.mxu3 %v906_v30  ;;  %v939_v29 = vld [vmem:[#allocation2 + $0x1ac8] sm:$0xff]  ;;  %v954_v30 = vld [vmem:[#allocation2 + $0x1b40] sm:$0xff] }
 0x1b1   :  { %3894 = vmatpush.msra.mxu0 %v856_v31  ;;  %3913 = vmatpush.msra.mxu1 %v873_v32  ;;  %v971_v31 = vld [vmem:[#allocation2 + $0x1bc8] sm:$0xff]  ;;  %v921_v32 = vld [vmem:[#allocation2 + $0x1a38] sm:$0xff] }
 0x1b2   :  { %3934 = vmatpush.msra.mxu2 %v888_v33  ;;  %3953 = vmatpush.msra.mxu3 %v905_v34  ;;  %v938_v33 = vld [vmem:[#allocation2 + $0x1ac0] sm:$0xff]  ;;  %v953_v34 = vld [vmem:[#allocation2 + $0x1b38] sm:$0xff] }
 0x1b3   :  { %3895 = vmatpush.msra.mxu0 %v855_v35  ;;  %3914 = vmatpush.msra.mxu1 %v872_v36  ;;  %v970_v35 = vld [vmem:[#allocation2 + $0x1bc0] sm:$0xff]  ;;  %v920_v36 = vld [vmem:[#allocation2 + $0x1a30] sm:$0xff] }
 0x1b4   :  { %3935 = vmatpush.msra.mxu2 %v887_v37  ;;  %3954 = vmatpush.msra.mxu3 %v904_v38  ;;  %v937_v37 = vld [vmem:[#allocation2 + $0x1ab8] sm:$0xff]  ;;  %v952_v38 = vld [vmem:[#allocation2 + $0x1b30] sm:$0xff] }
 0x1b5   :  { %3896 = vmatpush.msra.mxu0 %v854_v39  ;;  %3915 = vmatpush.msra.mxu1 %v871_v40  ;;  %v969_v39 = vld [vmem:[#allocation2 + $0x1bb8] sm:$0xff]  ;;  %v919_v40 = vld [vmem:[#allocation2 + $0x1a28] sm:$0xff] }
 0x1b6   :  { %3936 = vmatpush.msra.mxu2 %v886_v41  ;;  %3955 = vmatpush.msra.mxu3 %v903_v42  ;;  %v936_v41 = vld [vmem:[#allocation2 + $0x1ab0] sm:$0xff]  ;;  %v951_v42 = vld [vmem:[#allocation2 + $0x1b28] sm:$0xff] }
 0x1b7   :  { %3897 = vmatpush.msra.mxu0 %v853_v43  ;;  %3916 = vmatpush.msra.mxu1 %v870_v44  ;;  %v968_v43 = vld [vmem:[#allocation2 + $0x1bb0] sm:$0xff]  ;;  %v918_v44 = vld [vmem:[#allocation2 + $0x1a20] sm:$0xff] }
 0x1b8   :  { %3937 = vmatpush.msra.mxu2 %v885_v45  ;;  %3956 = vmatpush.msra.mxu3 %v902_v46  ;;  %v935_v45 = vld [vmem:[#allocation2 + $0x1aa8] sm:$0xff]  ;;  %v950_v46 = vld [vmem:[#allocation2 + $0x1b20] sm:$0xff] }
 0x1b9   :  { %3898 = vmatpush.msra.mxu0 %v852_v47  ;;  %3917 = vmatpush.msra.mxu1 %v869_v48  ;;  %v967_v47 = vld [vmem:[#allocation2 + $0x1ba8] sm:$0xff]  ;;  %v917_v48 = vld [vmem:[#allocation2 + $0x1a18] sm:$0xff] }
 0x1ba   :  { %3938 = vmatpush.msra.mxu2 %v884_v49  ;;  %3957 = vmatpush.msra.mxu3 %v901_v50  ;;  %v934_v49 = vld [vmem:[#allocation2 + $0x1aa0] sm:$0xff]  ;;  %v949_v50 = vld [vmem:[#allocation2 + $0x1b18] sm:$0xff] }
 0x1bb   :  { %3899 = vmatpush.msra.mxu0 %v851_v51  ;;  %3918 = vmatpush.msra.mxu1 %v868_v52  ;;  %v966_v51 = vld [vmem:[#allocation2 + $0x1ba0] sm:$0xff]  ;;  %v916_v52 = vld [vmem:[#allocation2 + $0x1a10] sm:$0xff] }
 0x1bc   :  { %3939 = vmatpush.msra.mxu2 %v883_v54  ;;  %3958 = vmatpush.msra.mxu3 %v900_v55  ;;  %v948_v54 = vld [vmem:[#allocation2 + $0x1b10] sm:$0xff]  ;;  %v965_v55 = vld [vmem:[#allocation2 + $0x1b98] sm:$0xff] }
 0x1bd   :  { %3900 = vmatpush.msra.mxu0 %v850_v56  ;;  %3919 = vmatpush.msra.mxu1 %v867_v57  ;;  %v915_v56 = vld [vmem:[#allocation2 + $0x1a08] sm:$0xff]  ;;  %v932_v57 = vld [vmem:[#allocation2 + $0x1a90] sm:$0xff] }
 0x1be   :  { %3940 = vmatpush.msra.mxu2 %v882_v58  ;;  %3959 = vmatpush.msra.mxu3 %v899_v59  ;;  %v57_v58 = vld [vmem:[%s6489_s0 + $0x70] sm:$0xff] }
 0x1bf   :  { %3901 = vmatmul.f32.vlgmr.msra.gmra.mxu0 %v2638_v60  ;;  %3941 = vmatmul.f32.vlgmr.msra.gmra.mxu2 %v2640_v61  ;;  %v947_v59 = vld [vmem:[#allocation2 + $0x1b08] sm:$0xff]  ;;  %v964_v60 = vld [vmem:[#allocation2 + $0x1b90] sm:$0xff]  ;;  %2646 = vst [vmem:[#allocation1] ss:$4 sm:$0xff] %v57_v58  ;;  %v914_v61 = vld [vmem:[#allocation2 + $0x1a00] sm:$0xff] }
 0x1c0   :  { %3965 = vmatpush.msrb.mxu0 %v929_v62  ;;  %4005 = vmatpush.msrb.mxu2 %v961_v63  ;;  %v931_v62 = vld [vmem:[#allocation2 + $0x1a88] sm:$0xff]  ;;  %v946_v63 = vld [vmem:[#allocation2 + $0x1b00] sm:$0xff]  ;;  %v997_v58 = vld [vmem:[#allocation2 + $0x1c98] sm:$0xff] }
 0x1c1   :  { %3920 = vmatpush.msra.mxu1 %v866_v0  ;;  %3960 = vmatpush.msra.mxu3 %v898_v1  ;;  %v963_v0 = vld [vmem:[#allocation2 + $0x1b88] sm:$0xff]  ;;  %v2642_v1 = vld.sshfl [vmem:[#allocation1 + $0x20] sm:$0xff pattern:$0x73625140] }
 0x1c2   :  { %3921 = vmatmul.f32.vlgmr.msra.gmra.mxu1 %v2639_v2  ;;  %3961 = vmatmul.f32.vlgmr.msra.gmra.mxu3 %v2641_v3  ;;  %v2644_v2 = vld.sshfl [vmem:[#allocation1 + $0x30] sm:$0xff pattern:$0x73625140]  ;;  %v993_v3 = vld [vmem:[#allocation2 + $0x1c78] sm:$0xff] }
 0x1c3   :  { %3966 = vmatpush.msrb.mxu0 %v928_v4  ;;  %3985 = vmatpush.msrb.mxu1 %v945_v5  ;;  %v1025_v4 = vld [vmem:[#allocation2 + $0x1d78] sm:$0xff]  ;;  %v930_v5 = vld [vmem:[#allocation2 + $0x1a80] sm:$0xff] }
 0x1c4   :  { %4006 = vmatpush.msrb.mxu2 %v960_v6  ;;  %4025 = vmatpush.msrb.mxu3 %v977_v7  ;;  %v962_v6 = vld [vmem:[#allocation2 + $0x1b80] sm:$0xff] }
 0x1c5   :  { %3967 = vmatpush.msrb.mxu0 %v927_v8  ;;  %3986 = vmatpush.msrb.mxu1 %v944_v9  ;;  %v2643_v7 = vld.sshfl [vmem:[#allocation1 + $0x28] sm:$0xff pattern:$0x73625140]  ;;  %v2645_v8 = vld.sshfl [vmem:[#allocation1 + $0x38] sm:$0xff pattern:$0x73625140] }
 0x1c6   :  { %4007 = vmatpush.msrb.mxu2 %v959_v10  ;;  %4026 = vmatpush.msrb.mxu3 %v976_v11  ;;  %v992_v9 = vld [vmem:[#allocation2 + $0x1c70] sm:$0xff]  ;;  %v1009_v10 = vld [vmem:[#allocation2 + $0x1cf8] sm:$0xff] }
 0x1c7   :  { %3968 = vmatpush.msrb.mxu0 %v926_v12  ;;  %3987 = vmatpush.msrb.mxu1 %v943_v13  ;;  %v1024_v11 = vld [vmem:[#allocation2 + $0x1d70] sm:$0xff]  ;;  %v1041_v12 = vld [vmem:[#allocation2 + $0x1df8] sm:$0xff]  ;;  %v991_v13 = vld [vmem:[#allocation2 + $0x1c68] sm:$0xff] }
 0x1c8   :  { %4008 = vmatpush.msrb.mxu2 %v958_v14  ;;  %4027 = vmatpush.msrb.mxu3 %v975_v15  ;;  %v1008_v14 = vld [vmem:[#allocation2 + $0x1cf0] sm:$0xff]  ;;  %v1023_v15 = vld [vmem:[#allocation2 + $0x1d68] sm:$0xff] }
 0x1c9   :  { %3969 = vmatpush.msrb.mxu0 %v925_v16  ;;  %3988 = vmatpush.msrb.mxu1 %v942_v17  ;;  %v1040_v16 = vld [vmem:[#allocation2 + $0x1df0] sm:$0xff]  ;;  %v990_v17 = vld [vmem:[#allocation2 + $0x1c60] sm:$0xff] }
 0x1ca   :  { %4009 = vmatpush.msrb.mxu2 %v957_v18  ;;  %4028 = vmatpush.msrb.mxu3 %v974_v19  ;;  %v1007_v18 = vld [vmem:[#allocation2 + $0x1ce8] sm:$0xff]  ;;  %v1022_v19 = vld [vmem:[#allocation2 + $0x1d60] sm:$0xff] }
 0x1cb   :  { %3970 = vmatpush.msrb.mxu0 %v924_v20  ;;  %3989 = vmatpush.msrb.mxu1 %v941_v21  ;;  %v1039_v20 = vld [vmem:[#allocation2 + $0x1de8] sm:$0xff]  ;;  %v989_v21 = vld [vmem:[#allocation2 + $0x1c58] sm:$0xff] }
 0x1cc   :  { %4010 = vmatpush.msrb.mxu2 %v956_v22  ;;  %4029 = vmatpush.msrb.mxu3 %v973_v23  ;;  %v1006_v22 = vld [vmem:[#allocation2 + $0x1ce0] sm:$0xff]  ;;  %v1021_v23 = vld [vmem:[#allocation2 + $0x1d58] sm:$0xff] }
 0x1cd   :  { %3971 = vmatpush.msrb.mxu0 %v923_v24  ;;  %3990 = vmatpush.msrb.mxu1 %v940_v25  ;;  %v1038_v24 = vld [vmem:[#allocation2 + $0x1de0] sm:$0xff]  ;;  %v988_v25 = vld [vmem:[#allocation2 + $0x1c50] sm:$0xff] }
 0x1ce   :  { %4011 = vmatpush.msrb.mxu2 %v955_v26  ;;  %4030 = vmatpush.msrb.mxu3 %v972_v27  ;;  %v1005_v26 = vld [vmem:[#allocation2 + $0x1cd8] sm:$0xff]  ;;  %v1020_v27 = vld [vmem:[#allocation2 + $0x1d50] sm:$0xff] }
 0x1cf   :  { %3972 = vmatpush.msrb.mxu0 %v922_v28  ;;  %3991 = vmatpush.msrb.mxu1 %v939_v29  ;;  %v1037_v28 = vld [vmem:[#allocation2 + $0x1dd8] sm:$0xff]  ;;  %v987_v29 = vld [vmem:[#allocation2 + $0x1c48] sm:$0xff] }
 0x1d0   :  { %4012 = vmatpush.msrb.mxu2 %v954_v30  ;;  %4031 = vmatpush.msrb.mxu3 %v971_v31  ;;  %v1004_v30 = vld [vmem:[#allocation2 + $0x1cd0] sm:$0xff]  ;;  %v1019_v31 = vld [vmem:[#allocation2 + $0x1d48] sm:$0xff] }
 0x1d1   :  { %3973 = vmatpush.msrb.mxu0 %v921_v32  ;;  %3992 = vmatpush.msrb.mxu1 %v938_v33  ;;  %v1036_v32 = vld [vmem:[#allocation2 + $0x1dd0] sm:$0xff]  ;;  %v986_v33 = vld [vmem:[#allocation2 + $0x1c40] sm:$0xff] }
 0x1d2   :  { %4013 = vmatpush.msrb.mxu2 %v953_v34  ;;  %4032 = vmatpush.msrb.mxu3 %v970_v35  ;;  %v1003_v34 = vld [vmem:[#allocation2 + $0x1cc8] sm:$0xff]  ;;  %v1018_v35 = vld [vmem:[#allocation2 + $0x1d40] sm:$0xff] }
 0x1d3   :  { %3974 = vmatpush.msrb.mxu0 %v920_v36  ;;  %3993 = vmatpush.msrb.mxu1 %v937_v37  ;;  %v1035_v36 = vld [vmem:[#allocation2 + $0x1dc8] sm:$0xff]  ;;  %v985_v37 = vld [vmem:[#allocation2 + $0x1c38] sm:$0xff] }
 0x1d4   :  { %4014 = vmatpush.msrb.mxu2 %v952_v38  ;;  %4033 = vmatpush.msrb.mxu3 %v969_v39  ;;  %v1002_v38 = vld [vmem:[#allocation2 + $0x1cc0] sm:$0xff]  ;;  %v1017_v39 = vld [vmem:[#allocation2 + $0x1d38] sm:$0xff] }
 0x1d5   :  { %3975 = vmatpush.msrb.mxu0 %v919_v40  ;;  %3994 = vmatpush.msrb.mxu1 %v936_v41  ;;  %v1034_v40 = vld [vmem:[#allocation2 + $0x1dc0] sm:$0xff]  ;;  %v984_v41 = vld [vmem:[#allocation2 + $0x1c30] sm:$0xff] }
 0x1d6   :  { %4015 = vmatpush.msrb.mxu2 %v951_v42  ;;  %4034 = vmatpush.msrb.mxu3 %v968_v43  ;;  %v1001_v42 = vld [vmem:[#allocation2 + $0x1cb8] sm:$0xff]  ;;  %v1016_v43 = vld [vmem:[#allocation2 + $0x1d30] sm:$0xff] }
 0x1d7   :  { %3976 = vmatpush.msrb.mxu0 %v918_v44  ;;  %3995 = vmatpush.msrb.mxu1 %v935_v45  ;;  %v1033_v44 = vld [vmem:[#allocation2 + $0x1db8] sm:$0xff]  ;;  %v983_v45 = vld [vmem:[#allocation2 + $0x1c28] sm:$0xff] }
 0x1d8   :  { %4016 = vmatpush.msrb.mxu2 %v950_v46  ;;  %4035 = vmatpush.msrb.mxu3 %v967_v47  ;;  %v1000_v46 = vld [vmem:[#allocation2 + $0x1cb0] sm:$0xff]  ;;  %v1015_v47 = vld [vmem:[#allocation2 + $0x1d28] sm:$0xff] }
 0x1d9   :  { %3977 = vmatpush.msrb.mxu0 %v917_v48  ;;  %3996 = vmatpush.msrb.mxu1 %v934_v49  ;;  %v1032_v48 = vld [vmem:[#allocation2 + $0x1db0] sm:$0xff]  ;;  %v982_v49 = vld [vmem:[#allocation2 + $0x1c20] sm:$0xff] }
 0x1da   :  { %4017 = vmatpush.msrb.mxu2 %v949_v50  ;;  %4036 = vmatpush.msrb.mxu3 %v966_v51  ;;  %v999_v50 = vld [vmem:[#allocation2 + $0x1ca8] sm:$0xff]  ;;  %v1014_v51 = vld [vmem:[#allocation2 + $0x1d20] sm:$0xff] }
 0x1db   :  { %3978 = vmatpush.msrb.mxu0 %v916_v52  ;;  %3997 = vmatpush.msrb.mxu1 %v933_v53  ;;  %v1031_v52 = vld [vmem:[#allocation2 + $0x1da8] sm:$0xff]  ;;  %v981_v53 = vld [vmem:[#allocation2 + $0x1c18] sm:$0xff] }
 0x1dc   :  { %4018 = vmatpush.msrb.mxu2 %v948_v54  ;;  %4037 = vmatpush.msrb.mxu3 %v965_v55  ;;  %v998_v54 = vld [vmem:[#allocation2 + $0x1ca0] sm:$0xff]  ;;  %v1013_v55 = vld [vmem:[#allocation2 + $0x1d18] sm:$0xff] }
 0x1dd   :  { %3979 = vmatpush.msrb.mxu0 %v915_v56  ;;  %3998 = vmatpush.msrb.mxu1 %v932_v57  ;;  %v1030_v56 = vld [vmem:[#allocation2 + $0x1da0] sm:$0xff]  ;;  %v980_v57 = vld [vmem:[#allocation2 + $0x1c10] sm:$0xff] }
 0x1de   :  { %4019 = vmatpush.msrb.mxu2 %v947_v59  ;;  %4038 = vmatpush.msrb.mxu3 %v964_v60  ;;  %v1012_v59 = vld [vmem:[#allocation2 + $0x1d10] sm:$0xff]  ;;  %v1029_v60 = vld [vmem:[#allocation2 + $0x1d98] sm:$0xff] }
 0x1df   :  { %3980 = vmatpush.msrb.mxu0 %v914_v61  ;;  %3999 = vmatpush.msrb.mxu1 %v931_v62  ;;  %v979_v61 = vld [vmem:[#allocation2 + $0x1c08] sm:$0xff]  ;;  %v996_v62 = vld [vmem:[#allocation2 + $0x1c90] sm:$0xff] }
 0x1e0   :  { %4020 = vmatpush.msrb.mxu2 %v946_v63  ;;  %4039 = vmatpush.msrb.mxu3 %v963_v0  ;;  %v58_v63 = vld [vmem:[%s6489_s0 + $0x78] sm:$0xff]  ;;  %v1011_v0 = vld [vmem:[#allocation2 + $0x1d08] sm:$0xff] }
 0x1e1   :  { %3981 = vmatmul.f32.vlgmr.msrb.gmra.mxu0 %v2642_v1  ;;  %4021 = vmatmul.f32.vlgmr.msrb.gmra.mxu2 %v2644_v2  ;;  %v1028_v1 = vld [vmem:[#allocation2 + $0x1d90] sm:$0xff]  ;;  %2647 = vst [vmem:[#allocation1 + $0x20] ss:$4 sm:$0xff] %v58_v63  ;;  %v978_v2 = vld [vmem:[#allocation2 + $0x1c00] sm:$0xff]  ;;  %v1061_v63 = vld [vmem:[#allocation2 + $0x1e98] sm:$0xff] }
 0x1e2   :  { %4045 = vmatpush.msra.mxu0 %v993_v3  ;;  %4085 = vmatpush.msra.mxu2 %v1025_v4  ;;  %v995_v3 = vld [vmem:[#allocation2 + $0x1c88] sm:$0xff]  ;;  %v1010_v4 = vld [vmem:[#allocation2 + $0x1d00] sm:$0xff] }
 0x1e3   :  { %4000 = vmatpush.msrb.mxu1 %v930_v5  ;;  %4040 = vmatpush.msrb.mxu3 %v962_v6  ;;  %v1027_v5 = vld [vmem:[#allocation2 + $0x1d88] sm:$0xff]  ;;  %v2648_v6 = vld.sshfl [vmem:[#allocation1] sm:$0xff pattern:$0x73625140] }
 0x1e4   :  { %4001 = vmatmul.f32.vlgmr.msrb.gmra.mxu1 %v2643_v7  ;;  %4041 = vmatmul.f32.vlgmr.msrb.gmra.mxu3 %v2645_v8  ;;  %v2650_v7 = vld.sshfl [vmem:[#allocation1 + $0x10] sm:$0xff pattern:$0x73625140]  ;;  %v1057_v8 = vld [vmem:[#allocation2 + $0x1e78] sm:$0xff] }
 0x1e5   :  { %4046 = vmatpush.msra.mxu0 %v992_v9  ;;  %4065 = vmatpush.msra.mxu1 %v1009_v10  ;;  %v1089_v9 = vld [vmem:[#allocation2 + $0x1f78] sm:$0xff]  ;;  %v994_v10 = vld [vmem:[#allocation2 + $0x1c80] sm:$0xff] }
 0x1e6   :  { %4086 = vmatpush.msra.mxu2 %v1024_v11  ;;  %4105 = vmatpush.msra.mxu3 %v1041_v12  ;;  %v1026_v11 = vld [vmem:[#allocation2 + $0x1d80] sm:$0xff] }
 0x1e7   :  { %4047 = vmatpush.msra.mxu0 %v991_v13  ;;  %4066 = vmatpush.msra.mxu1 %v1008_v14  ;;  %v2649_v12 = vld.sshfl [vmem:[#allocation1 + $0x8] sm:$0xff pattern:$0x73625140]  ;;  %v2651_v13 = vld.sshfl [vmem:[#allocation1 + $0x18] sm:$0xff pattern:$0x73625140] }
 0x1e8   :  { %4087 = vmatpush.msra.mxu2 %v1023_v15  ;;  %4106 = vmatpush.msra.mxu3 %v1040_v16  ;;  %v1056_v14 = vld [vmem:[#allocation2 + $0x1e70] sm:$0xff]  ;;  %v1073_v15 = vld [vmem:[#allocation2 + $0x1ef8] sm:$0xff] }
 0x1e9   :  { %4048 = vmatpush.msra.mxu0 %v990_v17  ;;  %4067 = vmatpush.msra.mxu1 %v1007_v18  ;;  %v1088_v16 = vld [vmem:[#allocation2 + $0x1f70] sm:$0xff]  ;;  %v1105_v17 = vld [vmem:[#allocation2 + $0x1ff8] sm:$0xff]  ;;  %v1055_v18 = vld [vmem:[#allocation2 + $0x1e68] sm:$0xff] }
 0x1ea   :  { %4088 = vmatpush.msra.mxu2 %v1022_v19  ;;  %4107 = vmatpush.msra.mxu3 %v1039_v20  ;;  %v1072_v19 = vld [vmem:[#allocation2 + $0x1ef0] sm:$0xff]  ;;  %v1087_v20 = vld [vmem:[#allocation2 + $0x1f68] sm:$0xff] }
 0x1eb   :  { %4049 = vmatpush.msra.mxu0 %v989_v21  ;;  %4068 = vmatpush.msra.mxu1 %v1006_v22  ;;  %v1104_v21 = vld [vmem:[#allocation2 + $0x1ff0] sm:$0xff]  ;;  %v1054_v22 = vld [vmem:[#allocation2 + $0x1e60] sm:$0xff] }
 0x1ec   :  { %4089 = vmatpush.msra.mxu2 %v1021_v23  ;;  %4108 = vmatpush.msra.mxu3 %v1038_v24  ;;  %v1071_v23 = vld [vmem:[#allocation2 + $0x1ee8] sm:$0xff]  ;;  %v1086_v24 = vld [vmem:[#allocation2 + $0x1f60] sm:$0xff] }
 0x1ed   :  { %4050 = vmatpush.msra.mxu0 %v988_v25  ;;  %4069 = vmatpush.msra.mxu1 %v1005_v26  ;;  %v1103_v25 = vld [vmem:[#allocation2 + $0x1fe8] sm:$0xff]  ;;  %v1053_v26 = vld [vmem:[#allocation2 + $0x1e58] sm:$0xff] }
 0x1ee   :  { %4090 = vmatpush.msra.mxu2 %v1020_v27  ;;  %4109 = vmatpush.msra.mxu3 %v1037_v28  ;;  %v1070_v27 = vld [vmem:[#allocation2 + $0x1ee0] sm:$0xff]  ;;  %v1085_v28 = vld [vmem:[#allocation2 + $0x1f58] sm:$0xff] }
 0x1ef   :  { %4051 = vmatpush.msra.mxu0 %v987_v29  ;;  %4070 = vmatpush.msra.mxu1 %v1004_v30  ;;  %v1102_v29 = vld [vmem:[#allocation2 + $0x1fe0] sm:$0xff]  ;;  %v1052_v30 = vld [vmem:[#allocation2 + $0x1e50] sm:$0xff] }
 0x1f0   :  { %4091 = vmatpush.msra.mxu2 %v1019_v31  ;;  %4110 = vmatpush.msra.mxu3 %v1036_v32  ;;  %v1069_v31 = vld [vmem:[#allocation2 + $0x1ed8] sm:$0xff]  ;;  %v1084_v32 = vld [vmem:[#allocation2 + $0x1f50] sm:$0xff] }
 0x1f1   :  { %4052 = vmatpush.msra.mxu0 %v986_v33  ;;  %4071 = vmatpush.msra.mxu1 %v1003_v34  ;;  %v1101_v33 = vld [vmem:[#allocation2 + $0x1fd8] sm:$0xff]  ;;  %v1051_v34 = vld [vmem:[#allocation2 + $0x1e48] sm:$0xff] }
 0x1f2   :  { %4092 = vmatpush.msra.mxu2 %v1018_v35  ;;  %4111 = vmatpush.msra.mxu3 %v1035_v36  ;;  %v1068_v35 = vld [vmem:[#allocation2 + $0x1ed0] sm:$0xff]  ;;  %v1083_v36 = vld [vmem:[#allocation2 + $0x1f48] sm:$0xff] }
 0x1f3   :  { %4053 = vmatpush.msra.mxu0 %v985_v37  ;;  %4072 = vmatpush.msra.mxu1 %v1002_v38  ;;  %v1100_v37 = vld [vmem:[#allocation2 + $0x1fd0] sm:$0xff]  ;;  %v1050_v38 = vld [vmem:[#allocation2 + $0x1e40] sm:$0xff] }
 0x1f4   :  { %4093 = vmatpush.msra.mxu2 %v1017_v39  ;;  %4112 = vmatpush.msra.mxu3 %v1034_v40  ;;  %v1067_v39 = vld [vmem:[#allocation2 + $0x1ec8] sm:$0xff]  ;;  %v1082_v40 = vld [vmem:[#allocation2 + $0x1f40] sm:$0xff] }
 0x1f5   :  { %4054 = vmatpush.msra.mxu0 %v984_v41  ;;  %4073 = vmatpush.msra.mxu1 %v1001_v42  ;;  %v1099_v41 = vld [vmem:[#allocation2 + $0x1fc8] sm:$0xff]  ;;  %v1049_v42 = vld [vmem:[#allocation2 + $0x1e38] sm:$0xff] }
 0x1f6   :  { %4094 = vmatpush.msra.mxu2 %v1016_v43  ;;  %4113 = vmatpush.msra.mxu3 %v1033_v44  ;;  %v1066_v43 = vld [vmem:[#allocation2 + $0x1ec0] sm:$0xff]  ;;  %v1081_v44 = vld [vmem:[#allocation2 + $0x1f38] sm:$0xff] }
 0x1f7   :  { %4055 = vmatpush.msra.mxu0 %v983_v45  ;;  %4074 = vmatpush.msra.mxu1 %v1000_v46  ;;  %v1098_v45 = vld [vmem:[#allocation2 + $0x1fc0] sm:$0xff]  ;;  %v1048_v46 = vld [vmem:[#allocation2 + $0x1e30] sm:$0xff] }
 0x1f8   :  { %4095 = vmatpush.msra.mxu2 %v1015_v47  ;;  %4114 = vmatpush.msra.mxu3 %v1032_v48  ;;  %v1065_v47 = vld [vmem:[#allocation2 + $0x1eb8] sm:$0xff]  ;;  %v1080_v48 = vld [vmem:[#allocation2 + $0x1f30] sm:$0xff] }
 0x1f9   :  { %4056 = vmatpush.msra.mxu0 %v982_v49  ;;  %4075 = vmatpush.msra.mxu1 %v999_v50  ;;  %v1097_v49 = vld [vmem:[#allocation2 + $0x1fb8] sm:$0xff]  ;;  %v1047_v50 = vld [vmem:[#allocation2 + $0x1e28] sm:$0xff] }
 0x1fa   :  { %4096 = vmatpush.msra.mxu2 %v1014_v51  ;;  %4115 = vmatpush.msra.mxu3 %v1031_v52  ;;  %v1064_v51 = vld [vmem:[#allocation2 + $0x1eb0] sm:$0xff]  ;;  %v1079_v52 = vld [vmem:[#allocation2 + $0x1f28] sm:$0xff] }
 0x1fb   :  { %4057 = vmatpush.msra.mxu0 %v981_v53  ;;  %4076 = vmatpush.msra.mxu1 %v998_v54  ;;  %v1096_v53 = vld [vmem:[#allocation2 + $0x1fb0] sm:$0xff]  ;;  %v1046_v54 = vld [vmem:[#allocation2 + $0x1e20] sm:$0xff] }
 0x1fc   :  { %4097 = vmatpush.msra.mxu2 %v1013_v55  ;;  %4116 = vmatpush.msra.mxu3 %v1030_v56  ;;  %v1063_v55 = vld [vmem:[#allocation2 + $0x1ea8] sm:$0xff]  ;;  %v1078_v56 = vld [vmem:[#allocation2 + $0x1f20] sm:$0xff] }
 0x1fd   :  { %4058 = vmatpush.msra.mxu0 %v980_v57  ;;  %4077 = vmatpush.msra.mxu1 %v997_v58  ;;  %v1095_v57 = vld [vmem:[#allocation2 + $0x1fa8] sm:$0xff]  ;;  %v1045_v58 = vld [vmem:[#allocation2 + $0x1e18] sm:$0xff] }
 0x1fe   :  { %4098 = vmatpush.msra.mxu2 %v1012_v59  ;;  %4117 = vmatpush.msra.mxu3 %v1029_v60  ;;  %v1062_v59 = vld [vmem:[#allocation2 + $0x1ea0] sm:$0xff]  ;;  %v1077_v60 = vld [vmem:[#allocation2 + $0x1f18] sm:$0xff] }
 0x1ff   :  { %4059 = vmatpush.msra.mxu0 %v979_v61  ;;  %4078 = vmatpush.msra.mxu1 %v996_v62  ;;  %v1094_v61 = vld [vmem:[#allocation2 + $0x1fa0] sm:$0xff]  ;;  %v1044_v62 = vld [vmem:[#allocation2 + $0x1e10] sm:$0xff] }
 0x200   :  { %4099 = vmatpush.msra.mxu2 %v1011_v0  ;;  %4118 = vmatpush.msra.mxu3 %v1028_v1  ;;  %v1076_v0 = vld [vmem:[#allocation2 + $0x1f10] sm:$0xff]  ;;  %v1093_v1 = vld [vmem:[#allocation2 + $0x1f98] sm:$0xff] }
 0x201   :  { %4060 = vmatpush.msra.mxu0 %v978_v2  ;;  %4079 = vmatpush.msra.mxu1 %v995_v3  ;;  %v1043_v2 = vld [vmem:[#allocation2 + $0x1e08] sm:$0xff]  ;;  %v1060_v3 = vld [vmem:[#allocation2 + $0x1e90] sm:$0xff] }
 0x202   :  { %4100 = vmatpush.msra.mxu2 %v1010_v4  ;;  %4119 = vmatpush.msra.mxu3 %v1027_v5  ;;  %v59_v4 = vld [vmem:[%s6489_s0 + $0x80] sm:$0xff]  ;;  %v1075_v5 = vld [vmem:[#allocation2 + $0x1f08] sm:$0xff] }
 0x203   :  { %4061 = vmatmul.f32.vlgmr.msra.gmra.mxu0 %v2648_v6  ;;  %4101 = vmatmul.f32.vlgmr.msra.gmra.mxu2 %v2650_v7  ;;  %v1092_v6 = vld [vmem:[#allocation2 + $0x1f90] sm:$0xff]  ;;  %2656 = vst [vmem:[#allocation1] ss:$4 sm:$0xff] %v59_v4  ;;  %v1042_v7 = vld [vmem:[#allocation2 + $0x1e00] sm:$0xff]  ;;  %v1125_v4 = vld [vmem:[#allocation2 + $0x2098] sm:$0xff] }
 0x204   :  { %4125 = vmatpush.msrb.mxu0 %v1057_v8  ;;  %4165 = vmatpush.msrb.mxu2 %v1089_v9  ;;  %v1059_v8 = vld [vmem:[#allocation2 + $0x1e88] sm:$0xff]  ;;  %v1074_v9 = vld [vmem:[#allocation2 + $0x1f00] sm:$0xff] }
 0x205   :  { %4080 = vmatpush.msra.mxu1 %v994_v10  ;;  %4120 = vmatpush.msra.mxu3 %v1026_v11  ;;  %v1091_v10 = vld [vmem:[#allocation2 + $0x1f88] sm:$0xff]  ;;  %v2652_v11 = vld.sshfl [vmem:[#allocation1 + $0x20] sm:$0xff pattern:$0x73625140] }
 0x206   :  { %4081 = vmatmul.f32.vlgmr.msra.gmra.mxu1 %v2649_v12  ;;  %4121 = vmatmul.f32.vlgmr.msra.gmra.mxu3 %v2651_v13  ;;  %v2654_v12 = vld.sshfl [vmem:[#allocation1 + $0x30] sm:$0xff pattern:$0x73625140]  ;;  %v1121_v13 = vld [vmem:[#allocation2 + $0x2078] sm:$0xff] }
 0x207   :  { %4126 = vmatpush.msrb.mxu0 %v1056_v14  ;;  %4145 = vmatpush.msrb.mxu1 %v1073_v15  ;;  %v1153_v14 = vld [vmem:[#allocation2 + $0x2178] sm:$0xff]  ;;  %v1058_v15 = vld [vmem:[#allocation2 + $0x1e80] sm:$0xff] }
 0x208   :  { %4166 = vmatpush.msrb.mxu2 %v1088_v16  ;;  %4185 = vmatpush.msrb.mxu3 %v1105_v17  ;;  %v1090_v16 = vld [vmem:[#allocation2 + $0x1f80] sm:$0xff] }
 0x209   :  { %4127 = vmatpush.msrb.mxu0 %v1055_v18  ;;  %4146 = vmatpush.msrb.mxu1 %v1072_v19  ;;  %v2653_v17 = vld.sshfl [vmem:[#allocation1 + $0x28] sm:$0xff pattern:$0x73625140]  ;;  %v2655_v18 = vld.sshfl [vmem:[#allocation1 + $0x38] sm:$0xff pattern:$0x73625140] }
 0x20a   :  { %4167 = vmatpush.msrb.mxu2 %v1087_v20  ;;  %4186 = vmatpush.msrb.mxu3 %v1104_v21  ;;  %v1120_v19 = vld [vmem:[#allocation2 + $0x2070] sm:$0xff]  ;;  %v1137_v20 = vld [vmem:[#allocation2 + $0x20f8] sm:$0xff] }
 0x20b   :  { %4128 = vmatpush.msrb.mxu0 %v1054_v22  ;;  %4147 = vmatpush.msrb.mxu1 %v1071_v23  ;;  %v1152_v21 = vld [vmem:[#allocation2 + $0x2170] sm:$0xff]  ;;  %v1169_v22 = vld [vmem:[#allocation2 + $0x21f8] sm:$0xff]  ;;  %v1119_v23 = vld [vmem:[#allocation2 + $0x2068] sm:$0xff] }
 0x20c   :  { %4168 = vmatpush.msrb.mxu2 %v1086_v24  ;;  %4187 = vmatpush.msrb.mxu3 %v1103_v25  ;;  %v1136_v24 = vld [vmem:[#allocation2 + $0x20f0] sm:$0xff]  ;;  %v1151_v25 = vld [vmem:[#allocation2 + $0x2168] sm:$0xff] }
 0x20d   :  { %4129 = vmatpush.msrb.mxu0 %v1053_v26  ;;  %4148 = vmatpush.msrb.mxu1 %v1070_v27  ;;  %v1168_v26 = vld [vmem:[#allocation2 + $0x21f0] sm:$0xff]  ;;  %v1118_v27 = vld [vmem:[#allocation2 + $0x2060] sm:$0xff] }
 0x20e   :  { %4169 = vmatpush.msrb.mxu2 %v1085_v28  ;;  %4188 = vmatpush.msrb.mxu3 %v1102_v29  ;;  %v1135_v28 = vld [vmem:[#allocation2 + $0x20e8] sm:$0xff]  ;;  %v1150_v29 = vld [vmem:[#allocation2 + $0x2160] sm:$0xff] }
 0x20f   :  { %4130 = vmatpush.msrb.mxu0 %v1052_v30  ;;  %4149 = vmatpush.msrb.mxu1 %v1069_v31  ;;  %v1167_v30 = vld [vmem:[#allocation2 + $0x21e8] sm:$0xff]  ;;  %v1117_v31 = vld [vmem:[#allocation2 + $0x2058] sm:$0xff] }
 0x210   :  { %4170 = vmatpush.msrb.mxu2 %v1084_v32  ;;  %4189 = vmatpush.msrb.mxu3 %v1101_v33  ;;  %v1134_v32 = vld [vmem:[#allocation2 + $0x20e0] sm:$0xff]  ;;  %v1149_v33 = vld [vmem:[#allocation2 + $0x2158] sm:$0xff] }
 0x211   :  { %4131 = vmatpush.msrb.mxu0 %v1051_v34  ;;  %4150 = vmatpush.msrb.mxu1 %v1068_v35  ;;  %v1166_v34 = vld [vmem:[#allocation2 + $0x21e0] sm:$0xff]  ;;  %v1116_v35 = vld [vmem:[#allocation2 + $0x2050] sm:$0xff] }
 0x212   :  { %4171 = vmatpush.msrb.mxu2 %v1083_v36  ;;  %4190 = vmatpush.msrb.mxu3 %v1100_v37  ;;  %v1133_v36 = vld [vmem:[#allocation2 + $0x20d8] sm:$0xff]  ;;  %v1148_v37 = vld [vmem:[#allocation2 + $0x2150] sm:$0xff] }
 0x213   :  { %4132 = vmatpush.msrb.mxu0 %v1050_v38  ;;  %4151 = vmatpush.msrb.mxu1 %v1067_v39  ;;  %v1165_v38 = vld [vmem:[#allocation2 + $0x21d8] sm:$0xff]  ;;  %v1115_v39 = vld [vmem:[#allocation2 + $0x2048] sm:$0xff] }
 0x214   :  { %4172 = vmatpush.msrb.mxu2 %v1082_v40  ;;  %4191 = vmatpush.msrb.mxu3 %v1099_v41  ;;  %v1132_v40 = vld [vmem:[#allocation2 + $0x20d0] sm:$0xff]  ;;  %v1147_v41 = vld [vmem:[#allocation2 + $0x2148] sm:$0xff] }
 0x215   :  { %4133 = vmatpush.msrb.mxu0 %v1049_v42  ;;  %4152 = vmatpush.msrb.mxu1 %v1066_v43  ;;  %v1164_v42 = vld [vmem:[#allocation2 + $0x21d0] sm:$0xff]  ;;  %v1114_v43 = vld [vmem:[#allocation2 + $0x2040] sm:$0xff] }
 0x216   :  { %4173 = vmatpush.msrb.mxu2 %v1081_v44  ;;  %4192 = vmatpush.msrb.mxu3 %v1098_v45  ;;  %v1131_v44 = vld [vmem:[#allocation2 + $0x20c8] sm:$0xff]  ;;  %v1146_v45 = vld [vmem:[#allocation2 + $0x2140] sm:$0xff] }
 0x217   :  { %4134 = vmatpush.msrb.mxu0 %v1048_v46  ;;  %4153 = vmatpush.msrb.mxu1 %v1065_v47  ;;  %v1163_v46 = vld [vmem:[#allocation2 + $0x21c8] sm:$0xff]  ;;  %v1113_v47 = vld [vmem:[#allocation2 + $0x2038] sm:$0xff] }
 0x218   :  { %4174 = vmatpush.msrb.mxu2 %v1080_v48  ;;  %4193 = vmatpush.msrb.mxu3 %v1097_v49  ;;  %v1130_v48 = vld [vmem:[#allocation2 + $0x20c0] sm:$0xff]  ;;  %v1145_v49 = vld [vmem:[#allocation2 + $0x2138] sm:$0xff] }
 0x219   :  { %4135 = vmatpush.msrb.mxu0 %v1047_v50  ;;  %4154 = vmatpush.msrb.mxu1 %v1064_v51  ;;  %v1162_v50 = vld [vmem:[#allocation2 + $0x21c0] sm:$0xff]  ;;  %v1112_v51 = vld [vmem:[#allocation2 + $0x2030] sm:$0xff] }
 0x21a   :  { %4175 = vmatpush.msrb.mxu2 %v1079_v52  ;;  %4194 = vmatpush.msrb.mxu3 %v1096_v53  ;;  %v1129_v52 = vld [vmem:[#allocation2 + $0x20b8] sm:$0xff]  ;;  %v1144_v53 = vld [vmem:[#allocation2 + $0x2130] sm:$0xff] }
 0x21b   :  { %4136 = vmatpush.msrb.mxu0 %v1046_v54  ;;  %4155 = vmatpush.msrb.mxu1 %v1063_v55  ;;  %v1161_v54 = vld [vmem:[#allocation2 + $0x21b8] sm:$0xff]  ;;  %v1111_v55 = vld [vmem:[#allocation2 + $0x2028] sm:$0xff] }
 0x21c   :  { %4176 = vmatpush.msrb.mxu2 %v1078_v56  ;;  %4195 = vmatpush.msrb.mxu3 %v1095_v57  ;;  %v1128_v56 = vld [vmem:[#allocation2 + $0x20b0] sm:$0xff]  ;;  %v1143_v57 = vld [vmem:[#allocation2 + $0x2128] sm:$0xff] }
 0x21d   :  { %4137 = vmatpush.msrb.mxu0 %v1045_v58  ;;  %4156 = vmatpush.msrb.mxu1 %v1062_v59  ;;  %v1160_v58 = vld [vmem:[#allocation2 + $0x21b0] sm:$0xff]  ;;  %v1110_v59 = vld [vmem:[#allocation2 + $0x2020] sm:$0xff] }
 0x21e   :  { %4177 = vmatpush.msrb.mxu2 %v1077_v60  ;;  %4196 = vmatpush.msrb.mxu3 %v1094_v61  ;;  %v1127_v60 = vld [vmem:[#allocation2 + $0x20a8] sm:$0xff]  ;;  %v1142_v61 = vld [vmem:[#allocation2 + $0x2120] sm:$0xff] }
 0x21f   :  { %4138 = vmatpush.msrb.mxu0 %v1044_v62  ;;  %4157 = vmatpush.msrb.mxu1 %v1061_v63  ;;  %v1159_v62 = vld [vmem:[#allocation2 + $0x21a8] sm:$0xff]  ;;  %v1109_v63 = vld [vmem:[#allocation2 + $0x2018] sm:$0xff] }
 0x220   :  { %4178 = vmatpush.msrb.mxu2 %v1076_v0  ;;  %4197 = vmatpush.msrb.mxu3 %v1093_v1  ;;  %v1126_v0 = vld [vmem:[#allocation2 + $0x20a0] sm:$0xff]  ;;  %v1141_v1 = vld [vmem:[#allocation2 + $0x2118] sm:$0xff] }
 0x221   :  { %4139 = vmatpush.msrb.mxu0 %v1043_v2  ;;  %4158 = vmatpush.msrb.mxu1 %v1060_v3  ;;  %v1158_v2 = vld [vmem:[#allocation2 + $0x21a0] sm:$0xff]  ;;  %v1108_v3 = vld [vmem:[#allocation2 + $0x2010] sm:$0xff] }
 0x222   :  { %4179 = vmatpush.msrb.mxu2 %v1075_v5  ;;  %4198 = vmatpush.msrb.mxu3 %v1092_v6  ;;  %v1140_v5 = vld [vmem:[#allocation2 + $0x2110] sm:$0xff]  ;;  %v1157_v6 = vld [vmem:[#allocation2 + $0x2198] sm:$0xff] }
 0x223   :  { %4140 = vmatpush.msrb.mxu0 %v1042_v7  ;;  %4159 = vmatpush.msrb.mxu1 %v1059_v8  ;;  %v1107_v7 = vld [vmem:[#allocation2 + $0x2008] sm:$0xff]  ;;  %v1124_v8 = vld [vmem:[#allocation2 + $0x2090] sm:$0xff] }
 0x224   :  { %4180 = vmatpush.msrb.mxu2 %v1074_v9  ;;  %4199 = vmatpush.msrb.mxu3 %v1091_v10  ;;  %v60_v9 = vld [vmem:[%s6489_s0 + $0x88] sm:$0xff]  ;;  %v1139_v10 = vld [vmem:[#allocation2 + $0x2108] sm:$0xff] }
 0x225   :  { %4141 = vmatmul.f32.vlgmr.msrb.gmra.mxu0 %v2652_v11  ;;  %4181 = vmatmul.f32.vlgmr.msrb.gmra.mxu2 %v2654_v12  ;;  %v1156_v11 = vld [vmem:[#allocation2 + $0x2190] sm:$0xff]  ;;  %2657 = vst [vmem:[#allocation1 + $0x20] ss:$4 sm:$0xff] %v60_v9  ;;  %v1106_v12 = vld [vmem:[#allocation2 + $0x2000] sm:$0xff]  ;;  %v1189_v9 = vld [vmem:[#allocation2 + $0x2298] sm:$0xff] }
 0x226   :  { %4205 = vmatpush.msra.mxu0 %v1121_v13  ;;  %4245 = vmatpush.msra.mxu2 %v1153_v14  ;;  %v1123_v13 = vld [vmem:[#allocation2 + $0x2088] sm:$0xff]  ;;  %v1138_v14 = vld [vmem:[#allocation2 + $0x2100] sm:$0xff] }
 0x227   :  { %4160 = vmatpush.msrb.mxu1 %v1058_v15  ;;  %4200 = vmatpush.msrb.mxu3 %v1090_v16  ;;  %v1155_v15 = vld [vmem:[#allocation2 + $0x2188] sm:$0xff]  ;;  %v2658_v16 = vld.sshfl [vmem:[#allocation1] sm:$0xff pattern:$0x73625140] }
 0x228   :  { %4161 = vmatmul.f32.vlgmr.msrb.gmra.mxu1 %v2653_v17  ;;  %4201 = vmatmul.f32.vlgmr.msrb.gmra.mxu3 %v2655_v18  ;;  %v2660_v17 = vld.sshfl [vmem:[#allocation1 + $0x10] sm:$0xff pattern:$0x73625140]  ;;  %v1185_v18 = vld [vmem:[#allocation2 + $0x2278] sm:$0xff] }
 0x229   :  { %4206 = vmatpush.msra.mxu0 %v1120_v19  ;;  %4225 = vmatpush.msra.mxu1 %v1137_v20  ;;  %v1217_v19 = vld [vmem:[#allocation2 + $0x2378] sm:$0xff]  ;;  %v1122_v20 = vld [vmem:[#allocation2 + $0x2080] sm:$0xff] }
 0x22a   :  { %4246 = vmatpush.msra.mxu2 %v1152_v21  ;;  %4265 = vmatpush.msra.mxu3 %v1169_v22  ;;  %v1154_v21 = vld [vmem:[#allocation2 + $0x2180] sm:$0xff] }
 0x22b   :  { %4207 = vmatpush.msra.mxu0 %v1119_v23  ;;  %4226 = vmatpush.msra.mxu1 %v1136_v24  ;;  %v2659_v22 = vld.sshfl [vmem:[#allocation1 + $0x8] sm:$0xff pattern:$0x73625140]  ;;  %v2661_v23 = vld.sshfl [vmem:[#allocation1 + $0x18] sm:$0xff pattern:$0x73625140] }
 0x22c   :  { %4247 = vmatpush.msra.mxu2 %v1151_v25  ;;  %4266 = vmatpush.msra.mxu3 %v1168_v26  ;;  %v1184_v24 = vld [vmem:[#allocation2 + $0x2270] sm:$0xff]  ;;  %v1201_v25 = vld [vmem:[#allocation2 + $0x22f8] sm:$0xff] }
 0x22d   :  { %4208 = vmatpush.msra.mxu0 %v1118_v27  ;;  %4227 = vmatpush.msra.mxu1 %v1135_v28  ;;  %v1216_v26 = vld [vmem:[#allocation2 + $0x2370] sm:$0xff]  ;;  %v1233_v27 = vld [vmem:[#allocation2 + $0x23f8] sm:$0xff]  ;;  %v1183_v28 = vld [vmem:[#allocation2 + $0x2268] sm:$0xff] }
 0x22e   :  { %4248 = vmatpush.msra.mxu2 %v1150_v29  ;;  %4267 = vmatpush.msra.mxu3 %v1167_v30  ;;  %v1200_v29 = vld [vmem:[#allocation2 + $0x22f0] sm:$0xff]  ;;  %v1215_v30 = vld [vmem:[#allocation2 + $0x2368] sm:$0xff] }
 0x22f   :  { %4209 = vmatpush.msra.mxu0 %v1117_v31  ;;  %4228 = vmatpush.msra.mxu1 %v1134_v32  ;;  %v1232_v31 = vld [vmem:[#allocation2 + $0x23f0] sm:$0xff]  ;;  %v1182_v32 = vld [vmem:[#allocation2 + $0x2260] sm:$0xff] }
 0x230   :  { %4249 = vmatpush.msra.mxu2 %v1149_v33  ;;  %4268 = vmatpush.msra.mxu3 %v1166_v34  ;;  %v1199_v33 = vld [vmem:[#allocation2 + $0x22e8] sm:$0xff]  ;;  %v1214_v34 = vld [vmem:[#allocation2 + $0x2360] sm:$0xff] }
 0x231   :  { %4210 = vmatpush.msra.mxu0 %v1116_v35  ;;  %4229 = vmatpush.msra.mxu1 %v1133_v36  ;;  %v1231_v35 = vld [vmem:[#allocation2 + $0x23e8] sm:$0xff]  ;;  %v1181_v36 = vld [vmem:[#allocation2 + $0x2258] sm:$0xff] }
 0x232   :  { %4250 = vmatpush.msra.mxu2 %v1148_v37  ;;  %4269 = vmatpush.msra.mxu3 %v1165_v38  ;;  %v1198_v37 = vld [vmem:[#allocation2 + $0x22e0] sm:$0xff]  ;;  %v1213_v38 = vld [vmem:[#allocation2 + $0x2358] sm:$0xff] }
 0x233   :  { %4211 = vmatpush.msra.mxu0 %v1115_v39  ;;  %4230 = vmatpush.msra.mxu1 %v1132_v40  ;;  %v1230_v39 = vld [vmem:[#allocation2 + $0x23e0] sm:$0xff]  ;;  %v1180_v40 = vld [vmem:[#allocation2 + $0x2250] sm:$0xff] }
 0x234   :  { %4251 = vmatpush.msra.mxu2 %v1147_v41  ;;  %4270 = vmatpush.msra.mxu3 %v1164_v42  ;;  %v1197_v41 = vld [vmem:[#allocation2 + $0x22d8] sm:$0xff]  ;;  %v1212_v42 = vld [vmem:[#allocation2 + $0x2350] sm:$0xff] }
 0x235   :  { %4212 = vmatpush.msra.mxu0 %v1114_v43  ;;  %4231 = vmatpush.msra.mxu1 %v1131_v44  ;;  %v1229_v43 = vld [vmem:[#allocation2 + $0x23d8] sm:$0xff]  ;;  %v1179_v44 = vld [vmem:[#allocation2 + $0x2248] sm:$0xff] }
 0x236   :  { %4252 = vmatpush.msra.mxu2 %v1146_v45  ;;  %4271 = vmatpush.msra.mxu3 %v1163_v46  ;;  %v1196_v45 = vld [vmem:[#allocation2 + $0x22d0] sm:$0xff]  ;;  %v1211_v46 = vld [vmem:[#allocation2 + $0x2348] sm:$0xff] }
 0x237   :  { %4213 = vmatpush.msra.mxu0 %v1113_v47  ;;  %4232 = vmatpush.msra.mxu1 %v1130_v48  ;;  %v1228_v47 = vld [vmem:[#allocation2 + $0x23d0] sm:$0xff]  ;;  %v1178_v48 = vld [vmem:[#allocation2 + $0x2240] sm:$0xff] }
 0x238   :  { %4253 = vmatpush.msra.mxu2 %v1145_v49  ;;  %4272 = vmatpush.msra.mxu3 %v1162_v50  ;;  %v1195_v49 = vld [vmem:[#allocation2 + $0x22c8] sm:$0xff]  ;;  %v1210_v50 = vld [vmem:[#allocation2 + $0x2340] sm:$0xff] }
 0x239   :  { %4214 = vmatpush.msra.mxu0 %v1112_v51  ;;  %4233 = vmatpush.msra.mxu1 %v1129_v52  ;;  %v1227_v51 = vld [vmem:[#allocation2 + $0x23c8] sm:$0xff]  ;;  %v1177_v52 = vld [vmem:[#allocation2 + $0x2238] sm:$0xff] }
 0x23a   :  { %4254 = vmatpush.msra.mxu2 %v1144_v53  ;;  %4273 = vmatpush.msra.mxu3 %v1161_v54  ;;  %v1194_v53 = vld [vmem:[#allocation2 + $0x22c0] sm:$0xff]  ;;  %v1209_v54 = vld [vmem:[#allocation2 + $0x2338] sm:$0xff] }
 0x23b   :  { %4215 = vmatpush.msra.mxu0 %v1111_v55  ;;  %4234 = vmatpush.msra.mxu1 %v1128_v56  ;;  %v1226_v55 = vld [vmem:[#allocation2 + $0x23c0] sm:$0xff]  ;;  %v1176_v56 = vld [vmem:[#allocation2 + $0x2230] sm:$0xff] }
 0x23c   :  { %4255 = vmatpush.msra.mxu2 %v1143_v57  ;;  %4274 = vmatpush.msra.mxu3 %v1160_v58  ;;  %v1193_v57 = vld [vmem:[#allocation2 + $0x22b8] sm:$0xff]  ;;  %v1208_v58 = vld [vmem:[#allocation2 + $0x2330] sm:$0xff] }
 0x23d   :  { %4216 = vmatpush.msra.mxu0 %v1110_v59  ;;  %4235 = vmatpush.msra.mxu1 %v1127_v60  ;;  %v1225_v59 = vld [vmem:[#allocation2 + $0x23b8] sm:$0xff]  ;;  %v1175_v60 = vld [vmem:[#allocation2 + $0x2228] sm:$0xff] }
 0x23e   :  { %4256 = vmatpush.msra.mxu2 %v1142_v61  ;;  %4275 = vmatpush.msra.mxu3 %v1159_v62  ;;  %v1192_v61 = vld [vmem:[#allocation2 + $0x22b0] sm:$0xff]  ;;  %v1207_v62 = vld [vmem:[#allocation2 + $0x2328] sm:$0xff] }
 0x23f   :  { %4217 = vmatpush.msra.mxu0 %v1109_v63  ;;  %4236 = vmatpush.msra.mxu1 %v1126_v0  ;;  %v1224_v63 = vld [vmem:[#allocation2 + $0x23b0] sm:$0xff]  ;;  %v1174_v0 = vld [vmem:[#allocation2 + $0x2220] sm:$0xff] }
 0x240   :  { %4257 = vmatpush.msra.mxu2 %v1141_v1  ;;  %4276 = vmatpush.msra.mxu3 %v1158_v2  ;;  %v1191_v1 = vld [vmem:[#allocation2 + $0x22a8] sm:$0xff]  ;;  %v1206_v2 = vld [vmem:[#allocation2 + $0x2320] sm:$0xff] }
 0x241   :  { %4218 = vmatpush.msra.mxu0 %v1108_v3  ;;  %4237 = vmatpush.msra.mxu1 %v1125_v4  ;;  %v1223_v3 = vld [vmem:[#allocation2 + $0x23a8] sm:$0xff]  ;;  %v1173_v4 = vld [vmem:[#allocation2 + $0x2218] sm:$0xff] }
 0x242   :  { %4258 = vmatpush.msra.mxu2 %v1140_v5  ;;  %4277 = vmatpush.msra.mxu3 %v1157_v6  ;;  %v1190_v5 = vld [vmem:[#allocation2 + $0x22a0] sm:$0xff]  ;;  %v1205_v6 = vld [vmem:[#allocation2 + $0x2318] sm:$0xff] }
 0x243   :  { %4219 = vmatpush.msra.mxu0 %v1107_v7  ;;  %4238 = vmatpush.msra.mxu1 %v1124_v8  ;;  %v1222_v7 = vld [vmem:[#allocation2 + $0x23a0] sm:$0xff]  ;;  %v1172_v8 = vld [vmem:[#allocation2 + $0x2210] sm:$0xff] }
 0x244   :  { %4259 = vmatpush.msra.mxu2 %v1139_v10  ;;  %4278 = vmatpush.msra.mxu3 %v1156_v11  ;;  %v1204_v10 = vld [vmem:[#allocation2 + $0x2310] sm:$0xff]  ;;  %v1221_v11 = vld [vmem:[#allocation2 + $0x2398] sm:$0xff] }
 0x245   :  { %4220 = vmatpush.msra.mxu0 %v1106_v12  ;;  %4239 = vmatpush.msra.mxu1 %v1123_v13  ;;  %v1171_v12 = vld [vmem:[#allocation2 + $0x2208] sm:$0xff]  ;;  %v1188_v13 = vld [vmem:[#allocation2 + $0x2290] sm:$0xff] }
 0x246   :  { %4260 = vmatpush.msra.mxu2 %v1138_v14  ;;  %4279 = vmatpush.msra.mxu3 %v1155_v15  ;;  %v61_v14 = vld [vmem:[%s6489_s0 + $0x90] sm:$0xff] }
 0x247   :  { %4221 = vmatmul.f32.vlgmr.msra.gmra.mxu0 %v2658_v16  ;;  %4261 = vmatmul.f32.vlgmr.msra.gmra.mxu2 %v2660_v17  ;;  %v1203_v15 = vld [vmem:[#allocation2 + $0x2308] sm:$0xff]  ;;  %v1220_v16 = vld [vmem:[#allocation2 + $0x2390] sm:$0xff]  ;;  %2666 = vst [vmem:[#allocation1] ss:$4 sm:$0xff] %v61_v14  ;;  %v1170_v17 = vld [vmem:[#allocation2 + $0x2200] sm:$0xff] }
 0x248   :  { %4285 = vmatpush.msrb.mxu0 %v1185_v18  ;;  %4325 = vmatpush.msrb.mxu2 %v1217_v19  ;;  %v1187_v18 = vld [vmem:[#allocation2 + $0x2288] sm:$0xff]  ;;  %v1202_v19 = vld [vmem:[#allocation2 + $0x2300] sm:$0xff]  ;;  %v1253_v14 = vld [vmem:[#allocation2 + $0x2498] sm:$0xff] }
 0x249   :  { %4240 = vmatpush.msra.mxu1 %v1122_v20  ;;  %4280 = vmatpush.msra.mxu3 %v1154_v21  ;;  %v1219_v20 = vld [vmem:[#allocation2 + $0x2388] sm:$0xff]  ;;  %v2662_v21 = vld.sshfl [vmem:[#allocation1 + $0x20] sm:$0xff pattern:$0x73625140] }
 0x24a   :  { %4241 = vmatmul.f32.vlgmr.msra.gmra.mxu1 %v2659_v22  ;;  %4281 = vmatmul.f32.vlgmr.msra.gmra.mxu3 %v2661_v23  ;;  %v2664_v22 = vld.sshfl [vmem:[#allocation1 + $0x30] sm:$0xff pattern:$0x73625140]  ;;  %v1249_v23 = vld [vmem:[#allocation2 + $0x2478] sm:$0xff] }
 0x24b   :  { %4286 = vmatpush.msrb.mxu0 %v1184_v24  ;;  %4305 = vmatpush.msrb.mxu1 %v1201_v25  ;;  %v1281_v24 = vld [vmem:[#allocation2 + $0x2578] sm:$0xff]  ;;  %v1186_v25 = vld [vmem:[#allocation2 + $0x2280] sm:$0xff] }
 0x24c   :  { %4326 = vmatpush.msrb.mxu2 %v1216_v26  ;;  %4345 = vmatpush.msrb.mxu3 %v1233_v27  ;;  %v1218_v26 = vld [vmem:[#allocation2 + $0x2380] sm:$0xff] }
 0x24d   :  { %4287 = vmatpush.msrb.mxu0 %v1183_v28  ;;  %4306 = vmatpush.msrb.mxu1 %v1200_v29  ;;  %v2663_v27 = vld.sshfl [vmem:[#allocation1 + $0x28] sm:$0xff pattern:$0x73625140]  ;;  %v2665_v28 = vld.sshfl [vmem:[#allocation1 + $0x38] sm:$0xff pattern:$0x73625140] }
 0x24e   :  { %4327 = vmatpush.msrb.mxu2 %v1215_v30  ;;  %4346 = vmatpush.msrb.mxu3 %v1232_v31  ;;  %v1248_v29 = vld [vmem:[#allocation2 + $0x2470] sm:$0xff]  ;;  %v1265_v30 = vld [vmem:[#allocation2 + $0x24f8] sm:$0xff] }
 0x24f   :  { %4288 = vmatpush.msrb.mxu0 %v1182_v32  ;;  %4307 = vmatpush.msrb.mxu1 %v1199_v33  ;;  %v1280_v31 = vld [vmem:[#allocation2 + $0x2570] sm:$0xff]  ;;  %v1297_v32 = vld [vmem:[#allocation2 + $0x25f8] sm:$0xff]  ;;  %v1247_v33 = vld [vmem:[#allocation2 + $0x2468] sm:$0xff] }
 0x250   :  { %4328 = vmatpush.msrb.mxu2 %v1214_v34  ;;  %4347 = vmatpush.msrb.mxu3 %v1231_v35  ;;  %v1264_v34 = vld [vmem:[#allocation2 + $0x24f0] sm:$0xff]  ;;  %v1279_v35 = vld [vmem:[#allocation2 + $0x2568] sm:$0xff] }
 0x251   :  { %4289 = vmatpush.msrb.mxu0 %v1181_v36  ;;  %4308 = vmatpush.msrb.mxu1 %v1198_v37  ;;  %v1296_v36 = vld [vmem:[#allocation2 + $0x25f0] sm:$0xff]  ;;  %v1246_v37 = vld [vmem:[#allocation2 + $0x2460] sm:$0xff] }
 0x252   :  { %4329 = vmatpush.msrb.mxu2 %v1213_v38  ;;  %4348 = vmatpush.msrb.mxu3 %v1230_v39  ;;  %v1263_v38 = vld [vmem:[#allocation2 + $0x24e8] sm:$0xff]  ;;  %v1278_v39 = vld [vmem:[#allocation2 + $0x2560] sm:$0xff] }
 0x253   :  { %4290 = vmatpush.msrb.mxu0 %v1180_v40  ;;  %4309 = vmatpush.msrb.mxu1 %v1197_v41  ;;  %v1295_v40 = vld [vmem:[#allocation2 + $0x25e8] sm:$0xff]  ;;  %v1245_v41 = vld [vmem:[#allocation2 + $0x2458] sm:$0xff] }
 0x254   :  { %4330 = vmatpush.msrb.mxu2 %v1212_v42  ;;  %4349 = vmatpush.msrb.mxu3 %v1229_v43  ;;  %v1262_v42 = vld [vmem:[#allocation2 + $0x24e0] sm:$0xff]  ;;  %v1277_v43 = vld [vmem:[#allocation2 + $0x2558] sm:$0xff] }
 0x255   :  { %4291 = vmatpush.msrb.mxu0 %v1179_v44  ;;  %4310 = vmatpush.msrb.mxu1 %v1196_v45  ;;  %v1294_v44 = vld [vmem:[#allocation2 + $0x25e0] sm:$0xff]  ;;  %v1244_v45 = vld [vmem:[#allocation2 + $0x2450] sm:$0xff] }
 0x256   :  { %4331 = vmatpush.msrb.mxu2 %v1211_v46  ;;  %4350 = vmatpush.msrb.mxu3 %v1228_v47  ;;  %v1261_v46 = vld [vmem:[#allocation2 + $0x24d8] sm:$0xff]  ;;  %v1276_v47 = vld [vmem:[#allocation2 + $0x2550] sm:$0xff] }
 0x257   :  { %4292 = vmatpush.msrb.mxu0 %v1178_v48  ;;  %4311 = vmatpush.msrb.mxu1 %v1195_v49  ;;  %v1293_v48 = vld [vmem:[#allocation2 + $0x25d8] sm:$0xff]  ;;  %v1243_v49 = vld [vmem:[#allocation2 + $0x2448] sm:$0xff] }
 0x258   :  { %4332 = vmatpush.msrb.mxu2 %v1210_v50  ;;  %4351 = vmatpush.msrb.mxu3 %v1227_v51  ;;  %v1260_v50 = vld [vmem:[#allocation2 + $0x24d0] sm:$0xff]  ;;  %v1275_v51 = vld [vmem:[#allocation2 + $0x2548] sm:$0xff] }
 0x259   :  { %4293 = vmatpush.msrb.mxu0 %v1177_v52  ;;  %4312 = vmatpush.msrb.mxu1 %v1194_v53  ;;  %v1292_v52 = vld [vmem:[#allocation2 + $0x25d0] sm:$0xff]  ;;  %v1242_v53 = vld [vmem:[#allocation2 + $0x2440] sm:$0xff] }
 0x25a   :  { %4333 = vmatpush.msrb.mxu2 %v1209_v54  ;;  %4352 = vmatpush.msrb.mxu3 %v1226_v55  ;;  %v1259_v54 = vld [vmem:[#allocation2 + $0x24c8] sm:$0xff]  ;;  %v1274_v55 = vld [vmem:[#allocation2 + $0x2540] sm:$0xff] }
 0x25b   :  { %4294 = vmatpush.msrb.mxu0 %v1176_v56  ;;  %4313 = vmatpush.msrb.mxu1 %v1193_v57  ;;  %v1291_v56 = vld [vmem:[#allocation2 + $0x25c8] sm:$0xff]  ;;  %v1241_v57 = vld [vmem:[#allocation2 + $0x2438] sm:$0xff] }
 0x25c   :  { %4334 = vmatpush.msrb.mxu2 %v1208_v58  ;;  %4353 = vmatpush.msrb.mxu3 %v1225_v59  ;;  %v1258_v58 = vld [vmem:[#allocation2 + $0x24c0] sm:$0xff]  ;;  %v1273_v59 = vld [vmem:[#allocation2 + $0x2538] sm:$0xff] }
 0x25d   :  { %4295 = vmatpush.msrb.mxu0 %v1175_v60  ;;  %4314 = vmatpush.msrb.mxu1 %v1192_v61  ;;  %v1290_v60 = vld [vmem:[#allocation2 + $0x25c0] sm:$0xff]  ;;  %v1240_v61 = vld [vmem:[#allocation2 + $0x2430] sm:$0xff] }
 0x25e   :  { %4335 = vmatpush.msrb.mxu2 %v1207_v62  ;;  %4354 = vmatpush.msrb.mxu3 %v1224_v63  ;;  %v1257_v62 = vld [vmem:[#allocation2 + $0x24b8] sm:$0xff]  ;;  %v1272_v63 = vld [vmem:[#allocation2 + $0x2530] sm:$0xff] }
 0x25f   :  { %4296 = vmatpush.msrb.mxu0 %v1174_v0  ;;  %4315 = vmatpush.msrb.mxu1 %v1191_v1  ;;  %v1289_v0 = vld [vmem:[#allocation2 + $0x25b8] sm:$0xff]  ;;  %v1239_v1 = vld [vmem:[#allocation2 + $0x2428] sm:$0xff] }
 0x260   :  { %4336 = vmatpush.msrb.mxu2 %v1206_v2  ;;  %4355 = vmatpush.msrb.mxu3 %v1223_v3  ;;  %v1256_v2 = vld [vmem:[#allocation2 + $0x24b0] sm:$0xff]  ;;  %v1271_v3 = vld [vmem:[#allocation2 + $0x2528] sm:$0xff] }
 0x261   :  { %4297 = vmatpush.msrb.mxu0 %v1173_v4  ;;  %4316 = vmatpush.msrb.mxu1 %v1190_v5  ;;  %v1288_v4 = vld [vmem:[#allocation2 + $0x25b0] sm:$0xff]  ;;  %v1238_v5 = vld [vmem:[#allocation2 + $0x2420] sm:$0xff] }
 0x262   :  { %4337 = vmatpush.msrb.mxu2 %v1205_v6  ;;  %4356 = vmatpush.msrb.mxu3 %v1222_v7  ;;  %v1255_v6 = vld [vmem:[#allocation2 + $0x24a8] sm:$0xff]  ;;  %v1270_v7 = vld [vmem:[#allocation2 + $0x2520] sm:$0xff] }
 0x263   :  { %4298 = vmatpush.msrb.mxu0 %v1172_v8  ;;  %4317 = vmatpush.msrb.mxu1 %v1189_v9  ;;  %v1287_v8 = vld [vmem:[#allocation2 + $0x25a8] sm:$0xff]  ;;  %v1237_v9 = vld [vmem:[#allocation2 + $0x2418] sm:$0xff] }
 0x264   :  { %4338 = vmatpush.msrb.mxu2 %v1204_v10  ;;  %4357 = vmatpush.msrb.mxu3 %v1221_v11  ;;  %v1254_v10 = vld [vmem:[#allocation2 + $0x24a0] sm:$0xff]  ;;  %v1269_v11 = vld [vmem:[#allocation2 + $0x2518] sm:$0xff] }
 0x265   :  { %4299 = vmatpush.msrb.mxu0 %v1171_v12  ;;  %4318 = vmatpush.msrb.mxu1 %v1188_v13  ;;  %v1286_v12 = vld [vmem:[#allocation2 + $0x25a0] sm:$0xff]  ;;  %v1236_v13 = vld [vmem:[#allocation2 + $0x2410] sm:$0xff] }
 0x266   :  { %4339 = vmatpush.msrb.mxu2 %v1203_v15  ;;  %4358 = vmatpush.msrb.mxu3 %v1220_v16  ;;  %v1268_v15 = vld [vmem:[#allocation2 + $0x2510] sm:$0xff]  ;;  %v1285_v16 = vld [vmem:[#allocation2 + $0x2598] sm:$0xff] }
 0x267   :  { %4300 = vmatpush.msrb.mxu0 %v1170_v17  ;;  %4319 = vmatpush.msrb.mxu1 %v1187_v18  ;;  %v1235_v17 = vld [vmem:[#allocation2 + $0x2408] sm:$0xff]  ;;  %v1252_v18 = vld [vmem:[#allocation2 + $0x2490] sm:$0xff] }
 0x268   :  { %4340 = vmatpush.msrb.mxu2 %v1202_v19  ;;  %4359 = vmatpush.msrb.mxu3 %v1219_v20  ;;  %v62_v19 = vld [vmem:[%s6489_s0 + $0x98] sm:$0xff]  ;;  %v1267_v20 = vld [vmem:[#allocation2 + $0x2508] sm:$0xff] }
 0x269   :  { %4301 = vmatmul.f32.vlgmr.msrb.gmra.mxu0 %v2662_v21  ;;  %4341 = vmatmul.f32.vlgmr.msrb.gmra.mxu2 %v2664_v22  ;;  %v1284_v21 = vld [vmem:[#allocation2 + $0x2590] sm:$0xff]  ;;  %2667 = vst [vmem:[#allocation1 + $0x20] ss:$4 sm:$0xff] %v62_v19  ;;  %v1234_v22 = vld [vmem:[#allocation2 + $0x2400] sm:$0xff]  ;;  %v1317_v19 = vld [vmem:[#allocation2 + $0x2698] sm:$0xff] }
 0x26a   :  { %4365 = vmatpush.msra.mxu0 %v1249_v23  ;;  %4405 = vmatpush.msra.mxu2 %v1281_v24  ;;  %v1251_v23 = vld [vmem:[#allocation2 + $0x2488] sm:$0xff]  ;;  %v1266_v24 = vld [vmem:[#allocation2 + $0x2500] sm:$0xff] }
 0x26b   :  { %4320 = vmatpush.msrb.mxu1 %v1186_v25  ;;  %4360 = vmatpush.msrb.mxu3 %v1218_v26  ;;  %v1283_v25 = vld [vmem:[#allocation2 + $0x2588] sm:$0xff]  ;;  %v2668_v26 = vld.sshfl [vmem:[#allocation1] sm:$0xff pattern:$0x73625140] }
 0x26c   :  { %4321 = vmatmul.f32.vlgmr.msrb.gmra.mxu1 %v2663_v27  ;;  %4361 = vmatmul.f32.vlgmr.msrb.gmra.mxu3 %v2665_v28  ;;  %v2670_v27 = vld.sshfl [vmem:[#allocation1 + $0x10] sm:$0xff pattern:$0x73625140]  ;;  %v1313_v28 = vld [vmem:[#allocation2 + $0x2678] sm:$0xff] }
 0x26d   :  { %4366 = vmatpush.msra.mxu0 %v1248_v29  ;;  %4385 = vmatpush.msra.mxu1 %v1265_v30  ;;  %v1345_v29 = vld [vmem:[#allocation2 + $0x2778] sm:$0xff]  ;;  %v1250_v30 = vld [vmem:[#allocation2 + $0x2480] sm:$0xff] }
 0x26e   :  { %4406 = vmatpush.msra.mxu2 %v1280_v31  ;;  %4425 = vmatpush.msra.mxu3 %v1297_v32  ;;  %v1282_v31 = vld [vmem:[#allocation2 + $0x2580] sm:$0xff] }
 0x26f   :  { %4367 = vmatpush.msra.mxu0 %v1247_v33  ;;  %4386 = vmatpush.msra.mxu1 %v1264_v34  ;;  %v2669_v32 = vld.sshfl [vmem:[#allocation1 + $0x8] sm:$0xff pattern:$0x73625140]  ;;  %v2671_v33 = vld.sshfl [vmem:[#allocation1 + $0x18] sm:$0xff pattern:$0x73625140] }
 0x270   :  { %4407 = vmatpush.msra.mxu2 %v1279_v35  ;;  %4426 = vmatpush.msra.mxu3 %v1296_v36  ;;  %v1312_v34 = vld [vmem:[#allocation2 + $0x2670] sm:$0xff]  ;;  %v1329_v35 = vld [vmem:[#allocation2 + $0x26f8] sm:$0xff] }
 0x271   :  { %4368 = vmatpush.msra.mxu0 %v1246_v37  ;;  %4387 = vmatpush.msra.mxu1 %v1263_v38  ;;  %v1344_v36 = vld [vmem:[#allocation2 + $0x2770] sm:$0xff]  ;;  %v1361_v37 = vld [vmem:[#allocation2 + $0x27f8] sm:$0xff]  ;;  %v1311_v38 = vld [vmem:[#allocation2 + $0x2668] sm:$0xff] }
 0x272   :  { %4408 = vmatpush.msra.mxu2 %v1278_v39  ;;  %4427 = vmatpush.msra.mxu3 %v1295_v40  ;;  %v1328_v39 = vld [vmem:[#allocation2 + $0x26f0] sm:$0xff]  ;;  %v1343_v40 = vld [vmem:[#allocation2 + $0x2768] sm:$0xff] }
 0x273   :  { %4369 = vmatpush.msra.mxu0 %v1245_v41  ;;  %4388 = vmatpush.msra.mxu1 %v1262_v42  ;;  %v1360_v41 = vld [vmem:[#allocation2 + $0x27f0] sm:$0xff]  ;;  %v1310_v42 = vld [vmem:[#allocation2 + $0x2660] sm:$0xff] }
 0x274   :  { %4409 = vmatpush.msra.mxu2 %v1277_v43  ;;  %4428 = vmatpush.msra.mxu3 %v1294_v44  ;;  %v1327_v43 = vld [vmem:[#allocation2 + $0x26e8] sm:$0xff]  ;;  %v1342_v44 = vld [vmem:[#allocation2 + $0x2760] sm:$0xff] }
 0x275   :  { %4370 = vmatpush.msra.mxu0 %v1244_v45  ;;  %4389 = vmatpush.msra.mxu1 %v1261_v46  ;;  %v1359_v45 = vld [vmem:[#allocation2 + $0x27e8] sm:$0xff]  ;;  %v1309_v46 = vld [vmem:[#allocation2 + $0x2658] sm:$0xff] }
 0x276   :  { %4410 = vmatpush.msra.mxu2 %v1276_v47  ;;  %4429 = vmatpush.msra.mxu3 %v1293_v48  ;;  %v1326_v47 = vld [vmem:[#allocation2 + $0x26e0] sm:$0xff]  ;;  %v1341_v48 = vld [vmem:[#allocation2 + $0x2758] sm:$0xff] }
 0x277   :  { %4371 = vmatpush.msra.mxu0 %v1243_v49  ;;  %4390 = vmatpush.msra.mxu1 %v1260_v50  ;;  %v1358_v49 = vld [vmem:[#allocation2 + $0x27e0] sm:$0xff]  ;;  %v1308_v50 = vld [vmem:[#allocation2 + $0x2650] sm:$0xff] }
 0x278   :  { %4411 = vmatpush.msra.mxu2 %v1275_v51  ;;  %4430 = vmatpush.msra.mxu3 %v1292_v52  ;;  %v1325_v51 = vld [vmem:[#allocation2 + $0x26d8] sm:$0xff]  ;;  %v1340_v52 = vld [vmem:[#allocation2 + $0x2750] sm:$0xff] }
 0x279   :  { %4372 = vmatpush.msra.mxu0 %v1242_v53  ;;  %4391 = vmatpush.msra.mxu1 %v1259_v54  ;;  %v1357_v53 = vld [vmem:[#allocation2 + $0x27d8] sm:$0xff]  ;;  %v1307_v54 = vld [vmem:[#allocation2 + $0x2648] sm:$0xff] }
 0x27a   :  { %4412 = vmatpush.msra.mxu2 %v1274_v55  ;;  %4431 = vmatpush.msra.mxu3 %v1291_v56  ;;  %v1324_v55 = vld [vmem:[#allocation2 + $0x26d0] sm:$0xff]  ;;  %v1339_v56 = vld [vmem:[#allocation2 + $0x2748] sm:$0xff] }
 0x27b   :  { %4373 = vmatpush.msra.mxu0 %v1241_v57  ;;  %4392 = vmatpush.msra.mxu1 %v1258_v58  ;;  %v1356_v57 = vld [vmem:[#allocation2 + $0x27d0] sm:$0xff]  ;;  %v1306_v58 = vld [vmem:[#allocation2 + $0x2640] sm:$0xff] }
 0x27c   :  { %4413 = vmatpush.msra.mxu2 %v1273_v59  ;;  %4432 = vmatpush.msra.mxu3 %v1290_v60  ;;  %v1323_v59 = vld [vmem:[#allocation2 + $0x26c8] sm:$0xff]  ;;  %v1338_v60 = vld [vmem:[#allocation2 + $0x2740] sm:$0xff] }
 0x27d   :  { %4374 = vmatpush.msra.mxu0 %v1240_v61  ;;  %4393 = vmatpush.msra.mxu1 %v1257_v62  ;;  %v1355_v61 = vld [vmem:[#allocation2 + $0x27c8] sm:$0xff]  ;;  %v1305_v62 = vld [vmem:[#allocation2 + $0x2638] sm:$0xff] }
 0x27e   :  { %4414 = vmatpush.msra.mxu2 %v1272_v63  ;;  %4433 = vmatpush.msra.mxu3 %v1289_v0  ;;  %v1322_v63 = vld [vmem:[#allocation2 + $0x26c0] sm:$0xff]  ;;  %v1337_v0 = vld [vmem:[#allocation2 + $0x2738] sm:$0xff] }
 0x27f   :  { %4375 = vmatpush.msra.mxu0 %v1239_v1  ;;  %4394 = vmatpush.msra.mxu1 %v1256_v2  ;;  %v1354_v1 = vld [vmem:[#allocation2 + $0x27c0] sm:$0xff]  ;;  %v1304_v2 = vld [vmem:[#allocation2 + $0x2630] sm:$0xff] }
 0x280   :  { %4415 = vmatpush.msra.mxu2 %v1271_v3  ;;  %4434 = vmatpush.msra.mxu3 %v1288_v4  ;;  %v1321_v3 = vld [vmem:[#allocation2 + $0x26b8] sm:$0xff]  ;;  %v1336_v4 = vld [vmem:[#allocation2 + $0x2730] sm:$0xff] }
 0x281   :  { %4376 = vmatpush.msra.mxu0 %v1238_v5  ;;  %4395 = vmatpush.msra.mxu1 %v1255_v6  ;;  %v1353_v5 = vld [vmem:[#allocation2 + $0x27b8] sm:$0xff]  ;;  %v1303_v6 = vld [vmem:[#allocation2 + $0x2628] sm:$0xff] }
 0x282   :  { %4416 = vmatpush.msra.mxu2 %v1270_v7  ;;  %4435 = vmatpush.msra.mxu3 %v1287_v8  ;;  %v1320_v7 = vld [vmem:[#allocation2 + $0x26b0] sm:$0xff]  ;;  %v1335_v8 = vld [vmem:[#allocation2 + $0x2728] sm:$0xff] }
 0x283   :  { %4377 = vmatpush.msra.mxu0 %v1237_v9  ;;  %4396 = vmatpush.msra.mxu1 %v1254_v10  ;;  %v1352_v9 = vld [vmem:[#allocation2 + $0x27b0] sm:$0xff]  ;;  %v1302_v10 = vld [vmem:[#allocation2 + $0x2620] sm:$0xff] }
 0x284   :  { %4417 = vmatpush.msra.mxu2 %v1269_v11  ;;  %4436 = vmatpush.msra.mxu3 %v1286_v12  ;;  %v1319_v11 = vld [vmem:[#allocation2 + $0x26a8] sm:$0xff]  ;;  %v1334_v12 = vld [vmem:[#allocation2 + $0x2720] sm:$0xff] }
 0x285   :  { %4378 = vmatpush.msra.mxu0 %v1236_v13  ;;  %4397 = vmatpush.msra.mxu1 %v1253_v14  ;;  %v1351_v13 = vld [vmem:[#allocation2 + $0x27a8] sm:$0xff]  ;;  %v1301_v14 = vld [vmem:[#allocation2 + $0x2618] sm:$0xff] }
 0x286   :  { %4418 = vmatpush.msra.mxu2 %v1268_v15  ;;  %4437 = vmatpush.msra.mxu3 %v1285_v16  ;;  %v1318_v15 = vld [vmem:[#allocation2 + $0x26a0] sm:$0xff]  ;;  %v1333_v16 = vld [vmem:[#allocation2 + $0x2718] sm:$0xff] }
 0x287   :  { %4379 = vmatpush.msra.mxu0 %v1235_v17  ;;  %4398 = vmatpush.msra.mxu1 %v1252_v18  ;;  %v1350_v17 = vld [vmem:[#allocation2 + $0x27a0] sm:$0xff]  ;;  %v1300_v18 = vld [vmem:[#allocation2 + $0x2610] sm:$0xff] }
 0x288   :  { %4419 = vmatpush.msra.mxu2 %v1267_v20  ;;  %4438 = vmatpush.msra.mxu3 %v1284_v21  ;;  %v1332_v20 = vld [vmem:[#allocation2 + $0x2710] sm:$0xff]  ;;  %v1349_v21 = vld [vmem:[#allocation2 + $0x2798] sm:$0xff] }
 0x289   :  { %4380 = vmatpush.msra.mxu0 %v1234_v22  ;;  %4399 = vmatpush.msra.mxu1 %v1251_v23  ;;  %v1299_v22 = vld [vmem:[#allocation2 + $0x2608] sm:$0xff]  ;;  %v1316_v23 = vld [vmem:[#allocation2 + $0x2690] sm:$0xff] }
 0x28a   :  { %4420 = vmatpush.msra.mxu2 %v1266_v24  ;;  %4439 = vmatpush.msra.mxu3 %v1283_v25  ;;  %v63_v24 = vld [vmem:[%s6489_s0 + $0xa0] sm:$0xff]  ;;  %v1331_v25 = vld [vmem:[#allocation2 + $0x2708] sm:$0xff] }
 0x28b   :  { %4381 = vmatmul.f32.vlgmr.msra.gmra.mxu0 %v2668_v26  ;;  %4421 = vmatmul.f32.vlgmr.msra.gmra.mxu2 %v2670_v27  ;;  %v1348_v26 = vld [vmem:[#allocation2 + $0x2790] sm:$0xff]  ;;  %2676 = vst [vmem:[#allocation1] ss:$4 sm:$0xff] %v63_v24  ;;  %v1298_v27 = vld [vmem:[#allocation2 + $0x2600] sm:$0xff]  ;;  %v1381_v24 = vld [vmem:[#allocation2 + $0x2898] sm:$0xff] }
 0x28c   :  { %4445 = vmatpush.msrb.mxu0 %v1313_v28  ;;  %4485 = vmatpush.msrb.mxu2 %v1345_v29  ;;  %v1315_v28 = vld [vmem:[#allocation2 + $0x2688] sm:$0xff]  ;;  %v1330_v29 = vld [vmem:[#allocation2 + $0x2700] sm:$0xff] }
 0x28d   :  { %4400 = vmatpush.msra.mxu1 %v1250_v30  ;;  %4440 = vmatpush.msra.mxu3 %v1282_v31  ;;  %v1347_v30 = vld [vmem:[#allocation2 + $0x2788] sm:$0xff]  ;;  %v2672_v31 = vld.sshfl [vmem:[#allocation1 + $0x20] sm:$0xff pattern:$0x73625140] }
 0x28e   :  { %4401 = vmatmul.f32.vlgmr.msra.gmra.mxu1 %v2669_v32  ;;  %4441 = vmatmul.f32.vlgmr.msra.gmra.mxu3 %v2671_v33  ;;  %v2674_v32 = vld.sshfl [vmem:[#allocation1 + $0x30] sm:$0xff pattern:$0x73625140]  ;;  %v1377_v33 = vld [vmem:[#allocation2 + $0x2878] sm:$0xff] }
 0x28f   :  { %4446 = vmatpush.msrb.mxu0 %v1312_v34  ;;  %4465 = vmatpush.msrb.mxu1 %v1329_v35  ;;  %v1409_v34 = vld [vmem:[#allocation2 + $0x2978] sm:$0xff]  ;;  %v1314_v35 = vld [vmem:[#allocation2 + $0x2680] sm:$0xff] }
 0x290   :  { %4486 = vmatpush.msrb.mxu2 %v1344_v36  ;;  %4505 = vmatpush.msrb.mxu3 %v1361_v37  ;;  %v1346_v36 = vld [vmem:[#allocation2 + $0x2780] sm:$0xff] }
 0x291   :  { %4447 = vmatpush.msrb.mxu0 %v1311_v38  ;;  %4466 = vmatpush.msrb.mxu1 %v1328_v39  ;;  %v2673_v37 = vld.sshfl [vmem:[#allocation1 + $0x28] sm:$0xff pattern:$0x73625140]  ;;  %v2675_v38 = vld.sshfl [vmem:[#allocation1 + $0x38] sm:$0xff pattern:$0x73625140] }
 0x292   :  { %4487 = vmatpush.msrb.mxu2 %v1343_v40  ;;  %4506 = vmatpush.msrb.mxu3 %v1360_v41  ;;  %v1376_v39 = vld [vmem:[#allocation2 + $0x2870] sm:$0xff]  ;;  %v1393_v40 = vld [vmem:[#allocation2 + $0x28f8] sm:$0xff] }
 0x293   :  { %4448 = vmatpush.msrb.mxu0 %v1310_v42  ;;  %4467 = vmatpush.msrb.mxu1 %v1327_v43  ;;  %v1408_v41 = vld [vmem:[#allocation2 + $0x2970] sm:$0xff]  ;;  %v1425_v42 = vld [vmem:[#allocation2 + $0x29f8] sm:$0xff]  ;;  %v1375_v43 = vld [vmem:[#allocation2 + $0x2868] sm:$0xff] }
 0x294   :  { %4488 = vmatpush.msrb.mxu2 %v1342_v44  ;;  %4507 = vmatpush.msrb.mxu3 %v1359_v45  ;;  %v1392_v44 = vld [vmem:[#allocation2 + $0x28f0] sm:$0xff]  ;;  %v1407_v45 = vld [vmem:[#allocation2 + $0x2968] sm:$0xff] }
 0x295   :  { %4449 = vmatpush.msrb.mxu0 %v1309_v46  ;;  %4468 = vmatpush.msrb.mxu1 %v1326_v47  ;;  %v1424_v46 = vld [vmem:[#allocation2 + $0x29f0] sm:$0xff]  ;;  %v1374_v47 = vld [vmem:[#allocation2 + $0x2860] sm:$0xff] }
 0x296   :  { %4489 = vmatpush.msrb.mxu2 %v1341_v48  ;;  %4508 = vmatpush.msrb.mxu3 %v1358_v49  ;;  %v1391_v48 = vld [vmem:[#allocation2 + $0x28e8] sm:$0xff]  ;;  %v1406_v49 = vld [vmem:[#allocation2 + $0x2960] sm:$0xff] }
 0x297   :  { %4450 = vmatpush.msrb.mxu0 %v1308_v50  ;;  %4469 = vmatpush.msrb.mxu1 %v1325_v51  ;;  %v1423_v50 = vld [vmem:[#allocation2 + $0x29e8] sm:$0xff]  ;;  %v1373_v51 = vld [vmem:[#allocation2 + $0x2858] sm:$0xff] }
 0x298   :  { %4490 = vmatpush.msrb.mxu2 %v1340_v52  ;;  %4509 = vmatpush.msrb.mxu3 %v1357_v53  ;;  %v1390_v52 = vld [vmem:[#allocation2 + $0x28e0] sm:$0xff]  ;;  %v1405_v53 = vld [vmem:[#allocation2 + $0x2958] sm:$0xff] }
 0x299   :  { %4451 = vmatpush.msrb.mxu0 %v1307_v54  ;;  %4470 = vmatpush.msrb.mxu1 %v1324_v55  ;;  %v1422_v54 = vld [vmem:[#allocation2 + $0x29e0] sm:$0xff]  ;;  %v1372_v55 = vld [vmem:[#allocation2 + $0x2850] sm:$0xff] }
 0x29a   :  { %4491 = vmatpush.msrb.mxu2 %v1339_v56  ;;  %4510 = vmatpush.msrb.mxu3 %v1356_v57  ;;  %v1389_v56 = vld [vmem:[#allocation2 + $0x28d8] sm:$0xff]  ;;  %v1404_v57 = vld [vmem:[#allocation2 + $0x2950] sm:$0xff] }
 0x29b   :  { %4452 = vmatpush.msrb.mxu0 %v1306_v58  ;;  %4471 = vmatpush.msrb.mxu1 %v1323_v59  ;;  %v1421_v58 = vld [vmem:[#allocation2 + $0x29d8] sm:$0xff]  ;;  %v1371_v59 = vld [vmem:[#allocation2 + $0x2848] sm:$0xff] }
 0x29c   :  { %4492 = vmatpush.msrb.mxu2 %v1338_v60  ;;  %4511 = vmatpush.msrb.mxu3 %v1355_v61  ;;  %v1388_v60 = vld [vmem:[#allocation2 + $0x28d0] sm:$0xff]  ;;  %v1403_v61 = vld [vmem:[#allocation2 + $0x2948] sm:$0xff] }
 0x29d   :  { %4453 = vmatpush.msrb.mxu0 %v1305_v62  ;;  %4472 = vmatpush.msrb.mxu1 %v1322_v63  ;;  %v1420_v62 = vld [vmem:[#allocation2 + $0x29d0] sm:$0xff]  ;;  %v1370_v63 = vld [vmem:[#allocation2 + $0x2840] sm:$0xff] }
 0x29e   :  { %4493 = vmatpush.msrb.mxu2 %v1337_v0  ;;  %4512 = vmatpush.msrb.mxu3 %v1354_v1  ;;  %v1387_v0 = vld [vmem:[#allocation2 + $0x28c8] sm:$0xff]  ;;  %v1402_v1 = vld [vmem:[#allocation2 + $0x2940] sm:$0xff] }
 0x29f   :  { %4454 = vmatpush.msrb.mxu0 %v1304_v2  ;;  %4473 = vmatpush.msrb.mxu1 %v1321_v3  ;;  %v1419_v2 = vld [vmem:[#allocation2 + $0x29c8] sm:$0xff]  ;;  %v1369_v3 = vld [vmem:[#allocation2 + $0x2838] sm:$0xff] }
 0x2a0   :  { %4494 = vmatpush.msrb.mxu2 %v1336_v4  ;;  %4513 = vmatpush.msrb.mxu3 %v1353_v5  ;;  %v1386_v4 = vld [vmem:[#allocation2 + $0x28c0] sm:$0xff]  ;;  %v1401_v5 = vld [vmem:[#allocation2 + $0x2938] sm:$0xff] }
 0x2a1   :  { %4455 = vmatpush.msrb.mxu0 %v1303_v6  ;;  %4474 = vmatpush.msrb.mxu1 %v1320_v7  ;;  %v1418_v6 = vld [vmem:[#allocation2 + $0x29c0] sm:$0xff]  ;;  %v1368_v7 = vld [vmem:[#allocation2 + $0x2830] sm:$0xff] }
 0x2a2   :  { %4495 = vmatpush.msrb.mxu2 %v1335_v8  ;;  %4514 = vmatpush.msrb.mxu3 %v1352_v9  ;;  %v1385_v8 = vld [vmem:[#allocation2 + $0x28b8] sm:$0xff]  ;;  %v1400_v9 = vld [vmem:[#allocation2 + $0x2930] sm:$0xff] }
 0x2a3   :  { %4456 = vmatpush.msrb.mxu0 %v1302_v10  ;;  %4475 = vmatpush.msrb.mxu1 %v1319_v11  ;;  %v1417_v10 = vld [vmem:[#allocation2 + $0x29b8] sm:$0xff]  ;;  %v1367_v11 = vld [vmem:[#allocation2 + $0x2828] sm:$0xff] }
 0x2a4   :  { %4496 = vmatpush.msrb.mxu2 %v1334_v12  ;;  %4515 = vmatpush.msrb.mxu3 %v1351_v13  ;;  %v1384_v12 = vld [vmem:[#allocation2 + $0x28b0] sm:$0xff]  ;;  %v1399_v13 = vld [vmem:[#allocation2 + $0x2928] sm:$0xff] }
 0x2a5   :  { %4457 = vmatpush.msrb.mxu0 %v1301_v14  ;;  %4476 = vmatpush.msrb.mxu1 %v1318_v15  ;;  %v1416_v14 = vld [vmem:[#allocation2 + $0x29b0] sm:$0xff]  ;;  %v1366_v15 = vld [vmem:[#allocation2 + $0x2820] sm:$0xff] }
 0x2a6   :  { %4497 = vmatpush.msrb.mxu2 %v1333_v16  ;;  %4516 = vmatpush.msrb.mxu3 %v1350_v17  ;;  %v1383_v16 = vld [vmem:[#allocation2 + $0x28a8] sm:$0xff]  ;;  %v1398_v17 = vld [vmem:[#allocation2 + $0x2920] sm:$0xff] }
 0x2a7   :  { %4458 = vmatpush.msrb.mxu0 %v1300_v18  ;;  %4477 = vmatpush.msrb.mxu1 %v1317_v19  ;;  %v1415_v18 = vld [vmem:[#allocation2 + $0x29a8] sm:$0xff]  ;;  %v1365_v19 = vld [vmem:[#allocation2 + $0x2818] sm:$0xff] }
 0x2a8   :  { %4498 = vmatpush.msrb.mxu2 %v1332_v20  ;;  %4517 = vmatpush.msrb.mxu3 %v1349_v21  ;;  %v1382_v20 = vld [vmem:[#allocation2 + $0x28a0] sm:$0xff]  ;;  %v1397_v21 = vld [vmem:[#allocation2 + $0x2918] sm:$0xff] }
 0x2a9   :  { %4459 = vmatpush.msrb.mxu0 %v1299_v22  ;;  %4478 = vmatpush.msrb.mxu1 %v1316_v23  ;;  %v1414_v22 = vld [vmem:[#allocation2 + $0x29a0] sm:$0xff]  ;;  %v1364_v23 = vld [vmem:[#allocation2 + $0x2810] sm:$0xff] }
 0x2aa   :  { %4499 = vmatpush.msrb.mxu2 %v1331_v25  ;;  %4518 = vmatpush.msrb.mxu3 %v1348_v26  ;;  %v1396_v25 = vld [vmem:[#allocation2 + $0x2910] sm:$0xff]  ;;  %v1413_v26 = vld [vmem:[#allocation2 + $0x2998] sm:$0xff] }
 0x2ab   :  { %4460 = vmatpush.msrb.mxu0 %v1298_v27  ;;  %4479 = vmatpush.msrb.mxu1 %v1315_v28  ;;  %v1363_v27 = vld [vmem:[#allocation2 + $0x2808] sm:$0xff]  ;;  %v1380_v28 = vld [vmem:[#allocation2 + $0x2890] sm:$0xff] }
 0x2ac   :  { %4500 = vmatpush.msrb.mxu2 %v1330_v29  ;;  %4519 = vmatpush.msrb.mxu3 %v1347_v30  ;;  %v64_v29 = vld [vmem:[%s6489_s0 + $0xa8] sm:$0xff]  ;;  %v1395_v30 = vld [vmem:[#allocation2 + $0x2908] sm:$0xff] }
 0x2ad   :  { %4461 = vmatmul.f32.vlgmr.msrb.gmra.mxu0 %v2672_v31  ;;  %4501 = vmatmul.f32.vlgmr.msrb.gmra.mxu2 %v2674_v32  ;;  %v1412_v31 = vld [vmem:[#allocation2 + $0x2990] sm:$0xff]  ;;  %2677 = vst [vmem:[#allocation1 + $0x20] ss:$4 sm:$0xff] %v64_v29  ;;  %v1362_v32 = vld [vmem:[#allocation2 + $0x2800] sm:$0xff]  ;;  %v1445_v29 = vld [vmem:[#allocation2 + $0x2a98] sm:$0xff] }
 0x2ae   :  { %4525 = vmatpush.msra.mxu0 %v1377_v33  ;;  %4565 = vmatpush.msra.mxu2 %v1409_v34  ;;  %v1379_v33 = vld [vmem:[#allocation2 + $0x2888] sm:$0xff]  ;;  %v1394_v34 = vld [vmem:[#allocation2 + $0x2900] sm:$0xff] }
 0x2af   :  { %4480 = vmatpush.msrb.mxu1 %v1314_v35  ;;  %4520 = vmatpush.msrb.mxu3 %v1346_v36  ;;  %v1411_v35 = vld [vmem:[#allocation2 + $0x2988] sm:$0xff]  ;;  %v2678_v36 = vld.sshfl [vmem:[#allocation1] sm:$0xff pattern:$0x73625140] }
 0x2b0   :  { %4481 = vmatmul.f32.vlgmr.msrb.gmra.mxu1 %v2673_v37  ;;  %4521 = vmatmul.f32.vlgmr.msrb.gmra.mxu3 %v2675_v38  ;;  %v2680_v37 = vld.sshfl [vmem:[#allocation1 + $0x10] sm:$0xff pattern:$0x73625140]  ;;  %v1441_v38 = vld [vmem:[#allocation2 + $0x2a78] sm:$0xff] }
 0x2b1   :  { %4526 = vmatpush.msra.mxu0 %v1376_v39  ;;  %4545 = vmatpush.msra.mxu1 %v1393_v40  ;;  %v1473_v39 = vld [vmem:[#allocation2 + $0x2b78] sm:$0xff]  ;;  %v1378_v40 = vld [vmem:[#allocation2 + $0x2880] sm:$0xff] }
 0x2b2   :  { %4566 = vmatpush.msra.mxu2 %v1408_v41  ;;  %4585 = vmatpush.msra.mxu3 %v1425_v42  ;;  %v1410_v41 = vld [vmem:[#allocation2 + $0x2980] sm:$0xff] }
 0x2b3   :  { %4527 = vmatpush.msra.mxu0 %v1375_v43  ;;  %4546 = vmatpush.msra.mxu1 %v1392_v44  ;;  %v2679_v42 = vld.sshfl [vmem:[#allocation1 + $0x8] sm:$0xff pattern:$0x73625140]  ;;  %v2681_v43 = vld.sshfl [vmem:[#allocation1 + $0x18] sm:$0xff pattern:$0x73625140] }
 0x2b4   :  { %4567 = vmatpush.msra.mxu2 %v1407_v45  ;;  %4586 = vmatpush.msra.mxu3 %v1424_v46  ;;  %v1440_v44 = vld [vmem:[#allocation2 + $0x2a70] sm:$0xff]  ;;  %v1457_v45 = vld [vmem:[#allocation2 + $0x2af8] sm:$0xff] }
 0x2b5   :  { %4528 = vmatpush.msra.mxu0 %v1374_v47  ;;  %4547 = vmatpush.msra.mxu1 %v1391_v48  ;;  %v1472_v46 = vld [vmem:[#allocation2 + $0x2b70] sm:$0xff]  ;;  %v1489_v47 = vld [vmem:[#allocation2 + $0x2bf8] sm:$0xff]  ;;  %v1439_v48 = vld [vmem:[#allocation2 + $0x2a68] sm:$0xff] }
 0x2b6   :  { %4568 = vmatpush.msra.mxu2 %v1406_v49  ;;  %4587 = vmatpush.msra.mxu3 %v1423_v50  ;;  %v1456_v49 = vld [vmem:[#allocation2 + $0x2af0] sm:$0xff]  ;;  %v1471_v50 = vld [vmem:[#allocation2 + $0x2b68] sm:$0xff] }
 0x2b7   :  { %4529 = vmatpush.msra.mxu0 %v1373_v51  ;;  %4548 = vmatpush.msra.mxu1 %v1390_v52  ;;  %v1488_v51 = vld [vmem:[#allocation2 + $0x2bf0] sm:$0xff]  ;;  %v1438_v52 = vld [vmem:[#allocation2 + $0x2a60] sm:$0xff] }
 0x2b8   :  { %4569 = vmatpush.msra.mxu2 %v1405_v53  ;;  %4588 = vmatpush.msra.mxu3 %v1422_v54  ;;  %v1455_v53 = vld [vmem:[#allocation2 + $0x2ae8] sm:$0xff]  ;;  %v1470_v54 = vld [vmem:[#allocation2 + $0x2b60] sm:$0xff] }
 0x2b9   :  { %4530 = vmatpush.msra.mxu0 %v1372_v55  ;;  %4549 = vmatpush.msra.mxu1 %v1389_v56  ;;  %v1487_v55 = vld [vmem:[#allocation2 + $0x2be8] sm:$0xff]  ;;  %v1437_v56 = vld [vmem:[#allocation2 + $0x2a58] sm:$0xff] }
 0x2ba   :  { %4570 = vmatpush.msra.mxu2 %v1404_v57  ;;  %4589 = vmatpush.msra.mxu3 %v1421_v58  ;;  %v1454_v57 = vld [vmem:[#allocation2 + $0x2ae0] sm:$0xff]  ;;  %v1469_v58 = vld [vmem:[#allocation2 + $0x2b58] sm:$0xff] }
 0x2bb   :  { %4531 = vmatpush.msra.mxu0 %v1371_v59  ;;  %4550 = vmatpush.msra.mxu1 %v1388_v60  ;;  %v1486_v59 = vld [vmem:[#allocation2 + $0x2be0] sm:$0xff]  ;;  %v1436_v60 = vld [vmem:[#allocation2 + $0x2a50] sm:$0xff] }
 0x2bc   :  { %4571 = vmatpush.msra.mxu2 %v1403_v61  ;;  %4590 = vmatpush.msra.mxu3 %v1420_v62  ;;  %v1453_v61 = vld [vmem:[#allocation2 + $0x2ad8] sm:$0xff]  ;;  %v1468_v62 = vld [vmem:[#allocation2 + $0x2b50] sm:$0xff] }
 0x2bd   :  { %4532 = vmatpush.msra.mxu0 %v1370_v63  ;;  %4551 = vmatpush.msra.mxu1 %v1387_v0  ;;  %v1485_v63 = vld [vmem:[#allocation2 + $0x2bd8] sm:$0xff]  ;;  %v1435_v0 = vld [vmem:[#allocation2 + $0x2a48] sm:$0xff] }
 0x2be   :  { %4572 = vmatpush.msra.mxu2 %v1402_v1  ;;  %4591 = vmatpush.msra.mxu3 %v1419_v2  ;;  %v1452_v1 = vld [vmem:[#allocation2 + $0x2ad0] sm:$0xff]  ;;  %v1467_v2 = vld [vmem:[#allocation2 + $0x2b48] sm:$0xff] }
 0x2bf   :  { %4533 = vmatpush.msra.mxu0 %v1369_v3  ;;  %4552 = vmatpush.msra.mxu1 %v1386_v4  ;;  %v1484_v3 = vld [vmem:[#allocation2 + $0x2bd0] sm:$0xff]  ;;  %v1434_v4 = vld [vmem:[#allocation2 + $0x2a40] sm:$0xff] }
 0x2c0   :  { %4573 = vmatpush.msra.mxu2 %v1401_v5  ;;  %4592 = vmatpush.msra.mxu3 %v1418_v6  ;;  %v1451_v5 = vld [vmem:[#allocation2 + $0x2ac8] sm:$0xff]  ;;  %v1466_v6 = vld [vmem:[#allocation2 + $0x2b40] sm:$0xff] }
 0x2c1   :  { %4534 = vmatpush.msra.mxu0 %v1368_v7  ;;  %4553 = vmatpush.msra.mxu1 %v1385_v8  ;;  %v1483_v7 = vld [vmem:[#allocation2 + $0x2bc8] sm:$0xff]  ;;  %v1433_v8 = vld [vmem:[#allocation2 + $0x2a38] sm:$0xff] }
 0x2c2   :  { %4574 = vmatpush.msra.mxu2 %v1400_v9  ;;  %4593 = vmatpush.msra.mxu3 %v1417_v10  ;;  %v1450_v9 = vld [vmem:[#allocation2 + $0x2ac0] sm:$0xff]  ;;  %v1465_v10 = vld [vmem:[#allocation2 + $0x2b38] sm:$0xff] }
 0x2c3   :  { %4535 = vmatpush.msra.mxu0 %v1367_v11  ;;  %4554 = vmatpush.msra.mxu1 %v1384_v12  ;;  %v1482_v11 = vld [vmem:[#allocation2 + $0x2bc0] sm:$0xff]  ;;  %v1432_v12 = vld [vmem:[#allocation2 + $0x2a30] sm:$0xff] }
 0x2c4   :  { %4575 = vmatpush.msra.mxu2 %v1399_v13  ;;  %4594 = vmatpush.msra.mxu3 %v1416_v14  ;;  %v1449_v13 = vld [vmem:[#allocation2 + $0x2ab8] sm:$0xff]  ;;  %v1464_v14 = vld [vmem:[#allocation2 + $0x2b30] sm:$0xff] }
 0x2c5   :  { %4536 = vmatpush.msra.mxu0 %v1366_v15  ;;  %4555 = vmatpush.msra.mxu1 %v1383_v16  ;;  %v1481_v15 = vld [vmem:[#allocation2 + $0x2bb8] sm:$0xff]  ;;  %v1431_v16 = vld [vmem:[#allocation2 + $0x2a28] sm:$0xff] }
 0x2c6   :  { %4576 = vmatpush.msra.mxu2 %v1398_v17  ;;  %4595 = vmatpush.msra.mxu3 %v1415_v18  ;;  %v1448_v17 = vld [vmem:[#allocation2 + $0x2ab0] sm:$0xff]  ;;  %v1463_v18 = vld [vmem:[#allocation2 + $0x2b28] sm:$0xff] }
 0x2c7   :  { %4537 = vmatpush.msra.mxu0 %v1365_v19  ;;  %4556 = vmatpush.msra.mxu1 %v1382_v20  ;;  %v1480_v19 = vld [vmem:[#allocation2 + $0x2bb0] sm:$0xff]  ;;  %v1430_v20 = vld [vmem:[#allocation2 + $0x2a20] sm:$0xff] }
 0x2c8   :  { %4577 = vmatpush.msra.mxu2 %v1397_v21  ;;  %4596 = vmatpush.msra.mxu3 %v1414_v22  ;;  %v1447_v21 = vld [vmem:[#allocation2 + $0x2aa8] sm:$0xff]  ;;  %v1462_v22 = vld [vmem:[#allocation2 + $0x2b20] sm:$0xff] }
 0x2c9   :  { %4538 = vmatpush.msra.mxu0 %v1364_v23  ;;  %4557 = vmatpush.msra.mxu1 %v1381_v24  ;;  %v1479_v23 = vld [vmem:[#allocation2 + $0x2ba8] sm:$0xff]  ;;  %v1429_v24 = vld [vmem:[#allocation2 + $0x2a18] sm:$0xff] }
 0x2ca   :  { %4578 = vmatpush.msra.mxu2 %v1396_v25  ;;  %4597 = vmatpush.msra.mxu3 %v1413_v26  ;;  %v1446_v25 = vld [vmem:[#allocation2 + $0x2aa0] sm:$0xff]  ;;  %v1461_v26 = vld [vmem:[#allocation2 + $0x2b18] sm:$0xff] }
 0x2cb   :  { %4539 = vmatpush.msra.mxu0 %v1363_v27  ;;  %4558 = vmatpush.msra.mxu1 %v1380_v28  ;;  %v1478_v27 = vld [vmem:[#allocation2 + $0x2ba0] sm:$0xff]  ;;  %v1428_v28 = vld [vmem:[#allocation2 + $0x2a10] sm:$0xff] }
 0x2cc   :  { %4579 = vmatpush.msra.mxu2 %v1395_v30  ;;  %4598 = vmatpush.msra.mxu3 %v1412_v31  ;;  %v1460_v30 = vld [vmem:[#allocation2 + $0x2b10] sm:$0xff]  ;;  %v1477_v31 = vld [vmem:[#allocation2 + $0x2b98] sm:$0xff] }
 0x2cd   :  { %4540 = vmatpush.msra.mxu0 %v1362_v32  ;;  %4559 = vmatpush.msra.mxu1 %v1379_v33  ;;  %v1427_v32 = vld [vmem:[#allocation2 + $0x2a08] sm:$0xff]  ;;  %v1444_v33 = vld [vmem:[#allocation2 + $0x2a90] sm:$0xff] }
 0x2ce   :  { %4580 = vmatpush.msra.mxu2 %v1394_v34  ;;  %4599 = vmatpush.msra.mxu3 %v1411_v35  ;;  %v65_v34 = vld [vmem:[%s6489_s0 + $0xb0] sm:$0xff] }
 0x2cf   :  { %4541 = vmatmul.f32.vlgmr.msra.gmra.mxu0 %v2678_v36  ;;  %4581 = vmatmul.f32.vlgmr.msra.gmra.mxu2 %v2680_v37  ;;  %v1459_v35 = vld [vmem:[#allocation2 + $0x2b08] sm:$0xff]  ;;  %v1476_v36 = vld [vmem:[#allocation2 + $0x2b90] sm:$0xff]  ;;  %2686 = vst [vmem:[#allocation1] ss:$4 sm:$0xff] %v65_v34  ;;  %v1426_v37 = vld [vmem:[#allocation2 + $0x2a00] sm:$0xff] }
 0x2d0   :  { %4605 = vmatpush.msrb.mxu0 %v1441_v38  ;;  %4645 = vmatpush.msrb.mxu2 %v1473_v39  ;;  %v1443_v38 = vld [vmem:[#allocation2 + $0x2a88] sm:$0xff]  ;;  %v1458_v39 = vld [vmem:[#allocation2 + $0x2b00] sm:$0xff]  ;;  %v1509_v34 = vld [vmem:[#allocation2 + $0x2c98] sm:$0xff] }
 0x2d1   :  { %4560 = vmatpush.msra.mxu1 %v1378_v40  ;;  %4600 = vmatpush.msra.mxu3 %v1410_v41  ;;  %v1475_v40 = vld [vmem:[#allocation2 + $0x2b88] sm:$0xff]  ;;  %v2682_v41 = vld.sshfl [vmem:[#allocation1 + $0x20] sm:$0xff pattern:$0x73625140] }
 0x2d2   :  { %4561 = vmatmul.f32.vlgmr.msra.gmra.mxu1 %v2679_v42  ;;  %4601 = vmatmul.f32.vlgmr.msra.gmra.mxu3 %v2681_v43  ;;  %v2684_v42 = vld.sshfl [vmem:[#allocation1 + $0x30] sm:$0xff pattern:$0x73625140]  ;;  %v1505_v43 = vld [vmem:[#allocation2 + $0x2c78] sm:$0xff] }
 0x2d3   :  { %4606 = vmatpush.msrb.mxu0 %v1440_v44  ;;  %4625 = vmatpush.msrb.mxu1 %v1457_v45  ;;  %v1537_v44 = vld [vmem:[#allocation2 + $0x2d78] sm:$0xff]  ;;  %v1442_v45 = vld [vmem:[#allocation2 + $0x2a80] sm:$0xff] }
 0x2d4   :  { %4646 = vmatpush.msrb.mxu2 %v1472_v46  ;;  %4665 = vmatpush.msrb.mxu3 %v1489_v47  ;;  %v1474_v46 = vld [vmem:[#allocation2 + $0x2b80] sm:$0xff] }
 0x2d5   :  { %4607 = vmatpush.msrb.mxu0 %v1439_v48  ;;  %4626 = vmatpush.msrb.mxu1 %v1456_v49  ;;  %v2683_v47 = vld.sshfl [vmem:[#allocation1 + $0x28] sm:$0xff pattern:$0x73625140]  ;;  %v2685_v48 = vld.sshfl [vmem:[#allocation1 + $0x38] sm:$0xff pattern:$0x73625140] }
 0x2d6   :  { %4647 = vmatpush.msrb.mxu2 %v1471_v50  ;;  %4666 = vmatpush.msrb.mxu3 %v1488_v51  ;;  %v1504_v49 = vld [vmem:[#allocation2 + $0x2c70] sm:$0xff]  ;;  %v1521_v50 = vld [vmem:[#allocation2 + $0x2cf8] sm:$0xff] }
 0x2d7   :  { %4608 = vmatpush.msrb.mxu0 %v1438_v52  ;;  %4627 = vmatpush.msrb.mxu1 %v1455_v53  ;;  %v1536_v51 = vld [vmem:[#allocation2 + $0x2d70] sm:$0xff]  ;;  %v1553_v52 = vld [vmem:[#allocation2 + $0x2df8] sm:$0xff]  ;;  %v1503_v53 = vld [vmem:[#allocation2 + $0x2c68] sm:$0xff] }
 0x2d8   :  { %4648 = vmatpush.msrb.mxu2 %v1470_v54  ;;  %4667 = vmatpush.msrb.mxu3 %v1487_v55  ;;  %v1520_v54 = vld [vmem:[#allocation2 + $0x2cf0] sm:$0xff]  ;;  %v1535_v55 = vld [vmem:[#allocation2 + $0x2d68] sm:$0xff] }
 0x2d9   :  { %4609 = vmatpush.msrb.mxu0 %v1437_v56  ;;  %4628 = vmatpush.msrb.mxu1 %v1454_v57  ;;  %v1552_v56 = vld [vmem:[#allocation2 + $0x2df0] sm:$0xff]  ;;  %v1502_v57 = vld [vmem:[#allocation2 + $0x2c60] sm:$0xff] }
 0x2da   :  { %4649 = vmatpush.msrb.mxu2 %v1469_v58  ;;  %4668 = vmatpush.msrb.mxu3 %v1486_v59  ;;  %v1519_v58 = vld [vmem:[#allocation2 + $0x2ce8] sm:$0xff]  ;;  %v1534_v59 = vld [vmem:[#allocation2 + $0x2d60] sm:$0xff] }
 0x2db   :  { %4610 = vmatpush.msrb.mxu0 %v1436_v60  ;;  %4629 = vmatpush.msrb.mxu1 %v1453_v61  ;;  %v1551_v60 = vld [vmem:[#allocation2 + $0x2de8] sm:$0xff]  ;;  %v1501_v61 = vld [vmem:[#allocation2 + $0x2c58] sm:$0xff] }
 0x2dc   :  { %4650 = vmatpush.msrb.mxu2 %v1468_v62  ;;  %4669 = vmatpush.msrb.mxu3 %v1485_v63  ;;  %v1518_v62 = vld [vmem:[#allocation2 + $0x2ce0] sm:$0xff]  ;;  %v1533_v63 = vld [vmem:[#allocation2 + $0x2d58] sm:$0xff] }
 0x2dd   :  { %4611 = vmatpush.msrb.mxu0 %v1435_v0  ;;  %4630 = vmatpush.msrb.mxu1 %v1452_v1  ;;  %v1550_v0 = vld [vmem:[#allocation2 + $0x2de0] sm:$0xff]  ;;  %v1500_v1 = vld [vmem:[#allocation2 + $0x2c50] sm:$0xff] }
 0x2de   :  { %4651 = vmatpush.msrb.mxu2 %v1467_v2  ;;  %4670 = vmatpush.msrb.mxu3 %v1484_v3  ;;  %v1517_v2 = vld [vmem:[#allocation2 + $0x2cd8] sm:$0xff]  ;;  %v1532_v3 = vld [vmem:[#allocation2 + $0x2d50] sm:$0xff] }
 0x2df   :  { %4612 = vmatpush.msrb.mxu0 %v1434_v4  ;;  %4631 = vmatpush.msrb.mxu1 %v1451_v5  ;;  %v1549_v4 = vld [vmem:[#allocation2 + $0x2dd8] sm:$0xff]  ;;  %v1499_v5 = vld [vmem:[#allocation2 + $0x2c48] sm:$0xff] }
 0x2e0   :  { %4652 = vmatpush.msrb.mxu2 %v1466_v6  ;;  %4671 = vmatpush.msrb.mxu3 %v1483_v7  ;;  %v1516_v6 = vld [vmem:[#allocation2 + $0x2cd0] sm:$0xff]  ;;  %v1531_v7 = vld [vmem:[#allocation2 + $0x2d48] sm:$0xff] }
 0x2e1   :  { %4613 = vmatpush.msrb.mxu0 %v1433_v8  ;;  %4632 = vmatpush.msrb.mxu1 %v1450_v9  ;;  %v1548_v8 = vld [vmem:[#allocation2 + $0x2dd0] sm:$0xff]  ;;  %v1498_v9 = vld [vmem:[#allocation2 + $0x2c40] sm:$0xff] }
 0x2e2   :  { %4653 = vmatpush.msrb.mxu2 %v1465_v10  ;;  %4672 = vmatpush.msrb.mxu3 %v1482_v11  ;;  %v1515_v10 = vld [vmem:[#allocation2 + $0x2cc8] sm:$0xff]  ;;  %v1530_v11 = vld [vmem:[#allocation2 + $0x2d40] sm:$0xff] }
 0x2e3   :  { %4614 = vmatpush.msrb.mxu0 %v1432_v12  ;;  %4633 = vmatpush.msrb.mxu1 %v1449_v13  ;;  %v1547_v12 = vld [vmem:[#allocation2 + $0x2dc8] sm:$0xff]  ;;  %v1497_v13 = vld [vmem:[#allocation2 + $0x2c38] sm:$0xff] }
 0x2e4   :  { %4654 = vmatpush.msrb.mxu2 %v1464_v14  ;;  %4673 = vmatpush.msrb.mxu3 %v1481_v15  ;;  %v1514_v14 = vld [vmem:[#allocation2 + $0x2cc0] sm:$0xff]  ;;  %v1529_v15 = vld [vmem:[#allocation2 + $0x2d38] sm:$0xff] }
 0x2e5   :  { %4615 = vmatpush.msrb.mxu0 %v1431_v16  ;;  %4634 = vmatpush.msrb.mxu1 %v1448_v17  ;;  %v1546_v16 = vld [vmem:[#allocation2 + $0x2dc0] sm:$0xff]  ;;  %v1496_v17 = vld [vmem:[#allocation2 + $0x2c30] sm:$0xff] }
 0x2e6   :  { %4655 = vmatpush.msrb.mxu2 %v1463_v18  ;;  %4674 = vmatpush.msrb.mxu3 %v1480_v19  ;;  %v1513_v18 = vld [vmem:[#allocation2 + $0x2cb8] sm:$0xff]  ;;  %v1528_v19 = vld [vmem:[#allocation2 + $0x2d30] sm:$0xff] }
 0x2e7   :  { %4616 = vmatpush.msrb.mxu0 %v1430_v20  ;;  %4635 = vmatpush.msrb.mxu1 %v1447_v21  ;;  %v1545_v20 = vld [vmem:[#allocation2 + $0x2db8] sm:$0xff]  ;;  %v1495_v21 = vld [vmem:[#allocation2 + $0x2c28] sm:$0xff] }
 0x2e8   :  { %4656 = vmatpush.msrb.mxu2 %v1462_v22  ;;  %4675 = vmatpush.msrb.mxu3 %v1479_v23  ;;  %v1512_v22 = vld [vmem:[#allocation2 + $0x2cb0] sm:$0xff]  ;;  %v1527_v23 = vld [vmem:[#allocation2 + $0x2d28] sm:$0xff] }
 0x2e9   :  { %4617 = vmatpush.msrb.mxu0 %v1429_v24  ;;  %4636 = vmatpush.msrb.mxu1 %v1446_v25  ;;  %v1544_v24 = vld [vmem:[#allocation2 + $0x2db0] sm:$0xff]  ;;  %v1494_v25 = vld [vmem:[#allocation2 + $0x2c20] sm:$0xff] }
 0x2ea   :  { %4657 = vmatpush.msrb.mxu2 %v1461_v26  ;;  %4676 = vmatpush.msrb.mxu3 %v1478_v27  ;;  %v1511_v26 = vld [vmem:[#allocation2 + $0x2ca8] sm:$0xff]  ;;  %v1526_v27 = vld [vmem:[#allocation2 + $0x2d20] sm:$0xff] }
 0x2eb   :  { %4618 = vmatpush.msrb.mxu0 %v1428_v28  ;;  %4637 = vmatpush.msrb.mxu1 %v1445_v29  ;;  %v1543_v28 = vld [vmem:[#allocation2 + $0x2da8] sm:$0xff]  ;;  %v1493_v29 = vld [vmem:[#allocation2 + $0x2c18] sm:$0xff] }
 0x2ec   :  { %4658 = vmatpush.msrb.mxu2 %v1460_v30  ;;  %4677 = vmatpush.msrb.mxu3 %v1477_v31  ;;  %v1510_v30 = vld [vmem:[#allocation2 + $0x2ca0] sm:$0xff]  ;;  %v1525_v31 = vld [vmem:[#allocation2 + $0x2d18] sm:$0xff] }
 0x2ed   :  { %4619 = vmatpush.msrb.mxu0 %v1427_v32  ;;  %4638 = vmatpush.msrb.mxu1 %v1444_v33  ;;  %v1542_v32 = vld [vmem:[#allocation2 + $0x2da0] sm:$0xff]  ;;  %v1492_v33 = vld [vmem:[#allocation2 + $0x2c10] sm:$0xff] }
 0x2ee   :  { %4659 = vmatpush.msrb.mxu2 %v1459_v35  ;;  %4678 = vmatpush.msrb.mxu3 %v1476_v36  ;;  %v1524_v35 = vld [vmem:[#allocation2 + $0x2d10] sm:$0xff]  ;;  %v1541_v36 = vld [vmem:[#allocation2 + $0x2d98] sm:$0xff] }
 0x2ef   :  { %4620 = vmatpush.msrb.mxu0 %v1426_v37  ;;  %4639 = vmatpush.msrb.mxu1 %v1443_v38  ;;  %v1491_v37 = vld [vmem:[#allocation2 + $0x2c08] sm:$0xff]  ;;  %v1508_v38 = vld [vmem:[#allocation2 + $0x2c90] sm:$0xff] }
 0x2f0   :  { %4660 = vmatpush.msrb.mxu2 %v1458_v39  ;;  %4679 = vmatpush.msrb.mxu3 %v1475_v40  ;;  %v66_v39 = vld [vmem:[%s6489_s0 + $0xb8] sm:$0xff]  ;;  %v1523_v40 = vld [vmem:[#allocation2 + $0x2d08] sm:$0xff] }
 0x2f1   :  { %4621 = vmatmul.f32.vlgmr.msrb.gmra.mxu0 %v2682_v41  ;;  %4661 = vmatmul.f32.vlgmr.msrb.gmra.mxu2 %v2684_v42  ;;  %v1540_v41 = vld [vmem:[#allocation2 + $0x2d90] sm:$0xff]  ;;  %2687 = vst [vmem:[#allocation1 + $0x20] ss:$4 sm:$0xff] %v66_v39  ;;  %v1490_v42 = vld [vmem:[#allocation2 + $0x2c00] sm:$0xff]  ;;  %v1573_v39 = vld [vmem:[#allocation2 + $0x2e98] sm:$0xff] }
 0x2f2   :  { %4685 = vmatpush.msra.mxu0 %v1505_v43  ;;  %4725 = vmatpush.msra.mxu2 %v1537_v44  ;;  %v1507_v43 = vld [vmem:[#allocation2 + $0x2c88] sm:$0xff]  ;;  %v1522_v44 = vld [vmem:[#allocation2 + $0x2d00] sm:$0xff] }
 0x2f3   :  { %4640 = vmatpush.msrb.mxu1 %v1442_v45  ;;  %4680 = vmatpush.msrb.mxu3 %v1474_v46  ;;  %v1539_v45 = vld [vmem:[#allocation2 + $0x2d88] sm:$0xff]  ;;  %v2688_v46 = vld.sshfl [vmem:[#allocation1] sm:$0xff pattern:$0x73625140] }
 0x2f4   :  { %4641 = vmatmul.f32.vlgmr.msrb.gmra.mxu1 %v2683_v47  ;;  %4681 = vmatmul.f32.vlgmr.msrb.gmra.mxu3 %v2685_v48  ;;  %v2690_v47 = vld.sshfl [vmem:[#allocation1 + $0x10] sm:$0xff pattern:$0x73625140]  ;;  %v1569_v48 = vld [vmem:[#allocation2 + $0x2e78] sm:$0xff] }
 0x2f5   :  { %4686 = vmatpush.msra.mxu0 %v1504_v49  ;;  %4705 = vmatpush.msra.mxu1 %v1521_v50  ;;  %v1601_v49 = vld [vmem:[#allocation2 + $0x2f78] sm:$0xff]  ;;  %v1506_v50 = vld [vmem:[#allocation2 + $0x2c80] sm:$0xff] }
 0x2f6   :  { %4726 = vmatpush.msra.mxu2 %v1536_v51  ;;  %4745 = vmatpush.msra.mxu3 %v1553_v52  ;;  %v1538_v51 = vld [vmem:[#allocation2 + $0x2d80] sm:$0xff] }
 0x2f7   :  { %4687 = vmatpush.msra.mxu0 %v1503_v53  ;;  %4706 = vmatpush.msra.mxu1 %v1520_v54  ;;  %v2689_v52 = vld.sshfl [vmem:[#allocation1 + $0x8] sm:$0xff pattern:$0x73625140]  ;;  %v2691_v53 = vld.sshfl [vmem:[#allocation1 + $0x18] sm:$0xff pattern:$0x73625140] }
 0x2f8   :  { %4727 = vmatpush.msra.mxu2 %v1535_v55  ;;  %4746 = vmatpush.msra.mxu3 %v1552_v56  ;;  %v1568_v54 = vld [vmem:[#allocation2 + $0x2e70] sm:$0xff]  ;;  %v1585_v55 = vld [vmem:[#allocation2 + $0x2ef8] sm:$0xff] }
 0x2f9   :  { %4688 = vmatpush.msra.mxu0 %v1502_v57  ;;  %4707 = vmatpush.msra.mxu1 %v1519_v58  ;;  %v1600_v56 = vld [vmem:[#allocation2 + $0x2f70] sm:$0xff]  ;;  %v1617_v57 = vld [vmem:[#allocation2 + $0x2ff8] sm:$0xff]  ;;  %v1567_v58 = vld [vmem:[#allocation2 + $0x2e68] sm:$0xff] }
 0x2fa   :  { %4728 = vmatpush.msra.mxu2 %v1534_v59  ;;  %4747 = vmatpush.msra.mxu3 %v1551_v60  ;;  %v1584_v59 = vld [vmem:[#allocation2 + $0x2ef0] sm:$0xff]  ;;  %v1599_v60 = vld [vmem:[#allocation2 + $0x2f68] sm:$0xff] }
 0x2fb   :  { %4689 = vmatpush.msra.mxu0 %v1501_v61  ;;  %4708 = vmatpush.msra.mxu1 %v1518_v62  ;;  %v1616_v61 = vld [vmem:[#allocation2 + $0x2ff0] sm:$0xff]  ;;  %v1566_v62 = vld [vmem:[#allocation2 + $0x2e60] sm:$0xff] }
 0x2fc   :  { %4729 = vmatpush.msra.mxu2 %v1533_v63  ;;  %4748 = vmatpush.msra.mxu3 %v1550_v0  ;;  %v1583_v63 = vld [vmem:[#allocation2 + $0x2ee8] sm:$0xff]  ;;  %v1598_v0 = vld [vmem:[#allocation2 + $0x2f60] sm:$0xff] }
 0x2fd   :  { %4690 = vmatpush.msra.mxu0 %v1500_v1  ;;  %4709 = vmatpush.msra.mxu1 %v1517_v2  ;;  %v1615_v1 = vld [vmem:[#allocation2 + $0x2fe8] sm:$0xff]  ;;  %v1565_v2 = vld [vmem:[#allocation2 + $0x2e58] sm:$0xff] }
 0x2fe   :  { %4730 = vmatpush.msra.mxu2 %v1532_v3  ;;  %4749 = vmatpush.msra.mxu3 %v1549_v4  ;;  %v1582_v3 = vld [vmem:[#allocation2 + $0x2ee0] sm:$0xff]  ;;  %v1597_v4 = vld [vmem:[#allocation2 + $0x2f58] sm:$0xff] }
 0x2ff   :  { %4691 = vmatpush.msra.mxu0 %v1499_v5  ;;  %4710 = vmatpush.msra.mxu1 %v1516_v6  ;;  %v1614_v5 = vld [vmem:[#allocation2 + $0x2fe0] sm:$0xff]  ;;  %v1564_v6 = vld [vmem:[#allocation2 + $0x2e50] sm:$0xff] }
 0x300   :  { %4731 = vmatpush.msra.mxu2 %v1531_v7  ;;  %4750 = vmatpush.msra.mxu3 %v1548_v8  ;;  %v1581_v7 = vld [vmem:[#allocation2 + $0x2ed8] sm:$0xff]  ;;  %v1596_v8 = vld [vmem:[#allocation2 + $0x2f50] sm:$0xff] }
 0x301   :  { %4692 = vmatpush.msra.mxu0 %v1498_v9  ;;  %4711 = vmatpush.msra.mxu1 %v1515_v10  ;;  %v1613_v9 = vld [vmem:[#allocation2 + $0x2fd8] sm:$0xff]  ;;  %v1563_v10 = vld [vmem:[#allocation2 + $0x2e48] sm:$0xff] }
 0x302   :  { %4732 = vmatpush.msra.mxu2 %v1530_v11  ;;  %4751 = vmatpush.msra.mxu3 %v1547_v12  ;;  %v1580_v11 = vld [vmem:[#allocation2 + $0x2ed0] sm:$0xff]  ;;  %v1595_v12 = vld [vmem:[#allocation2 + $0x2f48] sm:$0xff] }
 0x303   :  { %4693 = vmatpush.msra.mxu0 %v1497_v13  ;;  %4712 = vmatpush.msra.mxu1 %v1514_v14  ;;  %v1612_v13 = vld [vmem:[#allocation2 + $0x2fd0] sm:$0xff]  ;;  %v1562_v14 = vld [vmem:[#allocation2 + $0x2e40] sm:$0xff] }
 0x304   :  { %4733 = vmatpush.msra.mxu2 %v1529_v15  ;;  %4752 = vmatpush.msra.mxu3 %v1546_v16  ;;  %v1579_v15 = vld [vmem:[#allocation2 + $0x2ec8] sm:$0xff]  ;;  %v1594_v16 = vld [vmem:[#allocation2 + $0x2f40] sm:$0xff] }
 0x305   :  { %4694 = vmatpush.msra.mxu0 %v1496_v17  ;;  %4713 = vmatpush.msra.mxu1 %v1513_v18  ;;  %v1611_v17 = vld [vmem:[#allocation2 + $0x2fc8] sm:$0xff]  ;;  %v1561_v18 = vld [vmem:[#allocation2 + $0x2e38] sm:$0xff] }
 0x306   :  { %4734 = vmatpush.msra.mxu2 %v1528_v19  ;;  %4753 = vmatpush.msra.mxu3 %v1545_v20  ;;  %v1578_v19 = vld [vmem:[#allocation2 + $0x2ec0] sm:$0xff]  ;;  %v1593_v20 = vld [vmem:[#allocation2 + $0x2f38] sm:$0xff] }
 0x307   :  { %4695 = vmatpush.msra.mxu0 %v1495_v21  ;;  %4714 = vmatpush.msra.mxu1 %v1512_v22  ;;  %v1610_v21 = vld [vmem:[#allocation2 + $0x2fc0] sm:$0xff]  ;;  %v1560_v22 = vld [vmem:[#allocation2 + $0x2e30] sm:$0xff] }
 0x308   :  { %4735 = vmatpush.msra.mxu2 %v1527_v23  ;;  %4754 = vmatpush.msra.mxu3 %v1544_v24  ;;  %v1577_v23 = vld [vmem:[#allocation2 + $0x2eb8] sm:$0xff]  ;;  %v1592_v24 = vld [vmem:[#allocation2 + $0x2f30] sm:$0xff] }
 0x309   :  { %4696 = vmatpush.msra.mxu0 %v1494_v25  ;;  %4715 = vmatpush.msra.mxu1 %v1511_v26  ;;  %v1609_v25 = vld [vmem:[#allocation2 + $0x2fb8] sm:$0xff]  ;;  %v1559_v26 = vld [vmem:[#allocation2 + $0x2e28] sm:$0xff] }
 0x30a   :  { %4736 = vmatpush.msra.mxu2 %v1526_v27  ;;  %4755 = vmatpush.msra.mxu3 %v1543_v28  ;;  %v1576_v27 = vld [vmem:[#allocation2 + $0x2eb0] sm:$0xff]  ;;  %v1591_v28 = vld [vmem:[#allocation2 + $0x2f28] sm:$0xff] }
 0x30b   :  { %4697 = vmatpush.msra.mxu0 %v1493_v29  ;;  %4716 = vmatpush.msra.mxu1 %v1510_v30  ;;  %v1608_v29 = vld [vmem:[#allocation2 + $0x2fb0] sm:$0xff]  ;;  %v1558_v30 = vld [vmem:[#allocation2 + $0x2e20] sm:$0xff] }
 0x30c   :  { %4737 = vmatpush.msra.mxu2 %v1525_v31  ;;  %4756 = vmatpush.msra.mxu3 %v1542_v32  ;;  %v1575_v31 = vld [vmem:[#allocation2 + $0x2ea8] sm:$0xff]  ;;  %v1590_v32 = vld [vmem:[#allocation2 + $0x2f20] sm:$0xff] }
 0x30d   :  { %4698 = vmatpush.msra.mxu0 %v1492_v33  ;;  %4717 = vmatpush.msra.mxu1 %v1509_v34  ;;  %v1607_v33 = vld [vmem:[#allocation2 + $0x2fa8] sm:$0xff]  ;;  %v1557_v34 = vld [vmem:[#allocation2 + $0x2e18] sm:$0xff] }
 0x30e   :  { %4738 = vmatpush.msra.mxu2 %v1524_v35  ;;  %4757 = vmatpush.msra.mxu3 %v1541_v36  ;;  %v1574_v35 = vld [vmem:[#allocation2 + $0x2ea0] sm:$0xff]  ;;  %v1589_v36 = vld [vmem:[#allocation2 + $0x2f18] sm:$0xff] }
 0x30f   :  { %4699 = vmatpush.msra.mxu0 %v1491_v37  ;;  %4718 = vmatpush.msra.mxu1 %v1508_v38  ;;  %v1606_v37 = vld [vmem:[#allocation2 + $0x2fa0] sm:$0xff]  ;;  %v1556_v38 = vld [vmem:[#allocation2 + $0x2e10] sm:$0xff] }
 0x310   :  { %4739 = vmatpush.msra.mxu2 %v1523_v40  ;;  %4758 = vmatpush.msra.mxu3 %v1540_v41  ;;  %v1588_v40 = vld [vmem:[#allocation2 + $0x2f10] sm:$0xff]  ;;  %v1605_v41 = vld [vmem:[#allocation2 + $0x2f98] sm:$0xff] }
 0x311   :  { %4700 = vmatpush.msra.mxu0 %v1490_v42  ;;  %4719 = vmatpush.msra.mxu1 %v1507_v43  ;;  %v1555_v42 = vld [vmem:[#allocation2 + $0x2e08] sm:$0xff]  ;;  %v1572_v43 = vld [vmem:[#allocation2 + $0x2e90] sm:$0xff] }
 0x312   :  { %4740 = vmatpush.msra.mxu2 %v1522_v44  ;;  %4759 = vmatpush.msra.mxu3 %v1539_v45  ;;  %v67_v44 = vld [vmem:[%s6489_s0 + $0xc0] sm:$0xff]  ;;  %v1587_v45 = vld [vmem:[#allocation2 + $0x2f08] sm:$0xff] }
 0x313   :  { %4701 = vmatmul.f32.vlgmr.msra.gmra.mxu0 %v2688_v46  ;;  %4741 = vmatmul.f32.vlgmr.msra.gmra.mxu2 %v2690_v47  ;;  %v1604_v46 = vld [vmem:[#allocation2 + $0x2f90] sm:$0xff]  ;;  %2696 = vst [vmem:[#allocation1] ss:$4 sm:$0xff] %v67_v44  ;;  %v1554_v47 = vld [vmem:[#allocation2 + $0x2e00] sm:$0xff]  ;;  %v1637_v44 = vld [vmem:[#allocation2 + $0x3098] sm:$0xff] }
 0x314   :  { %4765 = vmatpush.msrb.mxu0 %v1569_v48  ;;  %4805 = vmatpush.msrb.mxu2 %v1601_v49  ;;  %v1571_v48 = vld [vmem:[#allocation2 + $0x2e88] sm:$0xff]  ;;  %v1586_v49 = vld [vmem:[#allocation2 + $0x2f00] sm:$0xff] }
 0x315   :  { %4720 = vmatpush.msra.mxu1 %v1506_v50  ;;  %4760 = vmatpush.msra.mxu3 %v1538_v51  ;;  %v1603_v50 = vld [vmem:[#allocation2 + $0x2f88] sm:$0xff]  ;;  %v2692_v51 = vld.sshfl [vmem:[#allocation1 + $0x20] sm:$0xff pattern:$0x73625140] }
 0x316   :  { %4721 = vmatmul.f32.vlgmr.msra.gmra.mxu1 %v2689_v52  ;;  %4761 = vmatmul.f32.vlgmr.msra.gmra.mxu3 %v2691_v53  ;;  %v2694_v52 = vld.sshfl [vmem:[#allocation1 + $0x30] sm:$0xff pattern:$0x73625140]  ;;  %v1633_v53 = vld [vmem:[#allocation2 + $0x3078] sm:$0xff] }
 0x317   :  { %4766 = vmatpush.msrb.mxu0 %v1568_v54  ;;  %4785 = vmatpush.msrb.mxu1 %v1585_v55  ;;  %v1665_v54 = vld [vmem:[#allocation2 + $0x3178] sm:$0xff]  ;;  %v1570_v55 = vld [vmem:[#allocation2 + $0x2e80] sm:$0xff] }
 0x318   :  { %4806 = vmatpush.msrb.mxu2 %v1600_v56  ;;  %4825 = vmatpush.msrb.mxu3 %v1617_v57  ;;  %v1602_v56 = vld [vmem:[#allocation2 + $0x2f80] sm:$0xff] }
 0x319   :  { %4767 = vmatpush.msrb.mxu0 %v1567_v58  ;;  %4786 = vmatpush.msrb.mxu1 %v1584_v59  ;;  %v2693_v57 = vld.sshfl [vmem:[#allocation1 + $0x28] sm:$0xff pattern:$0x73625140]  ;;  %v2695_v58 = vld.sshfl [vmem:[#allocation1 + $0x38] sm:$0xff pattern:$0x73625140] }
 0x31a   :  { %4807 = vmatpush.msrb.mxu2 %v1599_v60  ;;  %4826 = vmatpush.msrb.mxu3 %v1616_v61  ;;  %v1632_v59 = vld [vmem:[#allocation2 + $0x3070] sm:$0xff]  ;;  %v1649_v60 = vld [vmem:[#allocation2 + $0x30f8] sm:$0xff] }
 0x31b   :  { %4768 = vmatpush.msrb.mxu0 %v1566_v62  ;;  %4787 = vmatpush.msrb.mxu1 %v1583_v63  ;;  %v1664_v61 = vld [vmem:[#allocation2 + $0x3170] sm:$0xff]  ;;  %v1681_v62 = vld [vmem:[#allocation2 + $0x31f8] sm:$0xff]  ;;  %v1631_v63 = vld [vmem:[#allocation2 + $0x3068] sm:$0xff] }
 0x31c   :  { %4808 = vmatpush.msrb.mxu2 %v1598_v0  ;;  %4827 = vmatpush.msrb.mxu3 %v1615_v1  ;;  %v1648_v0 = vld [vmem:[#allocation2 + $0x30f0] sm:$0xff]  ;;  %v1663_v1 = vld [vmem:[#allocation2 + $0x3168] sm:$0xff] }
 0x31d   :  { %4769 = vmatpush.msrb.mxu0 %v1565_v2  ;;  %4788 = vmatpush.msrb.mxu1 %v1582_v3  ;;  %v1680_v2 = vld [vmem:[#allocation2 + $0x31f0] sm:$0xff]  ;;  %v1630_v3 = vld [vmem:[#allocation2 + $0x3060] sm:$0xff] }
 0x31e   :  { %4809 = vmatpush.msrb.mxu2 %v1597_v4  ;;  %4828 = vmatpush.msrb.mxu3 %v1614_v5  ;;  %v1647_v4 = vld [vmem:[#allocation2 + $0x30e8] sm:$0xff]  ;;  %v1662_v5 = vld [vmem:[#allocation2 + $0x3160] sm:$0xff] }
 0x31f   :  { %4770 = vmatpush.msrb.mxu0 %v1564_v6  ;;  %4789 = vmatpush.msrb.mxu1 %v1581_v7  ;;  %v1679_v6 = vld [vmem:[#allocation2 + $0x31e8] sm:$0xff]  ;;  %v1629_v7 = vld [vmem:[#allocation2 + $0x3058] sm:$0xff] }
 0x320   :  { %4810 = vmatpush.msrb.mxu2 %v1596_v8  ;;  %4829 = vmatpush.msrb.mxu3 %v1613_v9  ;;  %v1646_v8 = vld [vmem:[#allocation2 + $0x30e0] sm:$0xff]  ;;  %v1661_v9 = vld [vmem:[#allocation2 + $0x3158] sm:$0xff] }
 0x321   :  { %4771 = vmatpush.msrb.mxu0 %v1563_v10  ;;  %4790 = vmatpush.msrb.mxu1 %v1580_v11  ;;  %v1678_v10 = vld [vmem:[#allocation2 + $0x31e0] sm:$0xff]  ;;  %v1628_v11 = vld [vmem:[#allocation2 + $0x3050] sm:$0xff] }
 0x322   :  { %4811 = vmatpush.msrb.mxu2 %v1595_v12  ;;  %4830 = vmatpush.msrb.mxu3 %v1612_v13  ;;  %v1645_v12 = vld [vmem:[#allocation2 + $0x30d8] sm:$0xff]  ;;  %v1660_v13 = vld [vmem:[#allocation2 + $0x3150] sm:$0xff] }
 0x323   :  { %4772 = vmatpush.msrb.mxu0 %v1562_v14  ;;  %4791 = vmatpush.msrb.mxu1 %v1579_v15  ;;  %v1677_v14 = vld [vmem:[#allocation2 + $0x31d8] sm:$0xff]  ;;  %v1627_v15 = vld [vmem:[#allocation2 + $0x3048] sm:$0xff] }
 0x324   :  { %4812 = vmatpush.msrb.mxu2 %v1594_v16  ;;  %4831 = vmatpush.msrb.mxu3 %v1611_v17  ;;  %v1644_v16 = vld [vmem:[#allocation2 + $0x30d0] sm:$0xff]  ;;  %v1659_v17 = vld [vmem:[#allocation2 + $0x3148] sm:$0xff] }
 0x325   :  { %4773 = vmatpush.msrb.mxu0 %v1561_v18  ;;  %4792 = vmatpush.msrb.mxu1 %v1578_v19  ;;  %v1676_v18 = vld [vmem:[#allocation2 + $0x31d0] sm:$0xff]  ;;  %v1626_v19 = vld [vmem:[#allocation2 + $0x3040] sm:$0xff] }
 0x326   :  { %4813 = vmatpush.msrb.mxu2 %v1593_v20  ;;  %4832 = vmatpush.msrb.mxu3 %v1610_v21  ;;  %v1643_v20 = vld [vmem:[#allocation2 + $0x30c8] sm:$0xff]  ;;  %v1658_v21 = vld [vmem:[#allocation2 + $0x3140] sm:$0xff] }
 0x327   :  { %4774 = vmatpush.msrb.mxu0 %v1560_v22  ;;  %4793 = vmatpush.msrb.mxu1 %v1577_v23  ;;  %v1675_v22 = vld [vmem:[#allocation2 + $0x31c8] sm:$0xff]  ;;  %v1625_v23 = vld [vmem:[#allocation2 + $0x3038] sm:$0xff] }
 0x328   :  { %4814 = vmatpush.msrb.mxu2 %v1592_v24  ;;  %4833 = vmatpush.msrb.mxu3 %v1609_v25  ;;  %v1642_v24 = vld [vmem:[#allocation2 + $0x30c0] sm:$0xff]  ;;  %v1657_v25 = vld [vmem:[#allocation2 + $0x3138] sm:$0xff] }
 0x329   :  { %4775 = vmatpush.msrb.mxu0 %v1559_v26  ;;  %4794 = vmatpush.msrb.mxu1 %v1576_v27  ;;  %v1674_v26 = vld [vmem:[#allocation2 + $0x31c0] sm:$0xff]  ;;  %v1624_v27 = vld [vmem:[#allocation2 + $0x3030] sm:$0xff] }
 0x32a   :  { %4815 = vmatpush.msrb.mxu2 %v1591_v28  ;;  %4834 = vmatpush.msrb.mxu3 %v1608_v29  ;;  %v1641_v28 = vld [vmem:[#allocation2 + $0x30b8] sm:$0xff]  ;;  %v1656_v29 = vld [vmem:[#allocation2 + $0x3130] sm:$0xff] }
 0x32b   :  { %4776 = vmatpush.msrb.mxu0 %v1558_v30  ;;  %4795 = vmatpush.msrb.mxu1 %v1575_v31  ;;  %v1673_v30 = vld [vmem:[#allocation2 + $0x31b8] sm:$0xff]  ;;  %v1623_v31 = vld [vmem:[#allocation2 + $0x3028] sm:$0xff] }
 0x32c   :  { %4816 = vmatpush.msrb.mxu2 %v1590_v32  ;;  %4835 = vmatpush.msrb.mxu3 %v1607_v33  ;;  %v1640_v32 = vld [vmem:[#allocation2 + $0x30b0] sm:$0xff]  ;;  %v1655_v33 = vld [vmem:[#allocation2 + $0x3128] sm:$0xff] }
 0x32d   :  { %4777 = vmatpush.msrb.mxu0 %v1557_v34  ;;  %4796 = vmatpush.msrb.mxu1 %v1574_v35  ;;  %v1672_v34 = vld [vmem:[#allocation2 + $0x31b0] sm:$0xff]  ;;  %v1622_v35 = vld [vmem:[#allocation2 + $0x3020] sm:$0xff] }
 0x32e   :  { %4817 = vmatpush.msrb.mxu2 %v1589_v36  ;;  %4836 = vmatpush.msrb.mxu3 %v1606_v37  ;;  %v1639_v36 = vld [vmem:[#allocation2 + $0x30a8] sm:$0xff]  ;;  %v1654_v37 = vld [vmem:[#allocation2 + $0x3120] sm:$0xff] }
 0x32f   :  { %4778 = vmatpush.msrb.mxu0 %v1556_v38  ;;  %4797 = vmatpush.msrb.mxu1 %v1573_v39  ;;  %v1671_v38 = vld [vmem:[#allocation2 + $0x31a8] sm:$0xff]  ;;  %v1621_v39 = vld [vmem:[#allocation2 + $0x3018] sm:$0xff] }
 0x330   :  { %4818 = vmatpush.msrb.mxu2 %v1588_v40  ;;  %4837 = vmatpush.msrb.mxu3 %v1605_v41  ;;  %v1638_v40 = vld [vmem:[#allocation2 + $0x30a0] sm:$0xff]  ;;  %v1653_v41 = vld [vmem:[#allocation2 + $0x3118] sm:$0xff] }
 0x331   :  { %4779 = vmatpush.msrb.mxu0 %v1555_v42  ;;  %4798 = vmatpush.msrb.mxu1 %v1572_v43  ;;  %v1670_v42 = vld [vmem:[#allocation2 + $0x31a0] sm:$0xff]  ;;  %v1620_v43 = vld [vmem:[#allocation2 + $0x3010] sm:$0xff] }
 0x332   :  { %4819 = vmatpush.msrb.mxu2 %v1587_v45  ;;  %4838 = vmatpush.msrb.mxu3 %v1604_v46  ;;  %v1652_v45 = vld [vmem:[#allocation2 + $0x3110] sm:$0xff]  ;;  %v1669_v46 = vld [vmem:[#allocation2 + $0x3198] sm:$0xff] }
 0x333   :  { %4780 = vmatpush.msrb.mxu0 %v1554_v47  ;;  %4799 = vmatpush.msrb.mxu1 %v1571_v48  ;;  %v1619_v47 = vld [vmem:[#allocation2 + $0x3008] sm:$0xff]  ;;  %v1636_v48 = vld [vmem:[#allocation2 + $0x3090] sm:$0xff] }
 0x334   :  { %4820 = vmatpush.msrb.mxu2 %v1586_v49  ;;  %4839 = vmatpush.msrb.mxu3 %v1603_v50  ;;  %v68_v49 = vld [vmem:[%s6489_s0 + $0xc8] sm:$0xff]  ;;  %v1651_v50 = vld [vmem:[#allocation2 + $0x3108] sm:$0xff] }
 0x335   :  { %4781 = vmatmul.f32.vlgmr.msrb.gmra.mxu0 %v2692_v51  ;;  %4821 = vmatmul.f32.vlgmr.msrb.gmra.mxu2 %v2694_v52  ;;  %v1668_v51 = vld [vmem:[#allocation2 + $0x3190] sm:$0xff]  ;;  %2697 = vst [vmem:[#allocation1 + $0x20] ss:$4 sm:$0xff] %v68_v49  ;;  %v1618_v52 = vld [vmem:[#allocation2 + $0x3000] sm:$0xff] }
 0x336   :  { %4845 = vmatpush.msra.mxu0 %v1633_v53  ;;  %4885 = vmatpush.msra.mxu2 %v1665_v54  ;;  %v1635_v53 = vld [vmem:[#allocation2 + $0x3088] sm:$0xff]  ;;  %v1650_v54 = vld [vmem:[#allocation2 + $0x3100] sm:$0xff] }
 0x337   :  { %4800 = vmatpush.msrb.mxu1 %v1570_v55  ;;  %4840 = vmatpush.msrb.mxu3 %v1602_v56  ;;  %v1667_v55 = vld [vmem:[#allocation2 + $0x3188] sm:$0xff]  ;;  %v2698_v56 = vld.sshfl [vmem:[#allocation1] sm:$0xff pattern:$0x73625140]  ;;  %v1702_v49 = vld [vmem:[#allocation2 + $0x32a0] sm:$0xff] }
 0x338   :  { %4801 = vmatmul.f32.vlgmr.msrb.gmra.mxu1 %v2693_v57  ;;  %4841 = vmatmul.f32.vlgmr.msrb.gmra.mxu3 %v2695_v58  ;;  %v2700_v57 = vld.sshfl [vmem:[#allocation1 + $0x10] sm:$0xff pattern:$0x73625140]  ;;  %v1697_v58 = vld [vmem:[#allocation2 + $0x3278] sm:$0xff] }
 0x339   :  { %4846 = vmatpush.msra.mxu0 %v1632_v59  ;;  %4865 = vmatpush.msra.mxu1 %v1649_v60  ;;  %v1729_v59 = vld [vmem:[#allocation2 + $0x3378] sm:$0xff]  ;;  %v1634_v60 = vld [vmem:[#allocation2 + $0x3080] sm:$0xff] }
 0x33a   :  { %4886 = vmatpush.msra.mxu2 %v1664_v61  ;;  %4905 = vmatpush.msra.mxu3 %v1681_v62  ;;  %v1666_v61 = vld [vmem:[#allocation2 + $0x3180] sm:$0xff]  ;;  %v6288_v62 = vpop.f32.mrf.mxu0 }
 0x33b   :  { %4847 = vmatpush.msra.mxu0 %v1631_v63  ;;  %4866 = vmatpush.msra.mxu1 %v1648_v0  ;;  %v6290_v63 = vpop.f32.mrf.mxu2  ;;  %v2699_v0 = vld.sshfl [vmem:[#allocation1 + $0x8] sm:$0xff pattern:$0x73625140] }
 0x33c   :  { %4887 = vmatpush.msra.mxu2 %v1663_v1  ;;  %4906 = vmatpush.msra.mxu3 %v1680_v2  ;;  %v2701_v1 = vld.sshfl [vmem:[#allocation1 + $0x18] sm:$0xff pattern:$0x73625140] }
 0x33d   :  { %4848 = vmatpush.msra.mxu0 %v1630_v3  ;;  %4867 = vmatpush.msra.mxu1 %v1647_v4  ;;  %v1696_v2 = vld [vmem:[#allocation2 + $0x3270] sm:$0xff]  ;;  %v1713_v3 = vld [vmem:[#allocation2 + $0x32f8] sm:$0xff] }
 0x33e   :  { %4888 = vmatpush.msra.mxu2 %v1662_v5  ;;  %4907 = vmatpush.msra.mxu3 %v1679_v6  ;;  %v1728_v4 = vld [vmem:[#allocation2 + $0x3370] sm:$0xff]  ;;  %v1745_v5 = vld [vmem:[#allocation2 + $0x33f8] sm:$0xff]  ;;  %v6292_v6 = vpop.f32.mrf.mxu1 }
 0x33f   :  { %4849 = vmatpush.msra.mxu0 %v1629_v7  ;;  %4868 = vmatpush.msra.mxu1 %v1646_v8  ;;  %v6294_v7 = vpop.f32.mrf.mxu3  ;;  %v1695_v8 = vld [vmem:[#allocation2 + $0x3268] sm:$0xff] }
 0x340   :  { %4889 = vmatpush.msra.mxu2 %v1661_v9  ;;  %4908 = vmatpush.msra.mxu3 %v1678_v10  ;;  %v1712_v9 = vld [vmem:[#allocation2 + $0x32f0] sm:$0xff]  ;;  %v1727_v10 = vld [vmem:[#allocation2 + $0x3368] sm:$0xff] }
 0x341   :  { %4850 = vmatpush.msra.mxu0 %v1628_v11  ;;  %4869 = vmatpush.msra.mxu1 %v1645_v12  ;;  %v1744_v11 = vld [vmem:[#allocation2 + $0x33f0] sm:$0xff]  ;;  %v1694_v12 = vld [vmem:[#allocation2 + $0x3260] sm:$0xff] }
 0x342   :  { %4890 = vmatpush.msra.mxu2 %v1660_v13  ;;  %4909 = vmatpush.msra.mxu3 %v1677_v14  ;;  %v1711_v13 = vld [vmem:[#allocation2 + $0x32e8] sm:$0xff]  ;;  %v1726_v14 = vld [vmem:[#allocation2 + $0x3360] sm:$0xff] }
 0x343   :  { %4851 = vmatpush.msra.mxu0 %v1627_v15  ;;  %4870 = vmatpush.msra.mxu1 %v1644_v16  ;;  %v1743_v15 = vld [vmem:[#allocation2 + $0x33e8] sm:$0xff]  ;;  %v1693_v16 = vld [vmem:[#allocation2 + $0x3258] sm:$0xff] }
 0x344   :  { %4891 = vmatpush.msra.mxu2 %v1659_v17  ;;  %4910 = vmatpush.msra.mxu3 %v1676_v18  ;;  %v1710_v17 = vld [vmem:[#allocation2 + $0x32e0] sm:$0xff]  ;;  %v1725_v18 = vld [vmem:[#allocation2 + $0x3358] sm:$0xff] }
 0x345   :  { %4852 = vmatpush.msra.mxu0 %v1626_v19  ;;  %4871 = vmatpush.msra.mxu1 %v1643_v20  ;;  %v1742_v19 = vld [vmem:[#allocation2 + $0x33e0] sm:$0xff]  ;;  %v1692_v20 = vld [vmem:[#allocation2 + $0x3250] sm:$0xff] }
 0x346   :  { %4892 = vmatpush.msra.mxu2 %v1658_v21  ;;  %4911 = vmatpush.msra.mxu3 %v1675_v22  ;;  %v1709_v21 = vld [vmem:[#allocation2 + $0x32d8] sm:$0xff]  ;;  %v1724_v22 = vld [vmem:[#allocation2 + $0x3350] sm:$0xff] }
 0x347   :  { %4853 = vmatpush.msra.mxu0 %v1625_v23  ;;  %4872 = vmatpush.msra.mxu1 %v1642_v24  ;;  %v1741_v23 = vld [vmem:[#allocation2 + $0x33d8] sm:$0xff]  ;;  %v1691_v24 = vld [vmem:[#allocation2 + $0x3248] sm:$0xff] }
 0x348   :  { %4893 = vmatpush.msra.mxu2 %v1657_v25  ;;  %4912 = vmatpush.msra.mxu3 %v1674_v26  ;;  %v1708_v25 = vld [vmem:[#allocation2 + $0x32d0] sm:$0xff]  ;;  %v1723_v26 = vld [vmem:[#allocation2 + $0x3348] sm:$0xff] }
 0x349   :  { %4854 = vmatpush.msra.mxu0 %v1624_v27  ;;  %4873 = vmatpush.msra.mxu1 %v1641_v28  ;;  %v1740_v27 = vld [vmem:[#allocation2 + $0x33d0] sm:$0xff]  ;;  %v1690_v28 = vld [vmem:[#allocation2 + $0x3240] sm:$0xff] }
 0x34a   :  { %4894 = vmatpush.msra.mxu2 %v1656_v29  ;;  %4913 = vmatpush.msra.mxu3 %v1673_v30  ;;  %v1707_v29 = vld [vmem:[#allocation2 + $0x32c8] sm:$0xff]  ;;  %v1722_v30 = vld [vmem:[#allocation2 + $0x3340] sm:$0xff] }
 0x34b   :  { %4855 = vmatpush.msra.mxu0 %v1623_v31  ;;  %4874 = vmatpush.msra.mxu1 %v1640_v32  ;;  %v1739_v31 = vld [vmem:[#allocation2 + $0x33c8] sm:$0xff]  ;;  %v1689_v32 = vld [vmem:[#allocation2 + $0x3238] sm:$0xff] }
 0x34c   :  { %4895 = vmatpush.msra.mxu2 %v1655_v33  ;;  %4914 = vmatpush.msra.mxu3 %v1672_v34  ;;  %v1706_v33 = vld [vmem:[#allocation2 + $0x32c0] sm:$0xff]  ;;  %v1721_v34 = vld [vmem:[#allocation2 + $0x3338] sm:$0xff] }
 0x34d   :  { %4856 = vmatpush.msra.mxu0 %v1622_v35  ;;  %4875 = vmatpush.msra.mxu1 %v1639_v36  ;;  %v1738_v35 = vld [vmem:[#allocation2 + $0x33c0] sm:$0xff]  ;;  %v1688_v36 = vld [vmem:[#allocation2 + $0x3230] sm:$0xff] }
 0x34e   :  { %4896 = vmatpush.msra.mxu2 %v1654_v37  ;;  %4915 = vmatpush.msra.mxu3 %v1671_v38  ;;  %v1705_v37 = vld [vmem:[#allocation2 + $0x32b8] sm:$0xff]  ;;  %v1720_v38 = vld [vmem:[#allocation2 + $0x3330] sm:$0xff] }
 0x34f   :  { %4857 = vmatpush.msra.mxu0 %v1621_v39  ;;  %4876 = vmatpush.msra.mxu1 %v1638_v40  ;;  %v1737_v39 = vld [vmem:[#allocation2 + $0x33b8] sm:$0xff]  ;;  %v1687_v40 = vld [vmem:[#allocation2 + $0x3228] sm:$0xff] }
 0x350   :  { %4897 = vmatpush.msra.mxu2 %v1653_v41  ;;  %4916 = vmatpush.msra.mxu3 %v1670_v42  ;;  %v1704_v41 = vld [vmem:[#allocation2 + $0x32b0] sm:$0xff]  ;;  %v1719_v42 = vld [vmem:[#allocation2 + $0x3328] sm:$0xff] }
 0x351   :  { %4858 = vmatpush.msra.mxu0 %v1620_v43  ;;  %4877 = vmatpush.msra.mxu1 %v1637_v44  ;;  %v1736_v43 = vld [vmem:[#allocation2 + $0x33b0] sm:$0xff]  ;;  %v1686_v44 = vld [vmem:[#allocation2 + $0x3220] sm:$0xff] }
 0x352   :  { %4898 = vmatpush.msra.mxu2 %v1652_v45  ;;  %4917 = vmatpush.msra.mxu3 %v1669_v46  ;;  %v1703_v45 = vld [vmem:[#allocation2 + $0x32a8] sm:$0xff]  ;;  %v1718_v46 = vld [vmem:[#allocation2 + $0x3320] sm:$0xff] }
 0x353   :  { %4859 = vmatpush.msra.mxu0 %v1619_v47  ;;  %4878 = vmatpush.msra.mxu1 %v1636_v48  ;;  %v1735_v47 = vld [vmem:[#allocation2 + $0x33a8] sm:$0xff]  ;;  %v1685_v48 = vld [vmem:[#allocation2 + $0x3218] sm:$0xff] }
 0x354   :  { %4899 = vmatpush.msra.mxu2 %v1651_v50  ;;  %4918 = vmatpush.msra.mxu3 %v1668_v51  ;;  %v1717_v50 = vld [vmem:[#allocation2 + $0x3318] sm:$0xff]  ;;  %v1734_v51 = vld [vmem:[#allocation2 + $0x33a0] sm:$0xff] }
 0x355   :  { %4860 = vmatpush.msra.mxu0 %v1618_v52  ;;  %4879 = vmatpush.msra.mxu1 %v1635_v53  ;;  %v1684_v52 = vld [vmem:[#allocation2 + $0x3210] sm:$0xff]  ;;  %v1701_v53 = vld [vmem:[#allocation2 + $0x3298] sm:$0xff] }
 0x356   :  { %4900 = vmatpush.msra.mxu2 %v1650_v54  ;;  %4919 = vmatpush.msra.mxu3 %v1667_v55  ;;  %v1716_v54 = vld [vmem:[#allocation2 + $0x3310] sm:$0xff]  ;;  %v1733_v55 = vld [vmem:[#allocation2 + $0x3398] sm:$0xff] }
 0x357   :  { %4861 = vmatmul.f32.vlgmr.msra.gmra.mxu0 %v2698_v56  ;;  %4901 = vmatmul.f32.vlgmr.msra.gmra.mxu2 %v2700_v57  ;;  %v1683_v56 = vld [vmem:[#allocation2 + $0x3208] sm:$0xff]  ;;  %v1700_v57 = vld [vmem:[#allocation2 + $0x3290] sm:$0xff] }
 0x358   :  { %4925 = vmatpush.msrb.mxu0 %v1697_v58  ;;  %4965 = vmatpush.msrb.mxu2 %v1729_v59  ;;  %v69_v58 = vld [vmem:[%s6489_s0 + $0xd0] sm:$0xff] }
 0x359   :  { %4880 = vmatpush.msra.mxu1 %v1634_v60  ;;  %4920 = vmatpush.msra.mxu3 %v1666_v61  ;;  %v1715_v59 = vld [vmem:[#allocation2 + $0x3308] sm:$0xff]  ;;  %v1732_v60 = vld [vmem:[#allocation2 + $0x3390] sm:$0xff]  ;;  %2706 = vst [vmem:[#allocation1] ss:$4 sm:$0xff] %v69_v58  ;;  %v1682_v61 = vld [vmem:[#allocation2 + $0x3200] sm:$0xff] }
 0x35a   :  { %4881 = vmatmul.f32.vlgmr.msra.gmra.mxu1 %v2699_v0  ;;  %4921 = vmatmul.f32.vlgmr.msra.gmra.mxu3 %v2701_v1  ;;  %v1699_v0 = vld [vmem:[#allocation2 + $0x3288] sm:$0xff]  ;;  %v1714_v1 = vld [vmem:[#allocation2 + $0x3300] sm:$0xff] }
 0x35b   :  { %4926 = vmatpush.msrb.mxu0 %v1696_v2  ;;  %4945 = vmatpush.msrb.mxu1 %v1713_v3  ;;  %v1731_v2 = vld [vmem:[#allocation2 + $0x3388] sm:$0xff]  ;;  %v2702_v3 = vld.sshfl [vmem:[#allocation1 + $0x20] sm:$0xff pattern:$0x73625140] }
 0x35c   :  { %4966 = vmatpush.msrb.mxu2 %v1728_v4  ;;  %4985 = vmatpush.msrb.mxu3 %v1745_v5  ;;  %v2704_v4 = vld.sshfl [vmem:[#allocation1 + $0x30] sm:$0xff pattern:$0x73625140]  ;;  %v1761_v5 = vld [vmem:[#allocation2 + $0x3478] sm:$0xff] }
 0x35d   :  { %4927 = vmatpush.msrb.mxu0 %v1695_v8  ;;  %4946 = vmatpush.msrb.mxu1 %v1712_v9  ;;  %v1793_v8 = vld [vmem:[#allocation2 + $0x3578] sm:$0xff]  ;;  %v1698_v9 = vld [vmem:[#allocation2 + $0x3280] sm:$0xff]  ;;  %v1767_v58 = vld [vmem:[#allocation2 + $0x34a8] sm:$0xff] }
 0x35e   :  { %4967 = vmatpush.msrb.mxu2 %v1727_v10  ;;  %4986 = vmatpush.msrb.mxu3 %v1744_v11  ;;  %v1730_v10 = vld [vmem:[#allocation2 + $0x3380] sm:$0xff]  ;;  %v6299_v11 = vpop.f32.mrf.mxu0 }
 0x35f   :  { %4928 = vmatpush.msrb.mxu0 %v1694_v12  ;;  %4947 = vmatpush.msrb.mxu1 %v1711_v13  ;;  %v6301_v12 = vpop.f32.mrf.mxu2  ;;  %v2703_v13 = vld.sshfl [vmem:[#allocation1 + $0x28] sm:$0xff pattern:$0x73625140] }
 0x360   :  { %4968 = vmatpush.msrb.mxu2 %v1726_v14  ;;  %4987 = vmatpush.msrb.mxu3 %v1743_v15  ;;  %v2705_v14 = vld.sshfl [vmem:[#allocation1 + $0x38] sm:$0xff pattern:$0x73625140] }
 0x361   :  { %4929 = vmatpush.msrb.mxu0 %v1693_v16  ;;  %4948 = vmatpush.msrb.mxu1 %v1710_v17  ;;  %v1760_v15 = vld [vmem:[#allocation2 + $0x3470] sm:$0xff]  ;;  %v1777_v16 = vld [vmem:[#allocation2 + $0x34f8] sm:$0xff] }
 0x362   :  { %4969 = vmatpush.msrb.mxu2 %v1725_v18  ;;  %4988 = vmatpush.msrb.mxu3 %v1742_v19  ;;  %v1792_v17 = vld [vmem:[#allocation2 + $0x3570] sm:$0xff]  ;;  %v1809_v18 = vld [vmem:[#allocation2 + $0x35f8] sm:$0xff]  ;;  %v6303_v19 = vpop.f32.mrf.mxu1 }
 0x363   :  { %4930 = vmatpush.msrb.mxu0 %v1692_v20  ;;  %4949 = vmatpush.msrb.mxu1 %v1709_v21  ;;  %v6305_v20 = vpop.f32.mrf.mxu3  ;;  %v1759_v21 = vld [vmem:[#allocation2 + $0x3468] sm:$0xff] }
 0x364   :  { %4970 = vmatpush.msrb.mxu2 %v1724_v22  ;;  %4989 = vmatpush.msrb.mxu3 %v1741_v23  ;;  %v1776_v22 = vld [vmem:[#allocation2 + $0x34f0] sm:$0xff]  ;;  %v1791_v23 = vld [vmem:[#allocation2 + $0x3568] sm:$0xff] }
 0x365   :  { %4931 = vmatpush.msrb.mxu0 %v1691_v24  ;;  %4950 = vmatpush.msrb.mxu1 %v1708_v25  ;;  %v1808_v24 = vld [vmem:[#allocation2 + $0x35f0] sm:$0xff]  ;;  %v1758_v25 = vld [vmem:[#allocation2 + $0x3460] sm:$0xff] }
 0x366   :  { %4971 = vmatpush.msrb.mxu2 %v1723_v26  ;;  %4990 = vmatpush.msrb.mxu3 %v1740_v27  ;;  %v1775_v26 = vld [vmem:[#allocation2 + $0x34e8] sm:$0xff]  ;;  %v1790_v27 = vld [vmem:[#allocation2 + $0x3560] sm:$0xff] }
 0x367   :  { %4932 = vmatpush.msrb.mxu0 %v1690_v28  ;;  %4951 = vmatpush.msrb.mxu1 %v1707_v29  ;;  %v1807_v28 = vld [vmem:[#allocation2 + $0x35e8] sm:$0xff]  ;;  %v1757_v29 = vld [vmem:[#allocation2 + $0x3458] sm:$0xff] }
 0x368   :  { %4972 = vmatpush.msrb.mxu2 %v1722_v30  ;;  %4991 = vmatpush.msrb.mxu3 %v1739_v31  ;;  %v1774_v30 = vld [vmem:[#allocation2 + $0x34e0] sm:$0xff]  ;;  %v1789_v31 = vld [vmem:[#allocation2 + $0x3558] sm:$0xff] }
 0x369   :  { %4933 = vmatpush.msrb.mxu0 %v1689_v32  ;;  %4952 = vmatpush.msrb.mxu1 %v1706_v33  ;;  %v1806_v32 = vld [vmem:[#allocation2 + $0x35e0] sm:$0xff]  ;;  %v1756_v33 = vld [vmem:[#allocation2 + $0x3450] sm:$0xff] }
 0x36a   :  { %4973 = vmatpush.msrb.mxu2 %v1721_v34  ;;  %4992 = vmatpush.msrb.mxu3 %v1738_v35  ;;  %v1773_v34 = vld [vmem:[#allocation2 + $0x34d8] sm:$0xff]  ;;  %v1788_v35 = vld [vmem:[#allocation2 + $0x3550] sm:$0xff] }
 0x36b   :  { %4934 = vmatpush.msrb.mxu0 %v1688_v36  ;;  %4953 = vmatpush.msrb.mxu1 %v1705_v37  ;;  %v1805_v36 = vld [vmem:[#allocation2 + $0x35d8] sm:$0xff]  ;;  %v1755_v37 = vld [vmem:[#allocation2 + $0x3448] sm:$0xff] }
 0x36c   :  { %4974 = vmatpush.msrb.mxu2 %v1720_v38  ;;  %4993 = vmatpush.msrb.mxu3 %v1737_v39  ;;  %v1772_v38 = vld [vmem:[#allocation2 + $0x34d0] sm:$0xff]  ;;  %v1787_v39 = vld [vmem:[#allocation2 + $0x3548] sm:$0xff] }
 0x36d   :  { %4935 = vmatpush.msrb.mxu0 %v1687_v40  ;;  %4954 = vmatpush.msrb.mxu1 %v1704_v41  ;;  %v1804_v40 = vld [vmem:[#allocation2 + $0x35d0] sm:$0xff]  ;;  %v1754_v41 = vld [vmem:[#allocation2 + $0x3440] sm:$0xff] }
 0x36e   :  { %4975 = vmatpush.msrb.mxu2 %v1719_v42  ;;  %4994 = vmatpush.msrb.mxu3 %v1736_v43  ;;  %v1771_v42 = vld [vmem:[#allocation2 + $0x34c8] sm:$0xff]  ;;  %v1786_v43 = vld [vmem:[#allocation2 + $0x3540] sm:$0xff] }
 0x36f   :  { %4936 = vmatpush.msrb.mxu0 %v1686_v44  ;;  %4955 = vmatpush.msrb.mxu1 %v1703_v45  ;;  %v1803_v44 = vld [vmem:[#allocation2 + $0x35c8] sm:$0xff]  ;;  %v1753_v45 = vld [vmem:[#allocation2 + $0x3438] sm:$0xff] }
 0x370   :  { %4976 = vmatpush.msrb.mxu2 %v1718_v46  ;;  %4995 = vmatpush.msrb.mxu3 %v1735_v47  ;;  %v1770_v46 = vld [vmem:[#allocation2 + $0x34c0] sm:$0xff]  ;;  %v1785_v47 = vld [vmem:[#allocation2 + $0x3538] sm:$0xff] }
 0x371   :  { %4937 = vmatpush.msrb.mxu0 %v1685_v48  ;;  %4956 = vmatpush.msrb.mxu1 %v1702_v49  ;;  %v1802_v48 = vld [vmem:[#allocation2 + $0x35c0] sm:$0xff]  ;;  %v1752_v49 = vld [vmem:[#allocation2 + $0x3430] sm:$0xff] }
 0x372   :  { %4977 = vmatpush.msrb.mxu2 %v1717_v50  ;;  %4996 = vmatpush.msrb.mxu3 %v1734_v51  ;;  %v1769_v50 = vld [vmem:[#allocation2 + $0x34b8] sm:$0xff]  ;;  %v1784_v51 = vld [vmem:[#allocation2 + $0x3530] sm:$0xff] }
 0x373   :  { %4938 = vmatpush.msrb.mxu0 %v1684_v52  ;;  %4957 = vmatpush.msrb.mxu1 %v1701_v53  ;;  %v1801_v52 = vld [vmem:[#allocation2 + $0x35b8] sm:$0xff]  ;;  %v1751_v53 = vld [vmem:[#allocation2 + $0x3428] sm:$0xff] }
 0x374   :  { %4978 = vmatpush.msrb.mxu2 %v1716_v54  ;;  %4997 = vmatpush.msrb.mxu3 %v1733_v55  ;;  %v1768_v54 = vld [vmem:[#allocation2 + $0x34b0] sm:$0xff]  ;;  %v1783_v55 = vld [vmem:[#allocation2 + $0x3528] sm:$0xff] }
 0x375   :  { %4939 = vmatpush.msrb.mxu0 %v1683_v56  ;;  %4958 = vmatpush.msrb.mxu1 %v1700_v57  ;;  %v1800_v56 = vld [vmem:[#allocation2 + $0x35b0] sm:$0xff]  ;;  %v1750_v57 = vld [vmem:[#allocation2 + $0x3420] sm:$0xff] }
 0x376   :  { %4979 = vmatpush.msrb.mxu2 %v1715_v59  ;;  %4998 = vmatpush.msrb.mxu3 %v1732_v60  ;;  %v1782_v59 = vld [vmem:[#allocation2 + $0x3520] sm:$0xff]  ;;  %v1799_v60 = vld [vmem:[#allocation2 + $0x35a8] sm:$0xff] }
 0x377   :  { %4940 = vmatpush.msrb.mxu0 %v1682_v61  ;;  %4959 = vmatpush.msrb.mxu1 %v1699_v0  ;;  %v1749_v61 = vld [vmem:[#allocation2 + $0x3418] sm:$0xff]  ;;  %v1766_v0 = vld [vmem:[#allocation2 + $0x34a0] sm:$0xff] }
 0x378   :  { %4980 = vmatpush.msrb.mxu2 %v1714_v1  ;;  %4999 = vmatpush.msrb.mxu3 %v1731_v2  ;;  %v1781_v1 = vld [vmem:[#allocation2 + $0x3518] sm:$0xff]  ;;  %v1798_v2 = vld [vmem:[#allocation2 + $0x35a0] sm:$0xff] }
 0x379   :  { %4941 = vmatmul.f32.vlgmr.msrb.gmra.mxu0 %v2702_v3  ;;  %4981 = vmatmul.f32.vlgmr.msrb.gmra.mxu2 %v2704_v4  ;;  %v1748_v3 = vld [vmem:[#allocation2 + $0x3410] sm:$0xff]  ;;  %v1765_v4 = vld [vmem:[#allocation2 + $0x3498] sm:$0xff] }
 0x37a   :  { %5005 = vmatpush.msra.mxu0 %v1761_v5  ;;  %5045 = vmatpush.msra.mxu2 %v1793_v8  ;;  %v1780_v5 = vld [vmem:[#allocation2 + $0x3510] sm:$0xff]  ;;  %v1797_v8 = vld [vmem:[#allocation2 + $0x3598] sm:$0xff] }
 0x37b   :  { %4960 = vmatpush.msrb.mxu1 %v1698_v9  ;;  %5000 = vmatpush.msrb.mxu3 %v1730_v10  ;;  %v1747_v9 = vld [vmem:[#allocation2 + $0x3408] sm:$0xff]  ;;  %v1764_v10 = vld [vmem:[#allocation2 + $0x3490] sm:$0xff] }
 0x37c   :  { %4961 = vmatmul.f32.vlgmr.msrb.gmra.mxu1 %v2703_v13  ;;  %5001 = vmatmul.f32.vlgmr.msrb.gmra.mxu3 %v2705_v14  ;;  %v70_v13 = vld [vmem:[%s6489_s0 + $0xd8] sm:$0xff]  ;;  %v1779_v14 = vld [vmem:[#allocation2 + $0x3508] sm:$0xff] }
 0x37d   :  { %5006 = vmatpush.msra.mxu0 %v1760_v15  ;;  %5025 = vmatpush.msra.mxu1 %v1777_v16  ;;  %v1796_v15 = vld [vmem:[#allocation2 + $0x3590] sm:$0xff]  ;;  %2707 = vst [vmem:[#allocation1 + $0x20] ss:$4 sm:$0xff] %v70_v13  ;;  %v1746_v16 = vld [vmem:[#allocation2 + $0x3400] sm:$0xff] }
 0x37e   :  { %5046 = vmatpush.msra.mxu2 %v1792_v17  ;;  %5065 = vmatpush.msra.mxu3 %v1809_v18  ;;  %v1763_v17 = vld [vmem:[#allocation2 + $0x3488] sm:$0xff]  ;;  %v1778_v18 = vld [vmem:[#allocation2 + $0x3500] sm:$0xff]  ;;  %v1832_v13 = vld [vmem:[#allocation2 + $0x36b0] sm:$0xff] }
 0x37f   :  { %5007 = vmatpush.msra.mxu0 %v1759_v21  ;;  %5026 = vmatpush.msra.mxu1 %v1776_v22  ;;  %v1795_v21 = vld [vmem:[#allocation2 + $0x3588] sm:$0xff]  ;;  %v2708_v22 = vld.sshfl [vmem:[#allocation1] sm:$0xff pattern:$0x73625140] }
 0x380   :  { %5047 = vmatpush.msra.mxu2 %v1791_v23  ;;  %5066 = vmatpush.msra.mxu3 %v1808_v24  ;;  %v2710_v23 = vld.sshfl [vmem:[#allocation1 + $0x10] sm:$0xff pattern:$0x73625140]  ;;  %v1825_v24 = vld [vmem:[#allocation2 + $0x3678] sm:$0xff] }
 0x381   :  { %5008 = vmatpush.msra.mxu0 %v1758_v25  ;;  %5027 = vmatpush.msra.mxu1 %v1775_v26  ;;  %v1857_v25 = vld [vmem:[#allocation2 + $0x3778] sm:$0xff]  ;;  %v1762_v26 = vld [vmem:[#allocation2 + $0x3480] sm:$0xff] }
 0x382   :  { %5048 = vmatpush.msra.mxu2 %v1790_v27  ;;  %5067 = vmatpush.msra.mxu3 %v1807_v28  ;;  %v1794_v27 = vld [vmem:[#allocation2 + $0x3580] sm:$0xff]  ;;  %v6310_v28 = vpop.f32.mrf.mxu0 }
 0x383   :  { %5009 = vmatpush.msra.mxu0 %v1757_v29  ;;  %5028 = vmatpush.msra.mxu1 %v1774_v30  ;;  %v6312_v29 = vpop.f32.mrf.mxu2  ;;  %v2709_v30 = vld.sshfl [vmem:[#allocation1 + $0x8] sm:$0xff pattern:$0x73625140] }
 0x384   :  { %5049 = vmatpush.msra.mxu2 %v1789_v31  ;;  %5068 = vmatpush.msra.mxu3 %v1806_v32  ;;  %v2711_v31 = vld.sshfl [vmem:[#allocation1 + $0x18] sm:$0xff pattern:$0x73625140] }
 0x385   :  { %5010 = vmatpush.msra.mxu0 %v1756_v33  ;;  %5029 = vmatpush.msra.mxu1 %v1773_v34  ;;  %v1824_v32 = vld [vmem:[#allocation2 + $0x3670] sm:$0xff]  ;;  %v1841_v33 = vld [vmem:[#allocation2 + $0x36f8] sm:$0xff] }
 0x386   :  { %5050 = vmatpush.msra.mxu2 %v1788_v35  ;;  %5069 = vmatpush.msra.mxu3 %v1805_v36  ;;  %v1856_v34 = vld [vmem:[#allocation2 + $0x3770] sm:$0xff]  ;;  %v1873_v35 = vld [vmem:[#allocation2 + $0x37f8] sm:$0xff]  ;;  %v6314_v36 = vpop.f32.mrf.mxu1 }
 0x387   :  { %5011 = vmatpush.msra.mxu0 %v1755_v37  ;;  %5030 = vmatpush.msra.mxu1 %v1772_v38  ;;  %v6316_v37 = vpop.f32.mrf.mxu3  ;;  %v1823_v38 = vld [vmem:[#allocation2 + $0x3668] sm:$0xff] }
 0x388   :  { %5051 = vmatpush.msra.mxu2 %v1787_v39  ;;  %5070 = vmatpush.msra.mxu3 %v1804_v40  ;;  %v1840_v39 = vld [vmem:[#allocation2 + $0x36f0] sm:$0xff]  ;;  %v1855_v40 = vld [vmem:[#allocation2 + $0x3768] sm:$0xff] }
 0x389   :  { %5012 = vmatpush.msra.mxu0 %v1754_v41  ;;  %5031 = vmatpush.msra.mxu1 %v1771_v42  ;;  %v1872_v41 = vld [vmem:[#allocation2 + $0x37f0] sm:$0xff]  ;;  %v1822_v42 = vld [vmem:[#allocation2 + $0x3660] sm:$0xff] }
 0x38a   :  { %5052 = vmatpush.msra.mxu2 %v1786_v43  ;;  %5071 = vmatpush.msra.mxu3 %v1803_v44  ;;  %v1839_v43 = vld [vmem:[#allocation2 + $0x36e8] sm:$0xff]  ;;  %v1854_v44 = vld [vmem:[#allocation2 + $0x3760] sm:$0xff] }
 0x38b   :  { %5013 = vmatpush.msra.mxu0 %v1753_v45  ;;  %5032 = vmatpush.msra.mxu1 %v1770_v46  ;;  %v1871_v45 = vld [vmem:[#allocation2 + $0x37e8] sm:$0xff]  ;;  %v1821_v46 = vld [vmem:[#allocation2 + $0x3658] sm:$0xff] }
 0x38c   :  { %5053 = vmatpush.msra.mxu2 %v1785_v47  ;;  %5072 = vmatpush.msra.mxu3 %v1802_v48  ;;  %v1838_v47 = vld [vmem:[#allocation2 + $0x36e0] sm:$0xff]  ;;  %v1853_v48 = vld [vmem:[#allocation2 + $0x3758] sm:$0xff] }
 0x38d   :  { %5014 = vmatpush.msra.mxu0 %v1752_v49  ;;  %5033 = vmatpush.msra.mxu1 %v1769_v50  ;;  %v1870_v49 = vld [vmem:[#allocation2 + $0x37e0] sm:$0xff]  ;;  %v1820_v50 = vld [vmem:[#allocation2 + $0x3650] sm:$0xff] }
 0x38e   :  { %5054 = vmatpush.msra.mxu2 %v1784_v51  ;;  %5073 = vmatpush.msra.mxu3 %v1801_v52  ;;  %v1837_v51 = vld [vmem:[#allocation2 + $0x36d8] sm:$0xff]  ;;  %v1852_v52 = vld [vmem:[#allocation2 + $0x3750] sm:$0xff] }
 0x38f   :  { %5015 = vmatpush.msra.mxu0 %v1751_v53  ;;  %5034 = vmatpush.msra.mxu1 %v1768_v54  ;;  %v1869_v53 = vld [vmem:[#allocation2 + $0x37d8] sm:$0xff]  ;;  %v1819_v54 = vld [vmem:[#allocation2 + $0x3648] sm:$0xff] }
 0x390   :  { %5055 = vmatpush.msra.mxu2 %v1783_v55  ;;  %5074 = vmatpush.msra.mxu3 %v1800_v56  ;;  %v1836_v55 = vld [vmem:[#allocation2 + $0x36d0] sm:$0xff]  ;;  %v1851_v56 = vld [vmem:[#allocation2 + $0x3748] sm:$0xff] }
 0x391   :  { %5016 = vmatpush.msra.mxu0 %v1750_v57  ;;  %5035 = vmatpush.msra.mxu1 %v1767_v58  ;;  %v1868_v57 = vld [vmem:[#allocation2 + $0x37d0] sm:$0xff]  ;;  %v1818_v58 = vld [vmem:[#allocation2 + $0x3640] sm:$0xff] }
 0x392   :  { %5056 = vmatpush.msra.mxu2 %v1782_v59  ;;  %5075 = vmatpush.msra.mxu3 %v1799_v60  ;;  %v1835_v59 = vld [vmem:[#allocation2 + $0x36c8] sm:$0xff]  ;;  %v1850_v60 = vld [vmem:[#allocation2 + $0x3740] sm:$0xff] }
 0x393   :  { %5017 = vmatpush.msra.mxu0 %v1749_v61  ;;  %5036 = vmatpush.msra.mxu1 %v1766_v0  ;;  %v1867_v61 = vld [vmem:[#allocation2 + $0x37c8] sm:$0xff]  ;;  %v1817_v0 = vld [vmem:[#allocation2 + $0x3638] sm:$0xff] }
 0x394   :  { %5057 = vmatpush.msra.mxu2 %v1781_v1  ;;  %5076 = vmatpush.msra.mxu3 %v1798_v2  ;;  %v1834_v1 = vld [vmem:[#allocation2 + $0x36c0] sm:$0xff]  ;;  %v1849_v2 = vld [vmem:[#allocation2 + $0x3738] sm:$0xff] }
 0x395   :  { %5018 = vmatpush.msra.mxu0 %v1748_v3  ;;  %5037 = vmatpush.msra.mxu1 %v1765_v4  ;;  %v1866_v3 = vld [vmem:[#allocation2 + $0x37c0] sm:$0xff]  ;;  %v1816_v4 = vld [vmem:[#allocation2 + $0x3630] sm:$0xff] }
 0x396   :  { %5058 = vmatpush.msra.mxu2 %v1780_v5  ;;  %5077 = vmatpush.msra.mxu3 %v1797_v8  ;;  %v1833_v5 = vld [vmem:[#allocation2 + $0x36b8] sm:$0xff]  ;;  %v1848_v8 = vld [vmem:[#allocation2 + $0x3730] sm:$0xff] }
 0x397   :  { %5019 = vmatpush.msra.mxu0 %v1747_v9  ;;  %5038 = vmatpush.msra.mxu1 %v1764_v10  ;;  %v1865_v9 = vld [vmem:[#allocation2 + $0x37b8] sm:$0xff]  ;;  %v1815_v10 = vld [vmem:[#allocation2 + $0x3628] sm:$0xff] }
 0x398   :  { %5059 = vmatpush.msra.mxu2 %v1779_v14  ;;  %5078 = vmatpush.msra.mxu3 %v1796_v15  ;;  %v1847_v14 = vld [vmem:[#allocation2 + $0x3728] sm:$0xff]  ;;  %v1864_v15 = vld [vmem:[#allocation2 + $0x37b0] sm:$0xff] }
 0x399   :  { %5020 = vmatpush.msra.mxu0 %v1746_v16  ;;  %5039 = vmatpush.msra.mxu1 %v1763_v17  ;;  %v1814_v16 = vld [vmem:[#allocation2 + $0x3620] sm:$0xff]  ;;  %v1831_v17 = vld [vmem:[#allocation2 + $0x36a8] sm:$0xff] }
 0x39a   :  { %5060 = vmatpush.msra.mxu2 %v1778_v18  ;;  %5079 = vmatpush.msra.mxu3 %v1795_v21  ;;  %v1846_v18 = vld [vmem:[#allocation2 + $0x3720] sm:$0xff]  ;;  %v1863_v21 = vld [vmem:[#allocation2 + $0x37a8] sm:$0xff] }
 0x39b   :  { %5021 = vmatmul.f32.vlgmr.msra.gmra.mxu0 %v2708_v22  ;;  %5061 = vmatmul.f32.vlgmr.msra.gmra.mxu2 %v2710_v23  ;;  %v1813_v22 = vld [vmem:[#allocation2 + $0x3618] sm:$0xff]  ;;  %v1830_v23 = vld [vmem:[#allocation2 + $0x36a0] sm:$0xff] }
 0x39c   :  { %5085 = vmatpush.msrb.mxu0 %v1825_v24  ;;  %5125 = vmatpush.msrb.mxu2 %v1857_v25  ;;  %v1845_v24 = vld [vmem:[#allocation2 + $0x3718] sm:$0xff]  ;;  %v1862_v25 = vld [vmem:[#allocation2 + $0x37a0] sm:$0xff] }
 0x39d   :  { %5040 = vmatpush.msra.mxu1 %v1762_v26  ;;  %5080 = vmatpush.msra.mxu3 %v1794_v27  ;;  %v1812_v26 = vld [vmem:[#allocation2 + $0x3610] sm:$0xff]  ;;  %v1829_v27 = vld [vmem:[#allocation2 + $0x3698] sm:$0xff] }
 0x39e   :  { %5041 = vmatmul.f32.vlgmr.msra.gmra.mxu1 %v2709_v30  ;;  %5081 = vmatmul.f32.vlgmr.msra.gmra.mxu3 %v2711_v31  ;;  %v1844_v30 = vld [vmem:[#allocation2 + $0x3710] sm:$0xff]  ;;  %v1861_v31 = vld [vmem:[#allocation2 + $0x3798] sm:$0xff] }
 0x39f   :  { %5086 = vmatpush.msrb.mxu0 %v1824_v32  ;;  %5105 = vmatpush.msrb.mxu1 %v1841_v33  ;;  %v1811_v32 = vld [vmem:[#allocation2 + $0x3608] sm:$0xff]  ;;  %v1828_v33 = vld [vmem:[#allocation2 + $0x3690] sm:$0xff] }
 0x3a0   :  { %5126 = vmatpush.msrb.mxu2 %v1856_v34  ;;  %5145 = vmatpush.msrb.mxu3 %v1873_v35  ;;  %v71_v34 = vld [vmem:[%s6489_s0 + $0xe0] sm:$0xff]  ;;  %v1843_v35 = vld [vmem:[#allocation2 + $0x3708] sm:$0xff] }
 0x3a1   :  { %5087 = vmatpush.msrb.mxu0 %v1823_v38  ;;  %5106 = vmatpush.msrb.mxu1 %v1840_v39  ;;  %v1860_v38 = vld [vmem:[#allocation2 + $0x3790] sm:$0xff]  ;;  %2716 = vst [vmem:[#allocation1] ss:$4 sm:$0xff] %v71_v34  ;;  %v1810_v39 = vld [vmem:[#allocation2 + $0x3600] sm:$0xff]  ;;  %v1897_v34 = vld [vmem:[#allocation2 + $0x38b8] sm:$0xff] }
 0x3a2   :  { %5127 = vmatpush.msrb.mxu2 %v1855_v40  ;;  %5146 = vmatpush.msrb.mxu3 %v1872_v41  ;;  %v1827_v40 = vld [vmem:[#allocation2 + $0x3688] sm:$0xff]  ;;  %v1842_v41 = vld [vmem:[#allocation2 + $0x3700] sm:$0xff] }
 0x3a3   :  { %5088 = vmatpush.msrb.mxu0 %v1822_v42  ;;  %5107 = vmatpush.msrb.mxu1 %v1839_v43  ;;  %v1859_v42 = vld [vmem:[#allocation2 + $0x3788] sm:$0xff]  ;;  %v2712_v43 = vld.sshfl [vmem:[#allocation1 + $0x20] sm:$0xff pattern:$0x73625140] }
 0x3a4   :  { %5128 = vmatpush.msrb.mxu2 %v1854_v44  ;;  %5147 = vmatpush.msrb.mxu3 %v1871_v45  ;;  %v2714_v44 = vld.sshfl [vmem:[#allocation1 + $0x30] sm:$0xff pattern:$0x73625140]  ;;  %v1889_v45 = vld [vmem:[#allocation2 + $0x3878] sm:$0xff] }
 0x3a5   :  { %5089 = vmatpush.msrb.mxu0 %v1821_v46  ;;  %5108 = vmatpush.msrb.mxu1 %v1838_v47  ;;  %v1921_v46 = vld [vmem:[#allocation2 + $0x3978] sm:$0xff]  ;;  %v1826_v47 = vld [vmem:[#allocation2 + $0x3680] sm:$0xff] }
 0x3a6   :  { %5129 = vmatpush.msrb.mxu2 %v1853_v48  ;;  %5148 = vmatpush.msrb.mxu3 %v1870_v49  ;;  %v1858_v48 = vld [vmem:[#allocation2 + $0x3780] sm:$0xff]  ;;  %v6321_v49 = vpop.f32.mrf.mxu0 }
 0x3a7   :  { %5090 = vmatpush.msrb.mxu0 %v1820_v50  ;;  %5109 = vmatpush.msrb.mxu1 %v1837_v51  ;;  %v6323_v50 = vpop.f32.mrf.mxu2  ;;  %v2713_v51 = vld.sshfl [vmem:[#allocation1 + $0x28] sm:$0xff pattern:$0x73625140] }
 0x3a8   :  { %5130 = vmatpush.msrb.mxu2 %v1852_v52  ;;  %5149 = vmatpush.msrb.mxu3 %v1869_v53  ;;  %v2715_v52 = vld.sshfl [vmem:[#allocation1 + $0x38] sm:$0xff pattern:$0x73625140] }
 0x3a9   :  { %5091 = vmatpush.msrb.mxu0 %v1819_v54  ;;  %5110 = vmatpush.msrb.mxu1 %v1836_v55  ;;  %v1888_v53 = vld [vmem:[#allocation2 + $0x3870] sm:$0xff]  ;;  %v1905_v54 = vld [vmem:[#allocation2 + $0x38f8] sm:$0xff] }
 0x3aa   :  { %5131 = vmatpush.msrb.mxu2 %v1851_v56  ;;  %5150 = vmatpush.msrb.mxu3 %v1868_v57  ;;  %v1920_v55 = vld [vmem:[#allocation2 + $0x3970] sm:$0xff]  ;;  %v1937_v56 = vld [vmem:[#allocation2 + $0x39f8] sm:$0xff]  ;;  %v6325_v57 = vpop.f32.mrf.mxu1 }
 0x3ab   :  { %5092 = vmatpush.msrb.mxu0 %v1818_v58  ;;  %5111 = vmatpush.msrb.mxu1 %v1835_v59  ;;  %v6327_v58 = vpop.f32.mrf.mxu3  ;;  %v1887_v59 = vld [vmem:[#allocation2 + $0x3868] sm:$0xff] }
 0x3ac   :  { %5132 = vmatpush.msrb.mxu2 %v1850_v60  ;;  %5151 = vmatpush.msrb.mxu3 %v1867_v61  ;;  %v1904_v60 = vld [vmem:[#allocation2 + $0x38f0] sm:$0xff]  ;;  %v1919_v61 = vld [vmem:[#allocation2 + $0x3968] sm:$0xff] }
 0x3ad   :  { %5093 = vmatpush.msrb.mxu0 %v1817_v0  ;;  %5112 = vmatpush.msrb.mxu1 %v1834_v1  ;;  %v1936_v0 = vld [vmem:[#allocation2 + $0x39f0] sm:$0xff]  ;;  %v1886_v1 = vld [vmem:[#allocation2 + $0x3860] sm:$0xff] }
 0x3ae   :  { %5133 = vmatpush.msrb.mxu2 %v1849_v2  ;;  %5152 = vmatpush.msrb.mxu3 %v1866_v3  ;;  %v1903_v2 = vld [vmem:[#allocation2 + $0x38e8] sm:$0xff]  ;;  %v1918_v3 = vld [vmem:[#allocation2 + $0x3960] sm:$0xff] }
 0x3af   :  { %5094 = vmatpush.msrb.mxu0 %v1816_v4  ;;  %5113 = vmatpush.msrb.mxu1 %v1833_v5  ;;  %v1935_v4 = vld [vmem:[#allocation2 + $0x39e8] sm:$0xff]  ;;  %v1885_v5 = vld [vmem:[#allocation2 + $0x3858] sm:$0xff] }
 0x3b0   :  { %5134 = vmatpush.msrb.mxu2 %v1848_v8  ;;  %5153 = vmatpush.msrb.mxu3 %v1865_v9  ;;  %v1902_v8 = vld [vmem:[#allocation2 + $0x38e0] sm:$0xff]  ;;  %v1917_v9 = vld [vmem:[#allocation2 + $0x3958] sm:$0xff] }
 0x3b1   :  { %5095 = vmatpush.msrb.mxu0 %v1815_v10  ;;  %5114 = vmatpush.msrb.mxu1 %v1832_v13  ;;  %v1934_v10 = vld [vmem:[#allocation2 + $0x39e0] sm:$0xff]  ;;  %v1884_v13 = vld [vmem:[#allocation2 + $0x3850] sm:$0xff] }
 0x3b2   :  { %5135 = vmatpush.msrb.mxu2 %v1847_v14  ;;  %5154 = vmatpush.msrb.mxu3 %v1864_v15  ;;  %v1901_v14 = vld [vmem:[#allocation2 + $0x38d8] sm:$0xff]  ;;  %v1916_v15 = vld [vmem:[#allocation2 + $0x3950] sm:$0xff] }
 0x3b3   :  { %5096 = vmatpush.msrb.mxu0 %v1814_v16  ;;  %5115 = vmatpush.msrb.mxu1 %v1831_v17  ;;  %v1933_v16 = vld [vmem:[#allocation2 + $0x39d8] sm:$0xff]  ;;  %v1883_v17 = vld [vmem:[#allocation2 + $0x3848] sm:$0xff] }
 0x3b4   :  { %5136 = vmatpush.msrb.mxu2 %v1846_v18  ;;  %5155 = vmatpush.msrb.mxu3 %v1863_v21  ;;  %v1900_v18 = vld [vmem:[#allocation2 + $0x38d0] sm:$0xff]  ;;  %v1915_v21 = vld [vmem:[#allocation2 + $0x3948] sm:$0xff] }
 0x3b5   :  { %5097 = vmatpush.msrb.mxu0 %v1813_v22  ;;  %5116 = vmatpush.msrb.mxu1 %v1830_v23  ;;  %v1932_v22 = vld [vmem:[#allocation2 + $0x39d0] sm:$0xff]  ;;  %v1882_v23 = vld [vmem:[#allocation2 + $0x3840] sm:$0xff] }
 0x3b6   :  { %5137 = vmatpush.msrb.mxu2 %v1845_v24  ;;  %5156 = vmatpush.msrb.mxu3 %v1862_v25  ;;  %v1899_v24 = vld [vmem:[#allocation2 + $0x38c8] sm:$0xff]  ;;  %v1914_v25 = vld [vmem:[#allocation2 + $0x3940] sm:$0xff] }
 0x3b7   :  { %5098 = vmatpush.msrb.mxu0 %v1812_v26  ;;  %5117 = vmatpush.msrb.mxu1 %v1829_v27  ;;  %v1931_v26 = vld [vmem:[#allocation2 + $0x39c8] sm:$0xff]  ;;  %v1881_v27 = vld [vmem:[#allocation2 + $0x3838] sm:$0xff] }
 0x3b8   :  { %5138 = vmatpush.msrb.mxu2 %v1844_v30  ;;  %5157 = vmatpush.msrb.mxu3 %v1861_v31  ;;  %v1898_v30 = vld [vmem:[#allocation2 + $0x38c0] sm:$0xff]  ;;  %v1913_v31 = vld [vmem:[#allocation2 + $0x3938] sm:$0xff] }
 0x3b9   :  { %5099 = vmatpush.msrb.mxu0 %v1811_v32  ;;  %5118 = vmatpush.msrb.mxu1 %v1828_v33  ;;  %v1930_v32 = vld [vmem:[#allocation2 + $0x39c0] sm:$0xff]  ;;  %v1880_v33 = vld [vmem:[#allocation2 + $0x3830] sm:$0xff] }
 0x3ba   :  { %5139 = vmatpush.msrb.mxu2 %v1843_v35  ;;  %5158 = vmatpush.msrb.mxu3 %v1860_v38  ;;  %v1912_v35 = vld [vmem:[#allocation2 + $0x3930] sm:$0xff]  ;;  %v1929_v38 = vld [vmem:[#allocation2 + $0x39b8] sm:$0xff] }
 0x3bb   :  { %5100 = vmatpush.msrb.mxu0 %v1810_v39  ;;  %5119 = vmatpush.msrb.mxu1 %v1827_v40  ;;  %v1879_v39 = vld [vmem:[#allocation2 + $0x3828] sm:$0xff]  ;;  %v1896_v40 = vld [vmem:[#allocation2 + $0x38b0] sm:$0xff] }
 0x3bc   :  { %5140 = vmatpush.msrb.mxu2 %v1842_v41  ;;  %5159 = vmatpush.msrb.mxu3 %v1859_v42  ;;  %v1911_v41 = vld [vmem:[#allocation2 + $0x3928] sm:$0xff]  ;;  %v1928_v42 = vld [vmem:[#allocation2 + $0x39b0] sm:$0xff] }
 0x3bd   :  { %5101 = vmatmul.f32.vlgmr.msrb.gmra.mxu0 %v2712_v43  ;;  %5141 = vmatmul.f32.vlgmr.msrb.gmra.mxu2 %v2714_v44  ;;  %v1878_v43 = vld [vmem:[#allocation2 + $0x3820] sm:$0xff]  ;;  %v1895_v44 = vld [vmem:[#allocation2 + $0x38a8] sm:$0xff] }
 0x3be   :  { %5165 = vmatpush.msra.mxu0 %v1889_v45  ;;  %5205 = vmatpush.msra.mxu2 %v1921_v46  ;;  %v1910_v45 = vld [vmem:[#allocation2 + $0x3920] sm:$0xff]  ;;  %v1927_v46 = vld [vmem:[#allocation2 + $0x39a8] sm:$0xff] }
 0x3bf   :  { %5120 = vmatpush.msrb.mxu1 %v1826_v47  ;;  %5160 = vmatpush.msrb.mxu3 %v1858_v48  ;;  %v1877_v47 = vld [vmem:[#allocation2 + $0x3818] sm:$0xff]  ;;  %v1894_v48 = vld [vmem:[#allocation2 + $0x38a0] sm:$0xff] }
 0x3c0   :  { %5121 = vmatmul.f32.vlgmr.msrb.gmra.mxu1 %v2713_v51  ;;  %5161 = vmatmul.f32.vlgmr.msrb.gmra.mxu3 %v2715_v52  ;;  %v1909_v51 = vld [vmem:[#allocation2 + $0x3918] sm:$0xff]  ;;  %v1926_v52 = vld [vmem:[#allocation2 + $0x39a0] sm:$0xff] }
 0x3c1   :  { %5166 = vmatpush.msra.mxu0 %v1888_v53  ;;  %5185 = vmatpush.msra.mxu1 %v1905_v54  ;;  %v1876_v53 = vld [vmem:[#allocation2 + $0x3810] sm:$0xff]  ;;  %v1893_v54 = vld [vmem:[#allocation2 + $0x3898] sm:$0xff] }
 0x3c2   :  { %5206 = vmatpush.msra.mxu2 %v1920_v55  ;;  %5225 = vmatpush.msra.mxu3 %v1937_v56  ;;  %v1908_v55 = vld [vmem:[#allocation2 + $0x3910] sm:$0xff]  ;;  %v1925_v56 = vld [vmem:[#allocation2 + $0x3998] sm:$0xff] }
 0x3c3   :  { %5167 = vmatpush.msra.mxu0 %v1887_v59  ;;  %5186 = vmatpush.msra.mxu1 %v1904_v60  ;;  %v1875_v59 = vld [vmem:[#allocation2 + $0x3808] sm:$0xff]  ;;  %v1892_v60 = vld [vmem:[#allocation2 + $0x3890] sm:$0xff] }
 0x3c4   :  { %5207 = vmatpush.msra.mxu2 %v1919_v61  ;;  %5226 = vmatpush.msra.mxu3 %v1936_v0  ;;  %v72_v61 = vld [vmem:[%s6489_s0 + $0xe8] sm:$0xff]  ;;  %v1907_v0 = vld [vmem:[#allocation2 + $0x3908] sm:$0xff] }
 0x3c5   :  { %5168 = vmatpush.msra.mxu0 %v1886_v1  ;;  %5187 = vmatpush.msra.mxu1 %v1903_v2  ;;  %v1924_v1 = vld [vmem:[#allocation2 + $0x3990] sm:$0xff]  ;;  %2717 = vst [vmem:[#allocation1 + $0x20] ss:$4 sm:$0xff] %v72_v61  ;;  %v1874_v2 = vld [vmem:[#allocation2 + $0x3800] sm:$0xff]  ;;  %v1995_v61 = vld [vmem:[#allocation2 + $0x3bc8] sm:$0xff] }
 0x3c6   :  { %5208 = vmatpush.msra.mxu2 %v1918_v3  ;;  %5227 = vmatpush.msra.mxu3 %v1935_v4  ;;  %v1891_v3 = vld [vmem:[#allocation2 + $0x3888] sm:$0xff]  ;;  %v1906_v4 = vld [vmem:[#allocation2 + $0x3900] sm:$0xff] }
 0x3c7   :  { %5169 = vmatpush.msra.mxu0 %v1885_v5  ;;  %5188 = vmatpush.msra.mxu1 %v1902_v8  ;;  %v1923_v5 = vld [vmem:[#allocation2 + $0x3988] sm:$0xff]  ;;  %v2718_v8 = vld.sshfl [vmem:[#allocation1] sm:$0xff pattern:$0x73625140] }
 0x3c8   :  { %5209 = vmatpush.msra.mxu2 %v1917_v9  ;;  %5228 = vmatpush.msra.mxu3 %v1934_v10  ;;  %v2720_v9 = vld.sshfl [vmem:[#allocation1 + $0x10] sm:$0xff pattern:$0x73625140]  ;;  %v6108_v10 = vld [vmem:[%s6491_s2] ss:$0 sm:$0xff] }
 0x3c9   :  { %5170 = vmatpush.msra.mxu0 %v1884_v13  ;;  %5189 = vmatpush.msra.mxu1 %v1901_v14  ;;  %v1953_v13 = vld [vmem:[#allocation2 + $0x3a78] sm:$0xff] }
 0x3ca   :  { %5210 = vmatpush.msra.mxu2 %v1916_v15  ;;  %5229 = vmatpush.msra.mxu3 %v1933_v16  ;;  %v1985_v14 = vld [vmem:[#allocation2 + $0x3b78] sm:$0xff]  ;;  %v1890_v15 = vld [vmem:[#allocation2 + $0x3880] sm:$0xff] }
 0x3cb   :  { %5171 = vmatpush.msra.mxu0 %v1883_v17  ;;  %5190 = vmatpush.msra.mxu1 %v1900_v18  ;;  %v1922_v16 = vld [vmem:[#allocation2 + $0x3980] sm:$0xff]  ;;  %v6335_v17 = vpop.f32.mrf.mxu0  ;;  %v6337_v18 = vpop.f32.mrf.mxu2 }
 0x3cc   :  { %5211 = vmatpush.msra.mxu2 %v1915_v21  ;;  %5230 = vmatpush.msra.mxu3 %v1932_v22  ;;  %v2719_v21 = vld.sshfl [vmem:[#allocation1 + $0x8] sm:$0xff pattern:$0x73625140]  ;;  %v2721_v22 = vld.sshfl [vmem:[#allocation1 + $0x18] sm:$0xff pattern:$0x73625140] }
 0x3cd   :  { %5172 = vmatpush.msra.mxu0 %v1882_v23  ;;  %5191 = vmatpush.msra.mxu1 %v1899_v24  ;;  %v1952_v23 = vld [vmem:[#allocation2 + $0x3a70] sm:$0xff]  ;;  %v1969_v24 = vld [vmem:[#allocation2 + $0x3af8] sm:$0xff] }
 0x3ce   :  { %5212 = vmatpush.msra.mxu2 %v1914_v25  ;;  %5231 = vmatpush.msra.mxu3 %v1931_v26  ;;  %v2943_v25 = vadd.f32 %v6108_v10, %v6288_v62  ;;  %v1984_v26 = vld [vmem:[#allocation2 + $0x3b70] sm:$0xff]  ;;  %v1967_v62 = vld [vmem:[#allocation2 + $0x3ae8] sm:$0xff] }
 0x3cf   :  { %5173 = vmatpush.msra.mxu0 %v1881_v27  ;;  %5192 = vmatpush.msra.mxu1 %v1898_v30  ;;  %v2001_v27 = vld [vmem:[#allocation2 + $0x3bf8] sm:$0xff]  ;;  %v6340_v30 = vpop.f32.mrf.mxu1  ;;  %v1943_v10 = vld [vmem:[#allocation2 + $0x3a28] sm:$0xff] }
 0x3d0   :  { %5213 = vmatpush.msra.mxu2 %v1913_v31  ;;  %5232 = vmatpush.msra.mxu3 %v1930_v32  ;;  %v6342_v31 = vpop.f32.mrf.mxu3  ;;  %v1951_v32 = vld [vmem:[#allocation2 + $0x3a68] sm:$0xff] }
 0x3d1   :  { %5174 = vmatpush.msra.mxu0 %v1880_v33  ;;  %5193 = vmatpush.msra.mxu1 %v1897_v34  ;;  %v1968_v33 = vld [vmem:[#allocation2 + $0x3af0] sm:$0xff]  ;;  %v1983_v34 = vld [vmem:[#allocation2 + $0x3b68] sm:$0xff] }
 0x3d2   :  { %5214 = vmatpush.msra.mxu2 %v1912_v35  ;;  %5233 = vmatpush.msra.mxu3 %v1929_v38  ;;  %v2000_v35 = vld [vmem:[#allocation2 + $0x3bf0] sm:$0xff]  ;;  %v1950_v38 = vld [vmem:[#allocation2 + $0x3a60] sm:$0xff] }
 0x3d3   :  { %5175 = vmatpush.msra.mxu0 %v1879_v39  ;;  %5194 = vmatpush.msra.mxu1 %v1896_v40  ;;  %v2963_v39 = vadd.f32 %v6292_v6, %v2943_v25  ;;  %v1982_v40 = vld [vmem:[#allocation2 + $0x3b60] sm:$0xff]  ;;  %v1980_v6 = vld [vmem:[#allocation2 + $0x3b50] sm:$0xff] }
 0x3d4   :  { %5215 = vmatpush.msra.mxu2 %v1911_v41  ;;  %5234 = vmatpush.msra.mxu3 %v1928_v42  ;;  %v1999_v41 = vld [vmem:[#allocation2 + $0x3be8] sm:$0xff]  ;;  %v1949_v42 = vld [vmem:[#allocation2 + $0x3a58] sm:$0xff]  ;;  %v1958_v25 = vld [vmem:[#allocation2 + $0x3aa0] sm:$0xff] }
 0x3d5   :  { %5176 = vmatpush.msra.mxu0 %v1878_v43  ;;  %5195 = vmatpush.msra.mxu1 %v1895_v44  ;;  %v1966_v43 = vld [vmem:[#allocation2 + $0x3ae0] sm:$0xff]  ;;  %v1981_v44 = vld [vmem:[#allocation2 + $0x3b58] sm:$0xff] }
 0x3d6   :  { %5216 = vmatpush.msra.mxu2 %v1910_v45  ;;  %5235 = vmatpush.msra.mxu3 %v1927_v46  ;;  %v1998_v45 = vld [vmem:[#allocation2 + $0x3be0] sm:$0xff]  ;;  %v1948_v46 = vld [vmem:[#allocation2 + $0x3a50] sm:$0xff] }
 0x3d7   :  { %5177 = vmatpush.msra.mxu0 %v1877_v47  ;;  %5196 = vmatpush.msra.mxu1 %v1894_v48  ;;  %v1965_v47 = vld [vmem:[#allocation2 + $0x3ad8] sm:$0xff]  ;;  %v2983_v48 = vadd.f32 %v6290_v63, %v2963_v39  ;;  %v1978_v63 = vld [vmem:[#allocation2 + $0x3b40] sm:$0xff]  ;;  %v73_v39 = vld [vmem:[%s6489_s0 + $0xf0] sm:$0xff] }
 0x3d8   :  { %5217 = vmatpush.msra.mxu2 %v1909_v51  ;;  %5236 = vmatpush.msra.mxu3 %v1926_v52  ;;  %v1997_v51 = vld [vmem:[#allocation2 + $0x3bd8] sm:$0xff]  ;;  %v1947_v52 = vld [vmem:[#allocation2 + $0x3a48] sm:$0xff]  ;;  %2726 = vst [vmem:[#allocation1] ss:$4 sm:$0xff] %v73_v39 }
 0x3d9   :  { %5178 = vmatpush.msra.mxu0 %v1876_v53  ;;  %5197 = vmatpush.msra.mxu1 %v1893_v54  ;;  %v1964_v53 = vld [vmem:[#allocation2 + $0x3ad0] sm:$0xff]  ;;  %v1979_v54 = vld [vmem:[#allocation2 + $0x3b48] sm:$0xff]  ;;  %v2041_v39 = vld [vmem:[#allocation2 + $0x3d38] sm:$0xff] }
 0x3da   :  { %5218 = vmatpush.msra.mxu2 %v1908_v55  ;;  %5237 = vmatpush.msra.mxu3 %v1925_v56  ;;  %v1996_v55 = vld [vmem:[#allocation2 + $0x3bd0] sm:$0xff]  ;;  %v1946_v56 = vld [vmem:[#allocation2 + $0x3a40] sm:$0xff] }
 0x3db   :  { %5179 = vmatpush.msra.mxu0 %v1875_v59  ;;  %5198 = vmatpush.msra.mxu1 %v1892_v60  ;;  %v1963_v59 = vld [vmem:[#allocation2 + $0x3ac8] sm:$0xff]  ;;  %v3003_v60 = vadd.f32 %v6294_v7, %v2983_v48  ;;  %v1976_v7 = vld [vmem:[#allocation2 + $0x3b30] sm:$0xff] }
 0x3dc   :  { %5219 = vmatpush.msra.mxu2 %v1907_v0  ;;  %5238 = vmatpush.msra.mxu3 %v1924_v1  ;;  %v1945_v0 = vld [vmem:[#allocation2 + $0x3a38] sm:$0xff]  ;;  %v1962_v1 = vld [vmem:[#allocation2 + $0x3ac0] sm:$0xff] }
 0x3dd   :  { %5180 = vmatpush.msra.mxu0 %v1874_v2  ;;  %5199 = vmatpush.msra.mxu1 %v1891_v3  ;;  %v1977_v2 = vld [vmem:[#allocation2 + $0x3b38] sm:$0xff]  ;;  %v1994_v3 = vld [vmem:[#allocation2 + $0x3bc0] sm:$0xff] }
 0x3de   :  { %5220 = vmatpush.msra.mxu2 %v1906_v4  ;;  %5239 = vmatpush.msra.mxu3 %v1923_v5  ;;  %v1944_v4 = vld [vmem:[#allocation2 + $0x3a30] sm:$0xff]  ;;  %v1961_v5 = vld [vmem:[#allocation2 + $0x3ab8] sm:$0xff] }
 0x3df   :  { %5181 = vmatmul.f32.vlgmr.msra.gmra.mxu0 %v2718_v8  ;;  %5221 = vmatmul.f32.vlgmr.msra.gmra.mxu2 %v2720_v9  ;;  %v3023_v8 = vadd.f32 %v6299_v11, %v3003_v60  ;;  %v1993_v9 = vld [vmem:[#allocation2 + $0x3bb8] sm:$0xff]  ;;  %v1974_v11 = vld [vmem:[#allocation2 + $0x3b20] sm:$0xff] }
 0x3e0   :  { %5245 = vmatpush.msrb.mxu0 %v1953_v13  ;;  %5285 = vmatpush.msrb.mxu2 %v1985_v14  ;;  %v1960_v13 = vld [vmem:[#allocation2 + $0x3ab0] sm:$0xff]  ;;  %v1975_v14 = vld [vmem:[#allocation2 + $0x3b28] sm:$0xff] }
 0x3e1   :  { %5200 = vmatpush.msra.mxu1 %v1890_v15  ;;  %5240 = vmatpush.msra.mxu3 %v1922_v16  ;;  %v1992_v15 = vld [vmem:[#allocation2 + $0x3bb0] sm:$0xff]  ;;  %v1942_v16 = vld [vmem:[#allocation2 + $0x3a20] sm:$0xff] }
 0x3e2   :  { %5201 = vmatmul.f32.vlgmr.msra.gmra.mxu1 %v2719_v21  ;;  %5241 = vmatmul.f32.vlgmr.msra.gmra.mxu3 %v2721_v22  ;;  %v1959_v21 = vld [vmem:[#allocation2 + $0x3aa8] sm:$0xff]  ;;  %v3043_v22 = vadd.f32 %v6303_v19, %v3023_v8  ;;  %v1972_v19 = vld [vmem:[#allocation2 + $0x3b10] sm:$0xff] }
 0x3e3   :  { %5246 = vmatpush.msrb.mxu0 %v1952_v23  ;;  %5265 = vmatpush.msrb.mxu1 %v1969_v24  ;;  %v1991_v23 = vld [vmem:[#allocation2 + $0x3ba8] sm:$0xff]  ;;  %v1941_v24 = vld [vmem:[#allocation2 + $0x3a18] sm:$0xff]  ;;  %v2064_v8 = vld [vmem:[#allocation2 + $0x3df0] sm:$0xff] }
 0x3e4   :  { %5286 = vmatpush.msrb.mxu2 %v1984_v26  ;;  %5305 = vmatpush.msrb.mxu3 %v2001_v27  ;;  %v1973_v26 = vld [vmem:[#allocation2 + $0x3b18] sm:$0xff]  ;;  %v1990_v27 = vld [vmem:[#allocation2 + $0x3ba0] sm:$0xff] }
 0x3e5   :  { %5247 = vmatpush.msrb.mxu0 %v1951_v32  ;;  %5266 = vmatpush.msrb.mxu1 %v1968_v33  ;;  %v1940_v32 = vld [vmem:[#allocation2 + $0x3a10] sm:$0xff]  ;;  %v1957_v33 = vld [vmem:[#allocation2 + $0x3a98] sm:$0xff] }
 0x3e6   :  { %5287 = vmatpush.msrb.mxu2 %v1983_v34  ;;  %5306 = vmatpush.msrb.mxu3 %v2000_v35  ;;  %v3063_v34 = vadd.f32 %v6301_v12, %v3043_v22  ;;  %v1989_v35 = vld [vmem:[#allocation2 + $0x3b98] sm:$0xff]  ;;  %v1938_v12 = vld [vmem:[#allocation2 + $0x3a00] sm:$0xff] }
 0x3e7   :  { %5248 = vmatpush.msrb.mxu0 %v1950_v38  ;;  %5267 = vmatpush.msrb.mxu1 %v1967_v62  ;;  %v1939_v38 = vld [vmem:[#allocation2 + $0x3a08] sm:$0xff]  ;;  %v1956_v62 = vld [vmem:[#allocation2 + $0x3a90] sm:$0xff]  ;;  %v2029_v22 = vld [vmem:[#allocation2 + $0x3cd8] sm:$0xff] }
 0x3e8   :  { %5288 = vmatpush.msrb.mxu2 %v1982_v40  ;;  %5307 = vmatpush.msrb.mxu3 %v1999_v41  ;;  %v1971_v40 = vld [vmem:[#allocation2 + $0x3b08] sm:$0xff]  ;;  %v1988_v41 = vld [vmem:[#allocation2 + $0x3b90] sm:$0xff] }
 0x3e9   :  { %5249 = vmatpush.msrb.mxu0 %v1949_v42  ;;  %5268 = vmatpush.msrb.mxu1 %v1966_v43  ;;  %v1955_v42 = vld [vmem:[#allocation2 + $0x3a88] sm:$0xff]  ;;  %v3083_v43 = vadd.f32 %v6305_v20, %v3063_v34  ;;  %v6357_v20 = vpop.f32.mrf.mxu2 }
 0x3ea   :  { %5289 = vmatpush.msrb.mxu2 %v1981_v44  ;;  %5308 = vmatpush.msrb.mxu3 %v1998_v45  ;;  %v1970_v44 = vld [vmem:[#allocation2 + $0x3b00] sm:$0xff]  ;;  %v1987_v45 = vld [vmem:[#allocation2 + $0x3b88] sm:$0xff] }
 0x3eb   :  { %5250 = vmatpush.msrb.mxu0 %v1948_v46  ;;  %5269 = vmatpush.msrb.mxu1 %v1965_v47  ;;  %v2722_v46 = vld.sshfl [vmem:[#allocation1 + $0x20] sm:$0xff pattern:$0x73625140]  ;;  %v2724_v47 = vld.sshfl [vmem:[#allocation1 + $0x30] sm:$0xff pattern:$0x73625140]  ;;  %v3103_v48 = vadd.f32 %v6310_v28, %v3083_v43 }
 0x3ec   :  { %5290 = vmatpush.msrb.mxu2 %v1980_v6  ;;  %5309 = vmatpush.msrb.mxu3 %v1997_v51  ;;  %v2017_v6 = vld [vmem:[#allocation2 + $0x3c78] sm:$0xff]  ;;  %v2007_v43 = vld [vmem:[#allocation2 + $0x3c28] sm:$0xff] }
 0x3ed   :  { %5251 = vmatpush.msrb.mxu0 %v1947_v52  ;;  %5270 = vmatpush.msrb.mxu1 %v1964_v53  ;;  %v2049_v51 = vld [vmem:[#allocation2 + $0x3d78] sm:$0xff]  ;;  %v1954_v52 = vld [vmem:[#allocation2 + $0x3a80] sm:$0xff]  ;;  %v3123_v60 = vadd.f32 %v6314_v36, %v3103_v48  ;;  %v2023_v48 = vld [vmem:[#allocation2 + $0x3ca8] sm:$0xff] }
 0x3ee   :  { %5291 = vmatpush.msrb.mxu2 %v1979_v54  ;;  %5310 = vmatpush.msrb.mxu3 %v1996_v55  ;;  %v1986_v53 = vld [vmem:[#allocation2 + $0x3b80] sm:$0xff]  ;;  %v6355_v54 = vpop.f32.mrf.mxu0  ;;  %v2033_v28 = vld [vmem:[#allocation2 + $0x3cf8] sm:$0xff] }
 0x3ef   :  { %5252 = vmatpush.msrb.mxu0 %v1946_v56  ;;  %5271 = vmatpush.msrb.mxu1 %v1963_v59  ;;  %v2723_v55 = vld.sshfl [vmem:[#allocation1 + $0x28] sm:$0xff pattern:$0x73625140]  ;;  %v2725_v56 = vld.sshfl [vmem:[#allocation1 + $0x38] sm:$0xff pattern:$0x73625140] }
 0x3f0   :  { %5292 = vmatpush.msrb.mxu2 %v1978_v63  ;;  %5311 = vmatpush.msrb.mxu3 %v1995_v61  ;;  %v2016_v59 = vld [vmem:[#allocation2 + $0x3c70] sm:$0xff]  ;;  %v2065_v61 = vld [vmem:[#allocation2 + $0x3df8] sm:$0xff]  ;;  %v2014_v36 = vld [vmem:[#allocation2 + $0x3c60] sm:$0xff] }
 0x3f1   :  { %5253 = vmatpush.msrb.mxu0 %v1945_v0  ;;  %5272 = vmatpush.msrb.mxu1 %v1962_v1  ;;  %v2048_v63 = vld [vmem:[#allocation2 + $0x3d70] sm:$0xff]  ;;  %v6360_v0 = vpop.f32.mrf.mxu1  ;;  %v6362_v1 = vpop.f32.mrf.mxu3 }
 0x3f2   :  { %5293 = vmatpush.msrb.mxu2 %v1977_v2  ;;  %5312 = vmatpush.msrb.mxu3 %v1994_v3  ;;  %v2015_v2 = vld [vmem:[#allocation2 + $0x3c68] sm:$0xff]  ;;  %v2032_v3 = vld [vmem:[#allocation2 + $0x3cf0] sm:$0xff] }
 0x3f3   :  { %5254 = vmatpush.msrb.mxu0 %v1944_v4  ;;  %5273 = vmatpush.msrb.mxu1 %v1961_v5  ;;  %v3143_v4 = vadd.f32 %v6312_v29, %v3123_v60  ;;  %v2047_v5 = vld [vmem:[#allocation2 + $0x3d68] sm:$0xff]  ;;  %v2045_v29 = vld [vmem:[#allocation2 + $0x3d58] sm:$0xff] }
 0x3f4   :  { %5294 = vmatpush.msrb.mxu2 %v1976_v7  ;;  %5313 = vmatpush.msrb.mxu3 %v1993_v9  ;;  %v2031_v7 = vld [vmem:[#allocation2 + $0x3ce8] sm:$0xff]  ;;  %v2046_v9 = vld [vmem:[#allocation2 + $0x3d60] sm:$0xff] }
 0x3f5   :  { %5255 = vmatpush.msrb.mxu0 %v1943_v10  ;;  %5274 = vmatpush.msrb.mxu1 %v1960_v13  ;;  %v2063_v10 = vld [vmem:[#allocation2 + $0x3de8] sm:$0xff]  ;;  %v2013_v13 = vld [vmem:[#allocation2 + $0x3c58] sm:$0xff] }
 0x3f6   :  { %5295 = vmatpush.msrb.mxu2 %v1975_v14  ;;  %5314 = vmatpush.msrb.mxu3 %v1992_v15  ;;  %v2030_v14 = vld [vmem:[#allocation2 + $0x3ce0] sm:$0xff]  ;;  %v3163_v15 = vadd.f32 %v6316_v37, %v3143_v4  ;;  %v2043_v37 = vld [vmem:[#allocation2 + $0x3d48] sm:$0xff] }
 0x3f7   :  { %5256 = vmatpush.msrb.mxu0 %v1942_v16  ;;  %5275 = vmatpush.msrb.mxu1 %v1959_v21  ;;  %v2062_v16 = vld [vmem:[#allocation2 + $0x3de0] sm:$0xff]  ;;  %v2012_v21 = vld [vmem:[#allocation2 + $0x3c50] sm:$0xff] }
 0x3f8   :  { %5296 = vmatpush.msrb.mxu2 %v1974_v11  ;;  %5315 = vmatpush.msrb.mxu3 %v1991_v23  ;;  %v3183_v11 = vadd.f32 %v6321_v49, %v3163_v15  ;;  %v2044_v23 = vld [vmem:[#allocation2 + $0x3d50] sm:$0xff]  ;;  %v2042_v49 = vld [vmem:[#allocation2 + $0x3d40] sm:$0xff]  ;;  %v2113_v15 = vld [vmem:[#allocation2 + $0x3f78] sm:$0xff] }
 0x3f9   :  { %5257 = vmatpush.msrb.mxu0 %v1941_v24  ;;  %5276 = vmatpush.msrb.mxu1 %v1958_v25  ;;  %v2061_v24 = vld [vmem:[#allocation2 + $0x3dd8] sm:$0xff]  ;;  %v2011_v25 = vld [vmem:[#allocation2 + $0x3c48] sm:$0xff] }
 0x3fa   :  { %5297 = vmatpush.msrb.mxu2 %v1973_v26  ;;  %5316 = vmatpush.msrb.mxu3 %v1990_v27  ;;  %v2028_v26 = vld [vmem:[#allocation2 + $0x3cd0] sm:$0xff]  ;;  %v3203_v34 = vadd.f32 %v6325_v57, %v3183_v11  ;;  %v6378_v11 = vpop.f32.mrf.mxu2 }
 0x3fb   :  { %5258 = vmatpush.msrb.mxu0 %v1940_v32  ;;  %5277 = vmatpush.msrb.mxu1 %v1957_v33  ;;  %v2060_v27 = vld [vmem:[#allocation2 + $0x3dd0] sm:$0xff]  ;;  %v2010_v32 = vld [vmem:[#allocation2 + $0x3c40] sm:$0xff]  ;;  %v2027_v33 = vld [vmem:[#allocation2 + $0x3cc8] sm:$0xff] }
 0x3fc   :  { %5298 = vmatpush.msrb.mxu2 %v1972_v19  ;;  %5317 = vmatpush.msrb.mxu3 %v1989_v35  ;;  %v2059_v19 = vld [vmem:[#allocation2 + $0x3dc8] sm:$0xff]  ;;  %v2009_v35 = vld [vmem:[#allocation2 + $0x3c38] sm:$0xff]  ;;  %v2040_v57 = vld [vmem:[#allocation2 + $0x3d30] sm:$0xff] }
 0x3fd   :  { %5259 = vmatpush.msrb.mxu0 %v1939_v38  ;;  %5278 = vmatpush.msrb.mxu1 %v1956_v62  ;;  %v2026_v38 = vld [vmem:[#allocation2 + $0x3cc0] sm:$0xff]  ;;  %v3223_v62 = vadd.f32 %v6323_v50, %v3203_v34  ;;  %v2039_v50 = vld [vmem:[#allocation2 + $0x3d28] sm:$0xff] }
 0x3fe   :  { %5299 = vmatpush.msrb.mxu2 %v1971_v40  ;;  %5318 = vmatpush.msrb.mxu3 %v1988_v41  ;;  %v2058_v40 = vld [vmem:[#allocation2 + $0x3dc0] sm:$0xff]  ;;  %v2008_v41 = vld [vmem:[#allocation2 + $0x3c30] sm:$0xff] }
 0x3ff   :  { %5260 = vmatpush.msrb.mxu0 %v1938_v12  ;;  %5279 = vmatpush.msrb.mxu1 %v1955_v42  ;;  %v2025_v12 = vld [vmem:[#allocation2 + $0x3cb8] sm:$0xff] }
 0x400   :  { %5300 = vmatpush.msrb.mxu2 %v1970_v44  ;;  %5319 = vmatpush.msrb.mxu3 %v1987_v45  ;;  %v2057_v42 = vld [vmem:[#allocation2 + $0x3db8] sm:$0xff]  ;;  %v2024_v44 = vld [vmem:[#allocation2 + $0x3cb0] sm:$0xff]  ;;  %v3243_v45 = vadd.f32 %v6327_v58, %v3223_v62 }
 0x401   :  { %5261 = vmatmul.f32.vlgmr.msrb.gmra.mxu0 %v2722_v46  ;;  %5301 = vmatmul.f32.vlgmr.msrb.gmra.mxu2 %v2724_v47  ;;  %v2056_v46 = vld [vmem:[#allocation2 + $0x3db0] sm:$0xff]  ;;  %v2006_v47 = vld [vmem:[#allocation2 + $0x3c20] sm:$0xff]  ;;  %v2037_v58 = vld [vmem:[#allocation2 + $0x3d18] sm:$0xff] }
 0x402   :  { %5325 = vmatpush.msra.mxu0 %v2017_v6  ;;  %5365 = vmatpush.msra.mxu2 %v2049_v51  ;;  %v3263_v6 = vadd.f32 %v6335_v17, %v3243_v45  ;;  %v2038_v51 = vld [vmem:[#allocation2 + $0x3d20] sm:$0xff]  ;;  %v2036_v17 = vld [vmem:[#allocation2 + $0x3d10] sm:$0xff]  ;;  %v2125_v45 = vld [vmem:[#allocation2 + $0x3fd8] sm:$0xff] }
 0x403   :  { %5280 = vmatpush.msrb.mxu1 %v1954_v52  ;;  %5320 = vmatpush.msrb.mxu3 %v1986_v53  ;;  %v2055_v52 = vld [vmem:[#allocation2 + $0x3da8] sm:$0xff]  ;;  %v2005_v53 = vld [vmem:[#allocation2 + $0x3c18] sm:$0xff] }
 0x404   :  { %5281 = vmatmul.f32.vlgmr.msrb.gmra.mxu1 %v2723_v55  ;;  %5321 = vmatmul.f32.vlgmr.msrb.gmra.mxu3 %v2725_v56  ;;  %v2022_v55 = vld [vmem:[#allocation2 + $0x3ca0] sm:$0xff]  ;;  %v3283_v60 = vadd.f32 %v6340_v30, %v3263_v6  ;;  %v2124_v6 = vld [vmem:[#allocation2 + $0x3fd0] sm:$0xff] }
 0x405   :  { %5326 = vmatpush.msra.mxu0 %v2016_v59  ;;  %5345 = vmatpush.msra.mxu1 %v2033_v28  ;;  %v2054_v56 = vld [vmem:[#allocation2 + $0x3da0] sm:$0xff]  ;;  %v2004_v59 = vld [vmem:[#allocation2 + $0x3c10] sm:$0xff]  ;;  %v2021_v28 = vld [vmem:[#allocation2 + $0x3c98] sm:$0xff] }
 0x406   :  { %5366 = vmatpush.msra.mxu2 %v2048_v63  ;;  %5385 = vmatpush.msra.mxu3 %v2065_v61  ;;  %v2053_v63 = vld [vmem:[#allocation2 + $0x3d98] sm:$0xff]  ;;  %v2003_v61 = vld [vmem:[#allocation2 + $0x3c08] sm:$0xff]  ;;  %v3303_v4 = vadd.f32 %v6337_v18, %v3283_v60  ;;  %v2002_v30 = vld [vmem:[#allocation2 + $0x3c00] sm:$0xff] }
 0x407   :  { %5327 = vmatpush.msra.mxu0 %v2015_v2  ;;  %5346 = vmatpush.msra.mxu1 %v2032_v3  ;;  %v2020_v2 = vld [vmem:[#allocation2 + $0x3c90] sm:$0xff]  ;;  %v2081_v18 = vld [vmem:[#allocation2 + $0x3e78] sm:$0xff] }
 0x408   :  { %5367 = vmatpush.msra.mxu2 %v2047_v5  ;;  %5386 = vmatpush.msra.mxu3 %v2064_v8  ;;  %v74_v3 = vld [vmem:[%s6489_s0 + $0xf8] sm:$0xff]  ;;  %v2035_v5 = vld [vmem:[#allocation2 + $0x3d08] sm:$0xff] }
 0x409   :  { %5328 = vmatpush.msra.mxu0 %v2014_v36  ;;  %5347 = vmatpush.msra.mxu1 %v2031_v7  ;;  %v2052_v8 = vld [vmem:[#allocation2 + $0x3d90] sm:$0xff]  ;;  %2727 = vst [vmem:[#allocation1 + $0x20] ss:$4 sm:$0xff] %v74_v3  ;;  %v2019_v36 = vld [vmem:[#allocation2 + $0x3c88] sm:$0xff]  ;;  %v2034_v7 = vld [vmem:[#allocation2 + $0x3d00] sm:$0xff] }
 0x40a   :  { %5368 = vmatpush.msra.mxu2 %v2046_v9  ;;  %5387 = vmatpush.msra.mxu3 %v2063_v10  ;;  %v2051_v9 = vld [vmem:[#allocation2 + $0x3d88] sm:$0xff]  ;;  %v2728_v10 = vld.sshfl [vmem:[#allocation1] sm:$0xff pattern:$0x73625140]  ;;  %v2072_v60 = vld [vmem:[#allocation2 + $0x3e30] sm:$0xff] }
 0x40b   :  { %5329 = vmatpush.msra.mxu0 %v2013_v13  ;;  %5348 = vmatpush.msra.mxu1 %v2030_v14  ;;  %v2730_v13 = vld.sshfl [vmem:[#allocation1 + $0x10] sm:$0xff pattern:$0x73625140]  ;;  %v3323_v14 = vadd.f32 %v6342_v31, %v3303_v4  ;;  %v2080_v31 = vld [vmem:[#allocation2 + $0x3e70] sm:$0xff] }
 0x40c   :  { %5369 = vmatpush.msra.mxu2 %v2045_v29  ;;  %5388 = vmatpush.msra.mxu3 %v2062_v16  ;;  %v2018_v29 = vld [vmem:[#allocation2 + $0x3c80] sm:$0xff]  ;;  %v2071_v3 = vld [vmem:[#allocation2 + $0x3e28] sm:$0xff]  ;;  %v2088_v4 = vld [vmem:[#allocation2 + $0x3eb0] sm:$0xff] }
 0x40d   :  { %5330 = vmatpush.msra.mxu0 %v2012_v21  ;;  %5349 = vmatpush.msra.mxu1 %v2029_v22  ;;  %v2050_v16 = vld [vmem:[#allocation2 + $0x3d80] sm:$0xff]  ;;  %v3343_v21 = vadd.f32 %v6355_v54, %v3323_v14  ;;  %v3422_v22 = vpop.f32.mrf.mxu0  ;;  %v2079_v54 = vld [vmem:[#allocation2 + $0x3e68] sm:$0xff]  ;;  %v2069_v14 = vld [vmem:[#allocation2 + $0x3e18] sm:$0xff] }
 0x40e   :  { %5370 = vmatpush.msra.mxu2 %v2044_v23  ;;  %5389 = vmatpush.msra.mxu3 %v2061_v24  ;;  %v2729_v23 = vld.sshfl [vmem:[#allocation1 + $0x8] sm:$0xff pattern:$0x73625140]  ;;  %v2731_v24 = vld.sshfl [vmem:[#allocation1 + $0x18] sm:$0xff pattern:$0x73625140] }
 0x40f   :  { %5331 = vmatpush.msra.mxu0 %v2011_v25  ;;  %5350 = vmatpush.msra.mxu1 %v2028_v26  ;;  %v2097_v25 = vld [vmem:[#allocation2 + $0x3ef8] sm:$0xff]  ;;  %v2112_v26 = vld [vmem:[#allocation2 + $0x3f70] sm:$0xff]  ;;  %v3363_v34 = vadd.f32 %v6360_v0, %v3343_v21 }
 0x410   :  { %5371 = vmatpush.msra.mxu2 %v2043_v37  ;;  %5390 = vmatpush.msra.mxu3 %v2060_v27  ;;  %v2129_v37 = vld [vmem:[#allocation2 + $0x3ff8] sm:$0xff]  ;;  %v3442_v27 = vpop.f32.mrf.mxu1 }
 0x411   :  { %5332 = vmatpush.msra.mxu0 %v2010_v32  ;;  %5351 = vmatpush.msra.mxu1 %v2027_v33  ;;  %v6380_v32 = vpop.f32.mrf.mxu3  ;;  %v2096_v33 = vld [vmem:[#allocation2 + $0x3ef0] sm:$0xff]  ;;  %v3383_v62 = vadd.f32 %v6357_v20, %v3363_v34  ;;  %v2109_v0 = vld [vmem:[#allocation2 + $0x3f58] sm:$0xff]  ;;  %v2083_v34 = vld [vmem:[#allocation2 + $0x3e88] sm:$0xff] }
 0x412   :  { %5372 = vmatpush.msra.mxu2 %v2042_v49  ;;  %5391 = vmatpush.msra.mxu3 %v2059_v19  ;;  %v2111_v49 = vld [vmem:[#allocation2 + $0x3f68] sm:$0xff]  ;;  %v2128_v19 = vld [vmem:[#allocation2 + $0x3ff0] sm:$0xff] }
 0x413   :  { %5333 = vmatpush.msra.mxu0 %v2009_v35  ;;  %5352 = vmatpush.msra.mxu1 %v2026_v38  ;;  %v2078_v35 = vld [vmem:[#allocation2 + $0x3e60] sm:$0xff]  ;;  %v2095_v38 = vld [vmem:[#allocation2 + $0x3ee8] sm:$0xff]  ;;  %v2108_v20 = vld [vmem:[#allocation2 + $0x3f50] sm:$0xff] }
 0x414   :  { %5373 = vmatpush.msra.mxu2 %v2041_v39  ;;  %5392 = vmatpush.msra.mxu3 %v2058_v40  ;;  %v2110_v39 = vld [vmem:[#allocation2 + $0x3f60] sm:$0xff]  ;;  %v2127_v40 = vld [vmem:[#allocation2 + $0x3fe8] sm:$0xff] }
 0x415   :  { %5334 = vmatpush.msra.mxu0 %v2008_v41  ;;  %5353 = vmatpush.msra.mxu1 %v2025_v12  ;;  %v2077_v41 = vld [vmem:[#allocation2 + $0x3e58] sm:$0xff]  ;;  %v2094_v12 = vld [vmem:[#allocation2 + $0x3ee0] sm:$0xff] }
 0x416   :  { %5374 = vmatpush.msra.mxu2 %v2040_v57  ;;  %5393 = vmatpush.msra.mxu3 %v2057_v42  ;;  %v2126_v57 = vld [vmem:[#allocation2 + $0x3fe0] sm:$0xff]  ;;  %v2076_v42 = vld [vmem:[#allocation2 + $0x3e50] sm:$0xff] }
 0x417   :  { %5335 = vmatpush.msra.mxu0 %v2007_v43  ;;  %5354 = vmatpush.msra.mxu1 %v2024_v44  ;;  %v2093_v43 = vld [vmem:[#allocation2 + $0x3ed8] sm:$0xff]  ;;  %v3403_v44 = vadd.f32 %v6362_v1, %v3383_v62  ;;  %v2106_v1 = vld [vmem:[#allocation2 + $0x3f40] sm:$0xff] }
 0x418   :  { %5375 = vmatpush.msra.mxu2 %v2039_v50  ;;  %5394 = vmatpush.msra.mxu3 %v2056_v46  ;;  %v2075_v50 = vld [vmem:[#allocation2 + $0x3e48] sm:$0xff]  ;;  %v2092_v46 = vld [vmem:[#allocation2 + $0x3ed0] sm:$0xff]  ;;  %v3522_v21 = vpop.f32.mrf.mxu1  ;;  %v2732_v62 = vld.sshfl [vmem:[#allocation1 + $0x20] sm:$0xff pattern:$0x73625140] }
 0x419   :  { %5336 = vmatpush.msra.mxu0 %v2006_v47  ;;  %5355 = vmatpush.msra.mxu1 %v2023_v48  ;;  %v3423_v47 = vadd.f32 %v3422_v22, %v3403_v44  ;;  %v2107_v48 = vld [vmem:[#allocation2 + $0x3f48] sm:$0xff]  ;;  %v2068_v22 = vld [vmem:[#allocation2 + $0x3e10] sm:$0xff] }
 0x41a   :  { %5376 = vmatpush.msra.mxu2 %v2038_v51  ;;  %5395 = vmatpush.msra.mxu3 %v2055_v52  ;;  %v2074_v51 = vld [vmem:[#allocation2 + $0x3e40] sm:$0xff]  ;;  %v2091_v52 = vld [vmem:[#allocation2 + $0x3ec8] sm:$0xff]  ;;  %v2735_v44 = vld.sshfl [vmem:[#allocation1 + $0x38] sm:$0xff pattern:$0x73625140] }
 0x41b   :  { %5337 = vmatpush.msra.mxu0 %v2005_v53  ;;  %5356 = vmatpush.msra.mxu1 %v2022_v55  ;;  %v2123_v53 = vld [vmem:[#allocation2 + $0x3fc8] sm:$0xff]  ;;  %v2073_v55 = vld [vmem:[#allocation2 + $0x3e38] sm:$0xff] }
 0x41c   :  { %5377 = vmatpush.msra.mxu2 %v2037_v58  ;;  %5396 = vmatpush.msra.mxu3 %v2054_v56  ;;  %v2090_v58 = vld [vmem:[#allocation2 + $0x3ec0] sm:$0xff]  ;;  %v3443_v56 = vadd.f32 %v3442_v27, %v3423_v47  ;;  %v2193_v47 = vld [vmem:[#allocation2 + $0x41f8] sm:$0xff] }
 0x41d   :  { %5338 = vmatpush.msra.mxu0 %v2004_v59  ;;  %5357 = vmatpush.msra.mxu1 %v2021_v28  ;;  %v2105_v59 = vld [vmem:[#allocation2 + $0x3f38] sm:$0xff]  ;;  %v2122_v28 = vld [vmem:[#allocation2 + $0x3fc0] sm:$0xff] }
 0x41e   :  { %5378 = vmatpush.msra.mxu2 %v2036_v17  ;;  %5397 = vmatpush.msra.mxu3 %v2053_v63  ;;  %v2089_v17 = vld [vmem:[#allocation2 + $0x3eb8] sm:$0xff]  ;;  %v3463_v63 = vadd.f32 %v6378_v11, %v3443_v56 }
 0x41f   :  { %5339 = vmatpush.msra.mxu0 %v2003_v61  ;;  %5358 = vmatpush.msra.mxu1 %v2020_v2  ;;  %v2104_v61 = vld [vmem:[#allocation2 + $0x3f30] sm:$0xff]  ;;  %v2121_v2 = vld [vmem:[#allocation2 + $0x3fb8] sm:$0xff] }
 0x420   :  { %5379 = vmatpush.msra.mxu2 %v2035_v5  ;;  %5398 = vmatpush.msra.mxu3 %v2052_v8  ;;  %v2103_v5 = vld [vmem:[#allocation2 + $0x3f28] sm:$0xff]  ;;  %v2120_v8 = vld [vmem:[#allocation2 + $0x3fb0] sm:$0xff]  ;;  %v2085_v11 = vld [vmem:[#allocation2 + $0x3e98] sm:$0xff] }
 0x421   :  { %5340 = vmatpush.msra.mxu0 %v2002_v30  ;;  %5359 = vmatpush.msra.mxu1 %v2019_v36  ;;  %v3502_v30 = vpop.f32.mrf.mxu0  ;;  %v2070_v36 = vld [vmem:[#allocation2 + $0x3e20] sm:$0xff] }
 0x422   :  { %5380 = vmatpush.msra.mxu2 %v2034_v7  ;;  %5399 = vmatpush.msra.mxu3 %v2051_v9  ;;  %v2087_v7 = vld [vmem:[#allocation2 + $0x3ea8] sm:$0xff]  ;;  %v3483_v9 = vadd.f32 %v6380_v32, %v3463_v63 }
 0x423   :  { %5341 = vmatmul.f32.vlgmr.msra.gmra.mxu0 %v2728_v10  ;;  %5381 = vmatmul.f32.vlgmr.msra.gmra.mxu2 %v2730_v13  ;;  %v2102_v10 = vld [vmem:[#allocation2 + $0x3f20] sm:$0xff]  ;;  %v2119_v13 = vld [vmem:[#allocation2 + $0x3fa8] sm:$0xff] }
 0x424   :  { %5405 = vmatpush.msrb.mxu0 %v2081_v18  ;;  %5445 = vmatpush.msrb.mxu2 %v2113_v15  ;;  %v2086_v18 = vld [vmem:[#allocation2 + $0x3ea0] sm:$0xff]  ;;  %v3503_v15 = vadd.f32 %v3502_v30, %v3483_v9  ;;  %v2099_v32 = vld [vmem:[#allocation2 + $0x3f08] sm:$0xff]  ;;  %v2189_v30 = vld [vmem:[#allocation2 + $0x41d8] sm:$0xff] }
 0x425   :  { %5360 = vmatpush.msra.mxu1 %v2018_v29  ;;  %5400 = vmatpush.msra.mxu3 %v2050_v16  ;;  %v2101_v29 = vld [vmem:[#allocation2 + $0x3f18] sm:$0xff]  ;;  %v2118_v16 = vld [vmem:[#allocation2 + $0x3fa0] sm:$0xff]  ;;  %v2156_v9 = vld [vmem:[#allocation2 + $0x40d0] sm:$0xff] }
 0x426   :  { %5361 = vmatmul.f32.vlgmr.msra.gmra.mxu1 %v2729_v23  ;;  %5401 = vmatmul.f32.vlgmr.msra.gmra.mxu3 %v2731_v24  ;;  %v2100_v23 = vld [vmem:[#allocation2 + $0x3f10] sm:$0xff]  ;;  %v2117_v24 = vld [vmem:[#allocation2 + $0x3f98] sm:$0xff]  ;;  %v3523_v27 = vadd.f32 %v3522_v21, %v3503_v15  ;;  %v2155_v15 = vld [vmem:[#allocation2 + $0x40c8] sm:$0xff] }
 0x427   :  { %5406 = vmatpush.msrb.mxu0 %v2080_v31  ;;  %5425 = vmatpush.msrb.mxu1 %v2097_v25  ;;  %v3542_v31 = vpop.f32.mrf.mxu2  ;;  %v2067_v25 = vld [vmem:[#allocation2 + $0x3e08] sm:$0xff] }
 0x428   :  { %5446 = vmatpush.msrb.mxu2 %v2112_v26  ;;  %5465 = vmatpush.msrb.mxu3 %v2129_v37  ;;  %v2084_v26 = vld [vmem:[#allocation2 + $0x3e90] sm:$0xff]  ;;  %v75_v37 = vld [vmem:[%s6489_s0 + $0x100] sm:$0xff]  ;;  %v2187_v21 = vld [vmem:[#allocation2 + $0x41c8] sm:$0xff] }
 0x429   :  { %5407 = vmatpush.msrb.mxu0 %v2079_v54  ;;  %5426 = vmatpush.msrb.mxu1 %v2096_v33  ;;  %v2116_v54 = vld [vmem:[#allocation2 + $0x3f90] sm:$0xff]  ;;  %2736 = vst [vmem:[#allocation1] ss:$4 sm:$0xff] %v75_v37  ;;  %v2066_v33 = vld [vmem:[#allocation2 + $0x3e00] sm:$0xff]  ;;  %v2153_v37 = vld [vmem:[#allocation2 + $0x40b8] sm:$0xff] }
 0x42a   :  { %5447 = vmatpush.msrb.mxu2 %v2111_v49  ;;  %5466 = vmatpush.msrb.mxu3 %v2128_v19  ;;  %v3543_v49 = vadd.f32 %v3542_v31, %v3523_v27  ;;  %v2098_v19 = vld [vmem:[#allocation2 + $0x3f00] sm:$0xff] }
 0x42b   :  { %5408 = vmatpush.msrb.mxu0 %v2078_v35  ;;  %5427 = vmatpush.msrb.mxu1 %v2095_v38  ;;  %v2115_v35 = vld [vmem:[#allocation2 + $0x3f88] sm:$0xff]  ;;  %v3562_v38 = vpop.f32.mrf.mxu3  ;;  %v2186_v31 = vld [vmem:[#allocation2 + $0x41c0] sm:$0xff] }
 0x42c   :  { %5448 = vmatpush.msrb.mxu2 %v2110_v39  ;;  %5467 = vmatpush.msrb.mxu3 %v2127_v40  ;;  %v2734_v39 = vld.sshfl [vmem:[#allocation1 + $0x30] sm:$0xff pattern:$0x73625140]  ;;  %v2145_v40 = vld [vmem:[#allocation2 + $0x4078] sm:$0xff] }
 0x42d   :  { %5409 = vmatpush.msrb.mxu0 %v2077_v41  ;;  %5428 = vmatpush.msrb.mxu1 %v2094_v12  ;;  %v2177_v41 = vld [vmem:[#allocation2 + $0x4178] sm:$0xff]  ;;  %v3582_v12 = vpop.f32.mrf.mxu0 }
 0x42e   :  { %5449 = vmatpush.msrb.mxu2 %v2109_v0  ;;  %5468 = vmatpush.msrb.mxu3 %v2126_v57  ;;  %v2082_v0 = vld [vmem:[#allocation2 + $0x3e80] sm:$0xff] }
 0x42f   :  { %5410 = vmatpush.msrb.mxu0 %v2076_v42  ;;  %5429 = vmatpush.msrb.mxu1 %v2093_v43  ;;  %v2114_v57 = vld [vmem:[#allocation2 + $0x3f80] sm:$0xff]  ;;  %v3563_v42 = vadd.f32 %v3562_v38, %v3543_v49 }
 0x430   :  { %5450 = vmatpush.msrb.mxu2 %v2108_v20  ;;  %5469 = vmatpush.msrb.mxu3 %v2125_v45  ;;  %v2733_v43 = vld.sshfl [vmem:[#allocation1 + $0x28] sm:$0xff pattern:$0x73625140]  ;;  %v2144_v20 = vld [vmem:[#allocation2 + $0x4070] sm:$0xff]  ;;  %v2161_v45 = vld [vmem:[#allocation2 + $0x40f8] sm:$0xff] }
 0x431   :  { %5411 = vmatpush.msrb.mxu0 %v2075_v50  ;;  %5430 = vmatpush.msrb.mxu1 %v2092_v46  ;;  %v3583_v50 = vadd.f32 %v3582_v12, %v3563_v42  ;;  %v2176_v46 = vld [vmem:[#allocation2 + $0x4170] sm:$0xff] }
 0x432   :  { %5451 = vmatpush.msrb.mxu2 %v2107_v48  ;;  %5470 = vmatpush.msrb.mxu3 %v2124_v6  ;;  %v3602_v48 = vpop.f32.mrf.mxu1  ;;  %v2143_v6 = vld [vmem:[#allocation2 + $0x4068] sm:$0xff] }
 0x433   :  { %5412 = vmatpush.msrb.mxu0 %v2074_v51  ;;  %5431 = vmatpush.msrb.mxu1 %v2091_v52  ;;  %v2160_v51 = vld [vmem:[#allocation2 + $0x40f0] sm:$0xff]  ;;  %v2175_v52 = vld [vmem:[#allocation2 + $0x4168] sm:$0xff]  ;;  %v3603_v56 = vadd.f32 %v3602_v48, %v3583_v50 }
 0x434   :  { %5452 = vmatpush.msrb.mxu2 %v2106_v1  ;;  %5471 = vmatpush.msrb.mxu3 %v2123_v53  ;;  %v2192_v1 = vld [vmem:[#allocation2 + $0x41f0] sm:$0xff]  ;;  %v3622_v53 = vpop.f32.mrf.mxu2 }
 0x435   :  { %5413 = vmatpush.msrb.mxu0 %v2073_v55  ;;  %5432 = vmatpush.msrb.mxu1 %v2090_v58  ;;  %v2142_v55 = vld [vmem:[#allocation2 + $0x4060] sm:$0xff]  ;;  %v2159_v58 = vld [vmem:[#allocation2 + $0x40e8] sm:$0xff]  ;;  %v3623_v63 = vadd.f32 %v3622_v53, %v3603_v56  ;;  %v2180_v53 = vld [vmem:[#allocation2 + $0x4190] sm:$0xff] }
 0x436   :  { %5453 = vmatpush.msrb.mxu2 %v2105_v59  ;;  %5472 = vmatpush.msrb.mxu3 %v2122_v28  ;;  %v2174_v59 = vld [vmem:[#allocation2 + $0x4160] sm:$0xff]  ;;  %v2191_v28 = vld [vmem:[#allocation2 + $0x41e8] sm:$0xff] }
 0x437   :  { %5414 = vmatpush.msrb.mxu0 %v2072_v60  ;;  %5433 = vmatpush.msrb.mxu1 %v2089_v17  ;;  %v2141_v60 = vld [vmem:[#allocation2 + $0x4058] sm:$0xff]  ;;  %v2158_v17 = vld [vmem:[#allocation2 + $0x40e0] sm:$0xff]  ;;  %v2147_v56 = vld [vmem:[#allocation2 + $0x4088] sm:$0xff] }
 0x438   :  { %5454 = vmatpush.msrb.mxu2 %v2104_v61  ;;  %5473 = vmatpush.msrb.mxu3 %v2121_v2  ;;  %v2173_v61 = vld [vmem:[#allocation2 + $0x4158] sm:$0xff]  ;;  %v2190_v2 = vld [vmem:[#allocation2 + $0x41e0] sm:$0xff] }
 0x439   :  { %5415 = vmatpush.msrb.mxu0 %v2071_v3  ;;  %5434 = vmatpush.msrb.mxu1 %v2088_v4  ;;  %v3642_v3 = vpop.f32.mrf.mxu3  ;;  %v2140_v4 = vld [vmem:[#allocation2 + $0x4050] sm:$0xff] }
 0x43a   :  { %5455 = vmatpush.msrb.mxu2 %v2103_v5  ;;  %5474 = vmatpush.msrb.mxu3 %v2120_v8  ;;  %v2157_v5 = vld [vmem:[#allocation2 + $0x40d8] sm:$0xff]  ;;  %v2172_v8 = vld [vmem:[#allocation2 + $0x4150] sm:$0xff] }
 0x43b   :  { %5416 = vmatpush.msrb.mxu0 %v2070_v36  ;;  %5435 = vmatpush.msrb.mxu1 %v2087_v7  ;;  %v3662_v36 = vpop.f32.mrf.mxu0  ;;  %v2139_v7 = vld [vmem:[#allocation2 + $0x4048] sm:$0xff] }
 0x43c   :  { %5456 = vmatpush.msrb.mxu2 %v2102_v10  ;;  %5475 = vmatpush.msrb.mxu3 %v2119_v13  ;;  %v3643_v10 = vadd.f32 %v3642_v3, %v3623_v63  ;;  %v2171_v13 = vld [vmem:[#allocation2 + $0x4148] sm:$0xff]  ;;  %v2241_v3 = vld [vmem:[#allocation2 + $0x4378] sm:$0xff] }
 0x43d   :  { %5417 = vmatpush.msrb.mxu0 %v2069_v14  ;;  %5436 = vmatpush.msrb.mxu1 %v2086_v18  ;;  %v2188_v14 = vld [vmem:[#allocation2 + $0x41d0] sm:$0xff]  ;;  %v2138_v18 = vld [vmem:[#allocation2 + $0x4040] sm:$0xff]  ;;  %v2740_v63 = vld.sshfl [vmem:[#allocation1 + $0x10] sm:$0xff pattern:$0x73625140] }
 0x43e   :  { %5457 = vmatpush.msrb.mxu2 %v2101_v29  ;;  %5476 = vmatpush.msrb.mxu3 %v2118_v16  ;;  %v3663_v29 = vadd.f32 %v3662_v36, %v3643_v10  ;;  %v2170_v16 = vld [vmem:[#allocation2 + $0x4140] sm:$0xff]  ;;  %v2741_v36 = vld.sshfl [vmem:[#allocation1 + $0x18] sm:$0xff pattern:$0x73625140]  ;;  %v2225_v10 = vld [vmem:[#allocation2 + $0x42f8] sm:$0xff] }
 0x43f   :  { %5418 = vmatpush.msrb.mxu0 %v2068_v22  ;;  %5437 = vmatpush.msrb.mxu1 %v2085_v11  ;;  %v3682_v22 = vpop.f32.mrf.mxu1  ;;  %v2137_v11 = vld [vmem:[#allocation2 + $0x4038] sm:$0xff] }
 0x440   :  { %5458 = vmatpush.msrb.mxu2 %v2100_v23  ;;  %5477 = vmatpush.msrb.mxu3 %v2117_v24  ;;  %v2154_v23 = vld [vmem:[#allocation2 + $0x40c0] sm:$0xff]  ;;  %v2169_v24 = vld [vmem:[#allocation2 + $0x4138] sm:$0xff]  ;;  %v3683_v27 = vadd.f32 %v3682_v22, %v3663_v29  ;;  %v2224_v29 = vld [vmem:[#allocation2 + $0x42f0] sm:$0xff] }
 0x441   :  { %5419 = vmatpush.msrb.mxu0 %v2067_v25  ;;  %5438 = vmatpush.msrb.mxu1 %v2084_v26  ;;  %v3702_v25 = vpop.f32.mrf.mxu2  ;;  %v2136_v26 = vld [vmem:[#allocation2 + $0x4030] sm:$0xff]  ;;  %v3722_v38 = vpop.f32.mrf.mxu3 }
 0x442   :  { %5459 = vmatpush.msrb.mxu2 %v2099_v32  ;;  %5478 = vmatpush.msrb.mxu3 %v2116_v54  ;;  %v2168_v32 = vld [vmem:[#allocation2 + $0x4130] sm:$0xff]  ;;  %v2185_v54 = vld [vmem:[#allocation2 + $0x41b8] sm:$0xff]  ;;  %v3703_v49 = vadd.f32 %v3702_v25, %v3683_v27  ;;  %v2255_v25 = vld [vmem:[#allocation2 + $0x43e8] sm:$0xff] }
 0x443   :  { %5420 = vmatpush.msrb.mxu0 %v2066_v33  ;;  %5439 = vmatpush.msrb.mxu1 %v2083_v34  ;;  %v2135_v33 = vld [vmem:[#allocation2 + $0x4028] sm:$0xff]  ;;  %v2152_v34 = vld [vmem:[#allocation2 + $0x40b0] sm:$0xff]  ;;  %v3742_v12 = vpop.f32.mrf.mxu0  ;;  %v2222_v27 = vld [vmem:[#allocation2 + $0x42e0] sm:$0xff] }
 0x444   :  { %5460 = vmatpush.msrb.mxu2 %v2098_v19  ;;  %5479 = vmatpush.msrb.mxu3 %v2115_v35  ;;  %v2167_v19 = vld [vmem:[#allocation2 + $0x4128] sm:$0xff]  ;;  %v2184_v35 = vld [vmem:[#allocation2 + $0x41b0] sm:$0xff]  ;;  %v3723_v42 = vadd.f32 %v3722_v38, %v3703_v49  ;;  %v2221_v49 = vld [vmem:[#allocation2 + $0x42d8] sm:$0xff] }
 0x445   :  { %5421 = vmatmul.f32.vlgmr.msrb.gmra.mxu0 %v2732_v62  ;;  %5461 = vmatmul.f32.vlgmr.msrb.gmra.mxu2 %v2734_v39  ;;  %v2134_v62 = vld [vmem:[#allocation2 + $0x4020] sm:$0xff]  ;;  %v2151_v39 = vld [vmem:[#allocation2 + $0x40a8] sm:$0xff]  ;;  %v2256_v22 = vld [vmem:[#allocation2 + $0x43f0] sm:$0xff] }
 0x446   :  { %5485 = vmatpush.msra.mxu0 %v2145_v40  ;;  %5525 = vmatpush.msra.mxu2 %v2177_v41  ;;  %v2166_v40 = vld [vmem:[#allocation2 + $0x4120] sm:$0xff]  ;;  %v2183_v41 = vld [vmem:[#allocation2 + $0x41a8] sm:$0xff]  ;;  %v3743_v50 = vadd.f32 %v3742_v12, %v3723_v42  ;;  %v2253_v38 = vld [vmem:[#allocation2 + $0x43d8] sm:$0xff] }
 0x447   :  { %5440 = vmatpush.msrb.mxu1 %v2082_v0  ;;  %5480 = vmatpush.msrb.mxu3 %v2114_v57  ;;  %v2133_v0 = vld [vmem:[#allocation2 + $0x4018] sm:$0xff]  ;;  %v2150_v57 = vld [vmem:[#allocation2 + $0x40a0] sm:$0xff]  ;;  %v3762_v48 = vpop.f32.mrf.mxu1  ;;  %v2252_v12 = vld [vmem:[#allocation2 + $0x43d0] sm:$0xff] }
 0x448   :  { %5441 = vmatmul.f32.vlgmr.msrb.gmra.mxu1 %v2733_v43  ;;  %5481 = vmatmul.f32.vlgmr.msrb.gmra.mxu3 %v2735_v44  ;;  %v2165_v43 = vld [vmem:[#allocation2 + $0x4118] sm:$0xff]  ;;  %v2182_v44 = vld [vmem:[#allocation2 + $0x41a0] sm:$0xff]  ;;  %v2219_v42 = vld [vmem:[#allocation2 + $0x42c8] sm:$0xff] }
 0x449   :  { %5486 = vmatpush.msra.mxu0 %v2144_v20  ;;  %5505 = vmatpush.msra.mxu1 %v2161_v45  ;;  %v2132_v20 = vld [vmem:[#allocation2 + $0x4010] sm:$0xff]  ;;  %v2149_v45 = vld [vmem:[#allocation2 + $0x4098] sm:$0xff] }
 0x44a   :  { %5526 = vmatpush.msra.mxu2 %v2176_v46  ;;  %5545 = vmatpush.msra.mxu3 %v2193_v47  ;;  %v2164_v46 = vld [vmem:[#allocation2 + $0x4110] sm:$0xff]  ;;  %v2181_v47 = vld [vmem:[#allocation2 + $0x4198] sm:$0xff] }
 0x44b   :  { %5487 = vmatpush.msra.mxu0 %v2143_v6  ;;  %5506 = vmatpush.msra.mxu1 %v2160_v51  ;;  %v2131_v6 = vld [vmem:[#allocation2 + $0x4008] sm:$0xff]  ;;  %v2148_v51 = vld [vmem:[#allocation2 + $0x4090] sm:$0xff] }
 0x44c   :  { %5527 = vmatpush.msra.mxu2 %v2175_v52  ;;  %5546 = vmatpush.msra.mxu3 %v2192_v1  ;;  %v76_v52 = vld [vmem:[%s6489_s0 + $0x108] sm:$0xff]  ;;  %v2163_v1 = vld [vmem:[#allocation2 + $0x4108] sm:$0xff] }
 0x44d   :  { %5488 = vmatpush.msra.mxu0 %v2142_v55  ;;  %5507 = vmatpush.msra.mxu1 %v2159_v58  ;;  %2737 = vst [vmem:[#allocation1 + $0x20] ss:$4 sm:$0xff] %v76_v52  ;;  %v3782_v55 = vpop.f32.mrf.mxu2  ;;  %v2130_v58 = vld [vmem:[#allocation2 + $0x4000] sm:$0xff]  ;;  %v2217_v52 = vld [vmem:[#allocation2 + $0x42b8] sm:$0xff] }
 0x44e   :  { %5528 = vmatpush.msra.mxu2 %v2174_v59  ;;  %5547 = vmatpush.msra.mxu3 %v2191_v28  ;;  %v3763_v59 = vadd.f32 %v3762_v48, %v3743_v50  ;;  %v2162_v28 = vld [vmem:[#allocation2 + $0x4100] sm:$0xff] }
 0x44f   :  { %5489 = vmatpush.msra.mxu0 %v2141_v60  ;;  %5508 = vmatpush.msra.mxu1 %v2158_v17  ;;  %v2179_v60 = vld [vmem:[#allocation2 + $0x4188] sm:$0xff]  ;;  %v2738_v17 = vld.sshfl [vmem:[#allocation1] sm:$0xff pattern:$0x73625140]  ;;  %v2218_v50 = vld [vmem:[#allocation2 + $0x42c0] sm:$0xff] }
 0x450   :  { %5529 = vmatpush.msra.mxu2 %v2173_v61  ;;  %5548 = vmatpush.msra.mxu3 %v2190_v2  ;;  %v3783_v61 = vadd.f32 %v3782_v55, %v3763_v59  ;;  %v2209_v2 = vld [vmem:[#allocation2 + $0x4278] sm:$0xff]  ;;  %v2250_v48 = vld [vmem:[#allocation2 + $0x43c0] sm:$0xff] }
 0x451   :  { %5490 = vmatpush.msra.mxu0 %v2140_v4  ;;  %5509 = vmatpush.msra.mxu1 %v2157_v5  ;;  %v3802_v4 = vpop.f32.mrf.mxu3  ;;  %v2146_v5 = vld [vmem:[#allocation2 + $0x4080] sm:$0xff] }
 0x452   :  { %5530 = vmatpush.msra.mxu2 %v2172_v8  ;;  %5549 = vmatpush.msra.mxu3 %v2189_v30  ;;  %v2178_v8 = vld [vmem:[#allocation2 + $0x4180] sm:$0xff] }
 0x453   :  { %5491 = vmatpush.msra.mxu0 %v2139_v7  ;;  %5510 = vmatpush.msra.mxu1 %v2156_v9  ;;  %v2739_v30 = vld.sshfl [vmem:[#allocation1 + $0x8] sm:$0xff pattern:$0x73625140]  ;;  %v3822_v7 = vpop.f32.mrf.mxu0  ;;  %v2208_v9 = vld [vmem:[#allocation2 + $0x4270] sm:$0xff] }
 0x454   :  { %5531 = vmatpush.msra.mxu2 %v2171_v13  ;;  %5550 = vmatpush.msra.mxu3 %v2188_v14  ;;  %v3803_v13 = vadd.f32 %v3802_v4, %v3783_v61  ;;  %v2240_v14 = vld [vmem:[#allocation2 + $0x4370] sm:$0xff] }
 0x455   :  { %5492 = vmatpush.msra.mxu0 %v2138_v18  ;;  %5511 = vmatpush.msra.mxu1 %v2155_v15  ;;  %v2257_v18 = vld [vmem:[#allocation2 + $0x43f8] sm:$0xff]  ;;  %v2207_v15 = vld [vmem:[#allocation2 + $0x4268] sm:$0xff] }
 0x456   :  { %5532 = vmatpush.msra.mxu2 %v2170_v16  ;;  %5551 = vmatpush.msra.mxu3 %v2187_v21  ;;  %v3823_v16 = vadd.f32 %v3822_v7, %v3803_v13  ;;  %v2239_v21 = vld [vmem:[#allocation2 + $0x4368] sm:$0xff] }
 0x457   :  { %5493 = vmatpush.msra.mxu0 %v2137_v11  ;;  %5512 = vmatpush.msra.mxu1 %v2154_v23  ;;  %v3842_v11 = vpop.f32.mrf.mxu1  ;;  %v2206_v23 = vld [vmem:[#allocation2 + $0x4260] sm:$0xff] }
 0x458   :  { %5533 = vmatpush.msra.mxu2 %v2169_v24  ;;  %5552 = vmatpush.msra.mxu3 %v2186_v31  ;;  %v2223_v24 = vld [vmem:[#allocation2 + $0x42e8] sm:$0xff]  ;;  %v2238_v31 = vld [vmem:[#allocation2 + $0x4360] sm:$0xff] }
 0x459   :  { %5494 = vmatpush.msra.mxu0 %v2136_v26  ;;  %5513 = vmatpush.msra.mxu1 %v2153_v37  ;;  %v3862_v26 = vpop.f32.mrf.mxu2  ;;  %v2205_v37 = vld [vmem:[#allocation2 + $0x4258] sm:$0xff] }
 0x45a   :  { %5534 = vmatpush.msra.mxu2 %v2168_v32  ;;  %5553 = vmatpush.msra.mxu3 %v2185_v54  ;;  %v3843_v32 = vadd.f32 %v3842_v11, %v3823_v16  ;;  %v2237_v54 = vld [vmem:[#allocation2 + $0x4358] sm:$0xff]  ;;  %v77_v16 = vld [vmem:[%s6489_s0 + $0x110] sm:$0xff]  ;;  %v2244_v11 = vld [vmem:[#allocation2 + $0x4390] sm:$0xff] }
 0x45b   :  { %5495 = vmatpush.msra.mxu0 %v2135_v33  ;;  %5514 = vmatpush.msra.mxu1 %v2152_v34  ;;  %v2254_v33 = vld [vmem:[#allocation2 + $0x43e0] sm:$0xff]  ;;  %v2204_v34 = vld [vmem:[#allocation2 + $0x4250] sm:$0xff]  ;;  %2746 = vst [vmem:[#allocation1] ss:$4 sm:$0xff] %v77_v16  ;;  %v2281_v16 = vld [vmem:[#allocation2 + $0x44b8] sm:$0xff] }
 0x45c   :  { %5535 = vmatpush.msra.mxu2 %v2167_v19  ;;  %5554 = vmatpush.msra.mxu3 %v2184_v35  ;;  %v3863_v19 = vadd.f32 %v3862_v26, %v3843_v32  ;;  %v2236_v35 = vld [vmem:[#allocation2 + $0x4350] sm:$0xff]  ;;  %v2243_v26 = vld [vmem:[#allocation2 + $0x4388] sm:$0xff] }
 0x45d   :  { %5496 = vmatpush.msra.mxu0 %v2134_v62  ;;  %5515 = vmatpush.msra.mxu1 %v2151_v39  ;;  %v3882_v62 = vpop.f32.mrf.mxu3  ;;  %v2203_v39 = vld [vmem:[#allocation2 + $0x4248] sm:$0xff] }
 0x45e   :  { %5536 = vmatpush.msra.mxu2 %v2166_v40  ;;  %5555 = vmatpush.msra.mxu3 %v2183_v41  ;;  %v2220_v40 = vld [vmem:[#allocation2 + $0x42d0] sm:$0xff]  ;;  %v2235_v41 = vld [vmem:[#allocation2 + $0x4348] sm:$0xff] }
 0x45f   :  { %5497 = vmatpush.msra.mxu0 %v2133_v0  ;;  %5516 = vmatpush.msra.mxu1 %v2150_v57  ;;  %v3902_v0 = vpop.f32.mrf.mxu0  ;;  %v2202_v57 = vld [vmem:[#allocation2 + $0x4240] sm:$0xff]  ;;  %v2744_v32 = vld.sshfl [vmem:[#allocation1 + $0x30] sm:$0xff pattern:$0x73625140] }
 0x460   :  { %5537 = vmatpush.msra.mxu2 %v2165_v43  ;;  %5556 = vmatpush.msra.mxu3 %v2182_v44  ;;  %v3883_v43 = vadd.f32 %v3882_v62, %v3863_v19  ;;  %v2234_v44 = vld [vmem:[#allocation2 + $0x4340] sm:$0xff]  ;;  %v2745_v62 = vld.sshfl [vmem:[#allocation1 + $0x38] sm:$0xff pattern:$0x73625140] }
 0x461   :  { %5498 = vmatpush.msra.mxu0 %v2132_v20  ;;  %5517 = vmatpush.msra.mxu1 %v2149_v45  ;;  %v2251_v20 = vld [vmem:[#allocation2 + $0x43c8] sm:$0xff]  ;;  %v2201_v45 = vld [vmem:[#allocation2 + $0x4238] sm:$0xff]  ;;  %v3942_v55 = vpop.f32.mrf.mxu2  ;;  %v2242_v19 = vld [vmem:[#allocation2 + $0x4380] sm:$0xff] }
 0x462   :  { %5538 = vmatpush.msra.mxu2 %v2164_v46  ;;  %5557 = vmatpush.msra.mxu3 %v2181_v47  ;;  %v3903_v46 = vadd.f32 %v3902_v0, %v3883_v43  ;;  %v2233_v47 = vld [vmem:[#allocation2 + $0x4338] sm:$0xff]  ;;  %v2288_v43 = vld [vmem:[#allocation2 + $0x44f0] sm:$0xff] }
 0x463   :  { %5499 = vmatpush.msra.mxu0 %v2131_v6  ;;  %5518 = vmatpush.msra.mxu1 %v2148_v51  ;;  %v3922_v6 = vpop.f32.mrf.mxu1  ;;  %v2200_v51 = vld [vmem:[#allocation2 + $0x4230] sm:$0xff]  ;;  %v2321_v0 = vld [vmem:[#allocation2 + $0x45f8] sm:$0xff] }
 0x464   :  { %5539 = vmatpush.msra.mxu2 %v2163_v1  ;;  %5558 = vmatpush.msra.mxu3 %v2180_v53  ;;  %v2232_v1 = vld [vmem:[#allocation2 + $0x4330] sm:$0xff]  ;;  %v2249_v53 = vld [vmem:[#allocation2 + $0x43b8] sm:$0xff]  ;;  %v3923_v59 = vadd.f32 %v3922_v6, %v3903_v46  ;;  %v2287_v46 = vld [vmem:[#allocation2 + $0x44e8] sm:$0xff] }
 0x465   :  { %5500 = vmatpush.msra.mxu0 %v2130_v58  ;;  %5519 = vmatpush.msra.mxu1 %v2147_v56  ;;  %v2199_v58 = vld [vmem:[#allocation2 + $0x4228] sm:$0xff]  ;;  %v2216_v56 = vld [vmem:[#allocation2 + $0x42b0] sm:$0xff]  ;;  %v3962_v4 = vpop.f32.mrf.mxu3 }
 0x466   :  { %5540 = vmatpush.msra.mxu2 %v2162_v28  ;;  %5559 = vmatpush.msra.mxu3 %v2179_v60  ;;  %v2231_v28 = vld [vmem:[#allocation2 + $0x4328] sm:$0xff]  ;;  %v2248_v60 = vld [vmem:[#allocation2 + $0x43b0] sm:$0xff]  ;;  %v3943_v61 = vadd.f32 %v3942_v55, %v3923_v59  ;;  %v2318_v55 = vld [vmem:[#allocation2 + $0x45e0] sm:$0xff] }
 0x467   :  { %5501 = vmatmul.f32.vlgmr.msra.gmra.mxu0 %v2738_v17  ;;  %5541 = vmatmul.f32.vlgmr.msra.gmra.mxu2 %v2740_v63  ;;  %v2198_v17 = vld [vmem:[#allocation2 + $0x4220] sm:$0xff]  ;;  %v2215_v63 = vld [vmem:[#allocation2 + $0x42a8] sm:$0xff]  ;;  %v3982_v7 = vpop.f32.mrf.mxu0  ;;  %v2285_v59 = vld [vmem:[#allocation2 + $0x44d8] sm:$0xff] }
 0x468   :  { %5565 = vmatpush.msrb.mxu0 %v2209_v2  ;;  %5605 = vmatpush.msrb.mxu2 %v2241_v3  ;;  %v2230_v2 = vld [vmem:[#allocation2 + $0x4320] sm:$0xff]  ;;  %v2247_v3 = vld [vmem:[#allocation2 + $0x43a8] sm:$0xff]  ;;  %v3963_v13 = vadd.f32 %v3962_v4, %v3943_v61  ;;  %v2284_v61 = vld [vmem:[#allocation2 + $0x44d0] sm:$0xff] }
 0x469   :  { %5520 = vmatpush.msra.mxu1 %v2146_v5  ;;  %5560 = vmatpush.msra.mxu3 %v2178_v8  ;;  %v2197_v5 = vld [vmem:[#allocation2 + $0x4218] sm:$0xff]  ;;  %v2214_v8 = vld [vmem:[#allocation2 + $0x42a0] sm:$0xff]  ;;  %v2319_v6 = vld [vmem:[#allocation2 + $0x45e8] sm:$0xff] }
 0x46a   :  { %5521 = vmatmul.f32.vlgmr.msra.gmra.mxu1 %v2739_v30  ;;  %5561 = vmatmul.f32.vlgmr.msra.gmra.mxu3 %v2741_v36  ;;  %v2229_v30 = vld [vmem:[#allocation2 + $0x4318] sm:$0xff]  ;;  %v2246_v36 = vld [vmem:[#allocation2 + $0x43a0] sm:$0xff]  ;;  %v2316_v4 = vld [vmem:[#allocation2 + $0x45d0] sm:$0xff] }
 0x46b   :  { %5566 = vmatpush.msrb.mxu0 %v2208_v9  ;;  %5585 = vmatpush.msrb.mxu1 %v2225_v10  ;;  %v2196_v9 = vld [vmem:[#allocation2 + $0x4210] sm:$0xff]  ;;  %v2213_v10 = vld [vmem:[#allocation2 + $0x4298] sm:$0xff] }
 0x46c   :  { %5606 = vmatpush.msrb.mxu2 %v2240_v14  ;;  %5625 = vmatpush.msrb.mxu3 %v2257_v18  ;;  %v2228_v14 = vld [vmem:[#allocation2 + $0x4310] sm:$0xff]  ;;  %v2245_v18 = vld [vmem:[#allocation2 + $0x4398] sm:$0xff] }
 0x46d   :  { %5567 = vmatpush.msrb.mxu0 %v2207_v15  ;;  %5586 = vmatpush.msrb.mxu1 %v2224_v29  ;;  %v2195_v15 = vld [vmem:[#allocation2 + $0x4208] sm:$0xff]  ;;  %v2212_v29 = vld [vmem:[#allocation2 + $0x4290] sm:$0xff] }
 0x46e   :  { %5607 = vmatpush.msrb.mxu2 %v2239_v21  ;;  %5626 = vmatpush.msrb.mxu3 %v2256_v22  ;;  %v3983_v21 = vadd.f32 %v3982_v7, %v3963_v13  ;;  %v2227_v22 = vld [vmem:[#allocation2 + $0x4308] sm:$0xff]  ;;  %v2282_v13 = vld [vmem:[#allocation2 + $0x44c0] sm:$0xff] }
 0x46f   :  { %5568 = vmatpush.msrb.mxu0 %v2206_v23  ;;  %5587 = vmatpush.msrb.mxu1 %v2223_v24  ;;  %v4002_v23 = vpop.f32.mrf.mxu1  ;;  %v2194_v24 = vld [vmem:[#allocation2 + $0x4200] sm:$0xff]  ;;  %v2315_v7 = vld [vmem:[#allocation2 + $0x45c8] sm:$0xff] }
 0x470   :  { %5608 = vmatpush.msrb.mxu2 %v2238_v31  ;;  %5627 = vmatpush.msrb.mxu3 %v2255_v25  ;;  %v2211_v31 = vld [vmem:[#allocation2 + $0x4288] sm:$0xff]  ;;  %v2226_v25 = vld [vmem:[#allocation2 + $0x4300] sm:$0xff] }
 0x471   :  { %5569 = vmatpush.msrb.mxu0 %v2205_v37  ;;  %5588 = vmatpush.msrb.mxu1 %v2222_v27  ;;  %v4022_v37 = vpop.f32.mrf.mxu2  ;;  %v2742_v27 = vld.sshfl [vmem:[#allocation1 + $0x20] sm:$0xff pattern:$0x73625140] }
 0x472   :  { %5609 = vmatpush.msrb.mxu2 %v2237_v54  ;;  %5628 = vmatpush.msrb.mxu3 %v2254_v33  ;;  %v4003_v54 = vadd.f32 %v4002_v23, %v3983_v21  ;;  %v2273_v33 = vld [vmem:[#allocation2 + $0x4478] sm:$0xff] }
 0x473   :  { %5570 = vmatpush.msrb.mxu0 %v2204_v34  ;;  %5589 = vmatpush.msrb.mxu1 %v2221_v49  ;;  %v2305_v34 = vld [vmem:[#allocation2 + $0x4578] sm:$0xff]  ;;  %v2210_v49 = vld [vmem:[#allocation2 + $0x4280] sm:$0xff] }
 0x474   :  { %5610 = vmatpush.msrb.mxu2 %v2236_v35  ;;  %5629 = vmatpush.msrb.mxu3 %v2253_v38  ;;  %v4023_v35 = vadd.f32 %v4022_v37, %v4003_v54  ;;  %v2743_v38 = vld.sshfl [vmem:[#allocation1 + $0x28] sm:$0xff pattern:$0x73625140] }
 0x475   :  { %5571 = vmatpush.msrb.mxu0 %v2203_v39  ;;  %5590 = vmatpush.msrb.mxu1 %v2220_v40  ;;  %v4042_v39 = vpop.f32.mrf.mxu3  ;;  %v2272_v40 = vld [vmem:[#allocation2 + $0x4470] sm:$0xff] }
 0x476   :  { %5611 = vmatpush.msrb.mxu2 %v2235_v41  ;;  %5630 = vmatpush.msrb.mxu3 %v2252_v12  ;;  %v2289_v41 = vld [vmem:[#allocation2 + $0x44f8] sm:$0xff]  ;;  %v2304_v12 = vld [vmem:[#allocation2 + $0x4570] sm:$0xff] }
 0x477   :  { %5572 = vmatpush.msrb.mxu0 %v2202_v57  ;;  %5591 = vmatpush.msrb.mxu1 %v2219_v42  ;;  %v4062_v57 = vpop.f32.mrf.mxu0  ;;  %v2271_v42 = vld [vmem:[#allocation2 + $0x4468] sm:$0xff] }
 0x478   :  { %5612 = vmatpush.msrb.mxu2 %v2234_v44  ;;  %5631 = vmatpush.msrb.mxu3 %v2251_v20  ;;  %v4043_v44 = vadd.f32 %v4042_v39, %v4023_v35  ;;  %v2303_v20 = vld [vmem:[#allocation2 + $0x4568] sm:$0xff] }
 0x479   :  { %5573 = vmatpush.msrb.mxu0 %v2201_v45  ;;  %5592 = vmatpush.msrb.mxu1 %v2218_v50  ;;  %v2320_v45 = vld [vmem:[#allocation2 + $0x45f0] sm:$0xff]  ;;  %v2270_v50 = vld [vmem:[#allocation2 + $0x4460] sm:$0xff] }
 0x47a   :  { %5613 = vmatpush.msrb.mxu2 %v2233_v47  ;;  %5632 = vmatpush.msrb.mxu3 %v2250_v48  ;;  %v4063_v47 = vadd.f32 %v4062_v57, %v4043_v44  ;;  %v2302_v48 = vld [vmem:[#allocation2 + $0x4560] sm:$0xff]  ;;  %v78_v44 = vld [vmem:[%s6489_s0 + $0x118] sm:$0xff] }
 0x47b   :  { %5574 = vmatpush.msrb.mxu0 %v2200_v51  ;;  %5593 = vmatpush.msrb.mxu1 %v2217_v52  ;;  %v4082_v51 = vpop.f32.mrf.mxu1  ;;  %v2269_v52 = vld [vmem:[#allocation2 + $0x4458] sm:$0xff]  ;;  %2747 = vst [vmem:[#allocation1 + $0x20] ss:$4 sm:$0xff] %v78_v44 }
 0x47c   :  { %5614 = vmatpush.msrb.mxu2 %v2232_v1  ;;  %5633 = vmatpush.msrb.mxu3 %v2249_v53  ;;  %v2286_v1 = vld [vmem:[#allocation2 + $0x44e0] sm:$0xff]  ;;  %v2301_v53 = vld [vmem:[#allocation2 + $0x4558] sm:$0xff] }
 0x47d   :  { %5575 = vmatpush.msrb.mxu0 %v2199_v58  ;;  %5594 = vmatpush.msrb.mxu1 %v2216_v56  ;;  %v4102_v58 = vpop.f32.mrf.mxu2  ;;  %v2268_v56 = vld [vmem:[#allocation2 + $0x4450] sm:$0xff]  ;;  %v2345_v44 = vld [vmem:[#allocation2 + $0x46b8] sm:$0xff] }
 0x47e   :  { %5615 = vmatpush.msrb.mxu2 %v2231_v28  ;;  %5634 = vmatpush.msrb.mxu3 %v2248_v60  ;;  %v4083_v28 = vadd.f32 %v4082_v51, %v4063_v47  ;;  %v2300_v60 = vld [vmem:[#allocation2 + $0x4550] sm:$0xff]  ;;  %v2275_v47 = vld [vmem:[#allocation2 + $0x4488] sm:$0xff] }
 0x47f   :  { %5576 = vmatpush.msrb.mxu0 %v2198_v17  ;;  %5595 = vmatpush.msrb.mxu1 %v2215_v63  ;;  %v2317_v17 = vld [vmem:[#allocation2 + $0x45d8] sm:$0xff]  ;;  %v2267_v63 = vld [vmem:[#allocation2 + $0x4448] sm:$0xff] }
 0x480   :  { %5616 = vmatpush.msrb.mxu2 %v2230_v2  ;;  %5635 = vmatpush.msrb.mxu3 %v2247_v3  ;;  %v4103_v2 = vadd.f32 %v4102_v58, %v4083_v28  ;;  %v2299_v3 = vld [vmem:[#allocation2 + $0x4548] sm:$0xff]  ;;  %v2369_v58 = vld [vmem:[#allocation2 + $0x4778] sm:$0xff]  ;;  %v2306_v28 = vld [vmem:[#allocation2 + $0x4580] sm:$0xff] }
 0x481   :  { %5577 = vmatpush.msrb.mxu0 %v2197_v5  ;;  %5596 = vmatpush.msrb.mxu1 %v2214_v8  ;;  %v4122_v5 = vpop.f32.mrf.mxu3  ;;  %v2266_v8 = vld [vmem:[#allocation2 + $0x4440] sm:$0xff]  ;;  %v2307_v51 = vld [vmem:[#allocation2 + $0x4588] sm:$0xff] }
 0x482   :  { %5617 = vmatpush.msrb.mxu2 %v2229_v30  ;;  %5636 = vmatpush.msrb.mxu3 %v2246_v36  ;;  %v2283_v30 = vld [vmem:[#allocation2 + $0x44c8] sm:$0xff]  ;;  %v2298_v36 = vld [vmem:[#allocation2 + $0x4540] sm:$0xff] }
 0x483   :  { %5578 = vmatpush.msrb.mxu0 %v2196_v9  ;;  %5597 = vmatpush.msrb.mxu1 %v2213_v10  ;;  %v4142_v9 = vpop.f32.mrf.mxu0  ;;  %v2265_v10 = vld [vmem:[#allocation2 + $0x4438] sm:$0xff]  ;;  %v4162_v23 = vpop.f32.mrf.mxu1 }
 0x484   :  { %5618 = vmatpush.msrb.mxu2 %v2228_v14  ;;  %5637 = vmatpush.msrb.mxu3 %v2245_v18  ;;  %v4123_v14 = vadd.f32 %v4122_v5, %v4103_v2  ;;  %v2297_v18 = vld [vmem:[#allocation2 + $0x4538] sm:$0xff] }
 0x485   :  { %5579 = vmatpush.msrb.mxu0 %v2195_v15  ;;  %5598 = vmatpush.msrb.mxu1 %v2212_v29  ;;  %v2314_v15 = vld [vmem:[#allocation2 + $0x45c0] sm:$0xff]  ;;  %v2264_v29 = vld [vmem:[#allocation2 + $0x4430] sm:$0xff]  ;;  %v4182_v37 = vpop.f32.mrf.mxu2  ;;  %v2353_v2 = vld [vmem:[#allocation2 + $0x46f8] sm:$0xff] }
 0x486   :  { %5619 = vmatpush.msrb.mxu2 %v2227_v22  ;;  %5638 = vmatpush.msrb.mxu3 %v2244_v11  ;;  %v4143_v21 = vadd.f32 %v4142_v9, %v4123_v14  ;;  %v2296_v22 = vld [vmem:[#allocation2 + $0x4530] sm:$0xff]  ;;  %v2313_v11 = vld [vmem:[#allocation2 + $0x45b8] sm:$0xff]  ;;  %v2351_v14 = vld [vmem:[#allocation2 + $0x46e8] sm:$0xff] }
 0x487   :  { %5580 = vmatpush.msrb.mxu0 %v2194_v24  ;;  %5599 = vmatpush.msrb.mxu1 %v2211_v31  ;;  %v2263_v24 = vld [vmem:[#allocation2 + $0x4428] sm:$0xff]  ;;  %v2280_v31 = vld [vmem:[#allocation2 + $0x44b0] sm:$0xff]  ;;  %v2385_v5 = vld [vmem:[#allocation2 + $0x47f8] sm:$0xff] }
 0x488   :  { %5620 = vmatpush.msrb.mxu2 %v2226_v25  ;;  %5639 = vmatpush.msrb.mxu3 %v2243_v26  ;;  %v2295_v25 = vld [vmem:[#allocation2 + $0x4528] sm:$0xff]  ;;  %v2312_v26 = vld [vmem:[#allocation2 + $0x45b0] sm:$0xff]  ;;  %v4163_v54 = vadd.f32 %v4162_v23, %v4143_v21  ;;  %v2350_v21 = vld [vmem:[#allocation2 + $0x46e0] sm:$0xff] }
 0x489   :  { %5581 = vmatmul.f32.vlgmr.msrb.gmra.mxu0 %v2742_v27  ;;  %5621 = vmatmul.f32.vlgmr.msrb.gmra.mxu2 %v2744_v32  ;;  %v2262_v27 = vld [vmem:[#allocation2 + $0x4420] sm:$0xff]  ;;  %v2279_v32 = vld [vmem:[#allocation2 + $0x44a8] sm:$0xff]  ;;  %v4202_v39 = vpop.f32.mrf.mxu3  ;;  %v2384_v9 = vld [vmem:[#allocation2 + $0x47f0] sm:$0xff] }
 0x48a   :  { %5645 = vmatpush.msra.mxu0 %v2273_v33  ;;  %5685 = vmatpush.msra.mxu2 %v2305_v34  ;;  %v2294_v33 = vld [vmem:[#allocation2 + $0x4520] sm:$0xff]  ;;  %v2311_v34 = vld [vmem:[#allocation2 + $0x45a8] sm:$0xff]  ;;  %v4183_v35 = vadd.f32 %v4182_v37, %v4163_v54  ;;  %v2381_v37 = vld [vmem:[#allocation2 + $0x47d8] sm:$0xff] }
 0x48b   :  { %5600 = vmatpush.msrb.mxu1 %v2210_v49  ;;  %5640 = vmatpush.msrb.mxu3 %v2242_v19  ;;  %v2261_v49 = vld [vmem:[#allocation2 + $0x4418] sm:$0xff]  ;;  %v2278_v19 = vld [vmem:[#allocation2 + $0x44a0] sm:$0xff]  ;;  %v4222_v57 = vpop.f32.mrf.mxu0  ;;  %v2348_v54 = vld [vmem:[#allocation2 + $0x46d0] sm:$0xff] }
 0x48c   :  { %5601 = vmatmul.f32.vlgmr.msrb.gmra.mxu1 %v2743_v38  ;;  %5641 = vmatmul.f32.vlgmr.msrb.gmra.mxu3 %v2745_v62  ;;  %v2293_v38 = vld [vmem:[#allocation2 + $0x4518] sm:$0xff]  ;;  %v2310_v62 = vld [vmem:[#allocation2 + $0x45a0] sm:$0xff] }
 0x48d   :  { %5646 = vmatpush.msra.mxu0 %v2272_v40  ;;  %5665 = vmatpush.msra.mxu1 %v2289_v41  ;;  %v2260_v40 = vld [vmem:[#allocation2 + $0x4410] sm:$0xff]  ;;  %v2277_v41 = vld [vmem:[#allocation2 + $0x4498] sm:$0xff]  ;;  %v2382_v23 = vld [vmem:[#allocation2 + $0x47e0] sm:$0xff] }
 0x48e   :  { %5686 = vmatpush.msra.mxu2 %v2304_v12  ;;  %5705 = vmatpush.msra.mxu3 %v2321_v0  ;;  %v2292_v12 = vld [vmem:[#allocation2 + $0x4510] sm:$0xff]  ;;  %v2309_v0 = vld [vmem:[#allocation2 + $0x4598] sm:$0xff] }
 0x48f   :  { %5647 = vmatpush.msra.mxu0 %v2271_v42  ;;  %5666 = vmatpush.msra.mxu1 %v2288_v43  ;;  %v2259_v42 = vld [vmem:[#allocation2 + $0x4408] sm:$0xff]  ;;  %v2276_v43 = vld [vmem:[#allocation2 + $0x4490] sm:$0xff] }
 0x490   :  { %5687 = vmatpush.msra.mxu2 %v2303_v20  ;;  %5706 = vmatpush.msra.mxu3 %v2320_v45  ;;  %v4203_v20 = vadd.f32 %v4202_v39, %v4183_v35  ;;  %v2291_v45 = vld [vmem:[#allocation2 + $0x4508] sm:$0xff] }
 0x491   :  { %5648 = vmatpush.msra.mxu0 %v2270_v50  ;;  %5667 = vmatpush.msra.mxu1 %v2287_v46  ;;  %v2308_v50 = vld [vmem:[#allocation2 + $0x4590] sm:$0xff]  ;;  %v2258_v46 = vld [vmem:[#allocation2 + $0x4400] sm:$0xff]  ;;  %v2347_v35 = vld [vmem:[#allocation2 + $0x46c8] sm:$0xff] }
 0x492   :  { %5688 = vmatpush.msra.mxu2 %v2302_v48  ;;  %5707 = vmatpush.msra.mxu3 %v2319_v6  ;;  %v4223_v48 = vadd.f32 %v4222_v57, %v4203_v20  ;;  %v2290_v6 = vld [vmem:[#allocation2 + $0x4500] sm:$0xff]  ;;  %v2379_v39 = vld [vmem:[#allocation2 + $0x47c8] sm:$0xff] }
 0x493   :  { %5649 = vmatpush.msra.mxu0 %v2269_v52  ;;  %5668 = vmatpush.msra.mxu1 %v2286_v1  ;;  %v4242_v52 = vpop.f32.mrf.mxu1  ;;  %v2748_v1 = vld.sshfl [vmem:[#allocation1] sm:$0xff pattern:$0x73625140]  ;;  %v2378_v57 = vld [vmem:[#allocation2 + $0x47c0] sm:$0xff] }
 0x494   :  { %5689 = vmatpush.msra.mxu2 %v2301_v53  ;;  %5708 = vmatpush.msra.mxu3 %v2318_v55  ;;  %v2750_v53 = vld.sshfl [vmem:[#allocation1 + $0x10] sm:$0xff pattern:$0x73625140]  ;;  %v2337_v55 = vld [vmem:[#allocation2 + $0x4678] sm:$0xff] }
 0x495   :  { %5650 = vmatpush.msra.mxu0 %v2268_v56  ;;  %5669 = vmatpush.msra.mxu1 %v2285_v59  ;;  %v4262_v56 = vpop.f32.mrf.mxu2  ;;  %v2274_v59 = vld [vmem:[#allocation2 + $0x4480] sm:$0xff] }
 0x496   :  { %5690 = vmatpush.msra.mxu2 %v2300_v60  ;;  %5709 = vmatpush.msra.mxu3 %v2317_v17  ;;  %v4243_v60 = vadd.f32 %v4242_v52, %v4223_v48  ;;  %v2749_v17 = vld.sshfl [vmem:[#allocation1 + $0x8] sm:$0xff pattern:$0x73625140] }
 0x497   :  { %5651 = vmatpush.msra.mxu0 %v2267_v63  ;;  %5670 = vmatpush.msra.mxu1 %v2284_v61  ;;  %v2751_v63 = vld.sshfl [vmem:[#allocation1 + $0x18] sm:$0xff pattern:$0x73625140] }
 0x498   :  { %5691 = vmatpush.msra.mxu2 %v2299_v3  ;;  %5710 = vmatpush.msra.mxu3 %v2316_v4  ;;  %v2336_v61 = vld [vmem:[#allocation2 + $0x4670] sm:$0xff]  ;;  %v4263_v3 = vadd.f32 %v4262_v56, %v4243_v60 }
 0x499   :  { %5652 = vmatpush.msra.mxu0 %v2266_v8  ;;  %5671 = vmatpush.msra.mxu1 %v2283_v30  ;;  %v2368_v4 = vld [vmem:[#allocation2 + $0x4770] sm:$0xff]  ;;  %v4282_v8 = vpop.f32.mrf.mxu3  ;;  %v2335_v30 = vld [vmem:[#allocation2 + $0x4668] sm:$0xff] }
 0x49a   :  { %5692 = vmatpush.msra.mxu2 %v2298_v36  ;;  %5711 = vmatpush.msra.mxu3 %v2315_v7  ;;  %v2352_v36 = vld [vmem:[#allocation2 + $0x46f0] sm:$0xff]  ;;  %v2367_v7 = vld [vmem:[#allocation2 + $0x4768] sm:$0xff] }
 0x49b   :  { %5653 = vmatpush.msra.mxu0 %v2265_v10  ;;  %5672 = vmatpush.msra.mxu1 %v2282_v13  ;;  %v4302_v10 = vpop.f32.mrf.mxu0  ;;  %v2334_v13 = vld [vmem:[#allocation2 + $0x4660] sm:$0xff] }
 0x49c   :  { %5693 = vmatpush.msra.mxu2 %v2297_v18  ;;  %5712 = vmatpush.msra.mxu3 %v2314_v15  ;;  %v4283_v18 = vadd.f32 %v4282_v8, %v4263_v3  ;;  %v2366_v15 = vld [vmem:[#allocation2 + $0x4760] sm:$0xff] }
 0x49d   :  { %5654 = vmatpush.msra.mxu0 %v2264_v29  ;;  %5673 = vmatpush.msra.mxu1 %v2281_v16  ;;  %v2383_v29 = vld [vmem:[#allocation2 + $0x47e8] sm:$0xff]  ;;  %v2333_v16 = vld [vmem:[#allocation2 + $0x4658] sm:$0xff] }
 0x49e   :  { %5694 = vmatpush.msra.mxu2 %v2296_v22  ;;  %5713 = vmatpush.msra.mxu3 %v2313_v11  ;;  %v4303_v22 = vadd.f32 %v4302_v10, %v4283_v18  ;;  %v2365_v11 = vld [vmem:[#allocation2 + $0x4758] sm:$0xff]  ;;  %v2372_v10 = vld [vmem:[#allocation2 + $0x4790] sm:$0xff]  ;;  %v2339_v18 = vld [vmem:[#allocation2 + $0x4688] sm:$0xff] }
 0x49f   :  { %5655 = vmatpush.msra.mxu0 %v2263_v24  ;;  %5674 = vmatpush.msra.mxu1 %v2280_v31  ;;  %v4322_v24 = vpop.f32.mrf.mxu1  ;;  %v2332_v31 = vld [vmem:[#allocation2 + $0x4650] sm:$0xff] }
 0x4a0   :  { %5695 = vmatpush.msra.mxu2 %v2295_v25  ;;  %5714 = vmatpush.msra.mxu3 %v2312_v26  ;;  %v2349_v25 = vld [vmem:[#allocation2 + $0x46d8] sm:$0xff]  ;;  %v2364_v26 = vld [vmem:[#allocation2 + $0x4750] sm:$0xff] }
 0x4a1   :  { %5656 = vmatpush.msra.mxu0 %v2262_v27  ;;  %5675 = vmatpush.msra.mxu1 %v2279_v32  ;;  %v4342_v27 = vpop.f32.mrf.mxu2  ;;  %v2331_v32 = vld [vmem:[#allocation2 + $0x4648] sm:$0xff] }
 0x4a2   :  { %5696 = vmatpush.msra.mxu2 %v2294_v33  ;;  %5715 = vmatpush.msra.mxu3 %v2311_v34  ;;  %v4323_v33 = vadd.f32 %v4322_v24, %v4303_v22  ;;  %v2363_v34 = vld [vmem:[#allocation2 + $0x4748] sm:$0xff]  ;;  %v2433_v24 = vld [vmem:[#allocation2 + $0x4978] sm:$0xff] }
 0x4a3   :  { %5657 = vmatpush.msra.mxu0 %v2261_v49  ;;  %5676 = vmatpush.msra.mxu1 %v2278_v19  ;;  %v2380_v49 = vld [vmem:[#allocation2 + $0x47d0] sm:$0xff]  ;;  %v2330_v19 = vld [vmem:[#allocation2 + $0x4640] sm:$0xff]  ;;  %v2754_v22 = vld.sshfl [vmem:[#allocation1 + $0x30] sm:$0xff pattern:$0x73625140] }
 0x4a4   :  { %5697 = vmatpush.msra.mxu2 %v2293_v38  ;;  %5716 = vmatpush.msra.mxu3 %v2310_v62  ;;  %v4343_v38 = vadd.f32 %v4342_v27, %v4323_v33  ;;  %v2362_v62 = vld [vmem:[#allocation2 + $0x4740] sm:$0xff]  ;;  %v2755_v27 = vld.sshfl [vmem:[#allocation1 + $0x38] sm:$0xff pattern:$0x73625140]  ;;  %v2417_v33 = vld [vmem:[#allocation2 + $0x48f8] sm:$0xff] }
 0x4a5   :  { %5658 = vmatpush.msra.mxu0 %v2260_v40  ;;  %5677 = vmatpush.msra.mxu1 %v2277_v41  ;;  %v4362_v40 = vpop.f32.mrf.mxu3  ;;  %v2329_v41 = vld [vmem:[#allocation2 + $0x4638] sm:$0xff] }
 0x4a6   :  { %5698 = vmatpush.msra.mxu2 %v2292_v12  ;;  %5717 = vmatpush.msra.mxu3 %v2309_v0  ;;  %v2346_v12 = vld [vmem:[#allocation2 + $0x46c0] sm:$0xff]  ;;  %v2361_v0 = vld [vmem:[#allocation2 + $0x4738] sm:$0xff]  ;;  %v4363_v20 = vadd.f32 %v4362_v40, %v4343_v38  ;;  %v2416_v38 = vld [vmem:[#allocation2 + $0x48f0] sm:$0xff] }
 0x4a7   :  { %5659 = vmatpush.msra.mxu0 %v2259_v42  ;;  %5678 = vmatpush.msra.mxu1 %v2276_v43  ;;  %v4382_v42 = vpop.f32.mrf.mxu0  ;;  %v2328_v43 = vld [vmem:[#allocation2 + $0x4630] sm:$0xff]  ;;  %v4402_v52 = vpop.f32.mrf.mxu1 }
 0x4a8   :  { %5699 = vmatpush.msra.mxu2 %v2291_v45  ;;  %5718 = vmatpush.msra.mxu3 %v2308_v50  ;;  %v2360_v45 = vld [vmem:[#allocation2 + $0x4730] sm:$0xff]  ;;  %v2377_v50 = vld [vmem:[#allocation2 + $0x47b8] sm:$0xff]  ;;  %v4383_v48 = vadd.f32 %v4382_v42, %v4363_v20  ;;  %v2447_v42 = vld [vmem:[#allocation2 + $0x49e8] sm:$0xff] }
 0x4a9   :  { %5660 = vmatpush.msra.mxu0 %v2258_v46  ;;  %5679 = vmatpush.msra.mxu1 %v2275_v47  ;;  %v2327_v46 = vld [vmem:[#allocation2 + $0x4628] sm:$0xff]  ;;  %v2344_v47 = vld [vmem:[#allocation2 + $0x46b0] sm:$0xff]  ;;  %v4422_v56 = vpop.f32.mrf.mxu2  ;;  %v2414_v20 = vld [vmem:[#allocation2 + $0x48e0] sm:$0xff] }
 0x4aa   :  { %5700 = vmatpush.msra.mxu2 %v2290_v6  ;;  %5719 = vmatpush.msra.mxu3 %v2307_v51  ;;  %v2359_v6 = vld [vmem:[#allocation2 + $0x4728] sm:$0xff]  ;;  %v2376_v51 = vld [vmem:[#allocation2 + $0x47b0] sm:$0xff]  ;;  %v4403_v60 = vadd.f32 %v4402_v52, %v4383_v48  ;;  %v2413_v48 = vld [vmem:[#allocation2 + $0x48d8] sm:$0xff] }
 0x4ab   :  { %5661 = vmatmul.f32.vlgmr.msra.gmra.mxu0 %v2748_v1  ;;  %5701 = vmatmul.f32.vlgmr.msra.gmra.mxu2 %v2750_v53  ;;  %v2326_v1 = vld [vmem:[#allocation2 + $0x4620] sm:$0xff]  ;;  %v2343_v53 = vld [vmem:[#allocation2 + $0x46a8] sm:$0xff]  ;;  %v2448_v40 = vld [vmem:[#allocation2 + $0x49f0] sm:$0xff] }
 0x4ac   :  { %5725 = vmatpush.msrb.mxu0 %v2337_v55  ;;  %5765 = vmatpush.msrb.mxu2 %v2369_v58  ;;  %v2358_v55 = vld [vmem:[#allocation2 + $0x4720] sm:$0xff]  ;;  %v2375_v58 = vld [vmem:[#allocation2 + $0x47a8] sm:$0xff]  ;;  %v4423_v3 = vadd.f32 %v4422_v56, %v4403_v60  ;;  %v2445_v52 = vld [vmem:[#allocation2 + $0x49d8] sm:$0xff] }
 0x4ad   :  { %5680 = vmatpush.msra.mxu1 %v2274_v59  ;;  %5720 = vmatpush.msra.mxu3 %v2306_v28  ;;  %v2325_v59 = vld [vmem:[#allocation2 + $0x4618] sm:$0xff]  ;;  %v2342_v28 = vld [vmem:[#allocation2 + $0x46a0] sm:$0xff]  ;;  %v4442_v8 = vpop.f32.mrf.mxu3  ;;  %v2444_v56 = vld [vmem:[#allocation2 + $0x49d0] sm:$0xff] }
 0x4ae   :  { %5681 = vmatmul.f32.vlgmr.msra.gmra.mxu1 %v2749_v17  ;;  %5721 = vmatmul.f32.vlgmr.msra.gmra.mxu3 %v2751_v63  ;;  %v2357_v17 = vld [vmem:[#allocation2 + $0x4718] sm:$0xff]  ;;  %v2374_v63 = vld [vmem:[#allocation2 + $0x47a0] sm:$0xff]  ;;  %v2411_v60 = vld [vmem:[#allocation2 + $0x48c8] sm:$0xff] }
 0x4af   :  { %5726 = vmatpush.msrb.mxu0 %v2336_v61  ;;  %5745 = vmatpush.msrb.mxu1 %v2353_v2  ;;  %v2324_v61 = vld [vmem:[#allocation2 + $0x4610] sm:$0xff]  ;;  %v2341_v2 = vld [vmem:[#allocation2 + $0x4698] sm:$0xff] }
 0x4b0   :  { %5766 = vmatpush.msrb.mxu2 %v2368_v4  ;;  %5785 = vmatpush.msrb.mxu3 %v2385_v5  ;;  %v2356_v4 = vld [vmem:[#allocation2 + $0x4710] sm:$0xff]  ;;  %v2373_v5 = vld [vmem:[#allocation2 + $0x4798] sm:$0xff] }
 0x4b1   :  { %5727 = vmatpush.msrb.mxu0 %v2335_v30  ;;  %5746 = vmatpush.msrb.mxu1 %v2352_v36  ;;  %v2323_v30 = vld [vmem:[#allocation2 + $0x4608] sm:$0xff]  ;;  %v2340_v36 = vld [vmem:[#allocation2 + $0x4690] sm:$0xff] }
 0x4b2   :  { %5767 = vmatpush.msrb.mxu2 %v2367_v7  ;;  %5786 = vmatpush.msrb.mxu3 %v2384_v9  ;;  %v79_v7 = vld [vmem:[%s6489_s0 + $0x120] sm:$0xff]  ;;  %v2355_v9 = vld [vmem:[#allocation2 + $0x4708] sm:$0xff] }
 0x4b3   :  { %5728 = vmatpush.msrb.mxu0 %v2334_v13  ;;  %5747 = vmatpush.msrb.mxu1 %v2351_v14  ;;  %2756 = vst [vmem:[#allocation1] ss:$4 sm:$0xff] %v79_v7  ;;  %v4462_v13 = vpop.f32.mrf.mxu0  ;;  %v2322_v14 = vld [vmem:[#allocation2 + $0x4600] sm:$0xff]  ;;  %v2409_v7 = vld [vmem:[#allocation2 + $0x48b8] sm:$0xff] }
 0x4b4   :  { %5768 = vmatpush.msrb.mxu2 %v2366_v15  ;;  %5787 = vmatpush.msrb.mxu3 %v2383_v29  ;;  %v4443_v15 = vadd.f32 %v4442_v8, %v4423_v3  ;;  %v2354_v29 = vld [vmem:[#allocation2 + $0x4700] sm:$0xff] }
 0x4b5   :  { %5729 = vmatpush.msrb.mxu0 %v2333_v16  ;;  %5748 = vmatpush.msrb.mxu1 %v2350_v21  ;;  %v2371_v16 = vld [vmem:[#allocation2 + $0x4788] sm:$0xff]  ;;  %v2752_v21 = vld.sshfl [vmem:[#allocation1 + $0x20] sm:$0xff pattern:$0x73625140]  ;;  %v2410_v3 = vld [vmem:[#allocation2 + $0x48c0] sm:$0xff] }
 0x4b6   :  { %5769 = vmatpush.msrb.mxu2 %v2365_v11  ;;  %5788 = vmatpush.msrb.mxu3 %v2382_v23  ;;  %v4463_v11 = vadd.f32 %v4462_v13, %v4443_v15  ;;  %v2401_v23 = vld [vmem:[#allocation2 + $0x4878] sm:$0xff]  ;;  %v2442_v8 = vld [vmem:[#allocation2 + $0x49c0] sm:$0xff] }
 0x4b7   :  { %5730 = vmatpush.msrb.mxu0 %v2332_v31  ;;  %5749 = vmatpush.msrb.mxu1 %v2349_v25  ;;  %v4482_v31 = vpop.f32.mrf.mxu1  ;;  %v2338_v25 = vld [vmem:[#allocation2 + $0x4680] sm:$0xff] }
 0x4b8   :  { %5770 = vmatpush.msrb.mxu2 %v2364_v26  ;;  %5789 = vmatpush.msrb.mxu3 %v2381_v37  ;;  %v2370_v26 = vld [vmem:[#allocation2 + $0x4780] sm:$0xff] }
 0x4b9   :  { %5731 = vmatpush.msrb.mxu0 %v2331_v32  ;;  %5750 = vmatpush.msrb.mxu1 %v2348_v54  ;;  %v2753_v37 = vld.sshfl [vmem:[#allocation1 + $0x28] sm:$0xff pattern:$0x73625140]  ;;  %v4502_v32 = vpop.f32.mrf.mxu2  ;;  %v2400_v54 = vld [vmem:[#allocation2 + $0x4870] sm:$0xff] }
 0x4ba   :  { %5771 = vmatpush.msrb.mxu2 %v2363_v34  ;;  %5790 = vmatpush.msrb.mxu3 %v2380_v49  ;;  %v4483_v34 = vadd.f32 %v4482_v31, %v4463_v11  ;;  %v2432_v49 = vld [vmem:[#allocation2 + $0x4970] sm:$0xff] }
 0x4bb   :  { %5732 = vmatpush.msrb.mxu0 %v2330_v19  ;;  %5751 = vmatpush.msrb.mxu1 %v2347_v35  ;;  %v2449_v19 = vld [vmem:[#allocation2 + $0x49f8] sm:$0xff]  ;;  %v2399_v35 = vld [vmem:[#allocation2 + $0x4868] sm:$0xff] }
 0x4bc   :  { %5772 = vmatpush.msrb.mxu2 %v2362_v62  ;;  %5791 = vmatpush.msrb.mxu3 %v2379_v39  ;;  %v4503_v62 = vadd.f32 %v4502_v32, %v4483_v34  ;;  %v2431_v39 = vld [vmem:[#allocation2 + $0x4968] sm:$0xff] }
 0x4bd   :  { %5733 = vmatpush.msrb.mxu0 %v2329_v41  ;;  %5752 = vmatpush.msrb.mxu1 %v2346_v12  ;;  %v4522_v41 = vpop.f32.mrf.mxu3  ;;  %v2398_v12 = vld [vmem:[#allocation2 + $0x4860] sm:$0xff] }
 0x4be   :  { %5773 = vmatpush.msrb.mxu2 %v2361_v0  ;;  %5792 = vmatpush.msrb.mxu3 %v2378_v57  ;;  %v2415_v0 = vld [vmem:[#allocation2 + $0x48e8] sm:$0xff]  ;;  %v2430_v57 = vld [vmem:[#allocation2 + $0x4960] sm:$0xff] }
 0x4bf   :  { %5734 = vmatpush.msrb.mxu0 %v2328_v43  ;;  %5753 = vmatpush.msrb.mxu1 %v2345_v44  ;;  %v4542_v43 = vpop.f32.mrf.mxu0  ;;  %v2397_v44 = vld [vmem:[#allocation2 + $0x4858] sm:$0xff] }
 0x4c0   :  { %5774 = vmatpush.msrb.mxu2 %v2360_v45  ;;  %5793 = vmatpush.msrb.mxu3 %v2377_v50  ;;  %v4523_v45 = vadd.f32 %v4522_v41, %v4503_v62  ;;  %v2429_v50 = vld [vmem:[#allocation2 + $0x4958] sm:$0xff]  ;;  %v80_v62 = vld [vmem:[%s6489_s0 + $0x128] sm:$0xff]  ;;  %v2436_v41 = vld [vmem:[#allocation2 + $0x4990] sm:$0xff] }
 0x4c1   :  { %5735 = vmatpush.msrb.mxu0 %v2327_v46  ;;  %5754 = vmatpush.msrb.mxu1 %v2344_v47  ;;  %v2446_v46 = vld [vmem:[#allocation2 + $0x49e0] sm:$0xff]  ;;  %v2396_v47 = vld [vmem:[#allocation2 + $0x4850] sm:$0xff]  ;;  %2757 = vst [vmem:[#allocation1 + $0x20] ss:$4 sm:$0xff] %v80_v62  ;;  %v2473_v62 = vld [vmem:[#allocation2 + $0x4ab8] sm:$0xff] }
 0x4c2   :  { %5775 = vmatpush.msrb.mxu2 %v2359_v6  ;;  %5794 = vmatpush.msrb.mxu3 %v2376_v51  ;;  %v4543_v6 = vadd.f32 %v4542_v43, %v4523_v45  ;;  %v2428_v51 = vld [vmem:[#allocation2 + $0x4950] sm:$0xff]  ;;  %v2435_v43 = vld [vmem:[#allocation2 + $0x4988] sm:$0xff] }
 0x4c3   :  { %5736 = vmatpush.msrb.mxu0 %v2326_v1  ;;  %5755 = vmatpush.msrb.mxu1 %v2343_v53  ;;  %v4562_v1 = vpop.f32.mrf.mxu1  ;;  %v2395_v53 = vld [vmem:[#allocation2 + $0x4848] sm:$0xff] }
 0x4c4   :  { %5776 = vmatpush.msrb.mxu2 %v2358_v55  ;;  %5795 = vmatpush.msrb.mxu3 %v2375_v58  ;;  %v2412_v55 = vld [vmem:[#allocation2 + $0x48d0] sm:$0xff]  ;;  %v2427_v58 = vld [vmem:[#allocation2 + $0x4948] sm:$0xff] }
 0x4c5   :  { %5737 = vmatpush.msrb.mxu0 %v2325_v59  ;;  %5756 = vmatpush.msrb.mxu1 %v2342_v28  ;;  %v4582_v59 = vpop.f32.mrf.mxu2  ;;  %v2394_v28 = vld [vmem:[#allocation2 + $0x4840] sm:$0xff]  ;;  %v2760_v45 = vld.sshfl [vmem:[#allocation1 + $0x10] sm:$0xff pattern:$0x73625140] }
 0x4c6   :  { %5777 = vmatpush.msrb.mxu2 %v2357_v17  ;;  %5796 = vmatpush.msrb.mxu3 %v2374_v63  ;;  %v4563_v17 = vadd.f32 %v4562_v1, %v4543_v6  ;;  %v2426_v63 = vld [vmem:[#allocation2 + $0x4940] sm:$0xff]  ;;  %v2761_v1 = vld.sshfl [vmem:[#allocation1 + $0x18] sm:$0xff pattern:$0x73625140] }
 0x4c7   :  { %5738 = vmatpush.msrb.mxu0 %v2324_v61  ;;  %5757 = vmatpush.msrb.mxu1 %v2341_v2  ;;  %v2443_v61 = vld [vmem:[#allocation2 + $0x49c8] sm:$0xff]  ;;  %v2393_v2 = vld [vmem:[#allocation2 + $0x4838] sm:$0xff]  ;;  %v4622_v13 = vpop.f32.mrf.mxu0  ;;  %v2434_v6 = vld [vmem:[#allocation2 + $0x4980] sm:$0xff] }
 0x4c8   :  { %5778 = vmatpush.msrb.mxu2 %v2356_v4  ;;  %5797 = vmatpush.msrb.mxu3 %v2373_v5  ;;  %v4583_v4 = vadd.f32 %v4582_v59, %v4563_v17  ;;  %v2425_v5 = vld [vmem:[#allocation2 + $0x4938] sm:$0xff]  ;;  %v2480_v17 = vld [vmem:[#allocation2 + $0x4af0] sm:$0xff] }
 0x4c9   :  { %5739 = vmatpush.msrb.mxu0 %v2323_v30  ;;  %5758 = vmatpush.msrb.mxu1 %v2340_v36  ;;  %v4602_v30 = vpop.f32.mrf.mxu3  ;;  %v2392_v36 = vld [vmem:[#allocation2 + $0x4830] sm:$0xff]  ;;  %v2513_v59 = vld [vmem:[#allocation2 + $0x4bf8] sm:$0xff] }
 0x4ca   :  { %5779 = vmatpush.msrb.mxu2 %v2355_v9  ;;  %5798 = vmatpush.msrb.mxu3 %v2372_v10  ;;  %v2424_v9 = vld [vmem:[#allocation2 + $0x4930] sm:$0xff]  ;;  %v2441_v10 = vld [vmem:[#allocation2 + $0x49b8] sm:$0xff]  ;;  %v4603_v15 = vadd.f32 %v4602_v30, %v4583_v4  ;;  %v2479_v4 = vld [vmem:[#allocation2 + $0x4ae8] sm:$0xff] }
 0x4cb   :  { %5740 = vmatpush.msrb.mxu0 %v2322_v14  ;;  %5759 = vmatpush.msrb.mxu1 %v2339_v18  ;;  %v2391_v14 = vld [vmem:[#allocation2 + $0x4828] sm:$0xff]  ;;  %v2408_v18 = vld [vmem:[#allocation2 + $0x48b0] sm:$0xff]  ;;  %v4642_v31 = vpop.f32.mrf.mxu1 }
 0x4cc   :  { %5780 = vmatpush.msrb.mxu2 %v2354_v29  ;;  %5799 = vmatpush.msrb.mxu3 %v2371_v16  ;;  %v2423_v29 = vld [vmem:[#allocation2 + $0x4928] sm:$0xff]  ;;  %v2440_v16 = vld [vmem:[#allocation2 + $0x49b0] sm:$0xff]  ;;  %v4623_v11 = vadd.f32 %v4622_v13, %v4603_v15  ;;  %v2510_v13 = vld [vmem:[#allocation2 + $0x4be0] sm:$0xff] }
 0x4cd   :  { %5741 = vmatmul.f32.vlgmr.msrb.gmra.mxu0 %v2752_v21  ;;  %5781 = vmatmul.f32.vlgmr.msrb.gmra.mxu2 %v2754_v22  ;;  %v2390_v21 = vld [vmem:[#allocation2 + $0x4820] sm:$0xff]  ;;  %v2407_v22 = vld [vmem:[#allocation2 + $0x48a8] sm:$0xff]  ;;  %v4662_v32 = vpop.f32.mrf.mxu2  ;;  %v2477_v15 = vld [vmem:[#allocation2 + $0x4ad8] sm:$0xff] }
 0x4ce   :  { %5805 = vmatpush.msra.mxu0 %v2401_v23  ;;  %5845 = vmatpush.msra.mxu2 %v2433_v24  ;;  %v2422_v23 = vld [vmem:[#allocation2 + $0x4920] sm:$0xff]  ;;  %v2439_v24 = vld [vmem:[#allocation2 + $0x49a8] sm:$0xff]  ;;  %v4643_v34 = vadd.f32 %v4642_v31, %v4623_v11  ;;  %v2476_v11 = vld [vmem:[#allocation2 + $0x4ad0] sm:$0xff] }
 0x4cf   :  { %5760 = vmatpush.msrb.mxu1 %v2338_v25  ;;  %5800 = vmatpush.msrb.mxu3 %v2370_v26  ;;  %v2389_v25 = vld [vmem:[#allocation2 + $0x4818] sm:$0xff]  ;;  %v2406_v26 = vld [vmem:[#allocation2 + $0x48a0] sm:$0xff]  ;;  %v2511_v30 = vld [vmem:[#allocation2 + $0x4be8] sm:$0xff] }
 0x4d0   :  { %5761 = vmatmul.f32.vlgmr.msrb.gmra.mxu1 %v2753_v37  ;;  %5801 = vmatmul.f32.vlgmr.msrb.gmra.mxu3 %v2755_v27  ;;  %v2421_v37 = vld [vmem:[#allocation2 + $0x4918] sm:$0xff]  ;;  %v2438_v27 = vld [vmem:[#allocation2 + $0x49a0] sm:$0xff]  ;;  %v2508_v31 = vld [vmem:[#allocation2 + $0x4bd0] sm:$0xff] }
 0x4d1   :  { %5806 = vmatpush.msra.mxu0 %v2400_v54  ;;  %5825 = vmatpush.msra.mxu1 %v2417_v33  ;;  %v2388_v54 = vld [vmem:[#allocation2 + $0x4810] sm:$0xff]  ;;  %v2405_v33 = vld [vmem:[#allocation2 + $0x4898] sm:$0xff] }
 0x4d2   :  { %5846 = vmatpush.msra.mxu2 %v2432_v49  ;;  %5865 = vmatpush.msra.mxu3 %v2449_v19  ;;  %v2420_v49 = vld [vmem:[#allocation2 + $0x4910] sm:$0xff]  ;;  %v2437_v19 = vld [vmem:[#allocation2 + $0x4998] sm:$0xff] }
 0x4d3   :  { %5807 = vmatpush.msra.mxu0 %v2399_v35  ;;  %5826 = vmatpush.msra.mxu1 %v2416_v38  ;;  %v2387_v35 = vld [vmem:[#allocation2 + $0x4808] sm:$0xff]  ;;  %v2404_v38 = vld [vmem:[#allocation2 + $0x4890] sm:$0xff] }
 0x4d4   :  { %5847 = vmatpush.msra.mxu2 %v2431_v39  ;;  %5866 = vmatpush.msra.mxu3 %v2448_v40  ;;  %v4663_v39 = vadd.f32 %v4662_v32, %v4643_v34  ;;  %v2419_v40 = vld [vmem:[#allocation2 + $0x4908] sm:$0xff]  ;;  %v2474_v34 = vld [vmem:[#allocation2 + $0x4ac0] sm:$0xff] }
 0x4d5   :  { %5808 = vmatpush.msra.mxu0 %v2398_v12  ;;  %5827 = vmatpush.msra.mxu1 %v2415_v0  ;;  %v4682_v12 = vpop.f32.mrf.mxu3  ;;  %v2386_v0 = vld [vmem:[#allocation2 + $0x4800] sm:$0xff]  ;;  %v2507_v32 = vld [vmem:[#allocation2 + $0x4bc8] sm:$0xff] }
 0x4d6   :  { %5848 = vmatpush.msra.mxu2 %v2430_v57  ;;  %5867 = vmatpush.msra.mxu3 %v2447_v42  ;;  %v2403_v57 = vld [vmem:[#allocation2 + $0x4888] sm:$0xff]  ;;  %v2418_v42 = vld [vmem:[#allocation2 + $0x4900] sm:$0xff] }
 0x4d7   :  { %5809 = vmatpush.msra.mxu0 %v2397_v44  ;;  %5828 = vmatpush.msra.mxu1 %v2414_v20  ;;  %v4702_v44 = vpop.f32.mrf.mxu0  ;;  %v2758_v20 = vld.sshfl [vmem:[#allocation1] sm:$0xff pattern:$0x73625140] }
 0x4d8   :  { %5849 = vmatpush.msra.mxu2 %v2429_v50  ;;  %5868 = vmatpush.msra.mxu3 %v2446_v46  ;;  %v4683_v50 = vadd.f32 %v4682_v12, %v4663_v39  ;;  %v2465_v46 = vld [vmem:[#allocation2 + $0x4a78] sm:$0xff] }
 0x4d9   :  { %5810 = vmatpush.msra.mxu0 %v2396_v47  ;;  %5829 = vmatpush.msra.mxu1 %v2413_v48  ;;  %v2497_v47 = vld [vmem:[#allocation2 + $0x4b78] sm:$0xff]  ;;  %v2402_v48 = vld [vmem:[#allocation2 + $0x4880] sm:$0xff] }
 0x4da   :  { %5850 = vmatpush.msra.mxu2 %v2428_v51  ;;  %5869 = vmatpush.msra.mxu3 %v2445_v52  ;;  %v4703_v51 = vadd.f32 %v4702_v44, %v4683_v50  ;;  %v2759_v52 = vld.sshfl [vmem:[#allocation1 + $0x8] sm:$0xff pattern:$0x73625140] }
 0x4db   :  { %5811 = vmatpush.msra.mxu0 %v2395_v53  ;;  %5830 = vmatpush.msra.mxu1 %v2412_v55  ;;  %v4722_v53 = vpop.f32.mrf.mxu1  ;;  %v2464_v55 = vld [vmem:[#allocation2 + $0x4a70] sm:$0xff] }
 0x4dc   :  { %5851 = vmatpush.msra.mxu2 %v2427_v58  ;;  %5870 = vmatpush.msra.mxu3 %v2444_v56  ;;  %v2481_v58 = vld [vmem:[#allocation2 + $0x4af8] sm:$0xff]  ;;  %v2496_v56 = vld [vmem:[#allocation2 + $0x4b70] sm:$0xff] }
 0x4dd   :  { %5812 = vmatpush.msra.mxu0 %v2394_v28  ;;  %5831 = vmatpush.msra.mxu1 %v2411_v60  ;;  %v4742_v28 = vpop.f32.mrf.mxu2  ;;  %v2463_v60 = vld [vmem:[#allocation2 + $0x4a68] sm:$0xff] }
 0x4de   :  { %5852 = vmatpush.msra.mxu2 %v2426_v63  ;;  %5871 = vmatpush.msra.mxu3 %v2443_v61  ;;  %v4723_v63 = vadd.f32 %v4722_v53, %v4703_v51  ;;  %v2495_v61 = vld [vmem:[#allocation2 + $0x4b68] sm:$0xff] }
 0x4df   :  { %5813 = vmatpush.msra.mxu0 %v2393_v2  ;;  %5832 = vmatpush.msra.mxu1 %v2410_v3  ;;  %v2512_v2 = vld [vmem:[#allocation2 + $0x4bf0] sm:$0xff]  ;;  %v2462_v3 = vld [vmem:[#allocation2 + $0x4a60] sm:$0xff] }
 0x4e0   :  { %5853 = vmatpush.msra.mxu2 %v2425_v5  ;;  %5872 = vmatpush.msra.mxu3 %v2442_v8  ;;  %v4743_v5 = vadd.f32 %v4742_v28, %v4723_v63  ;;  %v2494_v8 = vld [vmem:[#allocation2 + $0x4b60] sm:$0xff]  ;;  %v2501_v28 = vld [vmem:[#allocation2 + $0x4b98] sm:$0xff]  ;;  %v2468_v63 = vld [vmem:[#allocation2 + $0x4a90] sm:$0xff] }
 0x4e1   :  { %5814 = vmatpush.msra.mxu0 %v2392_v36  ;;  %5833 = vmatpush.msra.mxu1 %v2409_v7  ;;  %v4762_v36 = vpop.f32.mrf.mxu3  ;;  %v2461_v7 = vld [vmem:[#allocation2 + $0x4a58] sm:$0xff] }
 0x4e2   :  { %5854 = vmatpush.msra.mxu2 %v2424_v9  ;;  %5873 = vmatpush.msra.mxu3 %v2441_v10  ;;  %v2478_v9 = vld [vmem:[#allocation2 + $0x4ae0] sm:$0xff]  ;;  %v2493_v10 = vld [vmem:[#allocation2 + $0x4b58] sm:$0xff] }
 0x4e3   :  { %5815 = vmatpush.msra.mxu0 %v2391_v14  ;;  %5834 = vmatpush.msra.mxu1 %v2408_v18  ;;  %v4782_v14 = vpop.f32.mrf.mxu0  ;;  %v2460_v18 = vld [vmem:[#allocation2 + $0x4a50] sm:$0xff] }
 0x4e4   :  { %5855 = vmatpush.msra.mxu2 %v2423_v29  ;;  %5874 = vmatpush.msra.mxu3 %v2440_v16  ;;  %v4763_v29 = vadd.f32 %v4762_v36, %v4743_v5  ;;  %v2492_v16 = vld [vmem:[#allocation2 + $0x4b50] sm:$0xff]  ;;  %v2467_v5 = vld [vmem:[#allocation2 + $0x4a88] sm:$0xff] }
 0x4e5   :  { %5816 = vmatpush.msra.mxu0 %v2390_v21  ;;  %5835 = vmatpush.msra.mxu1 %v2407_v22  ;;  %v2509_v21 = vld [vmem:[#allocation2 + $0x4bd8] sm:$0xff]  ;;  %v2459_v22 = vld [vmem:[#allocation2 + $0x4a48] sm:$0xff] }
 0x4e6   :  { %5856 = vmatpush.msra.mxu2 %v2422_v23  ;;  %5875 = vmatpush.msra.mxu3 %v2439_v24  ;;  %v4783_v23 = vadd.f32 %v4782_v14, %v4763_v29  ;;  %v2491_v24 = vld [vmem:[#allocation2 + $0x4b48] sm:$0xff]  ;;  %v2466_v14 = vld [vmem:[#allocation2 + $0x4a80] sm:$0xff] }
 0x4e7   :  { %5817 = vmatpush.msra.mxu0 %v2389_v25  ;;  %5836 = vmatpush.msra.mxu1 %v2406_v26  ;;  %v4802_v25 = vpop.f32.mrf.mxu1  ;;  %v2458_v26 = vld [vmem:[#allocation2 + $0x4a40] sm:$0xff]  ;;  %v2499_v36 = vld [vmem:[#allocation2 + $0x4b88] sm:$0xff] }
 0x4e8   :  { %5857 = vmatpush.msra.mxu2 %v2421_v37  ;;  %5876 = vmatpush.msra.mxu3 %v2438_v27  ;;  %v2475_v37 = vld [vmem:[#allocation2 + $0x4ac8] sm:$0xff]  ;;  %v2490_v27 = vld [vmem:[#allocation2 + $0x4b40] sm:$0xff] }
 0x4e9   :  { %5818 = vmatpush.msra.mxu0 %v2388_v54  ;;  %5837 = vmatpush.msra.mxu1 %v2405_v33  ;;  %v4822_v54 = vpop.f32.mrf.mxu2  ;;  %v2457_v33 = vld [vmem:[#allocation2 + $0x4a38] sm:$0xff]  ;;  %v4842_v12 = vpop.f32.mrf.mxu3  ;;  %v2763_v29 = vld.sshfl [vmem:[#allocation1 + $0x28] sm:$0xff pattern:$0x73625140] }
 0x4ea   :  { %5858 = vmatpush.msra.mxu2 %v2420_v49  ;;  %5877 = vmatpush.msra.mxu3 %v2437_v19  ;;  %v4803_v49 = vadd.f32 %v4802_v25, %v4783_v23  ;;  %v2489_v19 = vld [vmem:[#allocation2 + $0x4b38] sm:$0xff]  ;;  %v2530_v25 = vld [vmem:[#allocation2 + $0x4c80] sm:$0xff] }
 0x4eb   :  { %5819 = vmatpush.msra.mxu0 %v2387_v35  ;;  %5838 = vmatpush.msra.mxu1 %v2404_v38  ;;  %v2506_v35 = vld [vmem:[#allocation2 + $0x4bc0] sm:$0xff]  ;;  %v2456_v38 = vld [vmem:[#allocation2 + $0x4a30] sm:$0xff]  ;;  %v4862_v44 = vpop.f32.mrf.mxu0 }
 0x4ec   :  { %5859 = vmatpush.msra.mxu2 %v2419_v40  ;;  %5878 = vmatpush.msra.mxu3 %v2436_v41  ;;  %v4823_v39 = vadd.f32 %v4822_v54, %v4803_v49  ;;  %v2488_v40 = vld [vmem:[#allocation2 + $0x4b30] sm:$0xff]  ;;  %v2505_v41 = vld [vmem:[#allocation2 + $0x4bb8] sm:$0xff] }
 0x4ed   :  { %5820 = vmatpush.msra.mxu0 %v2386_v0  ;;  %5839 = vmatpush.msra.mxu1 %v2403_v57  ;;  %v2455_v0 = vld [vmem:[#allocation2 + $0x4a28] sm:$0xff]  ;;  %v2472_v57 = vld [vmem:[#allocation2 + $0x4ab0] sm:$0xff] }
 0x4ee   :  { %5860 = vmatpush.msra.mxu2 %v2418_v42  ;;  %5879 = vmatpush.msra.mxu3 %v2435_v43  ;;  %v2487_v42 = vld [vmem:[#allocation2 + $0x4b28] sm:$0xff]  ;;  %v2504_v43 = vld [vmem:[#allocation2 + $0x4bb0] sm:$0xff]  ;;  %v4843_v50 = vadd.f32 %v4842_v12, %v4823_v39 }
 0x4ef   :  { %5821 = vmatmul.f32.vlgmr.msra.gmra.mxu0 %v2758_v20  ;;  %5861 = vmatmul.f32.vlgmr.msra.gmra.mxu2 %v2760_v45  ;;  %v2454_v20 = vld [vmem:[#allocation2 + $0x4a20] sm:$0xff]  ;;  %v2471_v45 = vld [vmem:[#allocation2 + $0x4aa8] sm:$0xff]  ;;  %v4882_v53 = vpop.f32.mrf.mxu1  ;;  %v2520_v12 = vld [vmem:[#allocation2 + $0x4c30] sm:$0xff] }
 0x4f0   :  { %5885 = vmatpush.msrb.mxu0 %v2465_v46  ;;  %5925 = vmatpush.msrb.mxu2 %v2497_v47  ;;  %v2486_v46 = vld [vmem:[#allocation2 + $0x4b20] sm:$0xff]  ;;  %v2503_v47 = vld [vmem:[#allocation2 + $0x4ba8] sm:$0xff]  ;;  %v4863_v51 = vadd.f32 %v4862_v44, %v4843_v50 }
 0x4f1   :  { %5840 = vmatpush.msra.mxu1 %v2402_v48  ;;  %5880 = vmatpush.msra.mxu3 %v2434_v6  ;;  %v2453_v48 = vld [vmem:[#allocation2 + $0x4a18] sm:$0xff]  ;;  %v2470_v6 = vld [vmem:[#allocation2 + $0x4aa0] sm:$0xff] }
 0x4f2   :  { %5841 = vmatmul.f32.vlgmr.msra.gmra.mxu1 %v2759_v52  ;;  %5881 = vmatmul.f32.vlgmr.msra.gmra.mxu3 %v2761_v1  ;;  %v2485_v52 = vld [vmem:[#allocation2 + $0x4b18] sm:$0xff]  ;;  %v2502_v1 = vld [vmem:[#allocation2 + $0x4ba0] sm:$0xff] }
 0x4f3   :  { %5886 = vmatpush.msrb.mxu0 %v2464_v55  ;;  %5905 = vmatpush.msrb.mxu1 %v2481_v58  ;;  %v2452_v55 = vld [vmem:[#allocation2 + $0x4a10] sm:$0xff]  ;;  %v2469_v58 = vld [vmem:[#allocation2 + $0x4a98] sm:$0xff]  ;;  %v2518_v44 = vld [vmem:[#allocation2 + $0x4c20] sm:$0xff] }
 0x4f4   :  { %5926 = vmatpush.msrb.mxu2 %v2496_v56  ;;  %5945 = vmatpush.msrb.mxu3 %v2513_v59  ;;  %v81_v56 = vld [vmem:[%s6489_s0 + $0x130] sm:$0xf]  ;;  %v2484_v59 = vld [vmem:[#allocation2 + $0x4b10] sm:$0xff]  ;;  %s6090_s0 = sshll.u32 %s6166_s13, 4  ;;  %s6091_s0 = int_to_ptr.vmem [resolvable:$true] %s6090_s0 }
 0x4f5   :  { %5887 = vmatpush.msrb.mxu0 %v2463_v60  ;;  %5906 = vmatpush.msrb.mxu1 %v2480_v17  ;;  %2766 = vst [vmem:[#allocation1] ss:$4 sm:$0xff] %v81_v56  ;;  %v4902_v60 = vpop.f32.mrf.mxu2  ;;  %v2451_v17 = vld [vmem:[#allocation2 + $0x4a08] sm:$0xff] }
 0x4f6   :  { %5927 = vmatpush.msrb.mxu2 %v2495_v61  ;;  %5946 = vmatpush.msrb.mxu3 %v2512_v2  ;;  %v4883_v61 = vadd.f32 %v4882_v53, %v4863_v51  ;;  %v2483_v2 = vld [vmem:[#allocation2 + $0x4b08] sm:$0xff] }
 0x4f7   :  { %5888 = vmatpush.msrb.mxu0 %v2462_v3  ;;  %5907 = vmatpush.msrb.mxu1 %v2479_v4  ;;  %v2500_v3 = vld [vmem:[#allocation2 + $0x4b90] sm:$0xff]  ;;  %v2450_v4 = vld [vmem:[#allocation2 + $0x4a00] sm:$0xff] }
 0x4f8   :  { %5928 = vmatpush.msrb.mxu2 %v2494_v8  ;;  %5947 = vmatpush.msrb.mxu3 %v2511_v30  ;;  %v4903_v8 = vadd.f32 %v4902_v60, %v4883_v61  ;;  %v2482_v30 = vld [vmem:[#allocation2 + $0x4b00] sm:$0xff] }
 0x4f9   :  { %5889 = vmatpush.msrb.mxu0 %v2461_v7  ;;  %5908 = vmatpush.msrb.mxu1 %v2478_v9  ;;  %v4922_v7 = vpop.f32.mrf.mxu3  ;;  %v2762_v9 = vld.sshfl [vmem:[#allocation1 + $0x20] sm:$0xff pattern:$0x73625140] }
 0x4fa   :  { %5929 = vmatpush.msrb.mxu2 %v2493_v10  ;;  %5948 = vmatpush.msrb.mxu3 %v2510_v13  ;;  %v2764_v10 = vld.sshfl [vmem:[#allocation1 + $0x30] sm:$0xff pattern:$0x73625140]  ;;  %v2529_v13 = vld [vmem:[#allocation2 + $0x4c78] sm:$0xff] }
 0x4fb   :  { %5890 = vmatpush.msrb.mxu0 %v2460_v18  ;;  %5909 = vmatpush.msrb.mxu1 %v2477_v15  ;;  %v4942_v18 = vpop.f32.mrf.mxu0  ;;  %v2498_v15 = vld [vmem:[#allocation2 + $0x4b80] sm:$0xff] }
 0x4fc   :  { %5930 = vmatpush.msrb.mxu2 %v2492_v16  ;;  %5949 = vmatpush.msrb.mxu3 %v2509_v21  ;;  %v4923_v16 = vadd.f32 %v4922_v7, %v4903_v8  ;;  %v2765_v21 = vld.sshfl [vmem:[#allocation1 + $0x38] sm:$0xff pattern:$0x73625140]  ;;  %v2768_v54 = vld.sshfl [vmem:[#allocation1 + $0x8] sm:$0xff pattern:$0x73625140] }
 0x4fd   :  { %5891 = vmatpush.msrb.mxu0 %v2459_v22  ;;  %5910 = vmatpush.msrb.mxu1 %v2476_v11  ;;  %v2528_v22 = vld [vmem:[#allocation2 + $0x4c70] sm:$0xff]  ;;  %v2531_v11 = vld [vmem:[#allocation2 + $0x4c88] sm:$0xff]  ;;  %v2767_v53 = vld.sshfl [vmem:[#allocation1] sm:$0xff pattern:$0x73625140] }
 0x4fe   :  { %5931 = vmatpush.msrb.mxu2 %v2491_v24  ;;  %5950 = vmatpush.msrb.mxu3 %v2508_v31  ;;  %v4943_v23 = vadd.f32 %v4942_v18, %v4923_v16  ;;  %v2527_v24 = vld [vmem:[#allocation2 + $0x4c68] sm:$0xff]  ;;  %v4962_v31 = vpop.f32.mrf.mxu1 }
 0x4ff   :  { %5892 = vmatpush.msrb.mxu0 %v2458_v26  ;;  %5911 = vmatpush.msrb.mxu1 %v2475_v37  ;;  %v2526_v26 = vld [vmem:[#allocation2 + $0x4c60] sm:$0xff]  ;;  %v4982_v37 = vpop.f32.mrf.mxu2 }
 0x500   :  { %5932 = vmatpush.msrb.mxu2 %v2490_v27  ;;  %5951 = vmatpush.msrb.mxu3 %v2507_v32  ;;  %v4963_v27 = vadd.f32 %v4962_v31, %v4943_v23  ;;  %v2525_v32 = vld [vmem:[#allocation2 + $0x4c58] sm:$0xff] }
 0x501   :  { %5893 = vmatpush.msrb.mxu0 %v2457_v33  ;;  %5912 = vmatpush.msrb.mxu1 %v2474_v34  ;;  %v2524_v34 = vld [vmem:[#allocation2 + $0x4c50] sm:$0xff]  ;;  %v5002_v49 = vpop.f32.mrf.mxu3 }
 0x502   :  { %5933 = vmatpush.msrb.mxu2 %v2489_v19  ;;  %5952 = vmatpush.msrb.mxu3 %v2506_v35  ;;  %v4983_v33 = vadd.f32 %v4982_v37, %v4963_v27  ;;  %v2523_v19 = vld [vmem:[#allocation2 + $0x4c48] sm:$0xff] }
 0x503   :  { %5894 = vmatpush.msrb.mxu0 %v2456_v38  ;;  %5913 = vmatpush.msrb.mxu1 %v2473_v62  ;;  %v5022_v35 = vpop.f32.mrf.mxu0  ;;  %v2522_v62 = vld [vmem:[#allocation2 + $0x4c40] sm:$0xff] }
 0x504   :  { %5934 = vmatpush.msrb.mxu2 %v2488_v40  ;;  %5953 = vmatpush.msrb.mxu3 %v2505_v41  ;;  %v5003_v38 = vadd.f32 %v5002_v49, %v4983_v33  ;;  %v2521_v40 = vld [vmem:[#allocation2 + $0x4c38] sm:$0xff] }
 0x505   :  { %5895 = vmatpush.msrb.mxu0 %v2455_v0  ;;  %5914 = vmatpush.msrb.mxu1 %v2472_v57 }
 0x506   :  { %5935 = vmatpush.msrb.mxu2 %v2487_v42  ;;  %5954 = vmatpush.msrb.mxu3 %v2504_v43  ;;  %v5023_v39 = vadd.f32 %v5022_v35, %v5003_v38  ;;  %v5042_v41 = vpop.f32.mrf.mxu1  ;;  %v2519_v42 = vld [vmem:[#allocation2 + $0x4c28] sm:$0xff] }
 0x507   :  { %5896 = vmatpush.msrb.mxu0 %v2454_v20  ;;  %5915 = vmatpush.msrb.mxu1 %v2471_v45  ;;  %v5062_v0 = vpop.f32.mrf.mxu2  ;;  %v2517_v45 = vld [vmem:[#allocation2 + $0x4c18] sm:$0xff] }
 0x508   :  { %5936 = vmatpush.msrb.mxu2 %v2486_v46  ;;  %5955 = vmatpush.msrb.mxu3 %v2503_v47  ;;  %v5043_v57 = vadd.f32 %v5042_v41, %v5023_v39  ;;  %v2516_v47 = vld [vmem:[#allocation2 + $0x4c10] sm:$0xff] }
 0x509   :  { %5897 = vmatpush.msrb.mxu0 %v2453_v48  ;;  %5916 = vmatpush.msrb.mxu1 %v2470_v6  ;;  %v5082_v20 = vpop.f32.mrf.mxu3  ;;  %v2515_v6 = vld [vmem:[#allocation2 + $0x4c08] sm:$0xff] }
 0x50a   :  { %5937 = vmatpush.msrb.mxu2 %v2485_v52  ;;  %5956 = vmatpush.msrb.mxu3 %v2502_v1  ;;  %v5063_v43 = vadd.f32 %v5062_v0, %v5043_v57  ;;  %v2514_v52 = vld [vmem:[#allocation2 + $0x4c00] sm:$0xff] }
 0x50b   :  { %5898 = vmatpush.msrb.mxu0 %v2452_v55  ;;  %5917 = vmatpush.msrb.mxu1 %v2469_v58  ;;  %v5102_v50 = vpop.f32.mrf.mxu0 }
 0x50c   :  { %5938 = vmatpush.msrb.mxu2 %v2484_v59  ;;  %5957 = vmatpush.msrb.mxu3 %v2501_v28  ;;  %v5083_v46 = vadd.f32 %v5082_v20, %v5063_v43  ;;  %v6019_v43 = vld [vmem:[%s6492_s3 + $0x68] sm:$0xff]  ;;  %v6018_v20 = vld [vmem:[%s6492_s3 + $0x60] sm:$0xff] }
 0x50d   :  { %5899 = vmatpush.msrb.mxu0 %v2451_v17  ;;  %5918 = vmatpush.msrb.mxu1 %v2468_v63 }
 0x50e   :  { %5939 = vmatpush.msrb.mxu2 %v2483_v2  ;;  %5958 = vmatpush.msrb.mxu3 %v2500_v3  ;;  %v5103_v48 = vadd.f32 %v5102_v50, %v5083_v46  ;;  %v5122_v51 = vpop.f32.mrf.mxu1  ;;  %v6017_v50 = vld [vmem:[%s6492_s3 + $0x58] sm:$0xff] }
 0x50f   :  { %5900 = vmatpush.msrb.mxu0 %v2450_v4  ;;  %5919 = vmatpush.msrb.mxu1 %v2467_v5  ;;  %v5142_v1 = vpop.f32.mrf.mxu2 }
 0x510   :  { %5940 = vmatpush.msrb.mxu2 %v2482_v30  ;;  %5959 = vmatpush.msrb.mxu3 %v2499_v36  ;;  %v5123_v55 = vadd.f32 %v5122_v51, %v5103_v48  ;;  %v6016_v48 = vld [vmem:[%s6492_s3 + $0x50] sm:$0xff]  ;;  %v6015_v51 = vld [vmem:[%s6492_s3 + $0x48] sm:$0xff] }
 0x511   :  { %5901 = vmatmul.f32.vlgmr.msrb.gmra.mxu0 %v2762_v9  ;;  %5941 = vmatmul.f32.vlgmr.msrb.gmra.mxu2 %v2764_v10  ;;  %v5162_v56 = vpop.f32.mrf.mxu3 }
 0x512   :  { %5965 = vmatpush.msra.mxu0 %v2529_v13  ;;  %5920 = vmatpush.msrb.mxu1 %v2466_v14  ;;  %v5143_v58 = vadd.f32 %v5142_v1, %v5123_v55  ;;  %v6014_v1 = vld [vmem:[%s6492_s3 + $0x40] sm:$0xff] }
 0x513   :  { %5960 = vmatpush.msrb.mxu3 %v2498_v15  ;;  %5921 = vmatmul.f32.vlgmr.msrb.gmra.mxu1 %v2763_v29  ;;  %v5182_v59 = vpop.f32.mrf.mxu0 }
 0x514   :  { %5961 = vmatmul.f32.vlgmr.msrb.gmra.mxu3 %v2765_v21  ;;  %5966 = vmatpush.msra.mxu0 %v2528_v22  ;;  %v5163_v28 = vadd.f32 %v5162_v56, %v5143_v58  ;;  %v6013_v58 = vld [vmem:[%s6492_s3 + $0x38] sm:$0xff] }
 0x515   :  { %5999 = vmatpush.msra.mxu1 %v2531_v11 }
 0x516   :  { %5967 = vmatpush.msra.mxu0 %v2527_v24  ;;  %v5183_v60 = vadd.f32 %v5182_v59, %v5163_v28  ;;  %v5202_v17 = vpop.f32.mrf.mxu1  ;;  %v6012_v59 = vld [vmem:[%s6492_s3 + $0x30] sm:$0xff] }
 0x517   :  { %6000 = vmatpush.msra.mxu1 %v2530_v25  ;;  %v5222_v63 = vpop.f32.mrf.mxu2 }
 0x518   :  { %5968 = vmatpush.msra.mxu0 %v2526_v26  ;;  %v5203_v61 = vadd.f32 %v5202_v17, %v5183_v60  ;;  %v6011_v60 = vld [vmem:[%s6492_s3 + $0x28] sm:$0xff] }
 0x519   :  { %v5242_v3 = vpop.f32.mrf.mxu3 }
 0x51a   :  { %5969 = vmatpush.msra.mxu0 %v2525_v32  ;;  %v5223_v2 = vadd.f32 %v5222_v63, %v5203_v61  ;;  %v6010_v61 = vld [vmem:[%s6492_s3 + $0x20] sm:$0xff] }
 0x51b   :  { %6102 = vmatmul.msk.f32.vlgmr.msra.gmra.mxu1 %vm2922_vm0, %v2768_v54  ;;  %v5262_v4 = vpop.f32.mrf.mxu0 }
 0x51c   :  { %5970 = vmatpush.msra.mxu0 %v2524_v34  ;;  %v5243_v5 = vadd.f32 %v5242_v3, %v5223_v2 }
 0x51e   :  { %5971 = vmatpush.msra.mxu0 %v2523_v19  ;;  %v5263_v8 = vadd.f32 %v5262_v4, %v5243_v5  ;;  %v5282_v30 = vpop.f32.mrf.mxu1  ;;  %v6009_v4 = vld [vmem:[%s6492_s3 + $0x18] sm:$0xff] }
 0x51f   :  { %v5302_v36 = vpop.f32.mrf.mxu2 }
 0x520   :  { %5972 = vmatpush.msra.mxu0 %v2522_v62  ;;  %v5283_v7 = vadd.f32 %v5282_v30, %v5263_v8  ;;  %v6008_v30 = vld [vmem:[%s6492_s3 + $0x10] sm:$0xff] }
 0x521   :  { %v5322_v10 = vpop.f32.mrf.mxu3 }
 0x522   :  { %5973 = vmatpush.msra.mxu0 %v2521_v40  ;;  %v5303_v9 = vadd.f32 %v5302_v36, %v5283_v7  ;;  %v6007_v7 = vld [vmem:[%s6492_s3 + $0x8] sm:$0xff] }
 0x523   :  { %v5342_v13 = vpop.f32.mrf.mxu0 }
 0x524   :  { %5974 = vmatpush.msra.mxu0 %v2520_v12  ;;  %v5323_v14 = vadd.f32 %v5322_v10, %v5303_v9  ;;  %v6021_v12 = vld [vmem:[%s6492_s3 + $0x78] sm:$0xff]  ;;  %v6006_v10 = vld [vmem:[%s6492_s3] sm:$0xff] }
 0x525   :  { %6026 = vmatpush.msra.mxu2 %v6021_v12  ;;  %v6048_v12 = vld [vmem:[%s6494_s5 + $0x8] sm:$0xff] }
 0x526   :  { %5975 = vmatpush.msra.mxu0 %v2519_v42  ;;  %v5343_v18 = vadd.f32 %v5342_v13, %v5323_v14  ;;  %v5362_v15 = vpop.f32.mrf.mxu1  ;;  %v6020_v42 = vld [vmem:[%s6492_s3 + $0x70] sm:$0xff] }
 0x527   :  { %v5382_v29 = vpop.f32.mrf.mxu2  ;;  %6027 = vmatpush.msra.mxu2 %v6020_v42 }
 0x528   :  { %5976 = vmatpush.msra.mxu0 %v2518_v44  ;;  %v5363_v16 = vadd.f32 %v5362_v15, %v5343_v18  ;;  %v6054_v18 = vld [vmem:[%s6494_s5 + $0x38] sm:$0xff]  ;;  %v6053_v15 = vld [vmem:[%s6494_s5 + $0x30] sm:$0xff] }
 0x529   :  { %v5402_v22 = vpop.f32.mrf.mxu3  ;;  %6028 = vmatpush.msra.mxu2 %v6019_v43  ;;  %6071 = vmatpush.msra.mxu3 %v6054_v18 }
 0x52a   :  { %5977 = vmatpush.msra.mxu0 %v2517_v45  ;;  %v5383_v21 = vadd.f32 %v5382_v29, %v5363_v16  ;;  %v6052_v16 = vld [vmem:[%s6494_s5 + $0x28] sm:$0xff] }
 0x52b   :  { %v5422_v11 = vpop.f32.mrf.mxu0  ;;  %6029 = vmatpush.msra.mxu2 %v6018_v20  ;;  %6072 = vmatpush.msra.mxu3 %v6053_v15  ;;  %v6110_v20 = vld [vmem:[%s6495_s6] ss:$0 sm:$0xff] }
 0x52c   :  { %5978 = vmatpush.msra.mxu0 %v2516_v47  ;;  %v5403_v23 = vadd.f32 %v5402_v22, %v5383_v21  ;;  %v6051_v22 = vld [vmem:[%s6494_s5 + $0x20] sm:$0xff] }
 0x52d   :  { %6030 = vmatpush.msra.mxu2 %v6017_v50  ;;  %6073 = vmatpush.msra.mxu3 %v6052_v16 }
 0x52e   :  { %5979 = vmatpush.msra.mxu0 %v2515_v6  ;;  %v5423_v24 = vadd.f32 %v5422_v11, %v5403_v23  ;;  %v5442_v31 = vpop.f32.mrf.mxu1 }
 0x52f   :  { %v5462_v25 = vpop.f32.mrf.mxu2  ;;  %6031 = vmatpush.msra.mxu2 %v6016_v48  ;;  %6074 = vmatpush.msra.mxu3 %v6051_v22 }
 0x530   :  { %5980 = vmatpush.msra.mxu0 %v2514_v52  ;;  %v5443_v26 = vadd.f32 %v5442_v31, %v5423_v24  ;;  %v6050_v24 = vld [vmem:[%s6494_s5 + $0x18] sm:$0xff] }
 0x531   :  { %5981 = vmatmul.f32.vlgmr.msra.gmra.mxu0 %v2767_v53  ;;  %v5482_v27 = vpop.f32.mrf.mxu3  ;;  %6032 = vmatpush.msra.mxu2 %v6015_v51 }
 0x532   :  { %v5463_v37 = vadd.f32 %v5462_v25, %v5443_v26  ;;  %6075 = vmatpush.msra.mxu3 %v6050_v24 }
 0x533   :  { %v5502_v32 = vpop.f32.mrf.mxu0  ;;  %6033 = vmatpush.msra.mxu2 %v6014_v1 }
 0x534   :  { %v5483_v54 = vadd.f32 %v5482_v27, %v5463_v37 }
 0x535   :  { %6034 = vmatpush.msra.mxu2 %v6013_v58 }
 0x536   :  { %v5503_v33 = vadd.f32 %v5502_v32, %v5483_v54  ;;  %v5522_v34 = vpop.f32.mrf.mxu1 }
 0x537   :  { %v5542_v49 = vpop.f32.mrf.mxu2  ;;  %6035 = vmatpush.msra.mxu2 %v6012_v59 }
 0x538   :  { %v5523_v19 = vadd.f32 %v5522_v34, %v5503_v33 }
 0x539   :  { %v5562_v38 = vpop.f32.mrf.mxu3  ;;  %6036 = vmatpush.msra.mxu2 %v6011_v60 }
 0x53a   :  { %v5543_v35 = vadd.f32 %v5542_v49, %v5523_v19 }
 0x53b   :  { %v5582_v62 = vpop.f32.mrf.mxu0  ;;  %6037 = vmatpush.msra.mxu2 %v6010_v61 }
 0x53c   :  { %v5563_v39 = vadd.f32 %v5562_v38, %v5543_v35 }
 0x53d   :  { %6038 = vmatpush.msra.mxu2 %v6009_v4 }
 0x53e   :  { %v5583_v40 = vadd.f32 %v5582_v62, %v5563_v39  ;;  %v5602_v41 = vpop.f32.mrf.mxu1 }
 0x53f   :  { %v5622_v0 = vpop.f32.mrf.mxu2  ;;  %6039 = vmatpush.msra.mxu2 %v6008_v30 }
 0x540   :  { %v5603_v57 = vadd.f32 %v5602_v41, %v5583_v40  ;;  %v6049_v41 = vld [vmem:[%s6494_s5 + $0x10] sm:$0xff] }
 0x541   :  { %v5642_v45 = vpop.f32.mrf.mxu3  ;;  %6040 = vmatpush.msra.mxu2 %v6007_v7  ;;  %6076 = vmatpush.msra.mxu3 %v6049_v41 }
 0x542   :  { %v5623_v44 = vadd.f32 %v5622_v0, %v5603_v57  ;;  %v6047_v0 = vld [vmem:[%s6494_s5] sm:$0xff]  ;;  %s6092_s5 = sshll.u32 %s6496_s7, 4  ;;  %s6093_s5 = int_to_ptr.hbm [resolvable:$true] %s6092_s5 }
 0x543   :  { %v5662_v46 = vpop.f32.mrf.mxu0  ;;  %6041 = vmatpush.msra.mxu2 %v6006_v10  ;;  %6077 = vmatpush.msra.mxu3 %v6048_v12  ;;  %v6109_v57 = vld [vmem:[%s6493_s4] ss:$0 sm:$0xff] }
 0x544   :  { %v5643_v47 = vadd.f32 %v5642_v45, %v5623_v44 }
 0x545   :  { %6078 = vmatpush.msra.mxu3 %v6047_v0 }
 0x546   :  { %v5663_v6 = vadd.f32 %v5662_v46, %v5643_v47  ;;  %v5682_v52 = vpop.f32.mrf.mxu1 }
 0x547   :  { %v5702_v53 = vpop.f32.mrf.mxu2 }
 0x548   :  { %v5683_v55 = vadd.f32 %v5682_v52, %v5663_v6 }
 0x549   :  { %v5722_v28 = vpop.f32.mrf.mxu3 }
 0x54a   :  { %v5703_v56 = vadd.f32 %v5702_v53, %v5683_v55 }
 0x54b   :  { %v5742_v17 = vpop.f32.mrf.mxu0 }
 0x54c   :  { %v5723_v63 = vadd.f32 %v5722_v28, %v5703_v56 }
 0x54e   :  { %v5743_v2 = vadd.f32 %v5742_v17, %v5723_v63  ;;  %v5762_v3 = vpop.f32.mrf.mxu1 }
 0x550   :  { %v5782_v5 = vpop.f32.mrf.mxu2  ;;  %v5763_v8 = vadd.f32 %v5762_v3, %v5743_v2 }
 0x552   :  { %v5783_v36 = vadd.f32 %v5782_v5, %v5763_v8 }
 0x553   :  { %v5802_v9 = vpop.f32.mrf.mxu3 }
 0x554   :  { %v5803_v14 = vadd.f32 %v5802_v9, %v5783_v36 }
 0x56c   :  { %v5822_v13 = vpop.f32.mrf.mxu0 }
 0x56d   :  { %v5823_v29 = vadd.f32 %v5822_v13, %v5803_v14 }
 0x56f   :  { %v5842_v21 = vpop.f32.mrf.mxu1 }
 0x570   :  { %v5843_v23 = vadd.f32 %v5842_v21, %v5823_v29 }
 0x572   :  { %v5862_v11 = vpop.f32.mrf.mxu2 }
 0x573   :  { %v5863_v31 = vadd.f32 %v5862_v11, %v5843_v23 }
 0x575   :  { %v5882_v25 = vpop.f32.mrf.mxu3 }
 0x576   :  { %v5883_v37 = vadd.f32 %v5882_v25, %v5863_v31 }
 0x58e   :  { %v5902_v26 = vpop.f32.mrf.mxu0 }
 0x58f   :  { %v5903_v27 = vadd.f32 %v5902_v26, %v5883_v37 }
 0x590   :  { %v5922_v32 = vpop.f32.mrf.mxu1 }
 0x591   :  { %v5923_v33 = vadd.f32 %v5922_v32, %v5903_v27 }
 0x594   :  { %v5942_v54 = vpop.f32.mrf.mxu2 }
 0x595   :  { %v5943_v34 = vadd.f32 %v5942_v54, %v5923_v33 }
 0x597   :  { %v5962_v49 = vpop.f32.mrf.mxu3 }
 0x598   :  { %v5963_v19 = vadd.f32 %v5962_v49, %v5943_v34  ;;  %v6002_v38 = vpop.f32.mrf.mxu1 }
 0x5ae   :  { %v5982_v35 = vpop.f32.mrf.mxu0 }
 0x5af   :  { %v5983_v62 = vadd.f32 %v5982_v35, %v5963_v19 }
 0x5b1   :  { %v6003_v39 = vadd.f32 %v6002_v38, %v5983_v62 }
 0x5b3   :  { %v6005_v40 = vmax.f32 %v6003_v39, 0.0 }
 0x5b5   :  { %6042 = vmatmul.f32.vlgmr.msra.gmra.mxu2 %v6005_v40 }
 0x638   :  { %v6043_v42 = vpop.f32.mrf.mxu2 }
 0x639   :  { %v6044_v43 = vadd.f32 %v6109_v57, %v6043_v42 }
 0x63b   :  { %v6046_v44 = vmax.f32 %v6044_v43, 0.0 }
 0x63d   :  { %6103 = vmatmul.msk.f32.vlgmr.msra.gmra.mxu3 %vm6059_vm1, %v6046_v44 }
 0x6c0   :  { %v6080_v45 = vpop.f32.mrf.mxu3 }
 0x6c1   :  { %v6081_v50 = vadd.f32 %v6110_v20, %v6080_v45 }
 0x6c3   :  { %6084 = vst.msk [vmem:[#allocation5] sm:$0x3] %vm6083_vm2, %v6081_v50 }
 0x6c4   :  { %6095 = dma.vmem_to_hbm [thread:$0]  %s6091_s0, 32, %s6093_s5, [#allocation4]  }
 0x6c5   :  { %6161 = dma.done.wait [#allocation4], 32  }
 0x6c6   :  { %6162 = vsyncadd [#allocation4], 4294967264 }
 0x6c7   :  { %6100 = vsyncpa [#allocation3], 1 }
 0x6c8   :  { %6101 = vsyncpa [#allocation4], 1 }

</bundles_post_ra>
